<compile_context>
chip_gen: v7x
topology: tpu7x:2x2x1
jax: 0.10.0
libtpu: 0.0.40
codegen_flags: <defaults>
</compile_context>

<pallas_src>
import numpy as np

import jax
import jax.numpy as jnp
from jax.experimental import pallas as pl
from jax.experimental.pallas import tpu as pltpu


# ----------------------------- fused Pallas kernel ----------------------------
def _encoder_kernel(
    x_ref, act_ref,
    r1_ref, r2_ref, r3_ref, r4_ref,
    wt1_ref, b1_ref, wt2_ref, b2_ref, wt3_ref, b3_ref, wt4_ref, b4_ref,
    wa1_ref, ba1_ref, wa2_ref, ba2_ref,
    wff_ref, wfa_ref, bfu_ref,
    out_ref,
):
    f32 = jnp.float32
    bf16 = jnp.bfloat16

    def conv_layer(src, r_ref, wt_ref, b_ref):
        """4x4 / stride-2 / pad-1 conv + ReLU on a [Hi, Wi*Cin] bf16 activation.

        r_ref : [4*Ho, Hi]          0/1 row-selection (pad rows are zero rows).
        wt_ref: [4, Wi*Cin, Wo*Cout] column-Toeplitz weight (pad cols folded in).
        b_ref : [1, Wo*Cout]         bias tiled across Wo.
        Returns [Ho, Wo*Cout] bf16.
        """
        Ho = r_ref.shape[0] // 4
        acc = b_ref[...]                                     # [1, N] f32, broadcasts
        for di in range(4):                                  # static 4-tap unroll
            sel = r_ref[di * Ho:(di + 1) * Ho, :]            # [Ho, Hi] bf16 (ref view)
            rows = jnp.dot(sel, src,
                           preferred_element_type=f32).astype(bf16)    # [Ho, Wi*Cin]
            acc = acc + jnp.dot(rows, wt_ref[di],
                                preferred_element_type=f32)            # [Ho, Wo*Cout]
        return jnp.maximum(acc, 0.0).astype(bf16)

    # ---- frame encoder: 4x (conv + ReLU); activations stay in VMEM values ----
    y = x_ref[0]                                             # [H, W*C] bf16
    y = conv_layer(y, r1_ref, wt1_ref, b1_ref)               # [H/2,  (W/2)*64 ]
    y = conv_layer(y, r2_ref, wt2_ref, b2_ref)               # [H/4,  (W/4)*128]
    y = conv_layer(y, r3_ref, wt3_ref, b3_ref)               # [H/8,  (W/8)*256]
    y = conv_layer(y, r4_ref, wt4_ref, b4_ref)               # [H/16, (W/16)*L ]

    # ---- action encoder: 2x (Linear + ReLU) ----
    a = act_ref[0]                                           # [1, action_dim] bf16
    a = jnp.maximum(
        jnp.dot(a, wa1_ref[...], preferred_element_type=f32) + ba1_ref[...], 0.0)
    a = jnp.maximum(
        jnp.dot(a.astype(bf16), wa2_ref[...], preferred_element_type=f32)
        + ba2_ref[...], 0.0)                                 # [1, L]

    # ---- fusion 1x1 conv (concat + spatial broadcast never materialized) ----
    zf = jnp.dot(y, wff_ref[...], preferred_element_type=f32)               # [H4, W4*L]
    za = jnp.dot(a.astype(bf16), wfa_ref[...], preferred_element_type=f32)  # [1,  W4*L]
    out_ref[0] = (zf + za + bfu_ref[...]).astype(out_ref.dtype)


# ----------------------------- JAX wrapper -------------------------------------
def _full_block_spec(arr):
    zero = (0,) * arr.ndim
    return pl.BlockSpec(arr.shape, lambda b, _z=zero: _z)


def simple_encoder_forward(packed, frame_nchw, action):
    B, C, H, W = frame_nchw.shape
    assert H % 16 == 0 and W % 16 == 0, "spatial dims must be divisible by 16"
    H4, W4 = H // 16, W // 16
    latent = packed["wa2"].shape[1]
    A = action.shape[1]

    # frame: NCHW -> [B, H, W*C] bf16 (raw pixels: no im2col, no K zero-padding)
    x = jnp.transpose(frame_nchw, (0, 2, 3, 1)).reshape(B, H, W * C).astype(jnp.bfloat16)
    act = action.reshape(B, 1, A).astype(jnp.bfloat16)

    weights = (
        packed["r1"], packed["r2"], packed["r3"], packed["r4"],
        packed["wt1"], packed["b1"], packed["wt2"], packed["b2"],
        packed["wt3"], packed["b3"], packed["wt4"], packed["b4"],
        packed["wa1"], packed["ba1"], packed["wa2"], packed["ba2"],
        packed["wff"], packed["wfa"], packed["bfu"],
    )

    in_specs = [
        pl.BlockSpec((1, H, W * C), lambda b: (b, 0, 0)),      # per-batch frame
        pl.BlockSpec((1, 1, A), lambda b: (b, 0, 0)),          # per-batch action
    ] + [_full_block_spec(w) for w in weights]                 # constants: fetched once

    out = pl.pallas_call(
        _encoder_kernel,
        out_shape=jax.ShapeDtypeStruct((B, H4, W4 * latent), jnp.float32),
        grid=(B,),
        in_specs=in_specs,
        out_specs=pl.BlockSpec((1, H4, W4 * latent), lambda b: (b, 0, 0)),
        compiler_params=pltpu.CompilerParams(
            dimension_semantics=("parallel",),     # batch-parallel: both TCs on v7x
            vmem_limit_bytes=48 * 1024 * 1024,     # explicit budget (< v7x 64 MiB)
        ),
    )(x, act, *weights)

    z = out.reshape(B, H4, W4, latent)
    return jnp.transpose(z, (0, 3, 1, 2))                      # NCHW [B, L, H/16, W/16]


# ----------------------------- parameters --------------------------------------
def init_params(key, input_channels=3, action_dim=4, latent_dim=128):
    """Raw parameters: conv W as [kh, kw, cin, cout], linear W as [in, out]."""
    keys = jax.random.split(key, 7)

    def conv(k, cin, cout, kh=4, kw=4):
        fan_in = cin * kh * kw
        w = jax.random.normal(k, (kh, kw, cin, cout), jnp.float32) / jnp.sqrt(fan_in)
        return w, jnp.zeros((cout,), jnp.float32)

    def linear(k, cin, cout):
        w = jax.random.normal(k, (cin, cout), jnp.float32) / jnp.sqrt(cin)
        return w, jnp.zeros((cout,), jnp.float32)

    return {
        "frame_convs": [
            conv(keys[0], input_channels, 64),
            conv(keys[1], 64, 128),
            conv(keys[2], 128, 256),
            conv(keys[3], 256, latent_dim),
        ],
        "action_linears": [
            linear(keys[4], action_dim, 64),
            linear(keys[5], 64, latent_dim),
        ],
        "fusion": linear(keys[6], 2 * latent_dim, latent_dim),   # 1x1 conv == linear
    }


def pack_params(raw, H, W):
    """One-time packing: per conv layer build
         r  : [4*Ho, Hi]           bf16 0/1 row selection (H padding folded in),
         wt : [4, Wi*Cin, Wo*Cout] bf16 column-Toeplitz weight (W stride/pad folded in),
         b  : [1, Wo*Cout]         f32 bias tiled across Wo;
       plus bf16 action-MLP weights and the fusion weight split into
       frame (block-diagonal over W/16) and action (lane-tiled) halves."""
    bf16 = jnp.bfloat16
    f32 = jnp.float32

    def row_sel(Hi):
        Ho = Hi // 2
        r = np.zeros((4 * Ho, Hi), np.float32)
        for di in range(4):
            for ho in range(Ho):
                h = 2 * ho + di - 1                      # pad=1 offset
                if 0 <= h < Hi:
                    r[di * Ho + ho, h] = 1.0
        return jnp.asarray(r, bf16)

    def toeplitz_w(w, Wi):
        w = np.asarray(w, np.float32)                    # [4, 4, cin, cout]
        _, _, cin, cout = w.shape
        Wo = Wi // 2
        wt = np.zeros((4, Wi * cin, Wo * cout), np.float32)
        for di in range(4):
            for wo in range(Wo):
                for dj in range(4):
                    wi = 2 * wo + dj - 1                 # pad=1 offset
                    if 0 <= wi < Wi:
                        wt[di, wi * cin:(wi + 1) * cin,
                           wo * cout:(wo + 1) * cout] = w[di, dj]
        return jnp.asarray(wt, bf16)

    def tiled_bias(b, reps):
        return jnp.asarray(np.tile(np.asarray(b, np.float32), reps)[None, :], f32)

    packed = {}
    spatial = [(H, W), (H // 2, W // 2), (H // 4, W // 4), (H // 8, W // 8)]
    for idx, ((w, b), (_, Wi)) in enumerate(zip(raw["frame_convs"], spatial), start=1):
        Hi = spatial[idx - 1][0]
        packed[f"r{idx}"] = row_sel(Hi)
        packed[f"wt{idx}"] = toeplitz_w(w, Wi)
        packed[f"b{idx}"] = tiled_bias(b, Wi // 2)

    (wa1, ba1), (wa2, ba2) = raw["action_linears"]
    packed["wa1"] = jnp.asarray(wa1, bf16)
    packed["ba1"] = jnp.asarray(ba1, f32)[None, :]
    packed["wa2"] = jnp.asarray(wa2, bf16)
    packed["ba2"] = jnp.asarray(ba2, f32)[None, :]

    wf, bfu = raw["fusion"]                              # [2L, L], [L]
    latent = wf.shape[1]
    W4 = W // 16
    wf_np = np.asarray(wf, np.float32)
    wff, wfa = wf_np[:latent], wf_np[latent:]            # frame half / action half
    wffd = np.zeros((W4 * latent, W4 * latent), np.float32)
    for wo in range(W4):
        wffd[wo * latent:(wo + 1) * latent, wo * latent:(wo + 1) * latent] = wff
    packed["wff"] = jnp.asarray(wffd, bf16)              # block-diag frame weight
    packed["wfa"] = jnp.asarray(np.tile(wfa, (1, W4)), bf16)   # lane-tiled action weight
    packed["bfu"] = tiled_bias(bfu, W4)
    return packed


# ----------------------------- pure-JAX reference -------------------------------
def reference_forward(raw, frame_nchw, action):
    x = jnp.transpose(frame_nchw, (0, 2, 3, 1))
    for (w, b) in raw["frame_convs"]:
        x = jax.lax.conv_general_dilated(
            x, w, window_strides=(2, 2), padding=((1, 1), (1, 1)),
            dimension_numbers=("NHWC", "HWIO", "NHWC"))
        x = jax.nn.relu(x + b)
    a = action
    for (w, b) in raw["action_linears"]:
        a = jax.nn.relu(a @ w + b)
    wf, bfu = raw["fusion"]
    B, Hf, Wf, L = x.shape
    a_b = jnp.broadcast_to(a[:, None, None, :], (B, Hf, Wf, L))
    comb = jnp.concatenate([x, a_b], axis=-1)
    z = comb @ wf + bfu
    return jnp.transpose(z, (0, 3, 1, 2))


# ----------------------------- main ---------------------------------------------
if __name__ == "__main__":
    B, C, H, W = 2, 3, 16, 16
    action_dim, latent_dim = 4, 128

    key = jax.random.PRNGKey(0)
    k_param, k_frame, k_action = jax.random.split(key, 3)

    raw = init_params(k_param, input_channels=C, action_dim=action_dim,
                      latent_dim=latent_dim)
    packed = pack_params(raw, H, W)      # one-time packing (bf16, Toeplitz/selection)

    frame = jax.random.normal(k_frame, (B, C, H, W), jnp.float32)
    action = jax.random.normal(k_action, (B, action_dim), jnp.float32)

    fwd = jax.jit(simple_encoder_forward)
    z = jax.block_until_ready(fwd(packed, frame, action))

    # 16 -> 8 -> 4 -> 2 -> 1 spatial; output must be [B, latent, 1, 1]
    assert z.shape == (B, latent_dim, H // 16, W // 16), z.shape

    # numerical check vs f32 reference (bf16 operands -> loose tolerance)
    ref = reference_forward(raw, frame, action)
    np.testing.assert_allclose(np.asarray(z), np.asarray(ref), rtol=0.1, atol=0.1)

    print("KERNEL_OK")
</pallas_src>

<mosaic_0001>
module attributes {stable_mosaic.version = 11 : i64} {
  func.func @_encoder_kernel(%arg0: i32, %arg1: memref<1x16x48xbf16, #tpu.memory_space<vmem>>, %arg2: memref<1x1x4xbf16, #tpu.memory_space<vmem>>, %arg3: memref<32x16xbf16, #tpu.memory_space<vmem>>, %arg4: memref<16x8xbf16, #tpu.memory_space<vmem>>, %arg5: memref<8x4xbf16, #tpu.memory_space<vmem>>, %arg6: memref<4x2xbf16, #tpu.memory_space<vmem>>, %arg7: memref<4x48x512xbf16, #tpu.memory_space<vmem>>, %arg8: memref<1x512xf32, #tpu.memory_space<vmem>>, %arg9: memref<4x512x512xbf16, #tpu.memory_space<vmem>>, %arg10: memref<1x512xf32, #tpu.memory_space<vmem>>, %arg11: memref<4x512x512xbf16, #tpu.memory_space<vmem>>, %arg12: memref<1x512xf32, #tpu.memory_space<vmem>>, %arg13: memref<4x512x128xbf16, #tpu.memory_space<vmem>>, %arg14: memref<1x128xf32, #tpu.memory_space<vmem>>, %arg15: memref<4x64xbf16, #tpu.memory_space<vmem>>, %arg16: memref<1x64xf32, #tpu.memory_space<vmem>>, %arg17: memref<64x128xbf16, #tpu.memory_space<vmem>>, %arg18: memref<1x128xf32, #tpu.memory_space<vmem>>, %arg19: memref<128x128xbf16, #tpu.memory_space<vmem>>, %arg20: memref<128x128xbf16, #tpu.memory_space<vmem>>, %arg21: memref<1x128xf32, #tpu.memory_space<vmem>>, %arg22: memref<1x1x128xf32, #tpu.memory_space<vmem>>) attributes {dimension_semantics = [#tpu.dimension_semantics<parallel>], iteration_bounds = array<i64: 2>, scalar_prefetch = 0 : i64, scratch_operands = 0 : i64, tpu.core_type = #tpu.core_type<tc>, window_params = [{transform_indices = @transform_0, window_bounds = array<i64: 1, 16, 48>}, {transform_indices = @transform_1, window_bounds = array<i64: 1, 1, 4>}, {pipeline_mode = #tpu.pipeline_mode<synchronous>, transform_indices = @transform_2, window_bounds = array<i64: 32, 16>}, {pipeline_mode = #tpu.pipeline_mode<synchronous>, transform_indices = @transform_3, window_bounds = array<i64: 16, 8>}, {pipeline_mode = #tpu.pipeline_mode<synchronous>, transform_indices = @transform_4, window_bounds = array<i64: 8, 4>}, {pipeline_mode = #tpu.pipeline_mode<synchronous>, transform_indices = @transform_5, window_bounds = array<i64: 4, 2>}, {pipeline_mode = #tpu.pipeline_mode<synchronous>, transform_indices = @transform_6, window_bounds = array<i64: 4, 48, 512>}, {pipeline_mode = #tpu.pipeline_mode<synchronous>, transform_indices = @transform_7, window_bounds = array<i64: 1, 512>}, {pipeline_mode = #tpu.pipeline_mode<synchronous>, transform_indices = @transform_8, window_bounds = array<i64: 4, 512, 512>}, {pipeline_mode = #tpu.pipeline_mode<synchronous>, transform_indices = @transform_9, window_bounds = array<i64: 1, 512>}, {pipeline_mode = #tpu.pipeline_mode<synchronous>, transform_indices = @transform_10, window_bounds = array<i64: 4, 512, 512>}, {pipeline_mode = #tpu.pipeline_mode<synchronous>, transform_indices = @transform_11, window_bounds = array<i64: 1, 512>}, {pipeline_mode = #tpu.pipeline_mode<synchronous>, transform_indices = @transform_12, window_bounds = array<i64: 4, 512, 128>}, {pipeline_mode = #tpu.pipeline_mode<synchronous>, transform_indices = @transform_13, window_bounds = array<i64: 1, 128>}, {pipeline_mode = #tpu.pipeline_mode<synchronous>, transform_indices = @transform_14, window_bounds = array<i64: 4, 64>}, {pipeline_mode = #tpu.pipeline_mode<synchronous>, transform_indices = @transform_15, window_bounds = array<i64: 1, 64>}, {pipeline_mode = #tpu.pipeline_mode<synchronous>, transform_indices = @transform_16, window_bounds = array<i64: 64, 128>}, {pipeline_mode = #tpu.pipeline_mode<synchronous>, transform_indices = @transform_17, window_bounds = array<i64: 1, 128>}, {pipeline_mode = #tpu.pipeline_mode<synchronous>, transform_indices = @transform_18, window_bounds = array<i64: 128, 128>}, {pipeline_mode = #tpu.pipeline_mode<synchronous>, transform_indices = @transform_19, window_bounds = array<i64: 128, 128>}, {pipeline_mode = #tpu.pipeline_mode<synchronous>, transform_indices = @transform_20, window_bounds = array<i64: 1, 128>}, {transform_indices = @transform_21, window_bounds = array<i64: 1, 1, 128>}]} {
    %c0 = arith.constant 0 : index
    %c0_0 = arith.constant 0 : index
    %c0_1 = arith.constant 0 : index
    %0 = vector.load %arg1[%c0, %c0_0, %c0_1] : memref<1x16x48xbf16, #tpu.memory_space<vmem>>, vector<1x16x48xbf16>
    %1 = vector.shape_cast %0 : vector<1x16x48xbf16> to vector<16x48xbf16>
    %c0_2 = arith.constant 0 : index
    %c0_3 = arith.constant 0 : index
    %2 = vector.load %arg8[%c0_2, %c0_3] : memref<1x512xf32, #tpu.memory_space<vmem>>, vector<1x512xf32>
    %c0_4 = arith.constant 0 : index
    %c0_5 = arith.constant 0 : index
    %3 = vector.load %arg3[%c0_4, %c0_5] : memref<32x16xbf16, #tpu.memory_space<vmem>>, vector<8x16xbf16>
    %cst = arith.constant dense<0.000000e+00> : vector<8x48xf32>
    %4 = tpu.matmul %3, %1, %cst {dimension_numbers = #tpu.dot_dimension_numbers<[1], [0], [0], [1], [0, 0, 1, 1], [], []>} : vector<8x16xbf16>, vector<16x48xbf16>, vector<8x48xf32> -> vector<8x48xf32>
    %5 = arith.truncf %4 : vector<8x48xf32> to vector<8x48xbf16>
    %c0_6 = arith.constant 0 : index
    %c0_7 = arith.constant 0 : index
    %c0_8 = arith.constant 0 : index
    %6 = vector.load %arg7[%c0_6, %c0_7, %c0_8] : memref<4x48x512xbf16, #tpu.memory_space<vmem>>, vector<1x48x512xbf16>
    %7 = vector.shape_cast %6 : vector<1x48x512xbf16> to vector<48x512xbf16>
    %cst_9 = arith.constant dense<0.000000e+00> : vector<8x512xf32>
    %8 = tpu.matmul %5, %7, %cst_9 {dimension_numbers = #tpu.dot_dimension_numbers<[1], [0], [0], [1], [0, 0, 1, 1], [], []>} : vector<8x48xbf16>, vector<48x512xbf16>, vector<8x512xf32> -> vector<8x512xf32>
    %9 = vector.broadcast %2 : vector<1x512xf32> to vector<8x512xf32>
    %10 = arith.addf %9, %8 : vector<8x512xf32>
    %c8 = arith.constant 8 : index
    %c0_10 = arith.constant 0 : index
    %11 = vector.load %arg3[%c8, %c0_10] : memref<32x16xbf16, #tpu.memory_space<vmem>>, vector<8x16xbf16>
    %cst_11 = arith.constant dense<0.000000e+00> : vector<8x48xf32>
    %12 = tpu.matmul %11, %1, %cst_11 {dimension_numbers = #tpu.dot_dimension_numbers<[1], [0], [0], [1], [0, 0, 1, 1], [], []>} : vector<8x16xbf16>, vector<16x48xbf16>, vector<8x48xf32> -> vector<8x48xf32>
    %13 = arith.truncf %12 : vector<8x48xf32> to vector<8x48xbf16>
    %c1 = arith.constant 1 : index
    %c0_12 = arith.constant 0 : index
    %c0_13 = arith.constant 0 : index
    %14 = vector.load %arg7[%c1, %c0_12, %c0_13] : memref<4x48x512xbf16, #tpu.memory_space<vmem>>, vector<1x48x512xbf16>
    %15 = vector.shape_cast %14 : vector<1x48x512xbf16> to vector<48x512xbf16>
    %cst_14 = arith.constant dense<0.000000e+00> : vector<8x512xf32>
    %16 = tpu.matmul %13, %15, %cst_14 {dimension_numbers = #tpu.dot_dimension_numbers<[1], [0], [0], [1], [0, 0, 1, 1], [], []>} : vector<8x48xbf16>, vector<48x512xbf16>, vector<8x512xf32> -> vector<8x512xf32>
    %17 = arith.addf %10, %16 : vector<8x512xf32>
    %c16 = arith.constant 16 : index
    %c0_15 = arith.constant 0 : index
    %18 = vector.load %arg3[%c16, %c0_15] : memref<32x16xbf16, #tpu.memory_space<vmem>>, vector<8x16xbf16>
    %cst_16 = arith.constant dense<0.000000e+00> : vector<8x48xf32>
    %19 = tpu.matmul %18, %1, %cst_16 {dimension_numbers = #tpu.dot_dimension_numbers<[1], [0], [0], [1], [0, 0, 1, 1], [], []>} : vector<8x16xbf16>, vector<16x48xbf16>, vector<8x48xf32> -> vector<8x48xf32>
    %20 = arith.truncf %19 : vector<8x48xf32> to vector<8x48xbf16>
    %c2 = arith.constant 2 : index
    %c0_17 = arith.constant 0 : index
    %c0_18 = arith.constant 0 : index
    %21 = vector.load %arg7[%c2, %c0_17, %c0_18] : memref<4x48x512xbf16, #tpu.memory_space<vmem>>, vector<1x48x512xbf16>
    %22 = vector.shape_cast %21 : vector<1x48x512xbf16> to vector<48x512xbf16>
    %cst_19 = arith.constant dense<0.000000e+00> : vector<8x512xf32>
    %23 = tpu.matmul %20, %22, %cst_19 {dimension_numbers = #tpu.dot_dimension_numbers<[1], [0], [0], [1], [0, 0, 1, 1], [], []>} : vector<8x48xbf16>, vector<48x512xbf16>, vector<8x512xf32> -> vector<8x512xf32>
    %24 = arith.addf %17, %23 : vector<8x512xf32>
    %c24 = arith.constant 24 : index
    %c0_20 = arith.constant 0 : index
    %25 = vector.load %arg3[%c24, %c0_20] : memref<32x16xbf16, #tpu.memory_space<vmem>>, vector<8x16xbf16>
    %cst_21 = arith.constant dense<0.000000e+00> : vector<8x48xf32>
    %26 = tpu.matmul %25, %1, %cst_21 {dimension_numbers = #tpu.dot_dimension_numbers<[1], [0], [0], [1], [0, 0, 1, 1], [], []>} : vector<8x16xbf16>, vector<16x48xbf16>, vector<8x48xf32> -> vector<8x48xf32>
    %27 = arith.truncf %26 : vector<8x48xf32> to vector<8x48xbf16>
    %c3 = arith.constant 3 : index
    %c0_22 = arith.constant 0 : index
    %c0_23 = arith.constant 0 : index
    %28 = vector.load %arg7[%c3, %c0_22, %c0_23] : memref<4x48x512xbf16, #tpu.memory_space<vmem>>, vector<1x48x512xbf16>
    %29 = vector.shape_cast %28 : vector<1x48x512xbf16> to vector<48x512xbf16>
    %cst_24 = arith.constant dense<0.000000e+00> : vector<8x512xf32>
    %30 = tpu.matmul %27, %29, %cst_24 {dimension_numbers = #tpu.dot_dimension_numbers<[1], [0], [0], [1], [0, 0, 1, 1], [], []>} : vector<8x48xbf16>, vector<48x512xbf16>, vector<8x512xf32> -> vector<8x512xf32>
    %31 = arith.addf %24, %30 : vector<8x512xf32>
    %cst_25 = arith.constant 0.000000e+00 : f32
    %32 = vector.broadcast %cst_25 : f32 to vector<8x512xf32>
    %33 = arith.maximumf %31, %32 : vector<8x512xf32>
    %34 = arith.truncf %33 : vector<8x512xf32> to vector<8x512xbf16>
    %c0_26 = arith.constant 0 : index
    %c0_27 = arith.constant 0 : index
    %35 = vector.load %arg10[%c0_26, %c0_27] : memref<1x512xf32, #tpu.memory_space<vmem>>, vector<1x512xf32>
    %c0_28 = arith.constant 0 : index
    %c0_29 = arith.constant 0 : index
    %36 = vector.load %arg4[%c0_28, %c0_29] : memref<16x8xbf16, #tpu.memory_space<vmem>>, vector<4x8xbf16>
    %cst_30 = arith.constant dense<0.000000e+00> : vector<4x512xf32>
    %37 = tpu.matmul %36, %34, %cst_30 {dimension_numbers = #tpu.dot_dimension_numbers<[1], [0], [0], [1], [0, 0, 1, 1], [], []>} : vector<4x8xbf16>, vector<8x512xbf16>, vector<4x512xf32> -> vector<4x512xf32>
    %38 = arith.truncf %37 : vector<4x512xf32> to vector<4x512xbf16>
    %c0_31 = arith.constant 0 : index
    %c0_32 = arith.constant 0 : index
    %c0_33 = arith.constant 0 : index
    %39 = vector.load %arg9[%c0_31, %c0_32, %c0_33] : memref<4x512x512xbf16, #tpu.memory_space<vmem>>, vector<1x512x512xbf16>
    %40 = vector.shape_cast %39 : vector<1x512x512xbf16> to vector<512x512xbf16>
    %cst_34 = arith.constant dense<0.000000e+00> : vector<4x512xf32>
    %41 = tpu.matmul %38, %40, %cst_34 {dimension_numbers = #tpu.dot_dimension_numbers<[1], [0], [0], [1], [0, 0, 1, 1], [], []>} : vector<4x512xbf16>, vector<512x512xbf16>, vector<4x512xf32> -> vector<4x512xf32>
    %42 = vector.broadcast %35 : vector<1x512xf32> to vector<4x512xf32>
    %43 = arith.addf %42, %41 : vector<4x512xf32>
    %c4 = arith.constant 4 : index
    %c0_35 = arith.constant 0 : index
    %44 = vector.load %arg4[%c4, %c0_35] : memref<16x8xbf16, #tpu.memory_space<vmem>>, vector<4x8xbf16>
    %cst_36 = arith.constant dense<0.000000e+00> : vector<4x512xf32>
    %45 = tpu.matmul %44, %34, %cst_36 {dimension_numbers = #tpu.dot_dimension_numbers<[1], [0], [0], [1], [0, 0, 1, 1], [], []>} : vector<4x8xbf16>, vector<8x512xbf16>, vector<4x512xf32> -> vector<4x512xf32>
    %46 = arith.truncf %45 : vector<4x512xf32> to vector<4x512xbf16>
    %c1_37 = arith.constant 1 : index
    %c0_38 = arith.constant 0 : index
    %c0_39 = arith.constant 0 : index
    %47 = vector.load %arg9[%c1_37, %c0_38, %c0_39] : memref<4x512x512xbf16, #tpu.memory_space<vmem>>, vector<1x512x512xbf16>
    %48 = vector.shape_cast %47 : vector<1x512x512xbf16> to vector<512x512xbf16>
    %cst_40 = arith.constant dense<0.000000e+00> : vector<4x512xf32>
    %49 = tpu.matmul %46, %48, %cst_40 {dimension_numbers = #tpu.dot_dimension_numbers<[1], [0], [0], [1], [0, 0, 1, 1], [], []>} : vector<4x512xbf16>, vector<512x512xbf16>, vector<4x512xf32> -> vector<4x512xf32>
    %50 = arith.addf %43, %49 : vector<4x512xf32>
    %c8_41 = arith.constant 8 : index
    %c0_42 = arith.constant 0 : index
    %51 = vector.load %arg4[%c8_41, %c0_42] : memref<16x8xbf16, #tpu.memory_space<vmem>>, vector<4x8xbf16>
    %cst_43 = arith.constant dense<0.000000e+00> : vector<4x512xf32>
    %52 = tpu.matmul %51, %34, %cst_43 {dimension_numbers = #tpu.dot_dimension_numbers<[1], [0], [0], [1], [0, 0, 1, 1], [], []>} : vector<4x8xbf16>, vector<8x512xbf16>, vector<4x512xf32> -> vector<4x512xf32>
    %53 = arith.truncf %52 : vector<4x512xf32> to vector<4x512xbf16>
    %c2_44 = arith.constant 2 : index
    %c0_45 = arith.constant 0 : index
    %c0_46 = arith.constant 0 : index
    %54 = vector.load %arg9[%c2_44, %c0_45, %c0_46] : memref<4x512x512xbf16, #tpu.memory_space<vmem>>, vector<1x512x512xbf16>
    %55 = vector.shape_cast %54 : vector<1x512x512xbf16> to vector<512x512xbf16>
    %cst_47 = arith.constant dense<0.000000e+00> : vector<4x512xf32>
    %56 = tpu.matmul %53, %55, %cst_47 {dimension_numbers = #tpu.dot_dimension_numbers<[1], [0], [0], [1], [0, 0, 1, 1], [], []>} : vector<4x512xbf16>, vector<512x512xbf16>, vector<4x512xf32> -> vector<4x512xf32>
    %57 = arith.addf %50, %56 : vector<4x512xf32>
    %c12 = arith.constant 12 : index
    %c0_48 = arith.constant 0 : index
    %58 = vector.load %arg4[%c12, %c0_48] : memref<16x8xbf16, #tpu.memory_space<vmem>>, vector<4x8xbf16>
    %cst_49 = arith.constant dense<0.000000e+00> : vector<4x512xf32>
    %59 = tpu.matmul %58, %34, %cst_49 {dimension_numbers = #tpu.dot_dimension_numbers<[1], [0], [0], [1], [0, 0, 1, 1], [], []>} : vector<4x8xbf16>, vector<8x512xbf16>, vector<4x512xf32> -> vector<4x512xf32>
    %60 = arith.truncf %59 : vector<4x512xf32> to vector<4x512xbf16>
    %c3_50 = arith.constant 3 : index
    %c0_51 = arith.constant 0 : index
    %c0_52 = arith.constant 0 : index
    %61 = vector.load %arg9[%c3_50, %c0_51, %c0_52] : memref<4x512x512xbf16, #tpu.memory_space<vmem>>, vector<1x512x512xbf16>
    %62 = vector.shape_cast %61 : vector<1x512x512xbf16> to vector<512x512xbf16>
    %cst_53 = arith.constant dense<0.000000e+00> : vector<4x512xf32>
    %63 = tpu.matmul %60, %62, %cst_53 {dimension_numbers = #tpu.dot_dimension_numbers<[1], [0], [0], [1], [0, 0, 1, 1], [], []>} : vector<4x512xbf16>, vector<512x512xbf16>, vector<4x512xf32> -> vector<4x512xf32>
    %64 = arith.addf %57, %63 : vector<4x512xf32>
    %cst_54 = arith.constant 0.000000e+00 : f32
    %65 = vector.broadcast %cst_54 : f32 to vector<4x512xf32>
    %66 = arith.maximumf %64, %65 : vector<4x512xf32>
    %67 = arith.truncf %66 : vector<4x512xf32> to vector<4x512xbf16>
    %c0_55 = arith.constant 0 : index
    %c0_56 = arith.constant 0 : index
    %68 = vector.load %arg12[%c0_55, %c0_56] : memref<1x512xf32, #tpu.memory_space<vmem>>, vector<1x512xf32>
    %c0_57 = arith.constant 0 : index
    %c0_58 = arith.constant 0 : index
    %69 = vector.load %arg5[%c0_57, %c0_58] : memref<8x4xbf16, #tpu.memory_space<vmem>>, vector<2x4xbf16>
    %cst_59 = arith.constant dense<0.000000e+00> : vector<2x512xf32>
    %70 = tpu.matmul %69, %67, %cst_59 {dimension_numbers = #tpu.dot_dimension_numbers<[1], [0], [0], [1], [0, 0, 1, 1], [], []>} : vector<2x4xbf16>, vector<4x512xbf16>, vector<2x512xf32> -> vector<2x512xf32>
    %71 = arith.truncf %70 : vector<2x512xf32> to vector<2x512xbf16>
    %c0_60 = arith.constant 0 : index
    %c0_61 = arith.constant 0 : index
    %c0_62 = arith.constant 0 : index
    %72 = vector.load %arg11[%c0_60, %c0_61, %c0_62] : memref<4x512x512xbf16, #tpu.memory_space<vmem>>, vector<1x512x512xbf16>
    %73 = vector.shape_cast %72 : vector<1x512x512xbf16> to vector<512x512xbf16>
    %cst_63 = arith.constant dense<0.000000e+00> : vector<2x512xf32>
    %74 = tpu.matmul %71, %73, %cst_63 {dimension_numbers = #tpu.dot_dimension_numbers<[1], [0], [0], [1], [0, 0, 1, 1], [], []>} : vector<2x512xbf16>, vector<512x512xbf16>, vector<2x512xf32> -> vector<2x512xf32>
    %75 = vector.broadcast %68 : vector<1x512xf32> to vector<2x512xf32>
    %76 = arith.addf %75, %74 : vector<2x512xf32>
    %c2_64 = arith.constant 2 : index
    %c0_65 = arith.constant 0 : index
    %77 = vector.load %arg5[%c2_64, %c0_65] : memref<8x4xbf16, #tpu.memory_space<vmem>>, vector<2x4xbf16>
    %cst_66 = arith.constant dense<0.000000e+00> : vector<2x512xf32>
    %78 = tpu.matmul %77, %67, %cst_66 {dimension_numbers = #tpu.dot_dimension_numbers<[1], [0], [0], [1], [0, 0, 1, 1], [], []>} : vector<2x4xbf16>, vector<4x512xbf16>, vector<2x512xf32> -> vector<2x512xf32>
    %79 = arith.truncf %78 : vector<2x512xf32> to vector<2x512xbf16>
    %c1_67 = arith.constant 1 : index
    %c0_68 = arith.constant 0 : index
    %c0_69 = arith.constant 0 : index
    %80 = vector.load %arg11[%c1_67, %c0_68, %c0_69] : memref<4x512x512xbf16, #tpu.memory_space<vmem>>, vector<1x512x512xbf16>
    %81 = vector.shape_cast %80 : vector<1x512x512xbf16> to vector<512x512xbf16>
    %cst_70 = arith.constant dense<0.000000e+00> : vector<2x512xf32>
    %82 = tpu.matmul %79, %81, %cst_70 {dimension_numbers = #tpu.dot_dimension_numbers<[1], [0], [0], [1], [0, 0, 1, 1], [], []>} : vector<2x512xbf16>, vector<512x512xbf16>, vector<2x512xf32> -> vector<2x512xf32>
    %83 = arith.addf %76, %82 : vector<2x512xf32>
    %c4_71 = arith.constant 4 : index
    %c0_72 = arith.constant 0 : index
    %84 = vector.load %arg5[%c4_71, %c0_72] : memref<8x4xbf16, #tpu.memory_space<vmem>>, vector<2x4xbf16>
    %cst_73 = arith.constant dense<0.000000e+00> : vector<2x512xf32>
    %85 = tpu.matmul %84, %67, %cst_73 {dimension_numbers = #tpu.dot_dimension_numbers<[1], [0], [0], [1], [0, 0, 1, 1], [], []>} : vector<2x4xbf16>, vector<4x512xbf16>, vector<2x512xf32> -> vector<2x512xf32>
    %86 = arith.truncf %85 : vector<2x512xf32> to vector<2x512xbf16>
    %c2_74 = arith.constant 2 : index
    %c0_75 = arith.constant 0 : index
    %c0_76 = arith.constant 0 : index
    %87 = vector.load %arg11[%c2_74, %c0_75, %c0_76] : memref<4x512x512xbf16, #tpu.memory_space<vmem>>, vector<1x512x512xbf16>
    %88 = vector.shape_cast %87 : vector<1x512x512xbf16> to vector<512x512xbf16>
    %cst_77 = arith.constant dense<0.000000e+00> : vector<2x512xf32>
    %89 = tpu.matmul %86, %88, %cst_77 {dimension_numbers = #tpu.dot_dimension_numbers<[1], [0], [0], [1], [0, 0, 1, 1], [], []>} : vector<2x512xbf16>, vector<512x512xbf16>, vector<2x512xf32> -> vector<2x512xf32>
    %90 = arith.addf %83, %89 : vector<2x512xf32>
    %c6 = arith.constant 6 : index
    %c0_78 = arith.constant 0 : index
    %91 = vector.load %arg5[%c6, %c0_78] : memref<8x4xbf16, #tpu.memory_space<vmem>>, vector<2x4xbf16>
    %cst_79 = arith.constant dense<0.000000e+00> : vector<2x512xf32>
    %92 = tpu.matmul %91, %67, %cst_79 {dimension_numbers = #tpu.dot_dimension_numbers<[1], [0], [0], [1], [0, 0, 1, 1], [], []>} : vector<2x4xbf16>, vector<4x512xbf16>, vector<2x512xf32> -> vector<2x512xf32>
    %93 = arith.truncf %92 : vector<2x512xf32> to vector<2x512xbf16>
    %c3_80 = arith.constant 3 : index
    %c0_81 = arith.constant 0 : index
    %c0_82 = arith.constant 0 : index
    %94 = vector.load %arg11[%c3_80, %c0_81, %c0_82] : memref<4x512x512xbf16, #tpu.memory_space<vmem>>, vector<1x512x512xbf16>
    %95 = vector.shape_cast %94 : vector<1x512x512xbf16> to vector<512x512xbf16>
    %cst_83 = arith.constant dense<0.000000e+00> : vector<2x512xf32>
    %96 = tpu.matmul %93, %95, %cst_83 {dimension_numbers = #tpu.dot_dimension_numbers<[1], [0], [0], [1], [0, 0, 1, 1], [], []>} : vector<2x512xbf16>, vector<512x512xbf16>, vector<2x512xf32> -> vector<2x512xf32>
    %97 = arith.addf %90, %96 : vector<2x512xf32>
    %cst_84 = arith.constant 0.000000e+00 : f32
    %98 = vector.broadcast %cst_84 : f32 to vector<2x512xf32>
    %99 = arith.maximumf %97, %98 : vector<2x512xf32>
    %100 = arith.truncf %99 : vector<2x512xf32> to vector<2x512xbf16>
    %c0_85 = arith.constant 0 : index
    %c0_86 = arith.constant 0 : index
    %101 = vector.load %arg14[%c0_85, %c0_86] : memref<1x128xf32, #tpu.memory_space<vmem>>, vector<1x128xf32>
    %c0_87 = arith.constant 0 : index
    %c0_88 = arith.constant 0 : index
    %102 = vector.load %arg6[%c0_87, %c0_88] : memref<4x2xbf16, #tpu.memory_space<vmem>>, vector<1x2xbf16>
    %cst_89 = arith.constant dense<0.000000e+00> : vector<1x512xf32>
    %103 = tpu.matmul %102, %100, %cst_89 {dimension_numbers = #tpu.dot_dimension_numbers<[1], [0], [0], [1], [0, 0, 1, 1], [], []>} : vector<1x2xbf16>, vector<2x512xbf16>, vector<1x512xf32> -> vector<1x512xf32>
    %104 = arith.truncf %103 : vector<1x512xf32> to vector<1x512xbf16>
    %c0_90 = arith.constant 0 : index
    %c0_91 = arith.constant 0 : index
    %c0_92 = arith.constant 0 : index
    %105 = vector.load %arg13[%c0_90, %c0_91, %c0_92] : memref<4x512x128xbf16, #tpu.memory_space<vmem>>, vector<1x512x128xbf16>
    %106 = vector.shape_cast %105 : vector<1x512x128xbf16> to vector<512x128xbf16>
    %cst_93 = arith.constant dense<0.000000e+00> : vector<1x128xf32>
    %107 = tpu.matmul %104, %106, %cst_93 {dimension_numbers = #tpu.dot_dimension_numbers<[1], [0], [0], [1], [0, 0, 1, 1], [], []>} : vector<1x512xbf16>, vector<512x128xbf16>, vector<1x128xf32> -> vector<1x128xf32>
    %108 = arith.addf %101, %107 : vector<1x128xf32>
    %c1_94 = arith.constant 1 : index
    %c0_95 = arith.constant 0 : index
    %109 = vector.load %arg6[%c1_94, %c0_95] : memref<4x2xbf16, #tpu.memory_space<vmem>>, vector<1x2xbf16>
    %cst_96 = arith.constant dense<0.000000e+00> : vector<1x512xf32>
    %110 = tpu.matmul %109, %100, %cst_96 {dimension_numbers = #tpu.dot_dimension_numbers<[1], [0], [0], [1], [0, 0, 1, 1], [], []>} : vector<1x2xbf16>, vector<2x512xbf16>, vector<1x512xf32> -> vector<1x512xf32>
    %111 = arith.truncf %110 : vector<1x512xf32> to vector<1x512xbf16>
    %c1_97 = arith.constant 1 : index
    %c0_98 = arith.constant 0 : index
    %c0_99 = arith.constant 0 : index
    %112 = vector.load %arg13[%c1_97, %c0_98, %c0_99] : memref<4x512x128xbf16, #tpu.memory_space<vmem>>, vector<1x512x128xbf16>
    %113 = vector.shape_cast %112 : vector<1x512x128xbf16> to vector<512x128xbf16>
    %cst_100 = arith.constant dense<0.000000e+00> : vector<1x128xf32>
    %114 = tpu.matmul %111, %113, %cst_100 {dimension_numbers = #tpu.dot_dimension_numbers<[1], [0], [0], [1], [0, 0, 1, 1], [], []>} : vector<1x512xbf16>, vector<512x128xbf16>, vector<1x128xf32> -> vector<1x128xf32>
    %115 = arith.addf %108, %114 : vector<1x128xf32>
    %c2_101 = arith.constant 2 : index
    %c0_102 = arith.constant 0 : index
    %116 = vector.load %arg6[%c2_101, %c0_102] : memref<4x2xbf16, #tpu.memory_space<vmem>>, vector<1x2xbf16>
    %cst_103 = arith.constant dense<0.000000e+00> : vector<1x512xf32>
    %117 = tpu.matmul %116, %100, %cst_103 {dimension_numbers = #tpu.dot_dimension_numbers<[1], [0], [0], [1], [0, 0, 1, 1], [], []>} : vector<1x2xbf16>, vector<2x512xbf16>, vector<1x512xf32> -> vector<1x512xf32>
    %118 = arith.truncf %117 : vector<1x512xf32> to vector<1x512xbf16>
    %c2_104 = arith.constant 2 : index
    %c0_105 = arith.constant 0 : index
    %c0_106 = arith.constant 0 : index
    %119 = vector.load %arg13[%c2_104, %c0_105, %c0_106] : memref<4x512x128xbf16, #tpu.memory_space<vmem>>, vector<1x512x128xbf16>
    %120 = vector.shape_cast %119 : vector<1x512x128xbf16> to vector<512x128xbf16>
    %cst_107 = arith.constant dense<0.000000e+00> : vector<1x128xf32>
    %121 = tpu.matmul %118, %120, %cst_107 {dimension_numbers = #tpu.dot_dimension_numbers<[1], [0], [0], [1], [0, 0, 1, 1], [], []>} : vector<1x512xbf16>, vector<512x128xbf16>, vector<1x128xf32> -> vector<1x128xf32>
    %122 = arith.addf %115, %121 : vector<1x128xf32>
    %c3_108 = arith.constant 3 : index
    %c0_109 = arith.constant 0 : index
    %123 = vector.load %arg6[%c3_108, %c0_109] : memref<4x2xbf16, #tpu.memory_space<vmem>>, vector<1x2xbf16>
    %cst_110 = arith.constant dense<0.000000e+00> : vector<1x512xf32>
    %124 = tpu.matmul %123, %100, %cst_110 {dimension_numbers = #tpu.dot_dimension_numbers<[1], [0], [0], [1], [0, 0, 1, 1], [], []>} : vector<1x2xbf16>, vector<2x512xbf16>, vector<1x512xf32> -> vector<1x512xf32>
    %125 = arith.truncf %124 : vector<1x512xf32> to vector<1x512xbf16>
    %c3_111 = arith.constant 3 : index
    %c0_112 = arith.constant 0 : index
    %c0_113 = arith.constant 0 : index
    %126 = vector.load %arg13[%c3_111, %c0_112, %c0_113] : memref<4x512x128xbf16, #tpu.memory_space<vmem>>, vector<1x512x128xbf16>
    %127 = vector.shape_cast %126 : vector<1x512x128xbf16> to vector<512x128xbf16>
    %cst_114 = arith.constant dense<0.000000e+00> : vector<1x128xf32>
    %128 = tpu.matmul %125, %127, %cst_114 {dimension_numbers = #tpu.dot_dimension_numbers<[1], [0], [0], [1], [0, 0, 1, 1], [], []>} : vector<1x512xbf16>, vector<512x128xbf16>, vector<1x128xf32> -> vector<1x128xf32>
    %129 = arith.addf %122, %128 : vector<1x128xf32>
    %cst_115 = arith.constant 0.000000e+00 : f32
    %130 = vector.broadcast %cst_115 : f32 to vector<1x128xf32>
    %131 = arith.maximumf %129, %130 : vector<1x128xf32>
    %132 = arith.truncf %131 : vector<1x128xf32> to vector<1x128xbf16>
    %c0_116 = arith.constant 0 : index
    %c0_117 = arith.constant 0 : index
    %c0_118 = arith.constant 0 : index
    %133 = vector.load %arg2[%c0_116, %c0_117, %c0_118] : memref<1x1x4xbf16, #tpu.memory_space<vmem>>, vector<1x1x4xbf16>
    %134 = vector.shape_cast %133 : vector<1x1x4xbf16> to vector<1x4xbf16>
    %c0_119 = arith.constant 0 : index
    %c0_120 = arith.constant 0 : index
    %135 = vector.load %arg15[%c0_119, %c0_120] : memref<4x64xbf16, #tpu.memory_space<vmem>>, vector<4x64xbf16>
    %cst_121 = arith.constant dense<0.000000e+00> : vector<1x64xf32>
    %136 = tpu.matmul %134, %135, %cst_121 {dimension_numbers = #tpu.dot_dimension_numbers<[1], [0], [0], [1], [0, 0, 1, 1], [], []>} : vector<1x4xbf16>, vector<4x64xbf16>, vector<1x64xf32> -> vector<1x64xf32>
    %c0_122 = arith.constant 0 : index
    %c0_123 = arith.constant 0 : index
    %137 = vector.load %arg16[%c0_122, %c0_123] : memref<1x64xf32, #tpu.memory_space<vmem>>, vector<1x64xf32>
    %138 = arith.addf %136, %137 : vector<1x64xf32>
    %cst_124 = arith.constant 0.000000e+00 : f32
    %139 = vector.broadcast %cst_124 : f32 to vector<1x64xf32>
    %140 = arith.maximumf %138, %139 : vector<1x64xf32>
    %141 = arith.truncf %140 : vector<1x64xf32> to vector<1x64xbf16>
    %c0_125 = arith.constant 0 : index
    %c0_126 = arith.constant 0 : index
    %142 = vector.load %arg17[%c0_125, %c0_126] : memref<64x128xbf16, #tpu.memory_space<vmem>>, vector<64x128xbf16>
    %cst_127 = arith.constant dense<0.000000e+00> : vector<1x128xf32>
    %143 = tpu.matmul %141, %142, %cst_127 {dimension_numbers = #tpu.dot_dimension_numbers<[1], [0], [0], [1], [0, 0, 1, 1], [], []>} : vector<1x64xbf16>, vector<64x128xbf16>, vector<1x128xf32> -> vector<1x128xf32>
    %c0_128 = arith.constant 0 : index
    %c0_129 = arith.constant 0 : index
    %144 = vector.load %arg18[%c0_128, %c0_129] : memref<1x128xf32, #tpu.memory_space<vmem>>, vector<1x128xf32>
    %145 = arith.addf %143, %144 : vector<1x128xf32>
    %cst_130 = arith.constant 0.000000e+00 : f32
    %146 = vector.broadcast %cst_130 : f32 to vector<1x128xf32>
    %147 = arith.maximumf %145, %146 : vector<1x128xf32>
    %c0_131 = arith.constant 0 : index
    %c0_132 = arith.constant 0 : index
    %148 = vector.load %arg19[%c0_131, %c0_132] : memref<128x128xbf16, #tpu.memory_space<vmem>>, vector<128x128xbf16>
    %cst_133 = arith.constant dense<0.000000e+00> : vector<1x128xf32>
    %149 = tpu.matmul %132, %148, %cst_133 {dimension_numbers = #tpu.dot_dimension_numbers<[1], [0], [0], [1], [0, 0, 1, 1], [], []>} : vector<1x128xbf16>, vector<128x128xbf16>, vector<1x128xf32> -> vector<1x128xf32>
    %150 = arith.truncf %147 : vector<1x128xf32> to vector<1x128xbf16>
    %c0_134 = arith.constant 0 : index
    %c0_135 = arith.constant 0 : index
    %151 = vector.load %arg20[%c0_134, %c0_135] : memref<128x128xbf16, #tpu.memory_space<vmem>>, vector<128x128xbf16>
    %cst_136 = arith.constant dense<0.000000e+00> : vector<1x128xf32>
    %152 = tpu.matmul %150, %151, %cst_136 {dimension_numbers = #tpu.dot_dimension_numbers<[1], [0], [0], [1], [0, 0, 1, 1], [], []>} : vector<1x128xbf16>, vector<128x128xbf16>, vector<1x128xf32> -> vector<1x128xf32>
    %153 = arith.addf %149, %152 : vector<1x128xf32>
    %c0_137 = arith.constant 0 : index
    %c0_138 = arith.constant 0 : index
    %154 = vector.load %arg21[%c0_137, %c0_138] : memref<1x128xf32, #tpu.memory_space<vmem>>, vector<1x128xf32>
    %155 = arith.addf %153, %154 : vector<1x128xf32>
    %c0_139 = arith.constant 0 : index
    %c0_140 = arith.constant 0 : index
    %c0_141 = arith.constant 0 : index
    %156 = vector.load %arg22[%c0_139, %c0_140, %c0_141] : memref<1x1x128xf32, #tpu.memory_space<vmem>>, vector<1x1x128xf32>
    %157 = vector.shape_cast %156 : vector<1x1x128xf32> to vector<1x128xf32>
    %158 = vector.shape_cast %155 : vector<1x128xf32> to vector<1x1x128xf32>
    tpu.vector_store %arg22[%c0_139, %c0_140, %c0_141], %158 {strides = array<i32>} : memref<1x1x128xf32, #tpu.memory_space<vmem>>, vector<1x1x128xf32>,
    return
  }
  func.func @transform_0(%arg0: i32) -> (i32, i32, i32) {
    %c0_i32 = arith.constant 0 : i32
    %c0_i32_0 = arith.constant 0 : i32
    %c0_i32_1 = arith.constant 0 : i32
    return %arg0, %c0_i32, %c0_i32_0 : i32, i32, i32
  }
  func.func @transform_1(%arg0: i32) -> (i32, i32, i32) {
    %c0_i32 = arith.constant 0 : i32
    %c0_i32_0 = arith.constant 0 : i32
    %c0_i32_1 = arith.constant 0 : i32
    return %arg0, %c0_i32, %c0_i32_0 : i32, i32, i32
  }
  func.func @transform_2(%arg0: i32) -> (i32, i32) {
    %c0_i32 = arith.constant 0 : i32
    %c0_i32_0 = arith.constant 0 : i32
    %c0_i32_1 = arith.constant 0 : i32
    return %c0_i32, %c0_i32_0 : i32, i32
  }
  func.func @transform_3(%arg0: i32) -> (i32, i32) {
    %c0_i32 = arith.constant 0 : i32
    %c0_i32_0 = arith.constant 0 : i32
    %c0_i32_1 = arith.constant 0 : i32
    return %c0_i32, %c0_i32_0 : i32, i32
  }
  func.func @transform_4(%arg0: i32) -> (i32, i32) {
    %c0_i32 = arith.constant 0 : i32
    %c0_i32_0 = arith.constant 0 : i32
    %c0_i32_1 = arith.constant 0 : i32
    return %c0_i32, %c0_i32_0 : i32, i32
  }
  func.func @transform_5(%arg0: i32) -> (i32, i32) {
    %c0_i32 = arith.constant 0 : i32
    %c0_i32_0 = arith.constant 0 : i32
    %c0_i32_1 = arith.constant 0 : i32
    return %c0_i32, %c0_i32_0 : i32, i32
  }
  func.func @transform_6(%arg0: i32) -> (i32, i32, i32) {
    %c0_i32 = arith.constant 0 : i32
    %c0_i32_0 = arith.constant 0 : i32
    %c0_i32_1 = arith.constant 0 : i32
    %c0_i32_2 = arith.constant 0 : i32
    return %c0_i32, %c0_i32_0, %c0_i32_1 : i32, i32, i32
  }
  func.func @transform_7(%arg0: i32) -> (i32, i32) {
    %c0_i32 = arith.constant 0 : i32
    %c0_i32_0 = arith.constant 0 : i32
    %c0_i32_1 = arith.constant 0 : i32
    return %c0_i32, %c0_i32_0 : i32, i32
  }
  func.func @transform_8(%arg0: i32) -> (i32, i32, i32) {
    %c0_i32 = arith.constant 0 : i32
    %c0_i32_0 = arith.constant 0 : i32
    %c0_i32_1 = arith.constant 0 : i32
    %c0_i32_2 = arith.constant 0 : i32
    return %c0_i32, %c0_i32_0, %c0_i32_1 : i32, i32, i32
  }
  func.func @transform_9(%arg0: i32) -> (i32, i32) {
    %c0_i32 = arith.constant 0 : i32
    %c0_i32_0 = arith.constant 0 : i32
    %c0_i32_1 = arith.constant 0 : i32
    return %c0_i32, %c0_i32_0 : i32, i32
  }
  func.func @transform_10(%arg0: i32) -> (i32, i32, i32) {
    %c0_i32 = arith.constant 0 : i32
    %c0_i32_0 = arith.constant 0 : i32
    %c0_i32_1 = arith.constant 0 : i32
    %c0_i32_2 = arith.constant 0 : i32
    return %c0_i32, %c0_i32_0, %c0_i32_1 : i32, i32, i32
  }
  func.func @transform_11(%arg0: i32) -> (i32, i32) {
    %c0_i32 = arith.constant 0 : i32
    %c0_i32_0 = arith.constant 0 : i32
    %c0_i32_1 = arith.constant 0 : i32
    return %c0_i32, %c0_i32_0 : i32, i32
  }
  func.func @transform_12(%arg0: i32) -> (i32, i32, i32) {
    %c0_i32 = arith.constant 0 : i32
    %c0_i32_0 = arith.constant 0 : i32
    %c0_i32_1 = arith.constant 0 : i32
    %c0_i32_2 = arith.constant 0 : i32
    return %c0_i32, %c0_i32_0, %c0_i32_1 : i32, i32, i32
  }
  func.func @transform_13(%arg0: i32) -> (i32, i32) {
    %c0_i32 = arith.constant 0 : i32
    %c0_i32_0 = arith.constant 0 : i32
    %c0_i32_1 = arith.constant 0 : i32
    return %c0_i32, %c0_i32_0 : i32, i32
  }
  func.func @transform_14(%arg0: i32) -> (i32, i32) {
    %c0_i32 = arith.constant 0 : i32
    %c0_i32_0 = arith.constant 0 : i32
    %c0_i32_1 = arith.constant 0 : i32
    return %c0_i32, %c0_i32_0 : i32, i32
  }
  func.func @transform_15(%arg0: i32) -> (i32, i32) {
    %c0_i32 = arith.constant 0 : i32
    %c0_i32_0 = arith.constant 0 : i32
    %c0_i32_1 = arith.constant 0 : i32
    return %c0_i32, %c0_i32_0 : i32, i32
  }
  func.func @transform_16(%arg0: i32) -> (i32, i32) {
    %c0_i32 = arith.constant 0 : i32
    %c0_i32_0 = arith.constant 0 : i32
    %c0_i32_1 = arith.constant 0 : i32
    return %c0_i32, %c0_i32_0 : i32, i32
  }
  func.func @transform_17(%arg0: i32) -> (i32, i32) {
    %c0_i32 = arith.constant 0 : i32
    %c0_i32_0 = arith.constant 0 : i32
    %c0_i32_1 = arith.constant 0 : i32
    return %c0_i32, %c0_i32_0 : i32, i32
  }
  func.func @transform_18(%arg0: i32) -> (i32, i32) {
    %c0_i32 = arith.constant 0 : i32
    %c0_i32_0 = arith.constant 0 : i32
    %c0_i32_1 = arith.constant 0 : i32
    return %c0_i32, %c0_i32_0 : i32, i32
  }
  func.func @transform_19(%arg0: i32) -> (i32, i32) {
    %c0_i32 = arith.constant 0 : i32
    %c0_i32_0 = arith.constant 0 : i32
    %c0_i32_1 = arith.constant 0 : i32
    return %c0_i32, %c0_i32_0 : i32, i32
  }
  func.func @transform_20(%arg0: i32) -> (i32, i32) {
    %c0_i32 = arith.constant 0 : i32
    %c0_i32_0 = arith.constant 0 : i32
    %c0_i32_1 = arith.constant 0 : i32
    return %c0_i32, %c0_i32_0 : i32, i32
  }
  func.func @transform_21(%arg0: i32) -> (i32, i32, i32) {
    %c0_i32 = arith.constant 0 : i32
    %c0_i32_0 = arith.constant 0 : i32
    %c0_i32_1 = arith.constant 0 : i32
    return %arg0, %c0_i32, %c0_i32_0 : i32, i32, i32
  }
}

</mosaic_0001>

<bundles_post_ra>
// kernel: simple_encoder_forward.1
= control target key start
LH: loop header
LB: loop body
LE: loop exit
PB: predicated region body
PF: predicated region fallthrough
CT: control target
= control target key end

     0   :  { %s17593_s0 = inlined_call_operand.vmem [shape: bf16[2,16,48], index: 0, kind: input, shape index: {}]   ;;  %s17594_s1 = inlined_call_operand.vmem [shape: bf16[2,1,4], index: 1, kind: input, shape index: {}]   ;;  %s17595_s2 = inlined_call_operand.vmem [shape: bf16[32,16], index: 2, kind: input, shape index: {}]   ;;  %s17596_s3 = inlined_call_operand.vmem [shape: bf16[16,8], index: 3, kind: input, shape index: {}]   ;;  %s17597_s4 = inlined_call_operand.vmem [shape: bf16[8,4], index: 4, kind: input, shape index: {}]   ;;  %s17598_s5 = inlined_call_operand.vmem [shape: bf16[4,2], index: 5, kind: input, shape index: {}]   ;;  %s17599_s6 = inlined_call_operand.hbm [shape: bf16[4,48,512], index: 6, kind: input, shape index: {}]   ;;  %s17600_s7 = inlined_call_operand.hbm [shape: f32[1,512], index: 7, kind: input, shape index: {}]   ;;  %s17601_s8 = inlined_call_operand.hbm [shape: bf16[4,512,512], index: 8, kind: input, shape index: {}]   ;;  %s17602_s9 = inlined_call_operand.hbm [shape: f32[1,512], index: 9, kind: input, shape index: {}]   ;;  %s17603_s10 = inlined_call_operand.hbm [shape: bf16[4,512,512], index: 10, kind: input, shape index: {}]   ;;  %s17604_s11 = inlined_call_operand.hbm [shape: f32[1,512], index: 11, kind: input, shape index: {}]   ;;  %s17605_s12 = inlined_call_operand.hbm [shape: bf16[4,512,128], index: 12, kind: input, shape index: {}]   ;;  %s17606_s13 = inlined_call_operand.hbm [shape: f32[1,128], index: 13, kind: input, shape index: {}]   ;;  %s17607_s14 = inlined_call_operand.hbm [shape: bf16[4,64], index: 14, kind: input, shape index: {}]   ;;  %s17608_s15 = inlined_call_operand.hbm [shape: f32[1,64], index: 15, kind: input, shape index: {}]   ;;  %s17609_s16 = inlined_call_operand.hbm [shape: bf16[64,128], index: 16, kind: input, shape index: {}]   ;;  %s17610_s17 = inlined_call_operand.hbm [shape: f32[1,128], index: 17, kind: input, shape index: {}]   ;;  %s17611_s18 = inlined_call_operand.hbm [shape: bf16[128,128], index: 18, kind: input, shape index: {}]   ;;  %s17612_s19 = inlined_call_operand.hbm [shape: bf16[128,128], index: 19, kind: input, shape index: {}]   ;;  %s17613_s20 = inlined_call_operand.hbm [shape: f32[1,128], index: 20, kind: input, shape index: {}]   ;;  %s17614_s21 = inlined_call_operand.hbm [shape: f32[2,1,128], index: 21, kind: output, shape index: {}]  }
   0x1   :  { %17637 = sst [smem:[#allocation44_spill]] %s17593_s0 }
   0x2   :  { %17638 = sst [smem:[#allocation45_spill]] %s17594_s1 }
   0x3   :  { %17639 = sst [smem:[#allocation46_spill]] %s17595_s2 }
   0x4   :  { %17640 = sst [smem:[#allocation47_spill]] %s17596_s3 }
   0x5   :  { %17641 = sst [smem:[#allocation48_spill]] %s17597_s4 }
   0x6   :  { %17642 = sst [smem:[#allocation49_spill]] %s17598_s5 }
   0x7   :  { %17643 = sst [smem:[#allocation50_spill]] %s17600_s7 }
   0x8   :  { %17644 = sst [smem:[#allocation51_spill]] %s17602_s9 }
   0x9   :  { %17645 = sst [smem:[#allocation52_spill]] %s17614_s21 }
   0xa   :  { %26 = vsyncpa [#allocation3], 0 }
   0xb   :  { %27 = vsyncpa [#allocation6], 0 }
   0xc   :  { %28 = vsyncpa [#allocation9], 0 }
   0xd   :  { %29 = vsyncpa [#allocation12], 0 }
   0xe   :  { %30 = vsyncpa [#allocation15], 0 }
   0xf   :  { %31 = vsyncpa [#allocation18], 0 }
  0x10   :  { %32 = vsyncpa [#allocation21], 0 }
  0x11   :  { %33 = vsyncpa [#allocation24], 0 }
  0x12   :  { %34 = vsyncpa [#allocation4], 0 }
  0x13   :  { %36 = vsyncpa [#allocation4 + $0x1], 0  ;;  %s16763_s2 = smov 0   ;;  %s16765_s25 = smov 0  }
  0x14   :  { %s16767_s26 = smov 0   ;;  %s16769_s27 = smov 0  }
  0x15 LB: > { %17646 = sst [smem:[#allocation36_spill]] %s16615_s2  ;;  %s16784_s3 = sadd.s32 4294967295, %s16627_s27   ;;  %s16627_s27 = sphi %s16769_s27, %s17695_s27   ;;  %s16623_s26 = sphi %s16767_s26, %s17698_s26   ;;  %s16619_s25 = sphi %s16765_s25, %s17697_s25   ;;  %s16615_s2 = sphi %s16763_s2, %s17696_s2  }
  0x16   : > { %17647 = sst [smem:[#allocation37_spill]] %s16619_s25  ;;  %s12382_s28 = sadd.s32 4294967294, %s16627_s27  }
  0x17   : > { %17648 = sst [smem:[#allocation38_spill]] %s16623_s26  ;;  %s16788_s29 = sadd.s32 1, %s16627_s27  }
  0x18   : > { %17649 = sst [smem:[#allocation39_spill]] %s16627_s27  ;;  %s500_s0 = sadd.s32 1, %s16623_s26 }
  0x19   : > { %17650 = sst [smem:[#allocation40_spill]] %s16788_s29  ;;  %s497_s4 = ssub.s32 %s16627_s27, %s16788_s29 }
  0x1a   : > { %p510_p0 = scmp.ne.s32.totalorder %s16623_s26, %s16619_s25  ;;  %p498_p1 = scmp.eq.s32.totalorder %s497_s4, 0 }
  0x1b   : > { %p511_p2 = scmp.eq.s32.totalorder %s16784_s3, 1  ;;  %p516_p3 = scmp.ne.s32.totalorder %s16619_s25, %s16615_s2 }
  0x1c   : > { %p517_p4 = scmp.eq.s32.totalorder %s12382_s28, 1  ;;  %p12383_p7 = scmp.ge.s32.totalorder %s16627_s27, 1 }
  0x1d   : > { %s16799_s30 = scalar_select %p498_p1, %s16623_s26, %s500_s0  }
  0x1e   : > { %p16801_p5 = por %p511_p2, %p510_p0  ;;  %p16805_p6 = por %p517_p4, %p516_p3 }
  0x1f   : > { %17651 = sst [smem:[#allocation41_spill]] %s16799_s30  ;;  %p524_p8 = scmp.lt.s32.totalorder %s16627_s27, 3 }
  0x20   : > { %s17652_s5 = scalar_select %p16801_p5, 1, 0 }
  0x21   : > { %s17654_s22 = scalar_select %p16805_p6, 1, 0 }
  0x22   : > { %17653 = sst [smem:[#allocation42_spill]] %s17652_s5  ;;  %p17626_p9 = scmp.eq.s32.totalorder %s16784_s3, 0 }
  0x23   : > { %17655 = sst [smem:[#allocation43_spill]] %s17654_s22  ;;  %p16812_p10 = pnand %p12383_p7, %p524_p8 }
  0x24   : > { %s16629_s1 = smov [#allocation5]   ;;  %s16630_s28 = smov [#allocation8]  }
  0x25   : > { %s17656_s23 = scalar_select %p16812_p10, 1, 0 }
  0x26   : > { %s562_s24 = sshll.u32 %s16629_s1, 4  ;;  %p14213_p11 = pneg %p16812_p10  ;;  %s563_s24 = int_to_ptr.vmem [resolvable:$true] %s562_s24 }
  0x27   : > { %s586_s0 = sshll.u32 %s16630_s28, 4  ;;  %s16631_s30 = smov [#allocation11]   ;;  %s16824_s0 = int_to_ptr.vmem [resolvable:$true] %s586_s0 }
  0x28   : > { %p16820_p12 = pnand %p17626_p9, %p14213_p11  ;;  %s610_s26 = sshll.u32 %s16631_s30, 4  ;;  %s16826_s26 = int_to_ptr.vmem [resolvable:$true] %s610_s26 }
  0x29   : > { %s17658_s7 = sld [smem:[#allocation50_spill]] }
  0x2a   : > { %p16836_p0 = pneg %p16820_p12 }
  0x2f   : > { %s16113_s1 = scalar_lea.hbm %s17658_s7, 64 }
  0x30   : > { %p16114_p13 = scmp.ne.s32.totalorder %s17658_s7, %s16113_s1  ;;  %p16120_p3 = scmp.lt.u32.totalorder %s16113_s1, %s17658_s7 }
  0x32   : > { %p16116_p1 = pnand %p16836_p0, %p16114_p13 }
  0x34   : > { %p16117_p2 = pneg %p16116_p1 }
  0x36   : > { %p16122_p4 = pnand %p16120_p3, %p16117_p2 }
  0x38   : > { %16125 = shalt.err (!%p16122_p4)
}
  0x39   : > { %s16126_s29 = scalar_lea.vmem %s563_s24, 64  ;;  %p16134_p9 = scmp.lt.s32.totalorder %s563_s24, %s563_s24 }
  0x3a   : > { %p16127_p7 = scmp.ne.s32.totalorder %s563_s24, %s16126_s29  ;;  %p16135_p6 = scmp.lt.s32.totalorder %s16126_s29, %s16126_s29 }
  0x3c   : > { %p16129_p8 = pnand %p16127_p7, %p16836_p0  ;;  %p16136_p5 = por %p16135_p6, %p16134_p9 }
  0x3e   : > { %p16130_p11 = pneg %p16129_p8 }
  0x40   : > { %p16137_p10 = pnand %p16136_p5, %p16130_p11 }
  0x42   : > { %16140 = shalt.err (!%p16137_p10)
}
  0x43   : > { %14219 = dma.hbm_to_vmem [thread:$0]  (!%p16820_p12), %s17658_s7, 64, %s563_s24, [#allocation6]  }
  0x44   : > { %s17660_s9 = sld [smem:[#allocation51_spill]] }
  0x4a   : > { %s16141_s1 = scalar_lea.hbm %s17660_s9, 64 }
  0x4b   : > { %p16142_p13 = scmp.ne.s32.totalorder %s17660_s9, %s16141_s1  ;;  %p16148_p5 = scmp.lt.u32.totalorder %s16141_s1, %s17660_s9 }
  0x4d   : > { %p16144_p1 = pnand %p16142_p13, %p16836_p0 }
  0x4f   : > { %p16145_p6 = pneg %p16144_p1 }
  0x51   : > { %p16150_p9 = pnand %p16148_p5, %p16145_p6 }
  0x53   : > { %16153 = shalt.err (!%p16150_p9)
}
  0x54   : > { %s16154_s24 = scalar_lea.vmem %s16824_s0, 64  ;;  %p16162_p4 = scmp.lt.s32.totalorder %s16824_s0, %s16824_s0 }
  0x55   : > { %p16155_p10 = scmp.ne.s32.totalorder %s16824_s0, %s16154_s24  ;;  %p16163_p7 = scmp.lt.s32.totalorder %s16154_s24, %s16154_s24 }
  0x57   : > { %p16157_p2 = pnand %p16155_p10, %p16836_p0  ;;  %p16164_p8 = por %p16163_p7, %p16162_p4 }
  0x59   : > { %p16158_p3 = pneg %p16157_p2 }
  0x5b   : > { %p16165_p11 = pnand %p16164_p8, %p16158_p3 }
  0x5d   : > { %16168 = shalt.err (!%p16165_p11)
}
  0x5e   : > { %14225 = dma.hbm_to_vmem [thread:$0]  (!%p16820_p12), %s17660_s9, 64, %s16824_s0, [#allocation9]  }
  0x5f   : > { %s16169_s21 = scalar_lea.hbm %s17604_s11, 64 }
  0x60   : > { %p16170_p13 = scmp.ne.s32.totalorder %s17604_s11, %s16169_s21  ;;  %p16176_p5 = scmp.lt.u32.totalorder %s16169_s21, %s17604_s11 }
  0x62   : > { %p16172_p1 = pnand %p16170_p13, %p16836_p0 }
  0x64   : > { %p16173_p6 = pneg %p16172_p1 }
  0x66   : > { %p16178_p9 = pnand %p16176_p5, %p16173_p6 }
  0x68   : > { %16181 = shalt.err (!%p16178_p9)
}
  0x69   : > { %s16182_s0 = scalar_lea.vmem %s16826_s26, 64  ;;  %p16190_p4 = scmp.lt.s32.totalorder %s16826_s26, %s16826_s26 }
  0x6a   : > { %p16183_p10 = scmp.ne.s32.totalorder %s16826_s26, %s16182_s0  ;;  %p16191_p7 = scmp.lt.s32.totalorder %s16182_s0, %s16182_s0 }
  0x6c   : > { %p16185_p2 = pnand %p16183_p10, %p16836_p0  ;;  %p16192_p8 = por %p16191_p7, %p16190_p4 }
  0x6e   : > { %p16186_p3 = pneg %p16185_p2 }
  0x70   : > { %p16193_p11 = pnand %p16192_p8, %p16186_p3 }
  0x72   : > { %16196 = shalt.err (!%p16193_p11)
}
  0x73   : > { %14231 = dma.hbm_to_vmem [thread:$0]  (!%p16820_p12), %s17604_s11, 64, %s16826_s26, [#allocation12]  }
  0x74   : > { %s16632_s5 = smov [#allocation14]   ;;  %s16633_s27 = smov [#allocation17]  }
  0x75   : > { %s634_s2 = sshll.u32 %s16632_s5, 4  ;;  %s656_s21 = sshll.u32 %s16633_s27, 4  ;;  %s635_s2 = int_to_ptr.vmem [resolvable:$true] %s634_s2  ;;  %s657_s21 = int_to_ptr.vmem [resolvable:$true] %s656_s21 }
  0x76   : > { %s16197_s30 = scalar_lea.hbm %s17606_s13, 16 }
  0x77   : > { %p16198_p13 = scmp.ne.s32.totalorder %s17606_s13, %s16197_s30  ;;  %p16204_p5 = scmp.lt.u32.totalorder %s16197_s30, %s17606_s13 }
  0x79   : > { %p16200_p1 = pnand %p16198_p13, %p16836_p0 }
  0x7b   : > { %p16201_p6 = pneg %p16200_p1 }
  0x7d   : > { %p16206_p9 = pnand %p16204_p5, %p16201_p6 }
  0x7f   : > { %16209 = shalt.err (!%p16206_p9)
}
  0x80   : > { %s16210_s26 = scalar_lea.vmem %s635_s2, 16  ;;  %s16217_s25 = scalar_lea.vmem %s635_s2, 32 }
  0x81   : > { %p16211_p10 = scmp.ne.s32.totalorder %s635_s2, %s16210_s26  ;;  %p16218_p4 = scmp.lt.s32.totalorder %s635_s2, %s635_s2 }
  0x82   : > { %p16219_p7 = scmp.lt.s32.totalorder %s16217_s25, %s16210_s26 }
  0x83   : > { %p16213_p2 = pnand %p16211_p10, %p16836_p0 }
  0x84   : > { %p16220_p8 = por %p16219_p7, %p16218_p4 }
  0x85   : > { %p16214_p3 = pneg %p16213_p2 }
  0x87   : > { %p16221_p11 = pnand %p16220_p8, %p16214_p3 }
  0x89   : > { %16224 = shalt.err (!%p16221_p11)
}
  0x8a   : > { %14237 = dma.hbm_to_vmem [thread:$0]  (!%p16820_p12), %s17606_s13, 16, %s635_s2, [#allocation15]  }
  0x8b   : > { %s16225_s1 = scalar_lea.hbm %s17608_s15, 16 }
  0x8c   : > { %p16226_p13 = scmp.ne.s32.totalorder %s17608_s15, %s16225_s1  ;;  %p16232_p5 = scmp.lt.u32.totalorder %s16225_s1, %s17608_s15 }
  0x8e   : > { %p16228_p1 = pnand %p16226_p13, %p16836_p0 }
  0x90   : > { %p16229_p6 = pneg %p16228_p1 }
  0x92   : > { %p16234_p9 = pnand %p16232_p5, %p16229_p6 }
  0x94   : > { %16237 = shalt.err (!%p16234_p9)
}
  0x95   : > { %s16238_s26 = scalar_lea.vmem %s657_s21, 16  ;;  %s16245_s2 = scalar_lea.vmem %s657_s21, 32 }
  0x96   : > { %p16239_p10 = scmp.ne.s32.totalorder %s657_s21, %s16238_s26  ;;  %p16246_p4 = scmp.lt.s32.totalorder %s657_s21, %s657_s21 }
  0x97   : > { %p16247_p7 = scmp.lt.s32.totalorder %s16245_s2, %s16238_s26 }
  0x98   : > { %p16241_p2 = pnand %p16239_p10, %p16836_p0 }
  0x99   : > { %p16248_p8 = por %p16247_p7, %p16246_p4 }
  0x9a   : > { %p16242_p3 = pneg %p16241_p2 }
  0x9c   : > { %p16249_p11 = pnand %p16248_p8, %p16242_p3 }
  0x9e   : > { %16252 = shalt.err (!%p16249_p11)
}
  0x9f   : > { %14243 = dma.hbm_to_vmem [thread:$0]  (!%p16820_p12), %s17608_s15, 16, %s657_s21, [#allocation18]  }
  0xa0   : > { %s16634_s27 = smov [#allocation20]   ;;  %s16253_s30 = scalar_lea.hbm %s17610_s17, 16 }
  0xa1   : > { %s680_s7 = sshll.u32 %s16634_s27, 4  ;;  %p16254_p13 = scmp.ne.s32.totalorder %s17610_s17, %s16253_s30  ;;  %s681_s7 = int_to_ptr.vmem [resolvable:$true] %s680_s7 }
  0xa2   : > { %p16260_p5 = scmp.lt.u32.totalorder %s16253_s30, %s17610_s17 }
  0xa3   : > { %p16256_p1 = pnand %p16254_p13, %p16836_p0 }
  0xa5   : > { %p16257_p6 = pneg %p16256_p1 }
  0xa7   : > { %p16262_p9 = pnand %p16260_p5, %p16257_p6 }
  0xa9   : > { %16265 = shalt.err (!%p16262_p9)
}
  0xaa   : > { %s16266_s21 = scalar_lea.vmem %s681_s7, 16  ;;  %s16273_s2 = scalar_lea.vmem %s681_s7, 32 }
  0xab   : > { %p16267_p10 = scmp.ne.s32.totalorder %s681_s7, %s16266_s21  ;;  %p16274_p4 = scmp.lt.s32.totalorder %s681_s7, %s681_s7 }
  0xac   : > { %p16275_p7 = scmp.lt.s32.totalorder %s16273_s2, %s16266_s21 }
  0xad   : > { %p16269_p2 = pnand %p16267_p10, %p16836_p0 }
  0xae   : > { %p16276_p8 = por %p16275_p7, %p16274_p4 }
  0xaf   : > { %p16270_p3 = pneg %p16269_p2 }
  0xb1   : > { %p16277_p11 = pnand %p16276_p8, %p16270_p3 }
  0xb3   : > { %16280 = shalt.err (!%p16277_p11)
}
  0xb4   : > { %14249 = dma.hbm_to_vmem [thread:$0]  (!%p16820_p12), %s17610_s17, 16, %s681_s7, [#allocation21]  }
  0xb5   : > { %s16635_s27 = smov [#allocation23]   ;;  %s16636_s1 = smov [#allocation2]  }
  0xb6   : > { %s703_s22 = sshll.u32 %s16635_s27, 4  ;;  %s548_s30 = sshll.u32 %s16636_s1, 4  ;;  %s704_s22 = int_to_ptr.vmem [resolvable:$true] %s703_s22  ;;  %s16952_s30 = int_to_ptr.vmem [resolvable:$true] %s548_s30 }
  0xb7   : > { %s16281_s24 = scalar_lea.hbm %s17612_s19, 1024 }
  0xb8   : > { %p16282_p13 = scmp.ne.s32.totalorder %s17612_s19, %s16281_s24  ;;  %p16288_p5 = scmp.lt.u32.totalorder %s16281_s24, %s17612_s19 }
  0xba   : > { %p16284_p1 = pnand %p16282_p13, %p16836_p0 }
  0xbc   : > { %p16285_p6 = pneg %p16284_p1 }
  0xbe   : > { %p16290_p9 = pnand %p16288_p5, %p16285_p6 }
  0xc0   : > { %16293 = shalt.err (!%p16290_p9)
}
  0xc1   : > { %s16294_s25 = scalar_lea.vmem %s704_s22, 1024  ;;  %p16302_p4 = scmp.lt.s32.totalorder %s704_s22, %s704_s22 }
  0xc2   : > { %p16295_p10 = scmp.ne.s32.totalorder %s704_s22, %s16294_s25  ;;  %p16303_p7 = scmp.lt.s32.totalorder %s16294_s25, %s16294_s25 }
  0xc4   : > { %p16297_p2 = pnand %p16295_p10, %p16836_p0  ;;  %p16304_p8 = por %p16303_p7, %p16302_p4 }
  0xc6   : > { %p16298_p3 = pneg %p16297_p2 }
  0xc8   : > { %p16305_p11 = pnand %p16304_p8, %p16298_p3 }
  0xca   : > { %16308 = shalt.err (!%p16305_p11)
}
  0xcb   : > { %s17632_s5 = smov 64   ;;  %s17634_s27 = smov 4  }
  0xcc   : > { %14255 = dma.hbm_to_vmem [thread:$0]  (!%p16820_p12), %s17612_s19, 1024, %s704_s22, [#allocation24], %s17632_s5, %s17632_s5, %s17634_s27  }
  0xcd   : > { %s16309_s26 = scalar_lea.hbm %s17599_s6, 6144 }
  0xce   : > { %p16310_p13 = scmp.ne.s32.totalorder %s17599_s6, %s16309_s26  ;;  %p16316_p5 = scmp.lt.u32.totalorder %s16309_s26, %s17599_s6 }
  0xd0   : > { %p16312_p1 = pnand %p16310_p13, %p16836_p0 }
  0xd2   : > { %p16313_p6 = pneg %p16312_p1 }
  0xd4   : > { %p16318_p9 = pnand %p16316_p5, %p16313_p6 }
  0xd6   : > { %16321 = shalt.err (!%p16318_p9)
}
  0xd7   : > { %s16322_s22 = scalar_lea.vmem %s16952_s30, 6144  ;;  %p16330_p4 = scmp.lt.s32.totalorder %s16952_s30, %s16952_s30 }
  0xd8   : > { %p16323_p10 = scmp.ne.s32.totalorder %s16952_s30, %s16322_s22  ;;  %p16331_p7 = scmp.lt.s32.totalorder %s16322_s22, %s16322_s22 }
  0xda   : > { %p16325_p2 = pnand %p16323_p10, %p16836_p0  ;;  %p16332_p8 = por %p16331_p7, %p16330_p4 }
  0xdc   : > { %p16326_p3 = pneg %p16325_p2 }
  0xde   : > { %p16333_p11 = pnand %p16332_p8, %p16326_p3 }
  0xe0   : > { %16336 = shalt.err (!%p16333_p11)
}
  0xe1   : > { %s16639_s1 = smov 256   ;;  %s16640_s29 = smov 16  }
  0xe2   : > { %14216 = dma.hbm_to_vmem [thread:$0]  (!%p16820_p12), %s17599_s6, 6144, %s16952_s30, [#allocation3], %s16639_s1, %s16639_s1, %s16640_s29  }
  0xe3   : > { %s16641_s26 = smov [#allocation7]   ;;  %s16642_s2 = smov [#allocation10]  }
  0xe4   : > { %s572_s21 = sshll.u32 %s16641_s26, 4  ;;  %s596_s7 = sshll.u32 %s16642_s2, 4  ;;  %s573_s21 = int_to_ptr.vmem [resolvable:$true] %s572_s21  ;;  %s17001_s7 = int_to_ptr.vmem [resolvable:$true] %s596_s7 }
  0xe5   : > { %s16337_s5 = scalar_lea.hbm %s17601_s8, 65536 }
  0xe6   : > { %p16338_p13 = scmp.ne.s32.totalorder %s17601_s8, %s16337_s5  ;;  %p16344_p5 = scmp.lt.u32.totalorder %s16337_s5, %s17601_s8 }
  0xe8   : > { %p16340_p1 = pnand %p16338_p13, %p16836_p0 }
  0xea   : > { %p16341_p6 = pneg %p16340_p1 }
  0xec   : > { %p16346_p9 = pnand %p16344_p5, %p16341_p6 }
  0xee   : > { %16349 = shalt.err (!%p16346_p9)
}
  0xef   : > { %s16350_s24 = scalar_lea.vmem %s573_s21, 65536  ;;  %p16358_p4 = scmp.lt.s32.totalorder %s573_s21, %s573_s21 }
  0xf0   : > { %p16351_p10 = scmp.ne.s32.totalorder %s573_s21, %s16350_s24  ;;  %p16359_p7 = scmp.lt.s32.totalorder %s16350_s24, %s16350_s24 }
  0xf2   : > { %p16353_p2 = pnand %p16351_p10, %p16836_p0  ;;  %p16360_p8 = por %p16359_p7, %p16358_p4 }
  0xf4   : > { %p16354_p3 = pneg %p16353_p2 }
  0xf6   : > { %p16361_p11 = pnand %p16360_p8, %p16354_p3 }
  0xf8   : > { %16364 = shalt.err (!%p16361_p11)
}
  0xf9   : > { %14222 = dma.hbm_to_vmem [thread:$0]  (!%p16820_p12), %s17601_s8, 65536, %s573_s21, [#allocation6], %s16639_s1, %s16639_s1, %s16640_s29  }
  0xfa   : > { %s16365_s2 = scalar_lea.hbm %s17603_s10, 65536 }
  0xfb   : > { %p16366_p13 = scmp.ne.s32.totalorder %s17603_s10, %s16365_s2  ;;  %p16372_p5 = scmp.lt.u32.totalorder %s16365_s2, %s17603_s10 }
  0xfd   : > { %p16368_p1 = pnand %p16366_p13, %p16836_p0 }
  0xff   : > { %p16369_p6 = pneg %p16368_p1 }
 0x101   : > { %p16374_p9 = pnand %p16372_p5, %p16369_p6 }
 0x103   : > { %16377 = shalt.err (!%p16374_p9)
}
 0x104   : > { %s16378_s21 = scalar_lea.vmem %s17001_s7, 65536  ;;  %p16386_p4 = scmp.lt.s32.totalorder %s17001_s7, %s17001_s7 }
 0x105   : > { %p16379_p10 = scmp.ne.s32.totalorder %s17001_s7, %s16378_s21  ;;  %p16387_p7 = scmp.lt.s32.totalorder %s16378_s21, %s16378_s21 }
 0x107   : > { %p16381_p2 = pnand %p16379_p10, %p16836_p0  ;;  %p16388_p8 = por %p16387_p7, %p16386_p4 }
 0x109   : > { %p16382_p3 = pneg %p16381_p2 }
 0x10b   : > { %p16389_p11 = pnand %p16388_p8, %p16382_p3 }
 0x10d   : > { %16392 = shalt.err (!%p16389_p11)
}
 0x10e   : > { %14228 = dma.hbm_to_vmem [thread:$0]  (!%p16820_p12), %s17603_s10, 65536, %s17001_s7, [#allocation9], %s16639_s1, %s16639_s1, %s16640_s29  }
 0x10f   : > { %s16643_s5 = smov [#allocation13]   ;;  %s16644_s26 = smov [#allocation16]  }
 0x110   : > { %s620_s27 = sshll.u32 %s16643_s5, 4  ;;  %s645_s2 = sshll.u32 %s16644_s26, 4  ;;  %s621_s27 = int_to_ptr.vmem [resolvable:$true] %s620_s27  ;;  %s17050_s2 = int_to_ptr.vmem [resolvable:$true] %s645_s2 }
 0x111   : > { %s16393_s0 = scalar_lea.hbm %s17605_s12, 16384 }
 0x112   : > { %p16394_p13 = scmp.ne.s32.totalorder %s17605_s12, %s16393_s0  ;;  %p16400_p5 = scmp.lt.u32.totalorder %s16393_s0, %s17605_s12 }
 0x114   : > { %p16396_p1 = pnand %p16394_p13, %p16836_p0 }
 0x116   : > { %p16397_p6 = pneg %p16396_p1 }
 0x118   : > { %p16402_p9 = pnand %p16400_p5, %p16397_p6 }
 0x11a   : > { %16405 = shalt.err (!%p16402_p9)
}
 0x11b   : > { %s16406_s29 = scalar_lea.vmem %s621_s27, 16384  ;;  %p16414_p4 = scmp.lt.s32.totalorder %s621_s27, %s621_s27 }
 0x11c   : > { %p16407_p10 = scmp.ne.s32.totalorder %s621_s27, %s16406_s29  ;;  %p16415_p7 = scmp.lt.s32.totalorder %s16406_s29, %s16406_s29 }
 0x11e   : > { %p16409_p2 = pnand %p16407_p10, %p16836_p0  ;;  %p16416_p8 = por %p16415_p7, %p16414_p4 }
 0x120   : > { %p16410_p3 = pneg %p16409_p2 }
 0x122   : > { %p16417_p11 = pnand %p16416_p8, %p16410_p3 }
 0x124   : > { %16420 = shalt.err (!%p16417_p11)
}
 0x125   : > { %s17661_s7 = smov 4   ;;  %s17662_s9 = smov 64  }
 0x126   : > { %14234 = dma.hbm_to_vmem [thread:$0]  (!%p16820_p12), %s17605_s12, 16384, %s621_s27, [#allocation12], %s17662_s9, %s17662_s9, %s17661_s7  }
 0x127   : > { %s16421_s0 = scalar_lea.hbm %s17607_s14, 32 }
 0x128   : > { %p16422_p13 = scmp.ne.s32.totalorder %s17607_s14, %s16421_s0  ;;  %p16428_p5 = scmp.lt.u32.totalorder %s16421_s0, %s17607_s14 }
 0x12a   : > { %p16424_p1 = pnand %p16422_p13, %p16836_p0 }
 0x12c   : > { %p16425_p6 = pneg %p16424_p1 }
 0x12e   : > { %p16430_p9 = pnand %p16428_p5, %p16425_p6 }
 0x130   : > { %16433 = shalt.err (!%p16430_p9)
}
 0x131   : > { %s16434_s27 = scalar_lea.vmem %s17050_s2, 32  ;;  %p16442_p4 = scmp.lt.s32.totalorder %s17050_s2, %s17050_s2 }
 0x132   : > { %p16435_p10 = scmp.ne.s32.totalorder %s17050_s2, %s16434_s27  ;;  %p16443_p7 = scmp.lt.s32.totalorder %s16434_s27, %s16434_s27 }
 0x134   : > { %p16437_p2 = pnand %p16435_p10, %p16836_p0  ;;  %p16444_p8 = por %p16443_p7, %p16442_p4 }
 0x136   : > { %p16438_p3 = pneg %p16437_p2 }
 0x138   : > { %p16445_p11 = pnand %p16444_p8, %p16438_p3 }
 0x13a   : > { %16448 = shalt.err (!%p16445_p11)
}
 0x13b   : > { %14240 = dma.hbm_to_vmem [thread:$0]  (!%p16820_p12), %s17607_s14, 32, %s17050_s2, [#allocation15]  }
 0x13c   : > { %s16645_s26 = smov [#allocation19]   ;;  %s16646_s22 = smov [#allocation22]  }
 0x13d   : > { %s666_s25 = sshll.u32 %s16645_s26, 4  ;;  %s690_s0 = sshll.u32 %s16646_s22, 4  ;;  %s667_s25 = int_to_ptr.vmem [resolvable:$true] %s666_s25  ;;  %s17096_s0 = int_to_ptr.vmem [resolvable:$true] %s690_s0 }
 0x13e   : > { %s16449_s24 = scalar_lea.hbm %s17609_s16, 512 }
 0x13f   : > { %p16450_p13 = scmp.ne.s32.totalorder %s17609_s16, %s16449_s24  ;;  %p16456_p5 = scmp.lt.u32.totalorder %s16449_s24, %s17609_s16 }
 0x141   : > { %p16452_p1 = pnand %p16450_p13, %p16836_p0 }
 0x143   : > { %p16453_p6 = pneg %p16452_p1 }
 0x145   : > { %p16458_p9 = pnand %p16456_p5, %p16453_p6 }
 0x147   : > { %16461 = shalt.err (!%p16458_p9)
}
 0x148   : > { %s16462_s5 = scalar_lea.vmem %s667_s25, 512  ;;  %p16470_p4 = scmp.lt.s32.totalorder %s667_s25, %s667_s25 }
 0x149   : > { %p16463_p10 = scmp.ne.s32.totalorder %s667_s25, %s16462_s5  ;;  %p16471_p7 = scmp.lt.s32.totalorder %s16462_s5, %s16462_s5 }
 0x14b   : > { %p16465_p2 = pnand %p16463_p10, %p16836_p0  ;;  %p16472_p8 = por %p16471_p7, %p16470_p4 }
 0x14d   : > { %p16466_p3 = pneg %p16465_p2 }
 0x14f   : > { %p16473_p11 = pnand %p16472_p8, %p16466_p3 }
 0x151   : > { %16476 = shalt.err (!%p16473_p11)
}
 0x152   : > { %14246 = dma.hbm_to_vmem [thread:$0]  (!%p16820_p12), %s17609_s16, 512, %s667_s25, [#allocation18], %s17662_s9, %s17662_s9, %s17661_s7  }
 0x153   : > { %s16477_s24 = scalar_lea.hbm %s17611_s18, 1024 }
 0x154   : > { %p16478_p13 = scmp.ne.s32.totalorder %s17611_s18, %s16477_s24  ;;  %p16484_p5 = scmp.lt.u32.totalorder %s16477_s24, %s17611_s18 }
 0x156   : > { %p16480_p1 = pnand %p16478_p13, %p16836_p0 }
 0x158   : > { %p16481_p6 = pneg %p16480_p1 }
 0x15a   : > { %p16486_p9 = pnand %p16484_p5, %p16481_p6 }
 0x15c   : > { %16489 = shalt.err (!%p16486_p9)
}
 0x15d   : > { %s16490_s25 = scalar_lea.vmem %s17096_s0, 1024  ;;  %p16498_p4 = scmp.lt.s32.totalorder %s17096_s0, %s17096_s0 }
 0x15e   : > { %p16491_p10 = scmp.ne.s32.totalorder %s17096_s0, %s16490_s25  ;;  %p16499_p7 = scmp.lt.s32.totalorder %s16490_s25, %s16490_s25 }
 0x160   : > { %p16493_p2 = pnand %p16491_p10, %p16836_p0  ;;  %p16500_p8 = por %p16499_p7, %p16498_p4 }
 0x162   : > { %p16494_p3 = pneg %p16493_p2 }
 0x164   : > { %p16501_p11 = pnand %p16500_p8, %p16494_p3 }
 0x166   : > { %16504 = shalt.err (!%p16501_p11)
}
 0x167   : > { %14252 = dma.hbm_to_vmem [thread:$0]  (!%p16820_p12), %s17611_s18, 1024, %s17096_s0, [#allocation21], %s17662_s9, %s17662_s9, %s17661_s7  }
 0x168   : > { %s16647_s22 = smov [#allocation25]   ;;  %s16505_s1 = scalar_lea.hbm %s17613_s20, 16 }
 0x169   : > { %s717_s30 = sshll.u32 %s16647_s22, 4  ;;  %p16506_p13 = scmp.ne.s32.totalorder %s17613_s20, %s16505_s1  ;;  %s718_s30 = int_to_ptr.vmem [resolvable:$true] %s717_s30 }
 0x16a   : > { %p16512_p5 = scmp.lt.u32.totalorder %s16505_s1, %s17613_s20 }
 0x16b   : > { %p16508_p1 = pnand %p16506_p13, %p16836_p0 }
 0x16d   : > { %p16509_p6 = pneg %p16508_p1 }
 0x16f   : > { %p16514_p9 = pnand %p16512_p5, %p16509_p6 }
 0x171   : > { %16517 = shalt.err (!%p16514_p9)
}
 0x172   : > { %s16518_s7 = scalar_lea.vmem %s718_s30, 16  ;;  %s16525_s9 = scalar_lea.vmem %s718_s30, 32 }
 0x173   : > { %p16519_p10 = scmp.ne.s32.totalorder %s718_s30, %s16518_s7  ;;  %p16526_p4 = scmp.lt.s32.totalorder %s718_s30, %s718_s30 }
 0x174   : > { %p16527_p7 = scmp.lt.s32.totalorder %s16525_s9, %s16518_s7 }
 0x175   : > { %p16521_p2 = pnand %p16519_p10, %p16836_p0 }
 0x176   : > { %p16528_p8 = por %p16527_p7, %p16526_p4 }
 0x177   : > { %p16522_p3 = pneg %p16521_p2 }
 0x179   : > { %p16529_p11 = pnand %p16528_p8, %p16522_p3 }
 0x17b   : > { %16532 = shalt.err (!%p16529_p11)
}
 0x17c   : > { %14258 = dma.hbm_to_vmem [thread:$0]  (!%p16820_p12), %s17613_s20, 16, %s718_s30, [#allocation24]  }
 0x17d   : > { %p17663_p13 = scmp.ne.s32.totalorder %s17656_s23, 0 }
 0x17e   : > { %p17664_p1 = scmp.eq.s32.totalorder (!%p17663_p13), %s16784_s3, 0 }
 0x17f   : > { %744 = sbr.rel (%p17663_p13) target bundleno = 5823 (0x16bf), region = 104 }
 0x186   : > { %16578 = dma.done.wait (%p17664_p1), [#allocation3], 6144   ;;  %p17665_p0 = pmov %p17664_p1 }
 0x188   : > { %16580 = vsyncadd (%p17665_p0), [#allocation3], 4294961152  ;;  %p17666_p6 = pmov %p17665_p0 }
 0x189   : > { %p17667_p5 = pmov %p17665_p0 }
 0x18a   : > { %16582 = dma.done.wait (%p17666_p6), [#allocation6], 65600  }
 0x18b   : > { %16584 = vsyncadd (%p17667_p5), [#allocation6], 4294901696  ;;  %p17668_p9 = pmov %p17665_p0 }
 0x18c   : > { %p17669_p12 = pmov %p17665_p0 }
 0x18d   : > { %16586 = dma.done.wait (%p17668_p9), [#allocation9], 65600  }
 0x18e   : > { %16588 = vsyncadd (%p17669_p12), [#allocation9], 4294901696  ;;  %p17670_p10 = pmov %p17665_p0 }
 0x18f   : > { %p17671_p2 = pmov %p17665_p0 }
 0x190   : > { %16590 = dma.done.wait (%p17670_p10), [#allocation12], 16448  }
 0x191   : > { %16592 = vsyncadd (%p17671_p2), [#allocation12], 4294950848  ;;  %p17672_p3 = pmov %p17665_p0 }
 0x192   : > { %p17673_p4 = pmov %p17665_p0 }
 0x193   : > { %16594 = dma.done.wait (%p17672_p3), [#allocation15], 48  }
 0x194   : > { %16596 = vsyncadd (%p17673_p4), [#allocation15], 4294967248  ;;  %p17674_p7 = pmov %p17665_p0 }
 0x195   : > { %p17675_p8 = pmov %p17665_p0 }
 0x196   : > { %16598 = dma.done.wait (%p17674_p7), [#allocation18], 528  }
 0x197   : > { %16600 = vsyncadd (%p17675_p8), [#allocation18], 4294966768  ;;  %p17676_p11 = pmov %p17665_p0 }
 0x198   : > { %p17677_p13 = pmov %p17665_p0 }
 0x199   : > { %16602 = dma.done.wait (%p17676_p11), [#allocation21], 1040  }
 0x19a   : > { %16604 = vsyncadd (%p17677_p13), [#allocation21], 4294966256  ;;  %p17678_p1 = pmov %p17665_p0 }
 0x19c   : > { %16606 = dma.done.wait (%p17678_p1), [#allocation24], 1040  }
 0x19d   : > { %16608 = vsyncadd (%p17665_p0), [#allocation24], 4294966256  ;;  %p862_p6 = scmp.lt.s32.totalorder %s16784_s3, 1  ;;  %v16648_v0 = vmov 0.0   ;;  %vm16649_vm0 = vmmov 0   ;;  %s17679_s22 = sld [smem:[#allocation44_spill]] }
 0x19e   : > { %13921 = vmatprep.subr.bf16.mxu0 %v16648_v0  ;;  %13923 = vmatprep.mubr.msk.bf16.mxu0 %vm16649_vm0, %v16648_v0  ;;  %s17680_s1 = sld [smem:[#allocation46_spill]]  ;;  %vm881_vm1 = vcmask 130048   ;;  %v14350_v3 = vld [vmem:[#allocation2 + $0x4] ss:$16 sps:$4 sm:$0xff]   ;;  %v14352_v4 = vld [vmem:[#allocation2 + $0x8] ss:$16 sps:$4 sm:$0xff]  }
 0x19f   : > { %s17202_s23 = scalar_select %p862_p6, %s16784_s3, 1  ;;  %v14354_v5 = vld [vmem:[#allocation2 + $0xc] ss:$16 sps:$4 sm:$0xff]   ;;  %v14355_v6 = vld [vmem:[#allocation2] ss:$16 sps:$4 sm:$0xff]   ;;  %1002 = vmatprep.subr.bf16.mxu1 %v14350_v3  ;;  %v16650_v15 = vmov 0  }
 0x1a0   : > { %v14356_v7 = vld [vmem:[#allocation2 + $0x24] ss:$16 sps:$4 sm:$0xff]   ;;  %v14358_v8 = vld [vmem:[#allocation2 + $0x28] ss:$16 sps:$4 sm:$0xff]   ;;  %1003 = vmatpush1.bf16.msra.mxu1 %v14355_v6  ;;  %v14360_v9 = vld [vmem:[#allocation2 + $0x2c] ss:$16 sps:$4 sm:$0xff]   ;;  %1034 = vmatprep.mubr.bf16.mxu1 %v16650_v15 }
 0x1a1   : > { %s13711_s4 = sshll.u32 %s17202_s23, 3  ;;  %v14361_v10 = vld [vmem:[#allocation2 + $0x20] ss:$16 sps:$4 sm:$0xff]   ;;  %1004 = vmatprep.subr.bf16.mxu1 %v14356_v7  ;;  %v14362_v11 = vld [vmem:[#allocation2 + $0x44] ss:$16 sps:$4 sm:$0xff]   ;;  %vm998_vm2 = vcmask 392192  }
 0x1a2   : > { %v14364_v12 = vld [vmem:[#allocation2 + $0x48] ss:$16 sps:$4 sm:$0xff]   ;;  %v14366_v13 = vld [vmem:[#allocation2 + $0x4c] ss:$16 sps:$4 sm:$0xff]   ;;  %v14367_v14 = vld [vmem:[#allocation2 + $0x40] ss:$16 sps:$4 sm:$0xff]  }
 0x1a3   : > { %s17208_s30 = scalar_lea.vmem %s17679_s22, %s13711_s4  ;;  %v14370_v16 = vld [vmem:[#allocation2 + $0x64] ss:$16 sps:$4 sm:$0xff]   ;;  %v14368_v17 = vld [vmem:[#allocation2 + $0x60] ss:$16 sps:$4 sm:$0xff]   ;;  %v14373_v18 = vld [vmem:[#allocation2 + $0x6c] ss:$16 sps:$4 sm:$0xff]  }
 0x1a4   : > { %v14349_v1 = vld [vmem:[%s17208_s30] sm:$0xff]   ;;  %1005 = vmatpush1.bf16.msra.mxu1 %v14361_v10  ;;  %v14371_v29 = vld [vmem:[#allocation2 + $0x68] ss:$16 sps:$4 sm:$0xff]   ;;  %v14379_v30 = vld [vmem:[#allocation2 + $0x8c] ss:$16 sps:$4 sm:$0xff]   ;;  %vm1744_vm3 = vcmask 1043456  }
 0x1a5   : > { %v874_v2 = vld [vmem:[%s17680_s1] sm:$0xf]  ;;  %13922 = vmatpush3.bf16.msra.mxu0 %v14349_v1  ;;  %1006 = vmatprep.subr.bf16.mxu1 %v14362_v11  ;;  %v14376_v20 = vld [vmem:[#allocation2 + $0x84] ss:$16 sps:$4 sm:$0xff]   ;;  %v14377_v32 = vld [vmem:[#allocation2 + $0x88] ss:$16 sps:$4 sm:$0xff]  }
 0x1a6   : > { %1043 = vmatprep.subr.bf16.mxu0 %v14354_v5  ;;  %v14374_v25 = vld [vmem:[#allocation2 + $0x80] ss:$16 sps:$4 sm:$0xff]   ;;  %v14382_v27 = vld [vmem:[#allocation2 + $0xa4] ss:$16 sps:$4 sm:$0xff]   ;;  %v14385_v33 = vld [vmem:[#allocation2 + $0xac] ss:$16 sps:$4 sm:$0xff]  }
 0x1a7   : > { %v16111_v26 = vld [vmem:[%s17208_s30] sm:$0xff]   ;;  %v14383_v34 = vld [vmem:[#allocation2 + $0xa8] ss:$16 sps:$4 sm:$0xff]   ;;  %v14391_v37 = vld [vmem:[#allocation2 + $0xcc] ss:$16 sps:$4 sm:$0xff]   ;;  %s17681_s4 = sld [smem:[#allocation47_spill]] }
 0x1a8   : > { %13924 = vmatmul.mubr.msk.bf16.vlgmr.msra.gmra.mrb[0].mxu0 %vm881_vm1, %v874_v2  ;;  %1007 = vmatpush1.bf16.msra.mxu1 %v14367_v14  ;;  %v1109_v28 = vld [vmem:[%s17680_s1 + $0x4] sm:$0xf]  ;;  %v14380_v31 = vld [vmem:[#allocation2 + $0xa0] ss:$16 sps:$4 sm:$0xff]   ;;  %v1316_v47 = vld [vmem:[%s17680_s1 + $0x8] sm:$0xf]  ;;  %v1085_v14 = vlaneseq }
 0x1a9   : > { %1044 = vmatpush1.bf16.msra.mxu0 %v14352_v4  ;;  %1075 = vmatprep.mubr.bf16.mxu0 %v16650_v15  ;;  %v14388_v35 = vld [vmem:[#allocation2 + $0xc4] ss:$16 sps:$4 sm:$0xff]   ;;  %v14386_v36 = vld [vmem:[#allocation2 + $0xc0] ss:$16 sps:$4 sm:$0xff]   ;;  %v14389_v48 = vld [vmem:[#allocation2 + $0xc8] ss:$16 sps:$4 sm:$0xff]  }
 0x1aa   : > { %1045 = vmatprep.subr.bf16.mxu0 %v14360_v9  ;;  %1230 = vmatprep.subr.bf16.mxu1 %v14370_v16  ;;  %v14394_v39 = vld [vmem:[#allocation2 + $0xe4] ss:$16 sps:$4 sm:$0xff]   ;;  %v14392_v44 = vld [vmem:[#allocation2 + $0xe0] ss:$16 sps:$4 sm:$0xff]   ;;  %v14397_v49 = vld [vmem:[#allocation2 + $0xec] ss:$16 sps:$4 sm:$0xff]  }
 0x1ab   : > { %v16112_v45 = vld [vmem:[%s17208_s30] sm:$0xff]   ;;  %v14395_v51 = vld [vmem:[#allocation2 + $0xe8] ss:$16 sps:$4 sm:$0xff]   ;;  %v14403_v52 = vld [vmem:[#allocation2 + $0x10c] ss:$16 sps:$4 sm:$0xff]   ;;  %v17256_v16 = vshrl.u32 %v1085_v14, 7 }
 0x1ac   : > { %v14400_v46 = vld [vmem:[#allocation2 + $0x104] ss:$16 sps:$4 sm:$0xff]   ;;  %v14398_v50 = vld [vmem:[#allocation2 + $0x100] ss:$16 sps:$4 sm:$0xff]   ;;  %v14401_v53 = vld [vmem:[#allocation2 + $0x108] ss:$16 sps:$4 sm:$0xff]  }
 0x1ad   : > { %1046 = vmatpush1.bf16.msra.mxu0 %v14358_v8  ;;  %v14409_v54 = vld [vmem:[#allocation2 + $0x12c] ss:$16 sps:$4 sm:$0xff]   ;;  %v14406_v58 = vld [vmem:[#allocation2 + $0x124] ss:$16 sps:$4 sm:$0xff]   ;;  %v14407_v59 = vld [vmem:[#allocation2 + $0x128] ss:$16 sps:$4 sm:$0xff]  }
 0x1ae   : > { %1047 = vmatprep.subr.bf16.mxu0 %v14366_v13  ;;  %v14415_v61 = vld [vmem:[#allocation2 + $0x14c] ss:$16 sps:$4 sm:$0xff]   ;;  %v14413_v63 = vld [vmem:[#allocation2 + $0x148] ss:$16 sps:$4 sm:$0xff]   ;;  %v14404_v3 = vld [vmem:[#allocation2 + $0x120] ss:$16 sps:$4 sm:$0xff]  }
 0x1af   : > { %v14421_v1 = vld [vmem:[#allocation2 + $0x16c] ss:$16 sps:$4 sm:$0xff]   ;;  %v14412_v4 = vld [vmem:[#allocation2 + $0x144] ss:$16 sps:$4 sm:$0xff]   ;;  %v14419_v5 = vld [vmem:[#allocation2 + $0x168] ss:$16 sps:$4 sm:$0xff]  }
 0x1b0   : > { %v1523_v2 = vld [vmem:[%s17680_s1 + $0xc] sm:$0xf]  ;;  %v14410_v6 = vld [vmem:[#allocation2 + $0x140] ss:$16 sps:$4 sm:$0xff]   ;;  %v14418_v7 = vld [vmem:[#allocation2 + $0x164] ss:$16 sps:$4 sm:$0xff]  }
 0x1b1   : > { %1048 = vmatpush1.bf16.msra.mxu0 %v14364_v12  ;;  %v14416_v8 = vld [vmem:[#allocation2 + $0x160] ss:$16 sps:$4 sm:$0xff]   ;;  %vm1740_vm4 = vcmask 64512   ;;  %v14466_v14 = vld [vmem:[#allocation7 + $0xe4] ss:$16 sps:$4 sm:$0xff]   ;;  %vm5903_vm5 = vcmask 1041408  }
 0x1b2   : > { %13927 = vmatprep.subr.bf16.mxu0 %v16648_v0  ;;  %s17682_s2 = sld [smem:[#allocation48_spill]]  ;;  %vm5899_vm6 = vcmask 31744   ;;  %vm10066_vm7 = vcmask 1040384   ;;  %s17684_s21 = sld [smem:[#allocation49_spill]]  ;;  %vm10062_vm8 = vcmask 15360   ;;  %vm11903_vm9 = vcmask 523264  }
 0x1b3   : > { %s17685_s25 = sld [smem:[#allocation45_spill]]  ;;  %s17687_s5 = sld [smem:[#allocation42_spill]] }
 0x1b4   : > { %s13708_s28 = sshll.u32 %s16784_s3, 4  ;;  %s17688_s27 = sld [smem:[#allocation52_spill]] }
 0x1b8   : > { %s17683_s7 = smov %s17682_s2 }
 0x1b9   : > { %s869_s9 = scalar_lea.vmem %s17685_s25, %s17202_s23  ;;  %s17686_s23 = sld [smem:[#allocation37_spill]] }
 0x1ba   : > { %s17689_s29 = smov %s17688_s27  ;;  %p17690_p9 = scmp.ne.s32.totalorder %s17687_s5, 0 }
 0x1bf   : > { %s860_s0 = sand.u32 1, %s17686_s23  }
 0x1c0   : > { %s861_s26 = scalar_lea.vmem [#allocation26], %s860_s0  ;;  %s12161_s25 = scalar_lea.sflag [#allocation4], %s860_s0 }
 0x1c1   : > { %s12173_s22 = sshll.u32 %s861_s26, 4  ;;  %s17553_s22 = int_to_ptr.vmem [resolvable:$true] %s12173_s22 }
 0x1c2   : > { %s16533_s3 = scalar_lea.vmem %s17553_s22, 16 }
 0x1c3   : > { %p16534_p5 = scmp.ne.s32.totalorder %s17553_s22, %s16533_s3 }
 0x1c5   : > { %p16535_p12 = pnand %p16534_p5, %p17690_p9 }
 0x1c7   : > { %p16536_p10 = pneg %p16535_p12 }
 0x27b   : > { %v919_v19 = vpop.f32.mrb[0].mxu0 }
 0x27c   : > { %v925_v21 = vpack.c.bf16 %v919_v19, %v919_v19  ;;  %v13925_v22 = vpop.f32.mrb[1].mxu0  ;;  %v873_v19 = vld [vmem:[#allocation5] sm:$0xf] }
 0x27d   : > { %v922_v23 = vpop.f32.mrb[2].mxu0 }
 0x27e   : > { %v13926_v24 = vpop.f32.mrb[3].mxu0  ;;  %12432 = vmatmul.mubr.msk.bf16.vlgmr.msra.gmra.mrb[0].mxu1 %vm998_vm2, %v925_v21  ;;  %12433 = vmatmul.mubr.msk.bf16.vlgmr.msra.gmra.mrb[4].mxu0 %vm998_vm2, %v925_v21  ;;  %v17268_v21 = vsub.s32 3, %v17256_v16 }
 0x27f   : > { %13928 = vmatpush3.bf16.msra.mxu0 %v16111_v26  ;;  %13929 = vmatprep.mubr.msk.bf16.mxu0 %vm16649_vm0, %v16648_v0 }
 0x280   : > { %1271 = vmatprep.subr.bf16.mxu0 %v14373_v18  ;;  %1231 = vmatpush1.bf16.msra.mxu1 %v14368_v17  ;;  %v17259_v17 = vsub.s32 0, %v17256_v16  ;;  %v17262_v18 = vsub.s32 2, %v17256_v16 }
 0x281   : > { %1232 = vmatprep.subr.bf16.mxu1 %v14376_v20  ;;  %1262 = vmatprep.mubr.bf16.mxu1 %v16650_v15  ;;  %v17265_v20 = vsub.s32 1, %v17256_v16 }
 0x282   : > { %v1088_v22 = vrot.slane %v873_v19, %v17259_v17  ;;  %v1096_v23 = vrot.slane %v873_v19, %v17262_v18 }
 0x283   : > { %v1092_v24 = vrot.slane %v873_v19, %v17265_v20 }
 0x284   : > { %1233 = vmatpush1.bf16.msra.mxu1 %v14374_v25  ;;  %v1100_v25 = vrot.slane %v873_v19, %v17268_v21  ;;  %v14469_v19 = vld [vmem:[#allocation7 + $0xec] ss:$16 sps:$4 sm:$0xff]  }
 0x285   : > { %1234 = vmatprep.subr.bf16.mxu1 %v14382_v27 }
 0x286   : > { %13930 = vmatmul.mubr.msk.bf16.vlgmr.msra.gmra.mrb[8].mxu0 %vm881_vm1, %v1109_v28 }
 0x287   : > { %1272 = vmatpush1.bf16.msra.mxu0 %v14371_v29  ;;  %1303 = vmatprep.mubr.bf16.mxu0 %v16650_v15 }
 0x288   : > { %1273 = vmatprep.subr.bf16.mxu0 %v14379_v30  ;;  %1235 = vmatpush1.bf16.msra.mxu1 %v14380_v31 }
 0x289   : > { %1437 = vmatprep.subr.bf16.mxu1 %v14388_v35 }
 0x28b   : > { %1274 = vmatpush1.bf16.msra.mxu0 %v14377_v32 }
 0x28c   : > { %1275 = vmatprep.subr.bf16.mxu0 %v14385_v33 }
 0x28f   : > { %1276 = vmatpush1.bf16.msra.mxu0 %v14383_v34 }
 0x290   : > { %13933 = vmatprep.subr.bf16.mxu0 %v16648_v0 }
 0x359   : > { %v1147_v38 = vpop.f32.mrb[8].mxu0 }
 0x35a   : > { %v1153_v40 = vpack.c.bf16 %v1147_v38, %v1147_v38  ;;  %v13931_v41 = vpop.f32.mrb[9].mxu0 }
 0x35b   : > { %v1150_v42 = vpop.f32.mrb[10].mxu0 }
 0x35c   : > { %v13932_v43 = vpop.f32.mrb[11].mxu0  ;;  %12447 = vmatmul.mubr.msk.bf16.vlgmr.msra.gmra.mrb[0].mxu1 %vm998_vm2, %v1153_v40  ;;  %12448 = vmatmul.mubr.msk.bf16.vlgmr.msra.gmra.mrb[4].mxu0 %vm998_vm2, %v1153_v40 }
 0x35d   : > { %13934 = vmatpush3.bf16.msra.mxu0 %v16112_v45  ;;  %13935 = vmatprep.mubr.msk.bf16.mxu0 %vm16649_vm0, %v16648_v0 }
 0x35e   : > { %1478 = vmatprep.subr.bf16.mxu0 %v14391_v37  ;;  %1438 = vmatpush1.bf16.msra.mxu1 %v14386_v36 }
 0x35f   : > { %1439 = vmatprep.subr.bf16.mxu1 %v14394_v39  ;;  %1469 = vmatprep.mubr.bf16.mxu1 %v16650_v15 }
 0x362   : > { %1440 = vmatpush1.bf16.msra.mxu1 %v14392_v44 }
 0x363   : > { %1441 = vmatprep.subr.bf16.mxu1 %v14400_v46  ;;  %v14424_v46 = vld [vmem:[#allocation7 + $0x4] ss:$16 sps:$4 sm:$0xff]  }
 0x364   : > { %13936 = vmatmul.mubr.msk.bf16.vlgmr.msra.gmra.mrb[12].mxu0 %vm881_vm1, %v1316_v47  ;;  %v14427_v47 = vld [vmem:[#allocation7 + $0xc] ss:$16 sps:$4 sm:$0xff]  }
 0x365   : > { %1479 = vmatpush1.bf16.msra.mxu0 %v14389_v48  ;;  %1510 = vmatprep.mubr.bf16.mxu0 %v16650_v15 }
 0x366   : > { %1480 = vmatprep.subr.bf16.mxu0 %v14397_v49  ;;  %1442 = vmatpush1.bf16.msra.mxu1 %v14398_v50  ;;  %v1739_v50 = vld [vmem:[%s17681_s4] sm:$0x3] }
 0x367   : > { %13939 = vmatprep.subr.bf16.mxu1 %v16648_v0 }
 0x369   : > { %1481 = vmatpush1.bf16.msra.mxu0 %v14395_v51  ;;  %v14422_v51 = vld [vmem:[#allocation7] ss:$16 sps:$4 sm:$0xff]  }
 0x36a   : > { %1482 = vmatprep.subr.bf16.mxu0 %v14403_v52  ;;  %v14425_v52 = vld [vmem:[#allocation7 + $0x8] ss:$16 sps:$4 sm:$0xff]  }
 0x36d   : > { %1483 = vmatpush1.bf16.msra.mxu0 %v14401_v53  ;;  %v14430_v53 = vld [vmem:[#allocation7 + $0x24] ss:$16 sps:$4 sm:$0xff]  }
 0x36e   : > { %1685 = vmatprep.subr.bf16.mxu0 %v14409_v54  ;;  %v14433_v54 = vld [vmem:[#allocation7 + $0x2c] ss:$16 sps:$4 sm:$0xff]  }
 0x437   : > { %v1354_v55 = vpop.f32.mrb[12].mxu0 }
 0x438   : > { %v1360_v56 = vpack.c.bf16 %v1354_v55, %v1354_v55  ;;  %v13937_v57 = vpop.f32.mrb[13].mxu0  ;;  %v14428_v55 = vld [vmem:[#allocation7 + $0x20] ss:$16 sps:$4 sm:$0xff]  }
 0x439   : > { %v1357_v60 = vpop.f32.mrb[14].mxu0  ;;  %v14436_v57 = vld [vmem:[#allocation7 + $0x44] ss:$16 sps:$4 sm:$0xff]  }
 0x43a   : > { %v13938_v62 = vpop.f32.mrb[15].mxu0  ;;  %12462 = vmatmul.mubr.msk.bf16.vlgmr.msra.gmra.mrb[0].mxu1 %vm998_vm2, %v1360_v56  ;;  %12463 = vmatmul.mubr.msk.bf16.vlgmr.msra.gmra.mrb[4].mxu0 %vm998_vm2, %v1360_v56  ;;  %v14431_v56 = vld [vmem:[#allocation7 + $0x28] ss:$16 sps:$4 sm:$0xff]  }
 0x43b   : > { %13940 = vmatpush3.bf16.msra.mxu1 %v16112_v45  ;;  %13941 = vmatprep.mubr.msk.bf16.mxu1 %vm16649_vm0, %v16648_v0  ;;  %v14437_v60 = vld [vmem:[#allocation7 + $0x48] ss:$16 sps:$4 sm:$0xff]   ;;  %v14445_v62 = vld [vmem:[#allocation7 + $0x6c] ss:$16 sps:$4 sm:$0xff]  }
 0x43c   : > { %1644 = vmatprep.subr.bf16.mxu1 %v14406_v58  ;;  %1686 = vmatpush1.bf16.msra.mxu0 %v14407_v59  ;;  %v14439_v58 = vld [vmem:[#allocation7 + $0x4c] ss:$16 sps:$4 sm:$0xff]   ;;  %v14434_v59 = vld [vmem:[#allocation7 + $0x40] ss:$16 sps:$4 sm:$0xff]  }
 0x43d   : > { %1687 = vmatprep.subr.bf16.mxu0 %v14415_v61  ;;  %1717 = vmatprep.mubr.bf16.mxu0 %v16650_v15  ;;  %v14442_v61 = vld [vmem:[#allocation7 + $0x64] ss:$16 sps:$4 sm:$0xff]  }
 0x440   : > { %1688 = vmatpush1.bf16.msra.mxu0 %v14413_v63  ;;  %v14440_v63 = vld [vmem:[#allocation7 + $0x60] ss:$16 sps:$4 sm:$0xff]  }
 0x441   : > { %1689 = vmatprep.subr.bf16.mxu0 %v14421_v1  ;;  %v14443_v1 = vld [vmem:[#allocation7 + $0x68] ss:$16 sps:$4 sm:$0xff]  }
 0x442   : > { %13942 = vmatmul.mubr.msk.bf16.vlgmr.msra.gmra.mrb[4].mxu1 %vm881_vm1, %v1523_v2  ;;  %v14448_v2 = vld [vmem:[#allocation7 + $0x84] ss:$16 sps:$4 sm:$0xff]  }
 0x443   : > { %1645 = vmatpush1.bf16.msra.mxu1 %v14404_v3  ;;  %1676 = vmatprep.mubr.bf16.mxu1 %v16650_v15  ;;  %v14451_v3 = vld [vmem:[#allocation7 + $0x8c] ss:$16 sps:$4 sm:$0xff]  }
 0x444   : > { %1646 = vmatprep.subr.bf16.mxu1 %v14412_v4  ;;  %1690 = vmatpush1.bf16.msra.mxu0 %v14419_v5  ;;  %v14446_v4 = vld [vmem:[#allocation7 + $0x80] ss:$16 sps:$4 sm:$0xff]   ;;  %v14449_v5 = vld [vmem:[#allocation7 + $0x88] ss:$16 sps:$4 sm:$0xff]  }
 0x447   : > { %1647 = vmatpush1.bf16.msra.mxu1 %v14410_v6  ;;  %v14454_v6 = vld [vmem:[#allocation7 + $0xa4] ss:$16 sps:$4 sm:$0xff]  }
 0x448   : > { %1648 = vmatprep.subr.bf16.mxu1 %v14418_v7  ;;  %v14457_v7 = vld [vmem:[#allocation7 + $0xac] ss:$16 sps:$4 sm:$0xff]  }
 0x44b   : > { %1649 = vmatpush1.bf16.msra.mxu1 %v14416_v8  ;;  %v14452_v8 = vld [vmem:[#allocation7 + $0xa0] ss:$16 sps:$4 sm:$0xff]  }
 0x515   : > { %v1561_v9 = vpop.f32.mrb[4].mxu1 }
 0x516   : > { %v1567_v10 = vpack.c.bf16 %v1561_v9, %v1561_v9  ;;  %v13943_v11 = vpop.f32.mrb[5].mxu1  ;;  %v14455_v9 = vld [vmem:[#allocation7 + $0xa8] ss:$16 sps:$4 sm:$0xff]  }
 0x517   : > { %v1564_v12 = vpop.f32.mrb[6].mxu1  ;;  %v14463_v11 = vld [vmem:[#allocation7 + $0xcc] ss:$16 sps:$4 sm:$0xff]  }
 0x518   : > { %v13944_v13 = vpop.f32.mrb[7].mxu1  ;;  %12477 = vmatmul.mubr.msk.bf16.vlgmr.msra.gmra.mrb[0].mxu1 %vm998_vm2, %v1567_v10  ;;  %12478 = vmatmul.mubr.msk.bf16.vlgmr.msra.gmra.mrb[4].mxu0 %vm998_vm2, %v1567_v10  ;;  %v14460_v10 = vld [vmem:[#allocation7 + $0xc4] ss:$16 sps:$4 sm:$0xff]   ;;  %v14458_v12 = vld [vmem:[#allocation7 + $0xc0] ss:$16 sps:$4 sm:$0xff]  }
 0x519   : > { %1789 = vmatprep.mubr.bf16.mxu0 %v16650_v15  ;;  %1830 = vmatprep.mubr.bf16.mxu1 %v16650_v15  ;;  %v14461_v13 = vld [vmem:[#allocation7 + $0xc8] ss:$16 sps:$4 sm:$0xff]  }
 0x5eb   : > { %v1678_v26 = vpop.f32.mrb[0].mxu1  ;;  %v1719_v27 = vpop.f32.mrb[4].mxu0 }
 0x5ec   : > { %v14003_v28 = vadd.f32 %v1678_v26, %v1088_v22  ;;  %v14005_v29 = vadd.f32 %v1719_v27, %v1096_v23  ;;  %v1680_v30 = vpop.f32.mrb[1].mxu1  ;;  %v1721_v31 = vpop.f32.mrb[5].mxu0  ;;  %v14464_v22 = vld [vmem:[#allocation7 + $0xe0] ss:$16 sps:$4 sm:$0xff]   ;;  %v14467_v23 = vld [vmem:[#allocation7 + $0xe8] ss:$16 sps:$4 sm:$0xff]  }
 0x5ed   : > { %v14004_v32 = vadd.f32 %v1680_v30, %v1092_v24  ;;  %v14006_v33 = vadd.f32 %v1721_v31, %v1100_v25  ;;  %v1682_v34 = vpop.f32.mrb[2].mxu1  ;;  %v1723_v35 = vpop.f32.mrb[6].mxu0  ;;  %v14472_v24 = vld [vmem:[#allocation7 + $0x104] ss:$16 sps:$4 sm:$0xff]   ;;  %v14475_v25 = vld [vmem:[#allocation7 + $0x10c] ss:$16 sps:$4 sm:$0xff]  }
 0x5ee   : > { %v1730_v36 = vmax.f32 %v14003_v28, 0.0  ;;  %v1732_v37 = vmax.f32 %v14005_v29, 0.0  ;;  %v1683_v38 = vpop.f32.mrb[3].mxu1  ;;  %v1724_v39 = vpop.f32.mrb[7].mxu0  ;;  %v14470_v26 = vld [vmem:[#allocation7 + $0x100] ss:$16 sps:$4 sm:$0xff]  }
 0x5ef   : > { %v1731_v40 = vmax.f32 %v14004_v32, 0.0  ;;  %v1733_v41 = vmax.f32 %v14006_v33, 0.0  ;;  %v14473_v27 = vld [vmem:[#allocation7 + $0x108] ss:$16 sps:$4 sm:$0xff]   ;;  %v14478_v28 = vld [vmem:[#allocation7 + $0x124] ss:$16 sps:$4 sm:$0xff]  }
 0x5f0   : > { %v1734_v42 = vpack.c.bf16 %v1730_v36, %v1730_v36  ;;  %v1736_v43 = vpack.c.bf16 %v1732_v37, %v1732_v37  ;;  %v14481_v29 = vld [vmem:[#allocation7 + $0x12c] ss:$16 sps:$4 sm:$0xff]   ;;  %v14476_v30 = vld [vmem:[#allocation7 + $0x120] ss:$16 sps:$4 sm:$0xff]   ;;  %v14479_v31 = vld [vmem:[#allocation7 + $0x128] ss:$16 sps:$4 sm:$0xff]  }
 0x5f1   : > { %v17274_v44 = vpack.c.bf16 %v1731_v40, %v1731_v40  ;;  %v17276_v45 = vpack.c.bf16 %v1733_v41, %v1733_v41  ;;  %v14484_v32 = vld [vmem:[#allocation7 + $0x144] ss:$16 sps:$4 sm:$0xff]   ;;  %v14487_v33 = vld [vmem:[#allocation7 + $0x14c] ss:$16 sps:$4 sm:$0xff]   ;;  %v14482_v34 = vld [vmem:[#allocation7 + $0x140] ss:$16 sps:$4 sm:$0xff]  }
 0x5f2   : > { %v17279_v48 = vsel %vm1744_vm3, %v1734_v42, 0  ;;  %v17282_v49 = vsel %vm1744_vm3, %v1736_v43, 0  ;;  %v14485_v35 = vld [vmem:[#allocation7 + $0x148] ss:$16 sps:$4 sm:$0xff]   ;;  %v14490_v36 = vld [vmem:[#allocation7 + $0x164] ss:$16 sps:$4 sm:$0xff]  }
 0x5f3   : > { %12479 = vmatprep.subr.msk.bf16.mxu0 %vm1744_vm3, %v17274_v44  ;;  %12481 = vmatprep.subr.msk.bf16.mxu1 %vm1744_vm3, %v17276_v45  ;;  %v14493_v37 = vld [vmem:[#allocation7 + $0x16c] ss:$16 sps:$4 sm:$0xff]   ;;  %v14488_v38 = vld [vmem:[#allocation7 + $0x160] ss:$16 sps:$4 sm:$0xff]   ;;  %v14491_v39 = vld [vmem:[#allocation7 + $0x168] ss:$16 sps:$4 sm:$0xff]  }
 0x5f4   : > { %1758 = vmatpush1.bf16.msra.mxu0 %v17279_v48  ;;  %1799 = vmatpush1.bf16.msra.mxu1 %v17282_v49  ;;  %v14496_v40 = vld [vmem:[#allocation7 + $0x184] ss:$16 sps:$4 sm:$0xff]   ;;  %v14499_v41 = vld [vmem:[#allocation7 + $0x18c] ss:$16 sps:$4 sm:$0xff]   ;;  %v14494_v42 = vld [vmem:[#allocation7 + $0x180] ss:$16 sps:$4 sm:$0xff]  }
 0x5f5   : > { %2611 = vmatprep.subr.bf16.mxu0 %v14424_v46  ;;  %2693 = vmatprep.subr.bf16.mxu1 %v14427_v47  ;;  %v14497_v43 = vld [vmem:[#allocation7 + $0x188] ss:$16 sps:$4 sm:$0xff]   ;;  %v14502_v46 = vld [vmem:[#allocation7 + $0x1a4] ss:$16 sps:$4 sm:$0xff]   ;;  %v14505_v47 = vld [vmem:[#allocation7 + $0x1ac] ss:$16 sps:$4 sm:$0xff]  }
 0x5f7   : > { %12480 = vmatmul.mubr.msk.bf16.vlgmr.msra.gmra.mrb[16].mxu0 %vm1740_vm4, %v1739_v50  ;;  %12482 = vmatmul.mubr.msk.bf16.vlgmr.msra.gmra.mrb[8].mxu1 %vm1740_vm4, %v1739_v50  ;;  %v14500_v50 = vld [vmem:[#allocation7 + $0x1a0] ss:$16 sps:$4 sm:$0xff]  }
 0x5f8   : > { %2612 = vmatpush1.bf16.msra.mxu0 %v14422_v51  ;;  %2694 = vmatpush1.bf16.msra.mxu1 %v14425_v52  ;;  %v14503_v51 = vld [vmem:[#allocation7 + $0x1a8] ss:$16 sps:$4 sm:$0xff]   ;;  %v14508_v52 = vld [vmem:[#allocation7 + $0x1c4] ss:$16 sps:$4 sm:$0xff]  }
 0x5f9   : > { %2613 = vmatprep.subr.bf16.mxu0 %v14430_v53  ;;  %2695 = vmatprep.subr.bf16.mxu1 %v14433_v54  ;;  %v14511_v53 = vld [vmem:[#allocation7 + $0x1cc] ss:$16 sps:$4 sm:$0xff]   ;;  %v14506_v54 = vld [vmem:[#allocation7 + $0x1c0] ss:$16 sps:$4 sm:$0xff]  }
 0x5fc   : > { %2614 = vmatpush1.bf16.msra.mxu0 %v14428_v55  ;;  %2696 = vmatpush1.bf16.msra.mxu1 %v14431_v56  ;;  %v14509_v55 = vld [vmem:[#allocation7 + $0x1c8] ss:$16 sps:$4 sm:$0xff]   ;;  %v14514_v56 = vld [vmem:[#allocation7 + $0x1e4] ss:$16 sps:$4 sm:$0xff]  }
 0x5fd   : > { %2615 = vmatprep.subr.bf16.mxu0 %v14436_v57  ;;  %2697 = vmatprep.subr.bf16.mxu1 %v14439_v58  ;;  %v14517_v57 = vld [vmem:[#allocation7 + $0x1ec] ss:$16 sps:$4 sm:$0xff]   ;;  %v14512_v58 = vld [vmem:[#allocation7 + $0x1e0] ss:$16 sps:$4 sm:$0xff]  }
 0x600   : > { %2616 = vmatpush1.bf16.msra.mxu0 %v14434_v59  ;;  %2698 = vmatpush1.bf16.msra.mxu1 %v14437_v60  ;;  %v14515_v59 = vld [vmem:[#allocation7 + $0x1e8] ss:$16 sps:$4 sm:$0xff]   ;;  %v14520_v60 = vld [vmem:[#allocation7 + $0x204] ss:$16 sps:$4 sm:$0xff]  }
 0x601   : > { %2617 = vmatprep.subr.bf16.mxu0 %v14442_v61  ;;  %2699 = vmatprep.subr.bf16.mxu1 %v14445_v62  ;;  %v14523_v61 = vld [vmem:[#allocation7 + $0x20c] ss:$16 sps:$4 sm:$0xff]  }
 0x604   : > { %2618 = vmatpush1.bf16.msra.mxu0 %v14440_v63  ;;  %2700 = vmatpush1.bf16.msra.mxu1 %v14443_v1 }
 0x605   : > { %2619 = vmatprep.subr.bf16.mxu0 %v14448_v2  ;;  %2701 = vmatprep.subr.bf16.mxu1 %v14451_v3 }
 0x608   : > { %2620 = vmatpush1.bf16.msra.mxu0 %v14446_v4  ;;  %2702 = vmatpush1.bf16.msra.mxu1 %v14449_v5  ;;  %v14518_v5 = vld [vmem:[#allocation7 + $0x200] ss:$16 sps:$4 sm:$0xff]  }
 0x609   : > { %2621 = vmatprep.subr.bf16.mxu0 %v14454_v6  ;;  %2703 = vmatprep.subr.bf16.mxu1 %v14457_v7  ;;  %v14521_v6 = vld [vmem:[#allocation7 + $0x208] ss:$16 sps:$4 sm:$0xff]  }
 0x60c   : > { %2622 = vmatpush1.bf16.msra.mxu0 %v14452_v8  ;;  %2704 = vmatpush1.bf16.msra.mxu1 %v14455_v9 }
 0x60d   : > { %2623 = vmatprep.subr.bf16.mxu0 %v14460_v10  ;;  %2705 = vmatprep.subr.bf16.mxu1 %v14463_v11  ;;  %v14526_v10 = vld [vmem:[#allocation7 + $0x224] ss:$16 sps:$4 sm:$0xff]   ;;  %v14529_v11 = vld [vmem:[#allocation7 + $0x22c] ss:$16 sps:$4 sm:$0xff]  }
 0x610   : > { %2624 = vmatpush1.bf16.msra.mxu0 %v14458_v12  ;;  %2706 = vmatpush1.bf16.msra.mxu1 %v14461_v13 }
 0x611   : > { %2625 = vmatprep.subr.bf16.mxu0 %v14466_v14  ;;  %2707 = vmatprep.subr.bf16.mxu1 %v14469_v19  ;;  %v14524_v14 = vld [vmem:[#allocation7 + $0x220] ss:$16 sps:$4 sm:$0xff]   ;;  %v14527_v19 = vld [vmem:[#allocation7 + $0x228] ss:$16 sps:$4 sm:$0xff]  }
 0x614   : > { %2626 = vmatpush1.bf16.msra.mxu0 %v14464_v22  ;;  %2708 = vmatpush1.bf16.msra.mxu1 %v14467_v23  ;;  %v14532_v22 = vld [vmem:[#allocation7 + $0x244] ss:$16 sps:$4 sm:$0xff]   ;;  %v14535_v23 = vld [vmem:[#allocation7 + $0x24c] ss:$16 sps:$4 sm:$0xff]  }
 0x615   : > { %2627 = vmatprep.subr.bf16.mxu0 %v14472_v24  ;;  %2709 = vmatprep.subr.bf16.mxu1 %v14475_v25  ;;  %v14530_v24 = vld [vmem:[#allocation7 + $0x240] ss:$16 sps:$4 sm:$0xff]   ;;  %v14533_v25 = vld [vmem:[#allocation7 + $0x248] ss:$16 sps:$4 sm:$0xff]  }
 0x618   : > { %2628 = vmatpush1.bf16.msra.mxu0 %v14470_v26  ;;  %2710 = vmatpush1.bf16.msra.mxu1 %v14473_v27  ;;  %v14538_v26 = vld [vmem:[#allocation7 + $0x264] ss:$16 sps:$4 sm:$0xff]   ;;  %v14541_v27 = vld [vmem:[#allocation7 + $0x26c] ss:$16 sps:$4 sm:$0xff]  }
 0x619   : > { %2629 = vmatprep.subr.bf16.mxu0 %v14478_v28  ;;  %2711 = vmatprep.subr.bf16.mxu1 %v14481_v29  ;;  %v14536_v28 = vld [vmem:[#allocation7 + $0x260] ss:$16 sps:$4 sm:$0xff]   ;;  %v14539_v29 = vld [vmem:[#allocation7 + $0x268] ss:$16 sps:$4 sm:$0xff]  }
 0x61c   : > { %2630 = vmatpush1.bf16.msra.mxu0 %v14476_v30  ;;  %2712 = vmatpush1.bf16.msra.mxu1 %v14479_v31  ;;  %v14544_v30 = vld [vmem:[#allocation7 + $0x284] ss:$16 sps:$4 sm:$0xff]   ;;  %v14547_v31 = vld [vmem:[#allocation7 + $0x28c] ss:$16 sps:$4 sm:$0xff]  }
 0x61d   : > { %2631 = vmatprep.subr.bf16.mxu0 %v14484_v32  ;;  %2713 = vmatprep.subr.bf16.mxu1 %v14487_v33  ;;  %v14542_v32 = vld [vmem:[#allocation7 + $0x280] ss:$16 sps:$4 sm:$0xff]   ;;  %v14545_v33 = vld [vmem:[#allocation7 + $0x288] ss:$16 sps:$4 sm:$0xff]  }
 0x620   : > { %2632 = vmatpush1.bf16.msra.mxu0 %v14482_v34  ;;  %2714 = vmatpush1.bf16.msra.mxu1 %v14485_v35  ;;  %v14550_v34 = vld [vmem:[#allocation7 + $0x2a4] ss:$16 sps:$4 sm:$0xff]   ;;  %v14553_v35 = vld [vmem:[#allocation7 + $0x2ac] ss:$16 sps:$4 sm:$0xff]  }
 0x621   : > { %2633 = vmatprep.subr.bf16.mxu0 %v14490_v36  ;;  %2715 = vmatprep.subr.bf16.mxu1 %v14493_v37  ;;  %v14548_v36 = vld [vmem:[#allocation7 + $0x2a0] ss:$16 sps:$4 sm:$0xff]   ;;  %v14551_v37 = vld [vmem:[#allocation7 + $0x2a8] ss:$16 sps:$4 sm:$0xff]  }
 0x624   : > { %2634 = vmatpush1.bf16.msra.mxu0 %v14488_v38  ;;  %2716 = vmatpush1.bf16.msra.mxu1 %v14491_v39  ;;  %v14556_v38 = vld [vmem:[#allocation7 + $0x2c4] ss:$16 sps:$4 sm:$0xff]   ;;  %v14559_v39 = vld [vmem:[#allocation7 + $0x2cc] ss:$16 sps:$4 sm:$0xff]  }
 0x625   : > { %2635 = vmatprep.subr.bf16.mxu0 %v14496_v40  ;;  %2717 = vmatprep.subr.bf16.mxu1 %v14499_v41  ;;  %v14554_v40 = vld [vmem:[#allocation7 + $0x2c0] ss:$16 sps:$4 sm:$0xff]   ;;  %v14557_v41 = vld [vmem:[#allocation7 + $0x2c8] ss:$16 sps:$4 sm:$0xff]  }
 0x628   : > { %2636 = vmatpush1.bf16.msra.mxu0 %v14494_v42  ;;  %2718 = vmatpush1.bf16.msra.mxu1 %v14497_v43  ;;  %v14562_v42 = vld [vmem:[#allocation7 + $0x2e4] ss:$16 sps:$4 sm:$0xff]   ;;  %v14565_v43 = vld [vmem:[#allocation7 + $0x2ec] ss:$16 sps:$4 sm:$0xff]  }
 0x629   : > { %2637 = vmatprep.subr.bf16.mxu0 %v14502_v46  ;;  %2719 = vmatprep.subr.bf16.mxu1 %v14505_v47  ;;  %v14560_v46 = vld [vmem:[#allocation7 + $0x2e0] ss:$16 sps:$4 sm:$0xff]   ;;  %v14563_v47 = vld [vmem:[#allocation7 + $0x2e8] ss:$16 sps:$4 sm:$0xff]  }
 0x62c   : > { %2638 = vmatpush1.bf16.msra.mxu0 %v14500_v50  ;;  %2720 = vmatpush1.bf16.msra.mxu1 %v14503_v51  ;;  %v14568_v50 = vld [vmem:[#allocation7 + $0x304] ss:$16 sps:$4 sm:$0xff]   ;;  %v14571_v51 = vld [vmem:[#allocation7 + $0x30c] ss:$16 sps:$4 sm:$0xff]  }
 0x62d   : > { %2639 = vmatprep.subr.bf16.mxu0 %v14508_v52  ;;  %2721 = vmatprep.subr.bf16.mxu1 %v14511_v53  ;;  %v14566_v52 = vld [vmem:[#allocation7 + $0x300] ss:$16 sps:$4 sm:$0xff]   ;;  %v14569_v53 = vld [vmem:[#allocation7 + $0x308] ss:$16 sps:$4 sm:$0xff]  }
 0x630   : > { %2640 = vmatpush1.bf16.msra.mxu0 %v14506_v54  ;;  %2722 = vmatpush1.bf16.msra.mxu1 %v14509_v55  ;;  %v14574_v54 = vld [vmem:[#allocation7 + $0x324] ss:$16 sps:$4 sm:$0xff]   ;;  %v14577_v55 = vld [vmem:[#allocation7 + $0x32c] ss:$16 sps:$4 sm:$0xff]  }
 0x631   : > { %2641 = vmatprep.subr.bf16.mxu0 %v14514_v56  ;;  %2723 = vmatprep.subr.bf16.mxu1 %v14517_v57  ;;  %v14572_v56 = vld [vmem:[#allocation7 + $0x320] ss:$16 sps:$4 sm:$0xff]   ;;  %v14575_v57 = vld [vmem:[#allocation7 + $0x328] ss:$16 sps:$4 sm:$0xff]  }
 0x634   : > { %2642 = vmatpush1.bf16.msra.mxu0 %v14512_v58  ;;  %2724 = vmatpush1.bf16.msra.mxu1 %v14515_v59  ;;  %v14580_v58 = vld [vmem:[#allocation7 + $0x344] ss:$16 sps:$4 sm:$0xff]   ;;  %v14583_v59 = vld [vmem:[#allocation7 + $0x34c] ss:$16 sps:$4 sm:$0xff]  }
 0x635   : > { %2652 = vmatprep.subr.bf16.mxu0 %v14520_v60  ;;  %2734 = vmatprep.subr.bf16.mxu1 %v14523_v61  ;;  %v14578_v60 = vld [vmem:[#allocation7 + $0x340] ss:$16 sps:$4 sm:$0xff]   ;;  %v14581_v61 = vld [vmem:[#allocation7 + $0x348] ss:$16 sps:$4 sm:$0xff]  }
 0x6ca   : > { %v1791_v62 = vpop.f32.mrb[16].mxu0  ;;  %v17295_v63 = vpop.f32.mrb[8].mxu1 }
 0x6cb   : > { %v1793_v1 = vpop.f32.mrb[17].mxu0  ;;  %v1834_v2 = vpop.f32.mrb[9].mxu1  ;;  %v1839_v8 = vpack.c.bf16 %v1791_v62, %v1791_v62  ;;  %v14586_v62 = vld [vmem:[#allocation7 + $0x364] ss:$16 sps:$4 sm:$0xff]  }
 0x6cc   : > { %v1840_v3 = vpack.c.bf16 %v1793_v1, %v1793_v1  ;;  %v1795_v4 = vpop.f32.mrb[18].mxu0  ;;  %v1836_v7 = vpop.f32.mrb[10].mxu1  ;;  %v1842_v13 = vpack.c.bf16 %v1834_v2, %v1834_v2  ;;  %v14589_v1 = vld [vmem:[#allocation7 + $0x36c] ss:$16 sps:$4 sm:$0xff]   ;;  %v14584_v2 = vld [vmem:[#allocation7 + $0x360] ss:$16 sps:$4 sm:$0xff]  }
 0x6cd   : > { %v1796_v9 = vpop.f32.mrb[19].mxu0  ;;  %v1837_v12 = vpop.f32.mrb[11].mxu1  ;;  %v14592_v4 = vld [vmem:[#allocation7 + $0x384] ss:$16 sps:$4 sm:$0xff]   ;;  %v14593_v7 = vld [vmem:[#allocation7 + $0x388] ss:$16 sps:$4 sm:$0xff]  }
 0x6ce   : > { %2643 = vmatprep.mubr.bf16.mxu0 %v1840_v3  ;;  %2725 = vmatprep.mubr.bf16.mxu1 %v1840_v3  ;;  %v14587_v3 = vld [vmem:[#allocation7 + $0x368] ss:$16 sps:$4 sm:$0xff]   ;;  %v14601_v9 = vld [vmem:[#allocation7 + $0x3ac] ss:$16 sps:$4 sm:$0xff]   ;;  %v14604_v12 = vld [vmem:[#allocation7 + $0x3c4] ss:$16 sps:$4 sm:$0xff]  }
 0x6cf   : > { %2644 = vmatmul.mubr.bf16.vlgmr.msra.gmra.mrb[20].mxu0 %v1839_v8  ;;  %2726 = vmatmul.mubr.bf16.vlgmr.msra.gmra.mrb[12].mxu1 %v1839_v8  ;;  %v14598_v8 = vld [vmem:[#allocation7 + $0x3a4] ss:$16 sps:$4 sm:$0xff]  }
 0x6d0   : > { %2653 = vmatpush1.bf16.msra.mxu0 %v14518_v5  ;;  %2735 = vmatpush1.bf16.msra.mxu1 %v14521_v6  ;;  %v14595_v5 = vld [vmem:[#allocation7 + $0x38c] ss:$16 sps:$4 sm:$0xff]   ;;  %v14590_v6 = vld [vmem:[#allocation7 + $0x380] ss:$16 sps:$4 sm:$0xff]  }
 0x6d1   : > { %2654 = vmatprep.subr.bf16.mxu0 %v14526_v10  ;;  %2736 = vmatprep.subr.bf16.mxu1 %v14529_v11  ;;  %v14596_v10 = vld [vmem:[#allocation7 + $0x3a0] ss:$16 sps:$4 sm:$0xff]   ;;  %v14599_v11 = vld [vmem:[#allocation7 + $0x3a8] ss:$16 sps:$4 sm:$0xff]  }
 0x6d2   : > { %2684 = vmatprep.mubr.bf16.mxu0 %v1842_v13  ;;  %2766 = vmatprep.mubr.bf16.mxu1 %v1842_v13  ;;  %v14607_v13 = vld [vmem:[#allocation7 + $0x3cc] ss:$16 sps:$4 sm:$0xff]  }
 0x6d4   : > { %2655 = vmatpush1.bf16.msra.mxu0 %v14524_v14  ;;  %2737 = vmatpush1.bf16.msra.mxu1 %v14527_v19  ;;  %v14602_v14 = vld [vmem:[#allocation7 + $0x3c0] ss:$16 sps:$4 sm:$0xff]   ;;  %v14605_v19 = vld [vmem:[#allocation7 + $0x3c8] ss:$16 sps:$4 sm:$0xff]  }
 0x6d5   : > { %2656 = vmatprep.subr.bf16.mxu0 %v14532_v22  ;;  %2738 = vmatprep.subr.bf16.mxu1 %v14535_v23  ;;  %v14610_v22 = vld [vmem:[#allocation7 + $0x3e4] ss:$16 sps:$4 sm:$0xff]   ;;  %v14613_v23 = vld [vmem:[#allocation7 + $0x3ec] ss:$16 sps:$4 sm:$0xff]  }
 0x6d8   : > { %2657 = vmatpush1.bf16.msra.mxu0 %v14530_v24  ;;  %2739 = vmatpush1.bf16.msra.mxu1 %v14533_v25  ;;  %v14608_v24 = vld [vmem:[#allocation7 + $0x3e0] ss:$16 sps:$4 sm:$0xff]   ;;  %v14611_v25 = vld [vmem:[#allocation7 + $0x3e8] ss:$16 sps:$4 sm:$0xff]  }
 0x6d9   : > { %2658 = vmatprep.subr.bf16.mxu0 %v14538_v26  ;;  %2740 = vmatprep.subr.bf16.mxu1 %v14541_v27  ;;  %v1841_v26 = vpack.c.bf16 %v17295_v63, %v17295_v63  ;;  %v14617_v27 = vld [vmem:[#allocation7 + $0x404] ss:$16 sps:$4 sm:$0xff]  }
 0x6dc   : > { %2659 = vmatpush1.bf16.msra.mxu0 %v14536_v28  ;;  %2741 = vmatpush1.bf16.msra.mxu1 %v14539_v29  ;;  %v14620_v28 = vld [vmem:[#allocation7 + $0x40c] ss:$16 sps:$4 sm:$0xff]  }
 0x6dd   : > { %2660 = vmatprep.subr.bf16.mxu0 %v14544_v30  ;;  %2742 = vmatprep.subr.bf16.mxu1 %v14547_v31  ;;  %v14614_v29 = vld [vmem:[%s17681_s4] ss:$0 sps:$4 sm:$0xcc]   ;;  %v14615_v30 = vld [vmem:[#allocation7 + $0x400] ss:$16 sps:$4 sm:$0xff]  }
 0x6de   : > { %v2804_v63 = vrot.slane %v14614_v29, 2  ;;  %v14618_v31 = vld [vmem:[#allocation7 + $0x408] ss:$16 sps:$4 sm:$0xff]   ;;  %v14698_v29 = vld [vmem:[#allocation7 + $0x5ac] ss:$16 sps:$4 sm:$0xff]  }
 0x6e0   : > { %2661 = vmatpush1.bf16.msra.mxu0 %v14542_v32  ;;  %2743 = vmatpush1.bf16.msra.mxu1 %v14545_v33  ;;  %v14623_v32 = vld [vmem:[#allocation7 + $0x424] ss:$16 sps:$4 sm:$0xff]   ;;  %v14626_v33 = vld [vmem:[#allocation7 + $0x42c] ss:$16 sps:$4 sm:$0xff]  }
 0x6e1   : > { %2662 = vmatprep.subr.bf16.mxu0 %v14550_v34  ;;  %2744 = vmatprep.subr.bf16.mxu1 %v14553_v35  ;;  %v14621_v34 = vld [vmem:[#allocation7 + $0x420] ss:$16 sps:$4 sm:$0xff]   ;;  %v14624_v35 = vld [vmem:[#allocation7 + $0x428] ss:$16 sps:$4 sm:$0xff]  }
 0x6e4   : > { %2663 = vmatpush1.bf16.msra.mxu0 %v14548_v36  ;;  %2745 = vmatpush1.bf16.msra.mxu1 %v14551_v37  ;;  %v14629_v36 = vld [vmem:[#allocation7 + $0x444] ss:$16 sps:$4 sm:$0xff]   ;;  %v14632_v37 = vld [vmem:[#allocation7 + $0x44c] ss:$16 sps:$4 sm:$0xff]  }
 0x6e5   : > { %2664 = vmatprep.subr.bf16.mxu0 %v14556_v38  ;;  %2746 = vmatprep.subr.bf16.mxu1 %v14559_v39  ;;  %v14627_v38 = vld [vmem:[#allocation7 + $0x440] ss:$16 sps:$4 sm:$0xff]   ;;  %v14630_v39 = vld [vmem:[#allocation7 + $0x448] ss:$16 sps:$4 sm:$0xff]  }
 0x6e8   : > { %2665 = vmatpush1.bf16.msra.mxu0 %v14554_v40  ;;  %2747 = vmatpush1.bf16.msra.mxu1 %v14557_v41  ;;  %v14635_v40 = vld [vmem:[#allocation7 + $0x464] ss:$16 sps:$4 sm:$0xff]   ;;  %v14638_v41 = vld [vmem:[#allocation7 + $0x46c] ss:$16 sps:$4 sm:$0xff]  }
 0x6e9   : > { %2666 = vmatprep.subr.bf16.mxu0 %v14562_v42  ;;  %2748 = vmatprep.subr.bf16.mxu1 %v14565_v43  ;;  %v14633_v42 = vld [vmem:[#allocation7 + $0x460] ss:$16 sps:$4 sm:$0xff]   ;;  %v14636_v43 = vld [vmem:[#allocation7 + $0x468] ss:$16 sps:$4 sm:$0xff]  }
 0x6ec   : > { %2667 = vmatpush1.bf16.msra.mxu0 %v14560_v46  ;;  %2749 = vmatpush1.bf16.msra.mxu1 %v14563_v47  ;;  %v14641_v46 = vld [vmem:[#allocation7 + $0x484] ss:$16 sps:$4 sm:$0xff]   ;;  %v14644_v47 = vld [vmem:[#allocation7 + $0x48c] ss:$16 sps:$4 sm:$0xff]  }
 0x6ed   : > { %2668 = vmatprep.subr.bf16.mxu0 %v14568_v50  ;;  %2750 = vmatprep.subr.bf16.mxu1 %v14571_v51  ;;  %v14639_v50 = vld [vmem:[#allocation7 + $0x480] ss:$16 sps:$4 sm:$0xff]   ;;  %v14642_v51 = vld [vmem:[#allocation7 + $0x488] ss:$16 sps:$4 sm:$0xff]  }
 0x6f0   : > { %2669 = vmatpush1.bf16.msra.mxu0 %v14566_v52  ;;  %2751 = vmatpush1.bf16.msra.mxu1 %v14569_v53  ;;  %v14647_v52 = vld [vmem:[#allocation7 + $0x4a4] ss:$16 sps:$4 sm:$0xff]   ;;  %v14650_v53 = vld [vmem:[#allocation7 + $0x4ac] ss:$16 sps:$4 sm:$0xff]  }
 0x6f1   : > { %2670 = vmatprep.subr.bf16.mxu0 %v14574_v54  ;;  %2752 = vmatprep.subr.bf16.mxu1 %v14577_v55  ;;  %v14645_v54 = vld [vmem:[#allocation7 + $0x4a0] ss:$16 sps:$4 sm:$0xff]   ;;  %v14648_v55 = vld [vmem:[#allocation7 + $0x4a8] ss:$16 sps:$4 sm:$0xff]  }
 0x6f4   : > { %2671 = vmatpush1.bf16.msra.mxu0 %v14572_v56  ;;  %2753 = vmatpush1.bf16.msra.mxu1 %v14575_v57  ;;  %v14653_v56 = vld [vmem:[#allocation7 + $0x4c4] ss:$16 sps:$4 sm:$0xff]   ;;  %v14656_v57 = vld [vmem:[#allocation7 + $0x4cc] ss:$16 sps:$4 sm:$0xff]  }
 0x6f5   : > { %2672 = vmatprep.subr.bf16.mxu0 %v14580_v58  ;;  %2754 = vmatprep.subr.bf16.mxu1 %v14583_v59  ;;  %v14651_v58 = vld [vmem:[#allocation7 + $0x4c0] ss:$16 sps:$4 sm:$0xff]   ;;  %v14654_v59 = vld [vmem:[#allocation7 + $0x4c8] ss:$16 sps:$4 sm:$0xff]  }
 0x6f8   : > { %2673 = vmatpush1.bf16.msra.mxu0 %v14578_v60  ;;  %2755 = vmatpush1.bf16.msra.mxu1 %v14581_v61  ;;  %v14659_v60 = vld [vmem:[#allocation7 + $0x4e4] ss:$16 sps:$4 sm:$0xff]   ;;  %v14662_v61 = vld [vmem:[#allocation7 + $0x4ec] ss:$16 sps:$4 sm:$0xff]  }
 0x6f9   : > { %2674 = vmatprep.subr.bf16.mxu0 %v14586_v62  ;;  %2756 = vmatprep.subr.bf16.mxu1 %v14589_v1  ;;  %v14657_v62 = vld [vmem:[#allocation7 + $0x4e0] ss:$16 sps:$4 sm:$0xff]   ;;  %v14660_v1 = vld [vmem:[#allocation7 + $0x4e8] ss:$16 sps:$4 sm:$0xff]  }
 0x6fc   : > { %2675 = vmatpush1.bf16.msra.mxu0 %v14584_v2  ;;  %2757 = vmatpush1.bf16.msra.mxu1 %v14587_v3  ;;  %v14665_v2 = vld [vmem:[#allocation7 + $0x504] ss:$16 sps:$4 sm:$0xff]   ;;  %v14668_v3 = vld [vmem:[#allocation7 + $0x50c] ss:$16 sps:$4 sm:$0xff]  }
 0x6fd   : > { %2676 = vmatprep.subr.bf16.mxu0 %v14592_v4  ;;  %2758 = vmatprep.subr.bf16.mxu1 %v14595_v5  ;;  %v14663_v4 = vld [vmem:[#allocation7 + $0x500] ss:$16 sps:$4 sm:$0xff]   ;;  %v14666_v5 = vld [vmem:[#allocation7 + $0x508] ss:$16 sps:$4 sm:$0xff]  }
 0x700   : > { %2677 = vmatpush1.bf16.msra.mxu0 %v14590_v6  ;;  %2759 = vmatpush1.bf16.msra.mxu1 %v14593_v7  ;;  %v14671_v6 = vld [vmem:[#allocation7 + $0x524] ss:$16 sps:$4 sm:$0xff]   ;;  %v14674_v7 = vld [vmem:[#allocation7 + $0x52c] ss:$16 sps:$4 sm:$0xff]  }
 0x701   : > { %2678 = vmatprep.subr.bf16.mxu0 %v14598_v8  ;;  %2760 = vmatprep.subr.bf16.mxu1 %v14601_v9  ;;  %v14669_v8 = vld [vmem:[#allocation7 + $0x520] ss:$16 sps:$4 sm:$0xff]   ;;  %v14672_v9 = vld [vmem:[#allocation7 + $0x528] ss:$16 sps:$4 sm:$0xff]  }
 0x704   : > { %2679 = vmatpush1.bf16.msra.mxu0 %v14596_v10  ;;  %2761 = vmatpush1.bf16.msra.mxu1 %v14599_v11  ;;  %v14677_v10 = vld [vmem:[#allocation7 + $0x544] ss:$16 sps:$4 sm:$0xff]   ;;  %v14680_v11 = vld [vmem:[#allocation7 + $0x54c] ss:$16 sps:$4 sm:$0xff]  }
 0x705   : > { %2680 = vmatprep.subr.bf16.mxu0 %v14604_v12  ;;  %2762 = vmatprep.subr.bf16.mxu1 %v14607_v13  ;;  %v14675_v12 = vld [vmem:[#allocation7 + $0x540] ss:$16 sps:$4 sm:$0xff]   ;;  %v14678_v13 = vld [vmem:[#allocation7 + $0x548] ss:$16 sps:$4 sm:$0xff]  }
 0x708   : > { %2681 = vmatpush1.bf16.msra.mxu0 %v14602_v14  ;;  %2763 = vmatpush1.bf16.msra.mxu1 %v14605_v19  ;;  %v14683_v14 = vld [vmem:[#allocation7 + $0x564] ss:$16 sps:$4 sm:$0xff]   ;;  %v14686_v19 = vld [vmem:[#allocation7 + $0x56c] ss:$16 sps:$4 sm:$0xff]  }
 0x709   : > { %2682 = vmatprep.subr.bf16.mxu0 %v14610_v22  ;;  %2764 = vmatprep.subr.bf16.mxu1 %v14613_v23  ;;  %v14681_v22 = vld [vmem:[#allocation7 + $0x560] ss:$16 sps:$4 sm:$0xff]   ;;  %v14684_v23 = vld [vmem:[#allocation7 + $0x568] ss:$16 sps:$4 sm:$0xff]  }
 0x70c   : > { %2683 = vmatpush1.bf16.msra.mxu0 %v14608_v24  ;;  %2765 = vmatpush1.bf16.msra.mxu1 %v14611_v25  ;;  %v14689_v24 = vld [vmem:[#allocation7 + $0x584] ss:$16 sps:$4 sm:$0xff]   ;;  %v14692_v25 = vld [vmem:[#allocation7 + $0x58c] ss:$16 sps:$4 sm:$0xff]  }
 0x70d   : > { %12612 = vmatprep.subr.msk.bf16.mxu0 %vm1744_vm3, %v17274_v44  ;;  %12614 = vmatprep.subr.msk.bf16.mxu1 %vm1744_vm3, %v17276_v45 }
 0x70f   : > { %2685 = vmatmul.mubr.bf16.vlgmr.msra.gmra.mrb[20].mxu0 %v1841_v26  ;;  %2767 = vmatmul.mubr.bf16.vlgmr.msra.gmra.mrb[12].mxu1 %v1841_v26  ;;  %v14687_v26 = vld [vmem:[#allocation7 + $0x580] ss:$16 sps:$4 sm:$0xff]  }
 0x710   : > { %2809 = vmatpush1.bf16.msra.mxu0 %v17279_v48  ;;  %2850 = vmatpush1.bf16.msra.mxu1 %v17282_v49 }
 0x711   : > { %2840 = vmatprep.mubr.bf16.mxu0 %v16650_v15  ;;  %2881 = vmatprep.mubr.bf16.mxu1 %v16650_v15 }
 0x712   : > { %3663 = vmatprep.subr.bf16.mxu0 %v14617_v27  ;;  %3745 = vmatprep.subr.bf16.mxu1 %v14620_v28  ;;  %v14690_v27 = vld [vmem:[#allocation7 + $0x588] ss:$16 sps:$4 sm:$0xff]   ;;  %v14695_v28 = vld [vmem:[#allocation7 + $0x5a4] ss:$16 sps:$4 sm:$0xff]  }
 0x717   : > { %12613 = vmatmul.mubr.msk.bf16.vlgmr.msra.gmra.mrb[24].mxu0 %vm1740_vm4, %v2804_v63  ;;  %12615 = vmatmul.mubr.msk.bf16.vlgmr.msra.gmra.mrb[16].mxu1 %vm1740_vm4, %v2804_v63  ;;  %v14693_v63 = vld [vmem:[#allocation7 + $0x5a0] ss:$16 sps:$4 sm:$0xff]  }
 0x718   : > { %3664 = vmatpush1.bf16.msra.mxu0 %v14615_v30  ;;  %3746 = vmatpush1.bf16.msra.mxu1 %v14618_v31  ;;  %v14696_v30 = vld [vmem:[#allocation7 + $0x5a8] ss:$16 sps:$4 sm:$0xff]   ;;  %v14701_v31 = vld [vmem:[#allocation7 + $0x5c4] ss:$16 sps:$4 sm:$0xff]  }
 0x719   : > { %3665 = vmatprep.subr.bf16.mxu0 %v14623_v32  ;;  %3747 = vmatprep.subr.bf16.mxu1 %v14626_v33  ;;  %v14704_v32 = vld [vmem:[#allocation7 + $0x5cc] ss:$16 sps:$4 sm:$0xff]   ;;  %v14699_v33 = vld [vmem:[#allocation7 + $0x5c0] ss:$16 sps:$4 sm:$0xff]  }
 0x71c   : > { %3666 = vmatpush1.bf16.msra.mxu0 %v14621_v34  ;;  %3748 = vmatpush1.bf16.msra.mxu1 %v14624_v35  ;;  %v14702_v34 = vld [vmem:[#allocation7 + $0x5c8] ss:$16 sps:$4 sm:$0xff]   ;;  %v14707_v35 = vld [vmem:[#allocation7 + $0x5e4] ss:$16 sps:$4 sm:$0xff]  }
 0x71d   : > { %3667 = vmatprep.subr.bf16.mxu0 %v14629_v36  ;;  %3749 = vmatprep.subr.bf16.mxu1 %v14632_v37  ;;  %v14710_v36 = vld [vmem:[#allocation7 + $0x5ec] ss:$16 sps:$4 sm:$0xff]   ;;  %v14705_v37 = vld [vmem:[#allocation7 + $0x5e0] ss:$16 sps:$4 sm:$0xff]  }
 0x720   : > { %3668 = vmatpush1.bf16.msra.mxu0 %v14627_v38  ;;  %3750 = vmatpush1.bf16.msra.mxu1 %v14630_v39  ;;  %v14708_v38 = vld [vmem:[#allocation7 + $0x5e8] ss:$16 sps:$4 sm:$0xff]   ;;  %v14713_v39 = vld [vmem:[#allocation7 + $0x604] ss:$16 sps:$4 sm:$0xff]  }
 0x721   : > { %3669 = vmatprep.subr.bf16.mxu0 %v14635_v40  ;;  %3751 = vmatprep.subr.bf16.mxu1 %v14638_v41  ;;  %v14716_v40 = vld [vmem:[#allocation7 + $0x60c] ss:$16 sps:$4 sm:$0xff]  }
 0x724   : > { %3670 = vmatpush1.bf16.msra.mxu0 %v14633_v42  ;;  %3752 = vmatpush1.bf16.msra.mxu1 %v14636_v43 }
 0x725   : > { %3671 = vmatprep.subr.bf16.mxu0 %v14641_v46  ;;  %3753 = vmatprep.subr.bf16.mxu1 %v14644_v47 }
 0x728   : > { %3672 = vmatpush1.bf16.msra.mxu0 %v14639_v50  ;;  %3754 = vmatpush1.bf16.msra.mxu1 %v14642_v51  ;;  %v14711_v51 = vld [vmem:[#allocation7 + $0x600] ss:$16 sps:$4 sm:$0xff]  }
 0x729   : > { %3673 = vmatprep.subr.bf16.mxu0 %v14647_v52  ;;  %3755 = vmatprep.subr.bf16.mxu1 %v14650_v53  ;;  %v14714_v52 = vld [vmem:[#allocation7 + $0x608] ss:$16 sps:$4 sm:$0xff]  }
 0x72c   : > { %3674 = vmatpush1.bf16.msra.mxu0 %v14645_v54  ;;  %3756 = vmatpush1.bf16.msra.mxu1 %v14648_v55 }
 0x72d   : > { %3675 = vmatprep.subr.bf16.mxu0 %v14653_v56  ;;  %3757 = vmatprep.subr.bf16.mxu1 %v14656_v57  ;;  %v14719_v56 = vld [vmem:[#allocation7 + $0x624] ss:$16 sps:$4 sm:$0xff]   ;;  %v14722_v57 = vld [vmem:[#allocation7 + $0x62c] ss:$16 sps:$4 sm:$0xff]  }
 0x730   : > { %3676 = vmatpush1.bf16.msra.mxu0 %v14651_v58  ;;  %3758 = vmatpush1.bf16.msra.mxu1 %v14654_v59 }
 0x731   : > { %3677 = vmatprep.subr.bf16.mxu0 %v14659_v60  ;;  %3759 = vmatprep.subr.bf16.mxu1 %v14662_v61  ;;  %v14717_v60 = vld [vmem:[#allocation7 + $0x620] ss:$16 sps:$4 sm:$0xff]   ;;  %v14720_v61 = vld [vmem:[#allocation7 + $0x628] ss:$16 sps:$4 sm:$0xff]  }
 0x734   : > { %3678 = vmatpush1.bf16.msra.mxu0 %v14657_v62  ;;  %3760 = vmatpush1.bf16.msra.mxu1 %v14660_v1  ;;  %v14725_v62 = vld [vmem:[#allocation7 + $0x644] ss:$16 sps:$4 sm:$0xff]   ;;  %v14728_v1 = vld [vmem:[#allocation7 + $0x64c] ss:$16 sps:$4 sm:$0xff]  }
 0x735   : > { %3679 = vmatprep.subr.bf16.mxu0 %v14665_v2  ;;  %3761 = vmatprep.subr.bf16.mxu1 %v14668_v3  ;;  %v14723_v2 = vld [vmem:[#allocation7 + $0x640] ss:$16 sps:$4 sm:$0xff]   ;;  %v14726_v3 = vld [vmem:[#allocation7 + $0x648] ss:$16 sps:$4 sm:$0xff]  }
 0x738   : > { %3680 = vmatpush1.bf16.msra.mxu0 %v14663_v4  ;;  %3762 = vmatpush1.bf16.msra.mxu1 %v14666_v5  ;;  %v14731_v4 = vld [vmem:[#allocation7 + $0x664] ss:$16 sps:$4 sm:$0xff]   ;;  %v14734_v5 = vld [vmem:[#allocation7 + $0x66c] ss:$16 sps:$4 sm:$0xff]  }
 0x739   : > { %3681 = vmatprep.subr.bf16.mxu0 %v14671_v6  ;;  %3763 = vmatprep.subr.bf16.mxu1 %v14674_v7  ;;  %v14729_v6 = vld [vmem:[#allocation7 + $0x660] ss:$16 sps:$4 sm:$0xff]   ;;  %v14732_v7 = vld [vmem:[#allocation7 + $0x668] ss:$16 sps:$4 sm:$0xff]  }
 0x73c   : > { %3682 = vmatpush1.bf16.msra.mxu0 %v14669_v8  ;;  %3764 = vmatpush1.bf16.msra.mxu1 %v14672_v9  ;;  %v14737_v8 = vld [vmem:[#allocation7 + $0x684] ss:$16 sps:$4 sm:$0xff]   ;;  %v14740_v9 = vld [vmem:[#allocation7 + $0x68c] ss:$16 sps:$4 sm:$0xff]  }
 0x73d   : > { %3683 = vmatprep.subr.bf16.mxu0 %v14677_v10  ;;  %3765 = vmatprep.subr.bf16.mxu1 %v14680_v11  ;;  %v14735_v10 = vld [vmem:[#allocation7 + $0x680] ss:$16 sps:$4 sm:$0xff]   ;;  %v14738_v11 = vld [vmem:[#allocation7 + $0x688] ss:$16 sps:$4 sm:$0xff]  }
 0x740   : > { %3684 = vmatpush1.bf16.msra.mxu0 %v14675_v12  ;;  %3766 = vmatpush1.bf16.msra.mxu1 %v14678_v13  ;;  %v14743_v12 = vld [vmem:[#allocation7 + $0x6a4] ss:$16 sps:$4 sm:$0xff]   ;;  %v14746_v13 = vld [vmem:[#allocation7 + $0x6ac] ss:$16 sps:$4 sm:$0xff]  }
 0x741   : > { %3685 = vmatprep.subr.bf16.mxu0 %v14683_v14  ;;  %3767 = vmatprep.subr.bf16.mxu1 %v14686_v19  ;;  %v14741_v14 = vld [vmem:[#allocation7 + $0x6a0] ss:$16 sps:$4 sm:$0xff]   ;;  %v14744_v19 = vld [vmem:[#allocation7 + $0x6a8] ss:$16 sps:$4 sm:$0xff]  }
 0x744   : > { %3686 = vmatpush1.bf16.msra.mxu0 %v14681_v22  ;;  %3768 = vmatpush1.bf16.msra.mxu1 %v14684_v23  ;;  %v14749_v22 = vld [vmem:[#allocation7 + $0x6c4] ss:$16 sps:$4 sm:$0xff]   ;;  %v14752_v23 = vld [vmem:[#allocation7 + $0x6cc] ss:$16 sps:$4 sm:$0xff]  }
 0x745   : > { %3687 = vmatprep.subr.bf16.mxu0 %v14689_v24  ;;  %3769 = vmatprep.subr.bf16.mxu1 %v14692_v25  ;;  %v14747_v24 = vld [vmem:[#allocation7 + $0x6c0] ss:$16 sps:$4 sm:$0xff]   ;;  %v14750_v25 = vld [vmem:[#allocation7 + $0x6c8] ss:$16 sps:$4 sm:$0xff]  }
 0x748   : > { %3688 = vmatpush1.bf16.msra.mxu0 %v14687_v26  ;;  %3770 = vmatpush1.bf16.msra.mxu1 %v14690_v27  ;;  %v14755_v26 = vld [vmem:[#allocation7 + $0x6e4] ss:$16 sps:$4 sm:$0xff]   ;;  %v14758_v27 = vld [vmem:[#allocation7 + $0x6ec] ss:$16 sps:$4 sm:$0xff]  }
 0x749   : > { %3689 = vmatprep.subr.bf16.mxu0 %v14695_v28  ;;  %3771 = vmatprep.subr.bf16.mxu1 %v14698_v29  ;;  %v14753_v28 = vld [vmem:[#allocation7 + $0x6e0] ss:$16 sps:$4 sm:$0xff]   ;;  %v14756_v29 = vld [vmem:[#allocation7 + $0x6e8] ss:$16 sps:$4 sm:$0xff]  }
 0x74c   : > { %3690 = vmatpush1.bf16.msra.mxu0 %v14693_v63  ;;  %3772 = vmatpush1.bf16.msra.mxu1 %v14696_v30  ;;  %v14761_v63 = vld [vmem:[#allocation7 + $0x704] ss:$16 sps:$4 sm:$0xff]   ;;  %v14764_v30 = vld [vmem:[#allocation7 + $0x70c] ss:$16 sps:$4 sm:$0xff]  }
 0x74d   : > { %3691 = vmatprep.subr.bf16.mxu0 %v14701_v31  ;;  %3773 = vmatprep.subr.bf16.mxu1 %v14704_v32  ;;  %v14759_v31 = vld [vmem:[#allocation7 + $0x700] ss:$16 sps:$4 sm:$0xff]   ;;  %v14762_v32 = vld [vmem:[#allocation7 + $0x708] ss:$16 sps:$4 sm:$0xff]  }
 0x750   : > { %3692 = vmatpush1.bf16.msra.mxu0 %v14699_v33  ;;  %3774 = vmatpush1.bf16.msra.mxu1 %v14702_v34  ;;  %v14767_v33 = vld [vmem:[#allocation7 + $0x724] ss:$16 sps:$4 sm:$0xff]   ;;  %v14770_v34 = vld [vmem:[#allocation7 + $0x72c] ss:$16 sps:$4 sm:$0xff]  }
 0x751   : > { %3693 = vmatprep.subr.bf16.mxu0 %v14707_v35  ;;  %3775 = vmatprep.subr.bf16.mxu1 %v14710_v36  ;;  %v14765_v35 = vld [vmem:[#allocation7 + $0x720] ss:$16 sps:$4 sm:$0xff]   ;;  %v14768_v36 = vld [vmem:[#allocation7 + $0x728] ss:$16 sps:$4 sm:$0xff]  }
 0x754   : > { %3694 = vmatpush1.bf16.msra.mxu0 %v14705_v37  ;;  %3776 = vmatpush1.bf16.msra.mxu1 %v14708_v38  ;;  %v14773_v37 = vld [vmem:[#allocation7 + $0x744] ss:$16 sps:$4 sm:$0xff]   ;;  %v14776_v38 = vld [vmem:[#allocation7 + $0x74c] ss:$16 sps:$4 sm:$0xff]  }
 0x755   : > { %3704 = vmatprep.subr.bf16.mxu0 %v14713_v39  ;;  %3786 = vmatprep.subr.bf16.mxu1 %v14716_v40  ;;  %v14771_v39 = vld [vmem:[#allocation7 + $0x740] ss:$16 sps:$4 sm:$0xff]   ;;  %v14774_v40 = vld [vmem:[#allocation7 + $0x748] ss:$16 sps:$4 sm:$0xff]  }
 0x7ea   : > { %v2842_v41 = vpop.f32.mrb[24].mxu0  ;;  %v17312_v42 = vpop.f32.mrb[16].mxu1 }
 0x7eb   : > { %v2844_v43 = vpop.f32.mrb[25].mxu0  ;;  %v2885_v46 = vpop.f32.mrb[17].mxu1  ;;  %v2890_v54 = vpack.c.bf16 %v2842_v41, %v2842_v41  ;;  %v14779_v41 = vld [vmem:[#allocation7 + $0x764] ss:$16 sps:$4 sm:$0xff]  }
 0x7ec   : > { %v2891_v47 = vpack.c.bf16 %v2844_v43, %v2844_v43  ;;  %v2846_v50 = vpop.f32.mrb[26].mxu0  ;;  %v2887_v53 = vpop.f32.mrb[18].mxu1  ;;  %v2893_v59 = vpack.c.bf16 %v2885_v46, %v2885_v46  ;;  %v14782_v43 = vld [vmem:[#allocation7 + $0x76c] ss:$16 sps:$4 sm:$0xff]   ;;  %v14777_v46 = vld [vmem:[#allocation7 + $0x760] ss:$16 sps:$4 sm:$0xff]  }
 0x7ed   : > { %v2847_v55 = vpop.f32.mrb[27].mxu0  ;;  %v2888_v58 = vpop.f32.mrb[19].mxu1  ;;  %v14785_v50 = vld [vmem:[#allocation7 + $0x784] ss:$16 sps:$4 sm:$0xff]   ;;  %v14786_v53 = vld [vmem:[#allocation7 + $0x788] ss:$16 sps:$4 sm:$0xff]  }
 0x7ee   : > { %3695 = vmatprep.mubr.bf16.mxu0 %v2891_v47  ;;  %3777 = vmatprep.mubr.bf16.mxu1 %v2891_v47  ;;  %v14780_v47 = vld [vmem:[#allocation7 + $0x768] ss:$16 sps:$4 sm:$0xff]   ;;  %v14794_v55 = vld [vmem:[#allocation7 + $0x7ac] ss:$16 sps:$4 sm:$0xff]   ;;  %v14797_v58 = vld [vmem:[#allocation7 + $0x7c4] ss:$16 sps:$4 sm:$0xff]  }
 0x7ef   : > { %3696 = vmatmul.mubr.bf16.vlgmr.msra.gmra.mrb[20].mxu0 %v2890_v54  ;;  %3778 = vmatmul.mubr.bf16.vlgmr.msra.gmra.mrb[12].mxu1 %v2890_v54  ;;  %v14791_v54 = vld [vmem:[#allocation7 + $0x7a4] ss:$16 sps:$4 sm:$0xff]  }
 0x7f0   : > { %3705 = vmatpush1.bf16.msra.mxu0 %v14711_v51  ;;  %3787 = vmatpush1.bf16.msra.mxu1 %v14714_v52  ;;  %v14788_v51 = vld [vmem:[#allocation7 + $0x78c] ss:$16 sps:$4 sm:$0xff]   ;;  %v14783_v52 = vld [vmem:[#allocation7 + $0x780] ss:$16 sps:$4 sm:$0xff]  }
 0x7f1   : > { %3706 = vmatprep.subr.bf16.mxu0 %v14719_v56  ;;  %3788 = vmatprep.subr.bf16.mxu1 %v14722_v57  ;;  %v14789_v56 = vld [vmem:[#allocation7 + $0x7a0] ss:$16 sps:$4 sm:$0xff]   ;;  %v14792_v57 = vld [vmem:[#allocation7 + $0x7a8] ss:$16 sps:$4 sm:$0xff]  }
 0x7f2   : > { %3736 = vmatprep.mubr.bf16.mxu0 %v2893_v59  ;;  %3818 = vmatprep.mubr.bf16.mxu1 %v2893_v59  ;;  %v14800_v59 = vld [vmem:[#allocation7 + $0x7cc] ss:$16 sps:$4 sm:$0xff]  }
 0x7f4   : > { %3707 = vmatpush1.bf16.msra.mxu0 %v14717_v60  ;;  %3789 = vmatpush1.bf16.msra.mxu1 %v14720_v61  ;;  %v14795_v60 = vld [vmem:[#allocation7 + $0x7c0] ss:$16 sps:$4 sm:$0xff]   ;;  %v14798_v61 = vld [vmem:[#allocation7 + $0x7c8] ss:$16 sps:$4 sm:$0xff]  }
 0x7f5   : > { %3708 = vmatprep.subr.bf16.mxu0 %v14725_v62  ;;  %3790 = vmatprep.subr.bf16.mxu1 %v14728_v1  ;;  %v14803_v62 = vld [vmem:[#allocation7 + $0x7e4] ss:$16 sps:$4 sm:$0xff]   ;;  %v14806_v1 = vld [vmem:[#allocation7 + $0x7ec] ss:$16 sps:$4 sm:$0xff]  }
 0x7f8   : > { %3709 = vmatpush1.bf16.msra.mxu0 %v14723_v2  ;;  %3791 = vmatpush1.bf16.msra.mxu1 %v14726_v3  ;;  %v14801_v2 = vld [vmem:[#allocation7 + $0x7e0] ss:$16 sps:$4 sm:$0xff]   ;;  %v14804_v3 = vld [vmem:[#allocation7 + $0x7e8] ss:$16 sps:$4 sm:$0xff]  }
 0x7f9   : > { %3710 = vmatprep.subr.bf16.mxu0 %v14731_v4  ;;  %3792 = vmatprep.subr.bf16.mxu1 %v14734_v5  ;;  %v2892_v4 = vpack.c.bf16 %v17312_v42, %v17312_v42  ;;  %v14809_v5 = vld [vmem:[#allocation7 + $0x804] ss:$16 sps:$4 sm:$0xff]   ;;  %v3831_v42 = vld [vmem:[%s17681_s4 + $0x4] sm:$0x3] }
 0x7fc   : > { %3711 = vmatpush1.bf16.msra.mxu0 %v14729_v6  ;;  %3793 = vmatpush1.bf16.msra.mxu1 %v14732_v7  ;;  %v14812_v6 = vld [vmem:[#allocation7 + $0x80c] ss:$16 sps:$4 sm:$0xff]   ;;  %v14807_v7 = vld [vmem:[#allocation7 + $0x800] ss:$16 sps:$4 sm:$0xff]  }
 0x7fd   : > { %3712 = vmatprep.subr.bf16.mxu0 %v14737_v8  ;;  %3794 = vmatprep.subr.bf16.mxu1 %v14740_v9  ;;  %v14810_v8 = vld [vmem:[#allocation7 + $0x808] ss:$16 sps:$4 sm:$0xff]   ;;  %v14815_v9 = vld [vmem:[#allocation7 + $0x824] ss:$16 sps:$4 sm:$0xff]  }
 0x800   : > { %3713 = vmatpush1.bf16.msra.mxu0 %v14735_v10  ;;  %3795 = vmatpush1.bf16.msra.mxu1 %v14738_v11  ;;  %v14818_v10 = vld [vmem:[#allocation7 + $0x82c] ss:$16 sps:$4 sm:$0xff]   ;;  %v14813_v11 = vld [vmem:[#allocation7 + $0x820] ss:$16 sps:$4 sm:$0xff]  }
 0x801   : > { %3714 = vmatprep.subr.bf16.mxu0 %v14743_v12  ;;  %3796 = vmatprep.subr.bf16.mxu1 %v14746_v13  ;;  %v14816_v12 = vld [vmem:[#allocation7 + $0x828] ss:$16 sps:$4 sm:$0xff]   ;;  %v14821_v13 = vld [vmem:[#allocation7 + $0x844] ss:$16 sps:$4 sm:$0xff]  }
 0x804   : > { %3715 = vmatpush1.bf16.msra.mxu0 %v14741_v14  ;;  %3797 = vmatpush1.bf16.msra.mxu1 %v14744_v19  ;;  %v14824_v14 = vld [vmem:[#allocation7 + $0x84c] ss:$16 sps:$4 sm:$0xff]   ;;  %v14819_v19 = vld [vmem:[#allocation7 + $0x840] ss:$16 sps:$4 sm:$0xff]  }
 0x805   : > { %3716 = vmatprep.subr.bf16.mxu0 %v14749_v22  ;;  %3798 = vmatprep.subr.bf16.mxu1 %v14752_v23  ;;  %v14822_v22 = vld [vmem:[#allocation7 + $0x848] ss:$16 sps:$4 sm:$0xff]   ;;  %v14827_v23 = vld [vmem:[#allocation7 + $0x864] ss:$16 sps:$4 sm:$0xff]  }
 0x808   : > { %3717 = vmatpush1.bf16.msra.mxu0 %v14747_v24  ;;  %3799 = vmatpush1.bf16.msra.mxu1 %v14750_v25  ;;  %v14830_v24 = vld [vmem:[#allocation7 + $0x86c] ss:$16 sps:$4 sm:$0xff]   ;;  %v14825_v25 = vld [vmem:[#allocation7 + $0x860] ss:$16 sps:$4 sm:$0xff]  }
 0x809   : > { %3718 = vmatprep.subr.bf16.mxu0 %v14755_v26  ;;  %3800 = vmatprep.subr.bf16.mxu1 %v14758_v27  ;;  %v14828_v26 = vld [vmem:[#allocation7 + $0x868] ss:$16 sps:$4 sm:$0xff]   ;;  %v14833_v27 = vld [vmem:[#allocation7 + $0x884] ss:$16 sps:$4 sm:$0xff]  }
 0x80c   : > { %3719 = vmatpush1.bf16.msra.mxu0 %v14753_v28  ;;  %3801 = vmatpush1.bf16.msra.mxu1 %v14756_v29  ;;  %v14836_v28 = vld [vmem:[#allocation7 + $0x88c] ss:$16 sps:$4 sm:$0xff]   ;;  %v14831_v29 = vld [vmem:[#allocation7 + $0x880] ss:$16 sps:$4 sm:$0xff]  }
 0x80d   : > { %3720 = vmatprep.subr.bf16.mxu0 %v14761_v63  ;;  %3802 = vmatprep.subr.bf16.mxu1 %v14764_v30  ;;  %v14834_v63 = vld [vmem:[#allocation7 + $0x888] ss:$16 sps:$4 sm:$0xff]   ;;  %v14839_v30 = vld [vmem:[#allocation7 + $0x8a4] ss:$16 sps:$4 sm:$0xff]  }
 0x810   : > { %3721 = vmatpush1.bf16.msra.mxu0 %v14759_v31  ;;  %3803 = vmatpush1.bf16.msra.mxu1 %v14762_v32  ;;  %v14842_v31 = vld [vmem:[#allocation7 + $0x8ac] ss:$16 sps:$4 sm:$0xff]   ;;  %v14837_v32 = vld [vmem:[#allocation7 + $0x8a0] ss:$16 sps:$4 sm:$0xff]  }
 0x811   : > { %3722 = vmatprep.subr.bf16.mxu0 %v14767_v33  ;;  %3804 = vmatprep.subr.bf16.mxu1 %v14770_v34  ;;  %v14840_v33 = vld [vmem:[#allocation7 + $0x8a8] ss:$16 sps:$4 sm:$0xff]   ;;  %v14845_v34 = vld [vmem:[#allocation7 + $0x8c4] ss:$16 sps:$4 sm:$0xff]  }
 0x814   : > { %3723 = vmatpush1.bf16.msra.mxu0 %v14765_v35  ;;  %3805 = vmatpush1.bf16.msra.mxu1 %v14768_v36  ;;  %v14848_v35 = vld [vmem:[#allocation7 + $0x8cc] ss:$16 sps:$4 sm:$0xff]   ;;  %v14843_v36 = vld [vmem:[#allocation7 + $0x8c0] ss:$16 sps:$4 sm:$0xff]  }
 0x815   : > { %3724 = vmatprep.subr.bf16.mxu0 %v14773_v37  ;;  %3806 = vmatprep.subr.bf16.mxu1 %v14776_v38  ;;  %v14846_v37 = vld [vmem:[#allocation7 + $0x8c8] ss:$16 sps:$4 sm:$0xff]   ;;  %v14851_v38 = vld [vmem:[#allocation7 + $0x8e4] ss:$16 sps:$4 sm:$0xff]  }
 0x818   : > { %3725 = vmatpush1.bf16.msra.mxu0 %v14771_v39  ;;  %3807 = vmatpush1.bf16.msra.mxu1 %v14774_v40  ;;  %v14854_v39 = vld [vmem:[#allocation7 + $0x8ec] ss:$16 sps:$4 sm:$0xff]   ;;  %v14849_v40 = vld [vmem:[#allocation7 + $0x8e0] ss:$16 sps:$4 sm:$0xff]  }
 0x819   : > { %3726 = vmatprep.subr.bf16.mxu0 %v14779_v41  ;;  %3808 = vmatprep.subr.bf16.mxu1 %v14782_v43  ;;  %v14852_v41 = vld [vmem:[#allocation7 + $0x8e8] ss:$16 sps:$4 sm:$0xff]   ;;  %v14857_v43 = vld [vmem:[#allocation7 + $0x904] ss:$16 sps:$4 sm:$0xff]  }
 0x81c   : > { %3727 = vmatpush1.bf16.msra.mxu0 %v14777_v46  ;;  %3809 = vmatpush1.bf16.msra.mxu1 %v14780_v47  ;;  %v14860_v46 = vld [vmem:[#allocation7 + $0x90c] ss:$16 sps:$4 sm:$0xff]   ;;  %v14855_v47 = vld [vmem:[#allocation7 + $0x900] ss:$16 sps:$4 sm:$0xff]  }
 0x81d   : > { %3728 = vmatprep.subr.bf16.mxu0 %v14785_v50  ;;  %3810 = vmatprep.subr.bf16.mxu1 %v14788_v51  ;;  %v14858_v50 = vld [vmem:[#allocation7 + $0x908] ss:$16 sps:$4 sm:$0xff]   ;;  %v14863_v51 = vld [vmem:[#allocation7 + $0x924] ss:$16 sps:$4 sm:$0xff]  }
 0x820   : > { %3729 = vmatpush1.bf16.msra.mxu0 %v14783_v52  ;;  %3811 = vmatpush1.bf16.msra.mxu1 %v14786_v53  ;;  %v14866_v52 = vld [vmem:[#allocation7 + $0x92c] ss:$16 sps:$4 sm:$0xff]   ;;  %v14861_v53 = vld [vmem:[#allocation7 + $0x920] ss:$16 sps:$4 sm:$0xff]  }
 0x821   : > { %3730 = vmatprep.subr.bf16.mxu0 %v14791_v54  ;;  %3812 = vmatprep.subr.bf16.mxu1 %v14794_v55  ;;  %v14864_v54 = vld [vmem:[#allocation7 + $0x928] ss:$16 sps:$4 sm:$0xff]   ;;  %v14869_v55 = vld [vmem:[#allocation7 + $0x944] ss:$16 sps:$4 sm:$0xff]  }
 0x824   : > { %3731 = vmatpush1.bf16.msra.mxu0 %v14789_v56  ;;  %3813 = vmatpush1.bf16.msra.mxu1 %v14792_v57  ;;  %v14872_v56 = vld [vmem:[#allocation7 + $0x94c] ss:$16 sps:$4 sm:$0xff]   ;;  %v14867_v57 = vld [vmem:[#allocation7 + $0x940] ss:$16 sps:$4 sm:$0xff]  }
 0x825   : > { %3732 = vmatprep.subr.bf16.mxu0 %v14797_v58  ;;  %3814 = vmatprep.subr.bf16.mxu1 %v14800_v59  ;;  %v14870_v58 = vld [vmem:[#allocation7 + $0x948] ss:$16 sps:$4 sm:$0xff]   ;;  %v14875_v59 = vld [vmem:[#allocation7 + $0x964] ss:$16 sps:$4 sm:$0xff]  }
 0x828   : > { %3733 = vmatpush1.bf16.msra.mxu0 %v14795_v60  ;;  %3815 = vmatpush1.bf16.msra.mxu1 %v14798_v61  ;;  %v14878_v60 = vld [vmem:[#allocation7 + $0x96c] ss:$16 sps:$4 sm:$0xff]   ;;  %v14873_v61 = vld [vmem:[#allocation7 + $0x960] ss:$16 sps:$4 sm:$0xff]  }
 0x829   : > { %3734 = vmatprep.subr.bf16.mxu0 %v14803_v62  ;;  %3816 = vmatprep.subr.bf16.mxu1 %v14806_v1  ;;  %v14876_v62 = vld [vmem:[#allocation7 + $0x968] ss:$16 sps:$4 sm:$0xff]   ;;  %v14881_v1 = vld [vmem:[#allocation7 + $0x984] ss:$16 sps:$4 sm:$0xff]  }
 0x82c   : > { %3735 = vmatpush1.bf16.msra.mxu0 %v14801_v2  ;;  %3817 = vmatpush1.bf16.msra.mxu1 %v14804_v3  ;;  %v14884_v2 = vld [vmem:[#allocation7 + $0x98c] ss:$16 sps:$4 sm:$0xff]   ;;  %v14879_v3 = vld [vmem:[#allocation7 + $0x980] ss:$16 sps:$4 sm:$0xff]  }
 0x82d   : > { %12744 = vmatprep.subr.msk.bf16.mxu0 %vm1744_vm3, %v17274_v44  ;;  %12746 = vmatprep.subr.msk.bf16.mxu1 %vm1744_vm3, %v17276_v45 }
 0x82f   : > { %3737 = vmatmul.mubr.bf16.vlgmr.msra.gmra.mrb[20].mxu0 %v2892_v4  ;;  %3819 = vmatmul.mubr.bf16.vlgmr.msra.gmra.mrb[12].mxu1 %v2892_v4  ;;  %v14882_v4 = vld [vmem:[#allocation7 + $0x988] ss:$16 sps:$4 sm:$0xff]  }
 0x830   : > { %3836 = vmatpush1.bf16.msra.mxu0 %v17279_v48  ;;  %3877 = vmatpush1.bf16.msra.mxu1 %v17282_v49 }
 0x831   : > { %3867 = vmatprep.mubr.bf16.mxu0 %v16650_v15  ;;  %3908 = vmatprep.mubr.bf16.mxu1 %v16650_v15 }
 0x832   : > { %4690 = vmatprep.subr.bf16.mxu0 %v14809_v5  ;;  %4772 = vmatprep.subr.bf16.mxu1 %v14812_v6  ;;  %v14887_v5 = vld [vmem:[#allocation7 + $0x9a4] ss:$16 sps:$4 sm:$0xff]   ;;  %v14890_v6 = vld [vmem:[#allocation7 + $0x9ac] ss:$16 sps:$4 sm:$0xff]  }
 0x837   : > { %12745 = vmatmul.mubr.msk.bf16.vlgmr.msra.gmra.mrb[28].mxu0 %vm1740_vm4, %v3831_v42  ;;  %12747 = vmatmul.mubr.msk.bf16.vlgmr.msra.gmra.mrb[20].mxu1 %vm1740_vm4, %v3831_v42  ;;  %v14885_v42 = vld [vmem:[#allocation7 + $0x9a0] ss:$16 sps:$4 sm:$0xff]  }
 0x838   : > { %4691 = vmatpush1.bf16.msra.mxu0 %v14807_v7  ;;  %4773 = vmatpush1.bf16.msra.mxu1 %v14810_v8  ;;  %v14888_v7 = vld [vmem:[#allocation7 + $0x9a8] ss:$16 sps:$4 sm:$0xff]   ;;  %v14893_v8 = vld [vmem:[#allocation7 + $0x9c4] ss:$16 sps:$4 sm:$0xff]  }
 0x839   : > { %4692 = vmatprep.subr.bf16.mxu0 %v14815_v9  ;;  %4774 = vmatprep.subr.bf16.mxu1 %v14818_v10  ;;  %v14896_v9 = vld [vmem:[#allocation7 + $0x9cc] ss:$16 sps:$4 sm:$0xff]   ;;  %v14891_v10 = vld [vmem:[#allocation7 + $0x9c0] ss:$16 sps:$4 sm:$0xff]  }
 0x83c   : > { %4693 = vmatpush1.bf16.msra.mxu0 %v14813_v11  ;;  %4775 = vmatpush1.bf16.msra.mxu1 %v14816_v12  ;;  %v14894_v11 = vld [vmem:[#allocation7 + $0x9c8] ss:$16 sps:$4 sm:$0xff]   ;;  %v14899_v12 = vld [vmem:[#allocation7 + $0x9e4] ss:$16 sps:$4 sm:$0xff]  }
 0x83d   : > { %4694 = vmatprep.subr.bf16.mxu0 %v14821_v13  ;;  %4776 = vmatprep.subr.bf16.mxu1 %v14824_v14  ;;  %v14902_v13 = vld [vmem:[#allocation7 + $0x9ec] ss:$16 sps:$4 sm:$0xff]   ;;  %v14897_v14 = vld [vmem:[#allocation7 + $0x9e0] ss:$16 sps:$4 sm:$0xff]  }
 0x840   : > { %4695 = vmatpush1.bf16.msra.mxu0 %v14819_v19  ;;  %4777 = vmatpush1.bf16.msra.mxu1 %v14822_v22  ;;  %v14900_v19 = vld [vmem:[#allocation7 + $0x9e8] ss:$16 sps:$4 sm:$0xff]   ;;  %v14905_v22 = vld [vmem:[#allocation7 + $0xa04] ss:$16 sps:$4 sm:$0xff]  }
 0x841   : > { %4696 = vmatprep.subr.bf16.mxu0 %v14827_v23  ;;  %4778 = vmatprep.subr.bf16.mxu1 %v14830_v24  ;;  %v14908_v23 = vld [vmem:[#allocation7 + $0xa0c] ss:$16 sps:$4 sm:$0xff]  }
 0x844   : > { %4697 = vmatpush1.bf16.msra.mxu0 %v14825_v25  ;;  %4779 = vmatpush1.bf16.msra.mxu1 %v14828_v26 }
 0x845   : > { %4698 = vmatprep.subr.bf16.mxu0 %v14833_v27  ;;  %4780 = vmatprep.subr.bf16.mxu1 %v14836_v28 }
 0x848   : > { %4699 = vmatpush1.bf16.msra.mxu0 %v14831_v29  ;;  %4781 = vmatpush1.bf16.msra.mxu1 %v14834_v63  ;;  %v14903_v63 = vld [vmem:[#allocation7 + $0xa00] ss:$16 sps:$4 sm:$0xff]  }
 0x849   : > { %4700 = vmatprep.subr.bf16.mxu0 %v14839_v30  ;;  %4782 = vmatprep.subr.bf16.mxu1 %v14842_v31  ;;  %v14906_v30 = vld [vmem:[#allocation7 + $0xa08] ss:$16 sps:$4 sm:$0xff]  }
 0x84c   : > { %4701 = vmatpush1.bf16.msra.mxu0 %v14837_v32  ;;  %4783 = vmatpush1.bf16.msra.mxu1 %v14840_v33 }
 0x84d   : > { %4702 = vmatprep.subr.bf16.mxu0 %v14845_v34  ;;  %4784 = vmatprep.subr.bf16.mxu1 %v14848_v35  ;;  %v14911_v34 = vld [vmem:[#allocation7 + $0xa24] ss:$16 sps:$4 sm:$0xff]   ;;  %v14914_v35 = vld [vmem:[#allocation7 + $0xa2c] ss:$16 sps:$4 sm:$0xff]  }
 0x850   : > { %4703 = vmatpush1.bf16.msra.mxu0 %v14843_v36  ;;  %4785 = vmatpush1.bf16.msra.mxu1 %v14846_v37 }
 0x851   : > { %4704 = vmatprep.subr.bf16.mxu0 %v14851_v38  ;;  %4786 = vmatprep.subr.bf16.mxu1 %v14854_v39  ;;  %v14909_v38 = vld [vmem:[#allocation7 + $0xa20] ss:$16 sps:$4 sm:$0xff]   ;;  %v14912_v39 = vld [vmem:[#allocation7 + $0xa28] ss:$16 sps:$4 sm:$0xff]  }
 0x854   : > { %4705 = vmatpush1.bf16.msra.mxu0 %v14849_v40  ;;  %4787 = vmatpush1.bf16.msra.mxu1 %v14852_v41  ;;  %v14917_v40 = vld [vmem:[#allocation7 + $0xa44] ss:$16 sps:$4 sm:$0xff]   ;;  %v14920_v41 = vld [vmem:[#allocation7 + $0xa4c] ss:$16 sps:$4 sm:$0xff]  }
 0x855   : > { %4706 = vmatprep.subr.bf16.mxu0 %v14857_v43  ;;  %4788 = vmatprep.subr.bf16.mxu1 %v14860_v46  ;;  %v14915_v43 = vld [vmem:[#allocation7 + $0xa40] ss:$16 sps:$4 sm:$0xff]   ;;  %v14918_v46 = vld [vmem:[#allocation7 + $0xa48] ss:$16 sps:$4 sm:$0xff]  }
 0x858   : > { %4707 = vmatpush1.bf16.msra.mxu0 %v14855_v47  ;;  %4789 = vmatpush1.bf16.msra.mxu1 %v14858_v50  ;;  %v14923_v47 = vld [vmem:[#allocation7 + $0xa64] ss:$16 sps:$4 sm:$0xff]   ;;  %v14926_v50 = vld [vmem:[#allocation7 + $0xa6c] ss:$16 sps:$4 sm:$0xff]  }
 0x859   : > { %4708 = vmatprep.subr.bf16.mxu0 %v14863_v51  ;;  %4790 = vmatprep.subr.bf16.mxu1 %v14866_v52  ;;  %v14921_v51 = vld [vmem:[#allocation7 + $0xa60] ss:$16 sps:$4 sm:$0xff]   ;;  %v14924_v52 = vld [vmem:[#allocation7 + $0xa68] ss:$16 sps:$4 sm:$0xff]  }
 0x85c   : > { %4709 = vmatpush1.bf16.msra.mxu0 %v14861_v53  ;;  %4791 = vmatpush1.bf16.msra.mxu1 %v14864_v54  ;;  %v14929_v53 = vld [vmem:[#allocation7 + $0xa84] ss:$16 sps:$4 sm:$0xff]   ;;  %v14932_v54 = vld [vmem:[#allocation7 + $0xa8c] ss:$16 sps:$4 sm:$0xff]  }
 0x85d   : > { %4710 = vmatprep.subr.bf16.mxu0 %v14869_v55  ;;  %4792 = vmatprep.subr.bf16.mxu1 %v14872_v56  ;;  %v14927_v55 = vld [vmem:[#allocation7 + $0xa80] ss:$16 sps:$4 sm:$0xff]   ;;  %v14930_v56 = vld [vmem:[#allocation7 + $0xa88] ss:$16 sps:$4 sm:$0xff]  }
 0x860   : > { %4711 = vmatpush1.bf16.msra.mxu0 %v14867_v57  ;;  %4793 = vmatpush1.bf16.msra.mxu1 %v14870_v58  ;;  %v14935_v57 = vld [vmem:[#allocation7 + $0xaa4] ss:$16 sps:$4 sm:$0xff]   ;;  %v14938_v58 = vld [vmem:[#allocation7 + $0xaac] ss:$16 sps:$4 sm:$0xff]  }
 0x861   : > { %4712 = vmatprep.subr.bf16.mxu0 %v14875_v59  ;;  %4794 = vmatprep.subr.bf16.mxu1 %v14878_v60  ;;  %v14933_v59 = vld [vmem:[#allocation7 + $0xaa0] ss:$16 sps:$4 sm:$0xff]   ;;  %v14936_v60 = vld [vmem:[#allocation7 + $0xaa8] ss:$16 sps:$4 sm:$0xff]  }
 0x864   : > { %4713 = vmatpush1.bf16.msra.mxu0 %v14873_v61  ;;  %4795 = vmatpush1.bf16.msra.mxu1 %v14876_v62  ;;  %v14941_v61 = vld [vmem:[#allocation7 + $0xac4] ss:$16 sps:$4 sm:$0xff]   ;;  %v14944_v62 = vld [vmem:[#allocation7 + $0xacc] ss:$16 sps:$4 sm:$0xff]  }
 0x865   : > { %4714 = vmatprep.subr.bf16.mxu0 %v14881_v1  ;;  %4796 = vmatprep.subr.bf16.mxu1 %v14884_v2  ;;  %v14939_v1 = vld [vmem:[#allocation7 + $0xac0] ss:$16 sps:$4 sm:$0xff]   ;;  %v14942_v2 = vld [vmem:[#allocation7 + $0xac8] ss:$16 sps:$4 sm:$0xff]  }
 0x868   : > { %4715 = vmatpush1.bf16.msra.mxu0 %v14879_v3  ;;  %4797 = vmatpush1.bf16.msra.mxu1 %v14882_v4  ;;  %v14947_v3 = vld [vmem:[#allocation7 + $0xae4] ss:$16 sps:$4 sm:$0xff]   ;;  %v14950_v4 = vld [vmem:[#allocation7 + $0xaec] ss:$16 sps:$4 sm:$0xff]  }
 0x869   : > { %4716 = vmatprep.subr.bf16.mxu0 %v14887_v5  ;;  %4798 = vmatprep.subr.bf16.mxu1 %v14890_v6  ;;  %v14945_v5 = vld [vmem:[#allocation7 + $0xae0] ss:$16 sps:$4 sm:$0xff]   ;;  %v14948_v6 = vld [vmem:[#allocation7 + $0xae8] ss:$16 sps:$4 sm:$0xff]  }
 0x86c   : > { %4717 = vmatpush1.bf16.msra.mxu0 %v14885_v42  ;;  %4799 = vmatpush1.bf16.msra.mxu1 %v14888_v7  ;;  %v14953_v42 = vld [vmem:[#allocation7 + $0xb04] ss:$16 sps:$4 sm:$0xff]   ;;  %v14956_v7 = vld [vmem:[#allocation7 + $0xb0c] ss:$16 sps:$4 sm:$0xff]  }
 0x86d   : > { %4718 = vmatprep.subr.bf16.mxu0 %v14893_v8  ;;  %4800 = vmatprep.subr.bf16.mxu1 %v14896_v9  ;;  %v14951_v8 = vld [vmem:[#allocation7 + $0xb00] ss:$16 sps:$4 sm:$0xff]   ;;  %v14954_v9 = vld [vmem:[#allocation7 + $0xb08] ss:$16 sps:$4 sm:$0xff]  }
 0x870   : > { %4719 = vmatpush1.bf16.msra.mxu0 %v14891_v10  ;;  %4801 = vmatpush1.bf16.msra.mxu1 %v14894_v11  ;;  %v14959_v10 = vld [vmem:[#allocation7 + $0xb24] ss:$16 sps:$4 sm:$0xff]   ;;  %v14962_v11 = vld [vmem:[#allocation7 + $0xb2c] ss:$16 sps:$4 sm:$0xff]  }
 0x871   : > { %4720 = vmatprep.subr.bf16.mxu0 %v14899_v12  ;;  %4802 = vmatprep.subr.bf16.mxu1 %v14902_v13  ;;  %v14957_v12 = vld [vmem:[#allocation7 + $0xb20] ss:$16 sps:$4 sm:$0xff]   ;;  %v14960_v13 = vld [vmem:[#allocation7 + $0xb28] ss:$16 sps:$4 sm:$0xff]  }
 0x874   : > { %4721 = vmatpush1.bf16.msra.mxu0 %v14897_v14  ;;  %4803 = vmatpush1.bf16.msra.mxu1 %v14900_v19  ;;  %v14965_v14 = vld [vmem:[#allocation7 + $0xb44] ss:$16 sps:$4 sm:$0xff]   ;;  %v14968_v19 = vld [vmem:[#allocation7 + $0xb4c] ss:$16 sps:$4 sm:$0xff]  }
 0x875   : > { %4731 = vmatprep.subr.bf16.mxu0 %v14905_v22  ;;  %4813 = vmatprep.subr.bf16.mxu1 %v14908_v23  ;;  %v14963_v22 = vld [vmem:[#allocation7 + $0xb40] ss:$16 sps:$4 sm:$0xff]   ;;  %v14966_v23 = vld [vmem:[#allocation7 + $0xb48] ss:$16 sps:$4 sm:$0xff]  }
 0x90a   : > { %v3869_v24 = vpop.f32.mrb[28].mxu0  ;;  %v17329_v25 = vpop.f32.mrb[20].mxu1 }
 0x90b   : > { %v3871_v26 = vpop.f32.mrb[29].mxu0  ;;  %v3912_v27 = vpop.f32.mrb[21].mxu1  ;;  %v3917_v32 = vpack.c.bf16 %v3869_v24, %v3869_v24  ;;  %v14971_v24 = vld [vmem:[#allocation7 + $0xb64] ss:$16 sps:$4 sm:$0xff]  }
 0x90c   : > { %v3918_v28 = vpack.c.bf16 %v3871_v26, %v3871_v26  ;;  %v3873_v29 = vpop.f32.mrb[30].mxu0  ;;  %v3914_v31 = vpop.f32.mrb[22].mxu1  ;;  %v3920_v37 = vpack.c.bf16 %v3912_v27, %v3912_v27  ;;  %v14974_v26 = vld [vmem:[#allocation7 + $0xb6c] ss:$16 sps:$4 sm:$0xff]   ;;  %v14969_v27 = vld [vmem:[#allocation7 + $0xb60] ss:$16 sps:$4 sm:$0xff]  }
 0x90d   : > { %v3874_v33 = vpop.f32.mrb[31].mxu0  ;;  %v3915_v36 = vpop.f32.mrb[23].mxu1  ;;  %v14977_v29 = vld [vmem:[#allocation7 + $0xb84] ss:$16 sps:$4 sm:$0xff]   ;;  %v14978_v31 = vld [vmem:[#allocation7 + $0xb88] ss:$16 sps:$4 sm:$0xff]  }
 0x90e   : > { %4722 = vmatprep.mubr.bf16.mxu0 %v3918_v28  ;;  %4804 = vmatprep.mubr.bf16.mxu1 %v3918_v28  ;;  %v14972_v28 = vld [vmem:[#allocation7 + $0xb68] ss:$16 sps:$4 sm:$0xff]   ;;  %v14986_v33 = vld [vmem:[#allocation7 + $0xbac] ss:$16 sps:$4 sm:$0xff]   ;;  %v14989_v36 = vld [vmem:[#allocation7 + $0xbc4] ss:$16 sps:$4 sm:$0xff]  }
 0x90f   : > { %4723 = vmatmul.mubr.bf16.vlgmr.msra.gmra.mrb[20].mxu0 %v3917_v32  ;;  %4805 = vmatmul.mubr.bf16.vlgmr.msra.gmra.mrb[12].mxu1 %v3917_v32  ;;  %v14983_v32 = vld [vmem:[#allocation7 + $0xba4] ss:$16 sps:$4 sm:$0xff]  }
 0x910   : > { %4732 = vmatpush1.bf16.msra.mxu0 %v14903_v63  ;;  %4814 = vmatpush1.bf16.msra.mxu1 %v14906_v30  ;;  %v14980_v63 = vld [vmem:[#allocation7 + $0xb8c] ss:$16 sps:$4 sm:$0xff]   ;;  %v14975_v30 = vld [vmem:[#allocation7 + $0xb80] ss:$16 sps:$4 sm:$0xff]  }
 0x911   : > { %4733 = vmatprep.subr.bf16.mxu0 %v14911_v34  ;;  %4815 = vmatprep.subr.bf16.mxu1 %v14914_v35  ;;  %v14981_v34 = vld [vmem:[#allocation7 + $0xba0] ss:$16 sps:$4 sm:$0xff]   ;;  %v14984_v35 = vld [vmem:[#allocation7 + $0xba8] ss:$16 sps:$4 sm:$0xff]  }
 0x912   : > { %4763 = vmatprep.mubr.bf16.mxu0 %v3920_v37  ;;  %4845 = vmatprep.mubr.bf16.mxu1 %v3920_v37  ;;  %v14992_v37 = vld [vmem:[#allocation7 + $0xbcc] ss:$16 sps:$4 sm:$0xff]  }
 0x914   : > { %4734 = vmatpush1.bf16.msra.mxu0 %v14909_v38  ;;  %4816 = vmatpush1.bf16.msra.mxu1 %v14912_v39  ;;  %v14987_v38 = vld [vmem:[#allocation7 + $0xbc0] ss:$16 sps:$4 sm:$0xff]   ;;  %v14990_v39 = vld [vmem:[#allocation7 + $0xbc8] ss:$16 sps:$4 sm:$0xff]  }
 0x915   : > { %4735 = vmatprep.subr.bf16.mxu0 %v14917_v40  ;;  %4817 = vmatprep.subr.bf16.mxu1 %v14920_v41  ;;  %v14995_v40 = vld [vmem:[#allocation7 + $0xbe4] ss:$16 sps:$4 sm:$0xff]   ;;  %v14998_v41 = vld [vmem:[#allocation7 + $0xbec] ss:$16 sps:$4 sm:$0xff]  }
 0x918   : > { %4736 = vmatpush1.bf16.msra.mxu0 %v14915_v43  ;;  %4818 = vmatpush1.bf16.msra.mxu1 %v14918_v46  ;;  %v14993_v43 = vld [vmem:[#allocation7 + $0xbe0] ss:$16 sps:$4 sm:$0xff]   ;;  %v14996_v46 = vld [vmem:[#allocation7 + $0xbe8] ss:$16 sps:$4 sm:$0xff]  }
 0x919   : > { %4737 = vmatprep.subr.bf16.mxu0 %v14923_v47  ;;  %4819 = vmatprep.subr.bf16.mxu1 %v14926_v50  ;;  %v3919_v47 = vpack.c.bf16 %v17329_v25, %v17329_v25  ;;  %v15002_v50 = vld [vmem:[#allocation7 + $0xc04] ss:$16 sps:$4 sm:$0xff]   ;;  %v15003_v25 = vld [vmem:[#allocation7 + $0xc08] ss:$16 sps:$4 sm:$0xff]  }
 0x91c   : > { %4738 = vmatpush1.bf16.msra.mxu0 %v14921_v51  ;;  %4820 = vmatpush1.bf16.msra.mxu1 %v14924_v52  ;;  %v15005_v51 = vld [vmem:[#allocation7 + $0xc0c] ss:$16 sps:$4 sm:$0xff]   ;;  %v14999_v52 = vld [vmem:[%s17681_s4 + $0x4] ss:$0 sps:$4 sm:$0xcc]  }
 0x91d   : > { %4739 = vmatprep.subr.bf16.mxu0 %v14929_v53  ;;  %4821 = vmatprep.subr.bf16.mxu1 %v14932_v54  ;;  %v15008_v53 = vld [vmem:[#allocation7 + $0xc24] ss:$16 sps:$4 sm:$0xff]   ;;  %v15011_v54 = vld [vmem:[#allocation7 + $0xc2c] ss:$16 sps:$4 sm:$0xff]  }
 0x920   : > { %4740 = vmatpush1.bf16.msra.mxu0 %v14927_v55  ;;  %4822 = vmatpush1.bf16.msra.mxu1 %v14930_v56  ;;  %v15009_v55 = vld [vmem:[#allocation7 + $0xc28] ss:$16 sps:$4 sm:$0xff]   ;;  %v15017_v56 = vld [vmem:[#allocation7 + $0xc4c] ss:$16 sps:$4 sm:$0xff]  }
 0x921   : > { %4741 = vmatprep.subr.bf16.mxu0 %v14935_v57  ;;  %4823 = vmatprep.subr.bf16.mxu1 %v14938_v58  ;;  %v15012_v57 = vld [vmem:[#allocation7 + $0xc40] ss:$16 sps:$4 sm:$0xff]   ;;  %v15015_v58 = vld [vmem:[#allocation7 + $0xc48] ss:$16 sps:$4 sm:$0xff]  }
 0x924   : > { %4742 = vmatpush1.bf16.msra.mxu0 %v14933_v59  ;;  %4824 = vmatpush1.bf16.msra.mxu1 %v14936_v60  ;;  %v15020_v59 = vld [vmem:[#allocation7 + $0xc64] ss:$16 sps:$4 sm:$0xff]   ;;  %v15023_v60 = vld [vmem:[#allocation7 + $0xc6c] ss:$16 sps:$4 sm:$0xff]  }
 0x925   : > { %4743 = vmatprep.subr.bf16.mxu0 %v14941_v61  ;;  %4825 = vmatprep.subr.bf16.mxu1 %v14944_v62  ;;  %v15018_v61 = vld [vmem:[#allocation7 + $0xc60] ss:$16 sps:$4 sm:$0xff]   ;;  %v15021_v62 = vld [vmem:[#allocation7 + $0xc68] ss:$16 sps:$4 sm:$0xff]  }
 0x928   : > { %4744 = vmatpush1.bf16.msra.mxu0 %v14939_v1  ;;  %4826 = vmatpush1.bf16.msra.mxu1 %v14942_v2  ;;  %v15026_v1 = vld [vmem:[#allocation7 + $0xc84] ss:$16 sps:$4 sm:$0xff]   ;;  %v15029_v2 = vld [vmem:[#allocation7 + $0xc8c] ss:$16 sps:$4 sm:$0xff]  }
 0x929   : > { %4745 = vmatprep.subr.bf16.mxu0 %v14947_v3  ;;  %4827 = vmatprep.subr.bf16.mxu1 %v14950_v4  ;;  %v15024_v3 = vld [vmem:[#allocation7 + $0xc80] ss:$16 sps:$4 sm:$0xff]   ;;  %v15027_v4 = vld [vmem:[#allocation7 + $0xc88] ss:$16 sps:$4 sm:$0xff]  }
 0x92c   : > { %4746 = vmatpush1.bf16.msra.mxu0 %v14945_v5  ;;  %4828 = vmatpush1.bf16.msra.mxu1 %v14948_v6  ;;  %v15032_v5 = vld [vmem:[#allocation7 + $0xca4] ss:$16 sps:$4 sm:$0xff]   ;;  %v15035_v6 = vld [vmem:[#allocation7 + $0xcac] ss:$16 sps:$4 sm:$0xff]  }
 0x92d   : > { %4747 = vmatprep.subr.bf16.mxu0 %v14953_v42  ;;  %4829 = vmatprep.subr.bf16.mxu1 %v14956_v7  ;;  %v15030_v42 = vld [vmem:[#allocation7 + $0xca0] ss:$16 sps:$4 sm:$0xff]   ;;  %v15033_v7 = vld [vmem:[#allocation7 + $0xca8] ss:$16 sps:$4 sm:$0xff]  }
 0x930   : > { %4748 = vmatpush1.bf16.msra.mxu0 %v14951_v8  ;;  %4830 = vmatpush1.bf16.msra.mxu1 %v14954_v9  ;;  %v15038_v8 = vld [vmem:[#allocation7 + $0xcc4] ss:$16 sps:$4 sm:$0xff]   ;;  %v15041_v9 = vld [vmem:[#allocation7 + $0xccc] ss:$16 sps:$4 sm:$0xff]  }
 0x931   : > { %4749 = vmatprep.subr.bf16.mxu0 %v14959_v10  ;;  %4831 = vmatprep.subr.bf16.mxu1 %v14962_v11  ;;  %v15036_v10 = vld [vmem:[#allocation7 + $0xcc0] ss:$16 sps:$4 sm:$0xff]   ;;  %v15039_v11 = vld [vmem:[#allocation7 + $0xcc8] ss:$16 sps:$4 sm:$0xff]  }
 0x934   : > { %4750 = vmatpush1.bf16.msra.mxu0 %v14957_v12  ;;  %4832 = vmatpush1.bf16.msra.mxu1 %v14960_v13  ;;  %v15044_v12 = vld [vmem:[#allocation7 + $0xce4] ss:$16 sps:$4 sm:$0xff]   ;;  %v15047_v13 = vld [vmem:[#allocation7 + $0xcec] ss:$16 sps:$4 sm:$0xff]  }
 0x935   : > { %4751 = vmatprep.subr.bf16.mxu0 %v14965_v14  ;;  %4833 = vmatprep.subr.bf16.mxu1 %v14968_v19  ;;  %v15042_v14 = vld [vmem:[#allocation7 + $0xce0] ss:$16 sps:$4 sm:$0xff]   ;;  %v15045_v19 = vld [vmem:[#allocation7 + $0xce8] ss:$16 sps:$4 sm:$0xff]  }
 0x938   : > { %4752 = vmatpush1.bf16.msra.mxu0 %v14963_v22  ;;  %4834 = vmatpush1.bf16.msra.mxu1 %v14966_v23  ;;  %v15050_v22 = vld [vmem:[#allocation7 + $0xd04] ss:$16 sps:$4 sm:$0xff]   ;;  %v15053_v23 = vld [vmem:[#allocation7 + $0xd0c] ss:$16 sps:$4 sm:$0xff]  }
 0x939   : > { %4753 = vmatprep.subr.bf16.mxu0 %v14971_v24  ;;  %4835 = vmatprep.subr.bf16.mxu1 %v14974_v26  ;;  %v15048_v24 = vld [vmem:[#allocation7 + $0xd00] ss:$16 sps:$4 sm:$0xff]   ;;  %v15051_v26 = vld [vmem:[#allocation7 + $0xd08] ss:$16 sps:$4 sm:$0xff]  }
 0x93c   : > { %4754 = vmatpush1.bf16.msra.mxu0 %v14969_v27  ;;  %4836 = vmatpush1.bf16.msra.mxu1 %v14972_v28  ;;  %v15056_v27 = vld [vmem:[#allocation7 + $0xd24] ss:$16 sps:$4 sm:$0xff]   ;;  %v15059_v28 = vld [vmem:[#allocation7 + $0xd2c] ss:$16 sps:$4 sm:$0xff]  }
 0x93d   : > { %4755 = vmatprep.subr.bf16.mxu0 %v14977_v29  ;;  %4837 = vmatprep.subr.bf16.mxu1 %v14980_v63  ;;  %v15054_v29 = vld [vmem:[#allocation7 + $0xd20] ss:$16 sps:$4 sm:$0xff]   ;;  %v15057_v63 = vld [vmem:[#allocation7 + $0xd28] ss:$16 sps:$4 sm:$0xff]  }
 0x940   : > { %4756 = vmatpush1.bf16.msra.mxu0 %v14975_v30  ;;  %4838 = vmatpush1.bf16.msra.mxu1 %v14978_v31  ;;  %v15062_v30 = vld [vmem:[#allocation7 + $0xd44] ss:$16 sps:$4 sm:$0xff]   ;;  %v15065_v31 = vld [vmem:[#allocation7 + $0xd4c] ss:$16 sps:$4 sm:$0xff]  }
 0x941   : > { %4757 = vmatprep.subr.bf16.mxu0 %v14983_v32  ;;  %4839 = vmatprep.subr.bf16.mxu1 %v14986_v33  ;;  %v15060_v32 = vld [vmem:[#allocation7 + $0xd40] ss:$16 sps:$4 sm:$0xff]   ;;  %v15063_v33 = vld [vmem:[#allocation7 + $0xd48] ss:$16 sps:$4 sm:$0xff]  }
 0x944   : > { %4758 = vmatpush1.bf16.msra.mxu0 %v14981_v34  ;;  %4840 = vmatpush1.bf16.msra.mxu1 %v14984_v35  ;;  %v15068_v34 = vld [vmem:[#allocation7 + $0xd64] ss:$16 sps:$4 sm:$0xff]   ;;  %v15071_v35 = vld [vmem:[#allocation7 + $0xd6c] ss:$16 sps:$4 sm:$0xff]  }
 0x945   : > { %4759 = vmatprep.subr.bf16.mxu0 %v14989_v36  ;;  %4841 = vmatprep.subr.bf16.mxu1 %v14992_v37  ;;  %v15066_v36 = vld [vmem:[#allocation7 + $0xd60] ss:$16 sps:$4 sm:$0xff]   ;;  %v15069_v37 = vld [vmem:[#allocation7 + $0xd68] ss:$16 sps:$4 sm:$0xff]  }
 0x948   : > { %4760 = vmatpush1.bf16.msra.mxu0 %v14987_v38  ;;  %4842 = vmatpush1.bf16.msra.mxu1 %v14990_v39  ;;  %v15074_v38 = vld [vmem:[#allocation7 + $0xd84] ss:$16 sps:$4 sm:$0xff]   ;;  %v15077_v39 = vld [vmem:[#allocation7 + $0xd8c] ss:$16 sps:$4 sm:$0xff]  }
 0x949   : > { %4761 = vmatprep.subr.bf16.mxu0 %v14995_v40  ;;  %4843 = vmatprep.subr.bf16.mxu1 %v14998_v41  ;;  %v15072_v40 = vld [vmem:[#allocation7 + $0xd80] ss:$16 sps:$4 sm:$0xff]   ;;  %v15075_v41 = vld [vmem:[#allocation7 + $0xd88] ss:$16 sps:$4 sm:$0xff]  }
 0x94c   : > { %4762 = vmatpush1.bf16.msra.mxu0 %v14993_v43  ;;  %4844 = vmatpush1.bf16.msra.mxu1 %v14996_v46  ;;  %v15080_v43 = vld [vmem:[#allocation7 + $0xda4] ss:$16 sps:$4 sm:$0xff]   ;;  %v15083_v46 = vld [vmem:[#allocation7 + $0xdac] ss:$16 sps:$4 sm:$0xff]  }
 0x94d   : > { %12877 = vmatprep.subr.msk.bf16.mxu0 %vm1744_vm3, %v17274_v44  ;;  %12879 = vmatprep.subr.msk.bf16.mxu1 %vm1744_vm3, %v17276_v45  ;;  %v4862_v44 = vrot.slane %v14999_v52, 2  ;;  %v15000_v45 = vld [vmem:[#allocation7 + $0xc00] ss:$16 sps:$4 sm:$0xff]   ;;  %v15089_v52 = vld [vmem:[#allocation7 + $0xdcc] ss:$16 sps:$4 sm:$0xff]  }
 0x94f   : > { %4764 = vmatmul.mubr.bf16.vlgmr.msra.gmra.mrb[20].mxu0 %v3919_v47  ;;  %4846 = vmatmul.mubr.bf16.vlgmr.msra.gmra.mrb[12].mxu1 %v3919_v47  ;;  %v15078_v47 = vld [vmem:[#allocation7 + $0xda0] ss:$16 sps:$4 sm:$0xff]  }
 0x950   : > { %4867 = vmatpush1.bf16.msra.mxu0 %v17279_v48  ;;  %4908 = vmatpush1.bf16.msra.mxu1 %v17282_v49  ;;  %v15006_v48 = vld [vmem:[#allocation7 + $0xc20] ss:$16 sps:$4 sm:$0xff]   ;;  %v15014_v49 = vld [vmem:[#allocation7 + $0xc44] ss:$16 sps:$4 sm:$0xff]  }
 0x951   : > { %4898 = vmatprep.mubr.bf16.mxu0 %v16650_v15  ;;  %4939 = vmatprep.mubr.bf16.mxu1 %v16650_v15 }
 0x952   : > { %5721 = vmatprep.subr.bf16.mxu0 %v15002_v50  ;;  %5803 = vmatprep.subr.bf16.mxu1 %v15005_v51  ;;  %v15081_v50 = vld [vmem:[#allocation7 + $0xda8] ss:$16 sps:$4 sm:$0xff]   ;;  %v15086_v51 = vld [vmem:[#allocation7 + $0xdc4] ss:$16 sps:$4 sm:$0xff]  }
 0x957   : > { %12878 = vmatmul.mubr.msk.bf16.vlgmr.msra.gmra.mrb[32].mxu0 %vm1740_vm4, %v4862_v44  ;;  %12880 = vmatmul.mubr.msk.bf16.vlgmr.msra.gmra.mrb[24].mxu1 %vm1740_vm4, %v4862_v44  ;;  %v15084_v44 = vld [vmem:[#allocation7 + $0xdc0] ss:$16 sps:$4 sm:$0xff]  }
 0x958   : > { %5722 = vmatpush1.bf16.msra.mxu0 %v15000_v45  ;;  %5804 = vmatpush1.bf16.msra.mxu1 %v15003_v25  ;;  %v15087_v45 = vld [vmem:[#allocation7 + $0xdc8] ss:$16 sps:$4 sm:$0xff]   ;;  %v15092_v25 = vld [vmem:[#allocation7 + $0xde4] ss:$16 sps:$4 sm:$0xff]  }
 0x959   : > { %5723 = vmatprep.subr.bf16.mxu0 %v15008_v53  ;;  %5805 = vmatprep.subr.bf16.mxu1 %v15011_v54  ;;  %v15095_v53 = vld [vmem:[#allocation7 + $0xdec] ss:$16 sps:$4 sm:$0xff]   ;;  %v15090_v54 = vld [vmem:[#allocation7 + $0xde0] ss:$16 sps:$4 sm:$0xff]  }
 0x95c   : > { %5724 = vmatpush1.bf16.msra.mxu0 %v15006_v48  ;;  %5806 = vmatpush1.bf16.msra.mxu1 %v15009_v55  ;;  %v15093_v48 = vld [vmem:[#allocation7 + $0xde8] ss:$16 sps:$4 sm:$0xff]   ;;  %v15098_v55 = vld [vmem:[#allocation7 + $0xe04] ss:$16 sps:$4 sm:$0xff]  }
 0x95d   : > { %5725 = vmatprep.subr.bf16.mxu0 %v15014_v49  ;;  %5807 = vmatprep.subr.bf16.mxu1 %v15017_v56  ;;  %v15101_v49 = vld [vmem:[#allocation7 + $0xe0c] ss:$16 sps:$4 sm:$0xff]  }
 0x960   : > { %5726 = vmatpush1.bf16.msra.mxu0 %v15012_v57  ;;  %5808 = vmatpush1.bf16.msra.mxu1 %v15015_v58 }
 0x961   : > { %5727 = vmatprep.subr.bf16.mxu0 %v15020_v59  ;;  %5809 = vmatprep.subr.bf16.mxu1 %v15023_v60 }
 0x964   : > { %5728 = vmatpush1.bf16.msra.mxu0 %v15018_v61  ;;  %5810 = vmatpush1.bf16.msra.mxu1 %v15021_v62  ;;  %v15096_v62 = vld [vmem:[#allocation7 + $0xe00] ss:$16 sps:$4 sm:$0xff]  }
 0x965   : > { %5729 = vmatprep.subr.bf16.mxu0 %v15026_v1  ;;  %5811 = vmatprep.subr.bf16.mxu1 %v15029_v2  ;;  %v15099_v1 = vld [vmem:[#allocation7 + $0xe08] ss:$16 sps:$4 sm:$0xff]  }
 0x968   : > { %5730 = vmatpush1.bf16.msra.mxu0 %v15024_v3  ;;  %5812 = vmatpush1.bf16.msra.mxu1 %v15027_v4 }
 0x969   : > { %5731 = vmatprep.subr.bf16.mxu0 %v15032_v5  ;;  %5813 = vmatprep.subr.bf16.mxu1 %v15035_v6  ;;  %v15104_v5 = vld [vmem:[#allocation7 + $0xe24] ss:$16 sps:$4 sm:$0xff]   ;;  %v15107_v6 = vld [vmem:[#allocation7 + $0xe2c] ss:$16 sps:$4 sm:$0xff]  }
 0x96c   : > { %5732 = vmatpush1.bf16.msra.mxu0 %v15030_v42  ;;  %5814 = vmatpush1.bf16.msra.mxu1 %v15033_v7 }
 0x96d   : > { %5733 = vmatprep.subr.bf16.mxu0 %v15038_v8  ;;  %5815 = vmatprep.subr.bf16.mxu1 %v15041_v9  ;;  %v15102_v8 = vld [vmem:[#allocation7 + $0xe20] ss:$16 sps:$4 sm:$0xff]   ;;  %v15105_v9 = vld [vmem:[#allocation7 + $0xe28] ss:$16 sps:$4 sm:$0xff]  }
 0x970   : > { %5734 = vmatpush1.bf16.msra.mxu0 %v15036_v10  ;;  %5816 = vmatpush1.bf16.msra.mxu1 %v15039_v11  ;;  %v15110_v10 = vld [vmem:[#allocation7 + $0xe44] ss:$16 sps:$4 sm:$0xff]   ;;  %v15113_v11 = vld [vmem:[#allocation7 + $0xe4c] ss:$16 sps:$4 sm:$0xff]  }
 0x971   : > { %5735 = vmatprep.subr.bf16.mxu0 %v15044_v12  ;;  %5817 = vmatprep.subr.bf16.mxu1 %v15047_v13  ;;  %v15108_v12 = vld [vmem:[#allocation7 + $0xe40] ss:$16 sps:$4 sm:$0xff]   ;;  %v15111_v13 = vld [vmem:[#allocation7 + $0xe48] ss:$16 sps:$4 sm:$0xff]  }
 0x974   : > { %5736 = vmatpush1.bf16.msra.mxu0 %v15042_v14  ;;  %5818 = vmatpush1.bf16.msra.mxu1 %v15045_v19  ;;  %v15116_v14 = vld [vmem:[#allocation7 + $0xe64] ss:$16 sps:$4 sm:$0xff]   ;;  %v15119_v19 = vld [vmem:[#allocation7 + $0xe6c] ss:$16 sps:$4 sm:$0xff]  }
 0x975   : > { %5737 = vmatprep.subr.bf16.mxu0 %v15050_v22  ;;  %5819 = vmatprep.subr.bf16.mxu1 %v15053_v23  ;;  %v15114_v22 = vld [vmem:[#allocation7 + $0xe60] ss:$16 sps:$4 sm:$0xff]   ;;  %v15117_v23 = vld [vmem:[#allocation7 + $0xe68] ss:$16 sps:$4 sm:$0xff]  }
 0x978   : > { %5738 = vmatpush1.bf16.msra.mxu0 %v15048_v24  ;;  %5820 = vmatpush1.bf16.msra.mxu1 %v15051_v26  ;;  %v15122_v24 = vld [vmem:[#allocation7 + $0xe84] ss:$16 sps:$4 sm:$0xff]   ;;  %v15125_v26 = vld [vmem:[#allocation7 + $0xe8c] ss:$16 sps:$4 sm:$0xff]  }
 0x979   : > { %5739 = vmatprep.subr.bf16.mxu0 %v15056_v27  ;;  %5821 = vmatprep.subr.bf16.mxu1 %v15059_v28  ;;  %v15120_v27 = vld [vmem:[#allocation7 + $0xe80] ss:$16 sps:$4 sm:$0xff]   ;;  %v15123_v28 = vld [vmem:[#allocation7 + $0xe88] ss:$16 sps:$4 sm:$0xff]  }
 0x97c   : > { %5740 = vmatpush1.bf16.msra.mxu0 %v15054_v29  ;;  %5822 = vmatpush1.bf16.msra.mxu1 %v15057_v63  ;;  %v15128_v29 = vld [vmem:[#allocation7 + $0xea4] ss:$16 sps:$4 sm:$0xff]   ;;  %v15131_v63 = vld [vmem:[#allocation7 + $0xeac] ss:$16 sps:$4 sm:$0xff]  }
 0x97d   : > { %5741 = vmatprep.subr.bf16.mxu0 %v15062_v30  ;;  %5823 = vmatprep.subr.bf16.mxu1 %v15065_v31  ;;  %v15126_v30 = vld [vmem:[#allocation7 + $0xea0] ss:$16 sps:$4 sm:$0xff]   ;;  %v15129_v31 = vld [vmem:[#allocation7 + $0xea8] ss:$16 sps:$4 sm:$0xff]  }
 0x980   : > { %5742 = vmatpush1.bf16.msra.mxu0 %v15060_v32  ;;  %5824 = vmatpush1.bf16.msra.mxu1 %v15063_v33  ;;  %v15134_v32 = vld [vmem:[#allocation7 + $0xec4] ss:$16 sps:$4 sm:$0xff]   ;;  %v15137_v33 = vld [vmem:[#allocation7 + $0xecc] ss:$16 sps:$4 sm:$0xff]  }
 0x981   : > { %5743 = vmatprep.subr.bf16.mxu0 %v15068_v34  ;;  %5825 = vmatprep.subr.bf16.mxu1 %v15071_v35  ;;  %v15132_v34 = vld [vmem:[#allocation7 + $0xec0] ss:$16 sps:$4 sm:$0xff]   ;;  %v15135_v35 = vld [vmem:[#allocation7 + $0xec8] ss:$16 sps:$4 sm:$0xff]  }
 0x984   : > { %5744 = vmatpush1.bf16.msra.mxu0 %v15066_v36  ;;  %5826 = vmatpush1.bf16.msra.mxu1 %v15069_v37  ;;  %v15140_v36 = vld [vmem:[#allocation7 + $0xee4] ss:$16 sps:$4 sm:$0xff]   ;;  %v15143_v37 = vld [vmem:[#allocation7 + $0xeec] ss:$16 sps:$4 sm:$0xff]  }
 0x985   : > { %5745 = vmatprep.subr.bf16.mxu0 %v15074_v38  ;;  %5827 = vmatprep.subr.bf16.mxu1 %v15077_v39  ;;  %v15138_v38 = vld [vmem:[#allocation7 + $0xee0] ss:$16 sps:$4 sm:$0xff]   ;;  %v15141_v39 = vld [vmem:[#allocation7 + $0xee8] ss:$16 sps:$4 sm:$0xff]  }
 0x988   : > { %5746 = vmatpush1.bf16.msra.mxu0 %v15072_v40  ;;  %5828 = vmatpush1.bf16.msra.mxu1 %v15075_v41  ;;  %v15146_v40 = vld [vmem:[#allocation7 + $0xf04] ss:$16 sps:$4 sm:$0xff]   ;;  %v15149_v41 = vld [vmem:[#allocation7 + $0xf0c] ss:$16 sps:$4 sm:$0xff]  }
 0x989   : > { %5747 = vmatprep.subr.bf16.mxu0 %v15080_v43  ;;  %5829 = vmatprep.subr.bf16.mxu1 %v15083_v46  ;;  %v15144_v43 = vld [vmem:[#allocation7 + $0xf00] ss:$16 sps:$4 sm:$0xff]   ;;  %v15147_v46 = vld [vmem:[#allocation7 + $0xf08] ss:$16 sps:$4 sm:$0xff]  }
 0x98c   : > { %5748 = vmatpush1.bf16.msra.mxu0 %v15078_v47  ;;  %5830 = vmatpush1.bf16.msra.mxu1 %v15081_v50  ;;  %v15152_v47 = vld [vmem:[#allocation7 + $0xf24] ss:$16 sps:$4 sm:$0xff]   ;;  %v15155_v50 = vld [vmem:[#allocation7 + $0xf2c] ss:$16 sps:$4 sm:$0xff]  }
 0x98d   : > { %5749 = vmatprep.subr.bf16.mxu0 %v15086_v51  ;;  %5831 = vmatprep.subr.bf16.mxu1 %v15089_v52  ;;  %v15150_v51 = vld [vmem:[#allocation7 + $0xf20] ss:$16 sps:$4 sm:$0xff]   ;;  %v15153_v52 = vld [vmem:[#allocation7 + $0xf28] ss:$16 sps:$4 sm:$0xff]  }
 0x990   : > { %5750 = vmatpush1.bf16.msra.mxu0 %v15084_v44  ;;  %5832 = vmatpush1.bf16.msra.mxu1 %v15087_v45  ;;  %v15158_v44 = vld [vmem:[#allocation7 + $0xf44] ss:$16 sps:$4 sm:$0xff]   ;;  %v15161_v45 = vld [vmem:[#allocation7 + $0xf4c] ss:$16 sps:$4 sm:$0xff]  }
 0x991   : > { %5751 = vmatprep.subr.bf16.mxu0 %v15092_v25  ;;  %5833 = vmatprep.subr.bf16.mxu1 %v15095_v53  ;;  %v15156_v25 = vld [vmem:[#allocation7 + $0xf40] ss:$16 sps:$4 sm:$0xff]   ;;  %v15159_v53 = vld [vmem:[#allocation7 + $0xf48] ss:$16 sps:$4 sm:$0xff]  }
 0x994   : > { %5752 = vmatpush1.bf16.msra.mxu0 %v15090_v54  ;;  %5834 = vmatpush1.bf16.msra.mxu1 %v15093_v48  ;;  %v15164_v54 = vld [vmem:[#allocation7 + $0xf64] ss:$16 sps:$4 sm:$0xff]   ;;  %v15167_v48 = vld [vmem:[#allocation7 + $0xf6c] ss:$16 sps:$4 sm:$0xff]  }
 0x995   : > { %5762 = vmatprep.subr.bf16.mxu0 %v15098_v55  ;;  %5844 = vmatprep.subr.bf16.mxu1 %v15101_v49  ;;  %v15162_v55 = vld [vmem:[#allocation7 + $0xf60] ss:$16 sps:$4 sm:$0xff]   ;;  %v15165_v49 = vld [vmem:[#allocation7 + $0xf68] ss:$16 sps:$4 sm:$0xff]  }
 0xa2a   : > { %v4900_v56 = vpop.f32.mrb[32].mxu0  ;;  %v17346_v57 = vpop.f32.mrb[24].mxu1 }
 0xa2b   : > { %v4902_v58 = vpop.f32.mrb[33].mxu0  ;;  %v4943_v59 = vpop.f32.mrb[25].mxu1  ;;  %v4948_v3 = vpack.c.bf16 %v4900_v56, %v4900_v56  ;;  %v15170_v56 = vld [vmem:[#allocation7 + $0xf84] ss:$16 sps:$4 sm:$0xff]  }
 0xa2c   : > { %v4949_v60 = vpack.c.bf16 %v4902_v58, %v4902_v58  ;;  %v4904_v61 = vpop.f32.mrb[34].mxu0  ;;  %v4945_v2 = vpop.f32.mrb[26].mxu1  ;;  %v4951_v7 = vpack.c.bf16 %v4943_v59, %v4943_v59  ;;  %v15173_v58 = vld [vmem:[#allocation7 + $0xf8c] ss:$16 sps:$4 sm:$0xff]   ;;  %v15168_v59 = vld [vmem:[#allocation7 + $0xf80] ss:$16 sps:$4 sm:$0xff]  }
 0xa2d   : > { %v4905_v4 = vpop.f32.mrb[35].mxu0  ;;  %v4946_v42 = vpop.f32.mrb[27].mxu1  ;;  %v15176_v61 = vld [vmem:[#allocation7 + $0xfa4] ss:$16 sps:$4 sm:$0xff]   ;;  %v15177_v2 = vld [vmem:[#allocation7 + $0xfa8] ss:$16 sps:$4 sm:$0xff]  }
 0xa2e   : > { %5753 = vmatprep.mubr.bf16.mxu0 %v4949_v60  ;;  %5835 = vmatprep.mubr.bf16.mxu1 %v4949_v60  ;;  %v15171_v60 = vld [vmem:[#allocation7 + $0xf88] ss:$16 sps:$4 sm:$0xff]   ;;  %v15185_v4 = vld [vmem:[#allocation7 + $0xfcc] ss:$16 sps:$4 sm:$0xff]   ;;  %v15188_v42 = vld [vmem:[#allocation7 + $0xfe4] ss:$16 sps:$4 sm:$0xff]  }
 0xa2f   : > { %5754 = vmatmul.mubr.bf16.vlgmr.msra.gmra.mrb[20].mxu0 %v4948_v3  ;;  %5836 = vmatmul.mubr.bf16.vlgmr.msra.gmra.mrb[12].mxu1 %v4948_v3  ;;  %v15182_v3 = vld [vmem:[#allocation7 + $0xfc4] ss:$16 sps:$4 sm:$0xff]  }
 0xa30   : > { %5763 = vmatpush1.bf16.msra.mxu0 %v15096_v62  ;;  %5845 = vmatpush1.bf16.msra.mxu1 %v15099_v1  ;;  %v15179_v62 = vld [vmem:[#allocation7 + $0xfac] ss:$16 sps:$4 sm:$0xff]   ;;  %v15174_v1 = vld [vmem:[#allocation7 + $0xfa0] ss:$16 sps:$4 sm:$0xff]  }
 0xa31   : > { %5764 = vmatprep.subr.bf16.mxu0 %v15104_v5  ;;  %5846 = vmatprep.subr.bf16.mxu1 %v15107_v6  ;;  %v15180_v5 = vld [vmem:[#allocation7 + $0xfc0] ss:$16 sps:$4 sm:$0xff]   ;;  %v15183_v6 = vld [vmem:[#allocation7 + $0xfc8] ss:$16 sps:$4 sm:$0xff]  }
 0xa32   : > { %5794 = vmatprep.mubr.bf16.mxu0 %v4951_v7  ;;  %5876 = vmatprep.mubr.bf16.mxu1 %v4951_v7  ;;  %v15191_v7 = vld [vmem:[#allocation7 + $0xfec] ss:$16 sps:$4 sm:$0xff]  }
 0xa34   : > { %5765 = vmatpush1.bf16.msra.mxu0 %v15102_v8  ;;  %5847 = vmatpush1.bf16.msra.mxu1 %v15105_v9  ;;  %v15186_v8 = vld [vmem:[#allocation7 + $0xfe0] ss:$16 sps:$4 sm:$0xff]   ;;  %v15189_v9 = vld [vmem:[#allocation7 + $0xfe8] ss:$16 sps:$4 sm:$0xff]  }
 0xa35   : > { %5766 = vmatprep.subr.bf16.mxu0 %v15110_v10  ;;  %5848 = vmatprep.subr.bf16.mxu1 %v15113_v11  ;;  %v4950_v10 = vpack.c.bf16 %v17346_v57, %v17346_v57  ;;  %v1738_v11 = vld [vmem:[#allocation8] sm:$0xf] }
 0xa38   : > { %5767 = vmatpush1.bf16.msra.mxu0 %v15108_v12  ;;  %5849 = vmatpush1.bf16.msra.mxu1 %v15111_v13  ;;  %v2779_v12 = vrot.slane %v1738_v11, %v17259_v17  ;;  %v2787_v13 = vrot.slane %v1738_v11, %v17262_v18 }
 0xa39   : > { %5768 = vmatprep.subr.bf16.mxu0 %v15116_v14  ;;  %5850 = vmatprep.subr.bf16.mxu1 %v15119_v19  ;;  %v2783_v14 = vrot.slane %v1738_v11, %v17265_v20  ;;  %v2791_v19 = vrot.slane %v1738_v11, %v17268_v21  ;;  %v15239_v11 = vld [vmem:[#allocation10 + $0xec] ss:$16 sps:$4 sm:$0xff]  }
 0xa3c   : > { %5769 = vmatpush1.bf16.msra.mxu0 %v15114_v22  ;;  %5851 = vmatpush1.bf16.msra.mxu1 %v15117_v23 }
 0xa3d   : > { %5770 = vmatprep.subr.bf16.mxu0 %v15122_v24  ;;  %5852 = vmatprep.subr.bf16.mxu1 %v15125_v26 }
 0xa40   : > { %5771 = vmatpush1.bf16.msra.mxu0 %v15120_v27  ;;  %5853 = vmatpush1.bf16.msra.mxu1 %v15123_v28 }
 0xa41   : > { %5772 = vmatprep.subr.bf16.mxu0 %v15128_v29  ;;  %5854 = vmatprep.subr.bf16.mxu1 %v15131_v63 }
 0xa44   : > { %5773 = vmatpush1.bf16.msra.mxu0 %v15126_v30  ;;  %5855 = vmatpush1.bf16.msra.mxu1 %v15129_v31 }
 0xa45   : > { %5774 = vmatprep.subr.bf16.mxu0 %v15134_v32  ;;  %5856 = vmatprep.subr.bf16.mxu1 %v15137_v33 }
 0xa48   : > { %5775 = vmatpush1.bf16.msra.mxu0 %v15132_v34  ;;  %5857 = vmatpush1.bf16.msra.mxu1 %v15135_v35 }
 0xa49   : > { %5776 = vmatprep.subr.bf16.mxu0 %v15140_v36  ;;  %5858 = vmatprep.subr.bf16.mxu1 %v15143_v37 }
 0xa4c   : > { %5777 = vmatpush1.bf16.msra.mxu0 %v15138_v38  ;;  %5859 = vmatpush1.bf16.msra.mxu1 %v15141_v39 }
 0xa4d   : > { %5778 = vmatprep.subr.bf16.mxu0 %v15146_v40  ;;  %5860 = vmatprep.subr.bf16.mxu1 %v15149_v41  ;;  %v15194_v41 = vld [vmem:[#allocation10 + $0x4] ss:$16 sps:$4 sm:$0xff]  }
 0xa50   : > { %5779 = vmatpush1.bf16.msra.mxu0 %v15144_v43  ;;  %5861 = vmatpush1.bf16.msra.mxu1 %v15147_v46  ;;  %v15197_v43 = vld [vmem:[#allocation10 + $0xc] ss:$16 sps:$4 sm:$0xff]  }
 0xa51   : > { %5780 = vmatprep.subr.bf16.mxu0 %v15152_v47  ;;  %5862 = vmatprep.subr.bf16.mxu1 %v15155_v50  ;;  %v5898_v50 = vld [vmem:[%s17682_s2] sm:$0x1]  ;;  %s17551_s2 = scalar_lea.hbm %s17688_s27, %s13708_s28 }
 0xa54   : > { %5781 = vmatpush1.bf16.msra.mxu0 %v15150_v51  ;;  %5863 = vmatpush1.bf16.msra.mxu1 %v15153_v52  ;;  %v15192_v51 = vld [vmem:[#allocation10] ss:$16 sps:$4 sm:$0xff]   ;;  %v15195_v52 = vld [vmem:[#allocation10 + $0x8] ss:$16 sps:$4 sm:$0xff]  }
 0xa55   : > { %5782 = vmatprep.subr.bf16.mxu0 %v15158_v44  ;;  %5864 = vmatprep.subr.bf16.mxu1 %v15161_v45  ;;  %v15200_v44 = vld [vmem:[#allocation10 + $0x24] ss:$16 sps:$4 sm:$0xff]   ;;  %v15203_v45 = vld [vmem:[#allocation10 + $0x2c] ss:$16 sps:$4 sm:$0xff]  }
 0xa58   : > { %5783 = vmatpush1.bf16.msra.mxu0 %v15156_v25  ;;  %5865 = vmatpush1.bf16.msra.mxu1 %v15159_v53  ;;  %v15198_v25 = vld [vmem:[#allocation10 + $0x20] ss:$16 sps:$4 sm:$0xff]   ;;  %v15201_v53 = vld [vmem:[#allocation10 + $0x28] ss:$16 sps:$4 sm:$0xff]  }
 0xa59   : > { %5784 = vmatprep.subr.bf16.mxu0 %v15164_v54  ;;  %5866 = vmatprep.subr.bf16.mxu1 %v15167_v48  ;;  %v15206_v54 = vld [vmem:[#allocation10 + $0x44] ss:$16 sps:$4 sm:$0xff]   ;;  %v15209_v48 = vld [vmem:[#allocation10 + $0x4c] ss:$16 sps:$4 sm:$0xff]  }
 0xa5c   : > { %5785 = vmatpush1.bf16.msra.mxu0 %v15162_v55  ;;  %5867 = vmatpush1.bf16.msra.mxu1 %v15165_v49  ;;  %v15204_v55 = vld [vmem:[#allocation10 + $0x40] ss:$16 sps:$4 sm:$0xff]   ;;  %v15207_v49 = vld [vmem:[#allocation10 + $0x48] ss:$16 sps:$4 sm:$0xff]  }
 0xa5d   : > { %5786 = vmatprep.subr.bf16.mxu0 %v15170_v56  ;;  %5868 = vmatprep.subr.bf16.mxu1 %v15173_v58  ;;  %v15212_v56 = vld [vmem:[#allocation10 + $0x64] ss:$16 sps:$4 sm:$0xff]   ;;  %v15215_v58 = vld [vmem:[#allocation10 + $0x6c] ss:$16 sps:$4 sm:$0xff]  }
 0xa60   : > { %5787 = vmatpush1.bf16.msra.mxu0 %v15168_v59  ;;  %5869 = vmatpush1.bf16.msra.mxu1 %v15171_v60  ;;  %v15210_v59 = vld [vmem:[#allocation10 + $0x60] ss:$16 sps:$4 sm:$0xff]   ;;  %v15213_v60 = vld [vmem:[#allocation10 + $0x68] ss:$16 sps:$4 sm:$0xff]  }
 0xa61   : > { %5788 = vmatprep.subr.bf16.mxu0 %v15176_v61  ;;  %5870 = vmatprep.subr.bf16.mxu1 %v15179_v62  ;;  %v15218_v61 = vld [vmem:[#allocation10 + $0x84] ss:$16 sps:$4 sm:$0xff]   ;;  %v15221_v62 = vld [vmem:[#allocation10 + $0x8c] ss:$16 sps:$4 sm:$0xff]  }
 0xa64   : > { %5789 = vmatpush1.bf16.msra.mxu0 %v15174_v1  ;;  %5871 = vmatpush1.bf16.msra.mxu1 %v15177_v2  ;;  %v15216_v1 = vld [vmem:[#allocation10 + $0x80] ss:$16 sps:$4 sm:$0xff]   ;;  %v15219_v2 = vld [vmem:[#allocation10 + $0x88] ss:$16 sps:$4 sm:$0xff]  }
 0xa65   : > { %5790 = vmatprep.subr.bf16.mxu0 %v15182_v3  ;;  %5872 = vmatprep.subr.bf16.mxu1 %v15185_v4  ;;  %v15224_v3 = vld [vmem:[#allocation10 + $0xa4] ss:$16 sps:$4 sm:$0xff]   ;;  %v15227_v4 = vld [vmem:[#allocation10 + $0xac] ss:$16 sps:$4 sm:$0xff]  }
 0xa68   : > { %5791 = vmatpush1.bf16.msra.mxu0 %v15180_v5  ;;  %5873 = vmatpush1.bf16.msra.mxu1 %v15183_v6  ;;  %v15222_v5 = vld [vmem:[#allocation10 + $0xa0] ss:$16 sps:$4 sm:$0xff]   ;;  %v15225_v6 = vld [vmem:[#allocation10 + $0xa8] ss:$16 sps:$4 sm:$0xff]  }
 0xa69   : > { %5792 = vmatprep.subr.bf16.mxu0 %v15188_v42  ;;  %5874 = vmatprep.subr.bf16.mxu1 %v15191_v7  ;;  %v15230_v42 = vld [vmem:[#allocation10 + $0xc4] ss:$16 sps:$4 sm:$0xff]   ;;  %v15233_v7 = vld [vmem:[#allocation10 + $0xcc] ss:$16 sps:$4 sm:$0xff]  }
 0xa6c   : > { %5793 = vmatpush1.bf16.msra.mxu0 %v15186_v8  ;;  %5875 = vmatpush1.bf16.msra.mxu1 %v15189_v9  ;;  %v15228_v8 = vld [vmem:[#allocation10 + $0xc0] ss:$16 sps:$4 sm:$0xff]   ;;  %v15231_v9 = vld [vmem:[#allocation10 + $0xc8] ss:$16 sps:$4 sm:$0xff]  }
 0xa6f   : > { %5795 = vmatmul.mubr.bf16.vlgmr.msra.gmra.mrb[20].mxu0 %v4950_v10  ;;  %5877 = vmatmul.mubr.bf16.vlgmr.msra.gmra.mrb[12].mxu1 %v4950_v10  ;;  %v15236_v10 = vld [vmem:[#allocation10 + $0xe4] ss:$16 sps:$4 sm:$0xff]  }
 0xa70   : > { %5948 = vmatprep.mubr.bf16.mxu0 %v16650_v15  ;;  %5989 = vmatprep.mubr.bf16.mxu1 %v16650_v15 }
 0xb42   : > { %v5796_v22 = vpop.f32.mrb[20].mxu0  ;;  %v5878_v23 = vpop.f32.mrb[12].mxu1 }
 0xb43   : > { %v14007_v24 = vadd.f32 %v5796_v22, %v2779_v12  ;;  %v14009_v26 = vadd.f32 %v5878_v23, %v2787_v13  ;;  %v5798_v57 = vpop.f32.mrb[21].mxu0  ;;  %v5880_v27 = vpop.f32.mrb[13].mxu1  ;;  %v15234_v12 = vld [vmem:[#allocation10 + $0xe0] ss:$16 sps:$4 sm:$0xff]   ;;  %v15237_v13 = vld [vmem:[#allocation10 + $0xe8] ss:$16 sps:$4 sm:$0xff]  }
 0xb44   : > { %v14008_v28 = vadd.f32 %v5798_v57, %v2783_v14  ;;  %v14010_v29 = vadd.f32 %v5880_v27, %v2791_v19  ;;  %v5800_v63 = vpop.f32.mrb[22].mxu0  ;;  %v5882_v30 = vpop.f32.mrb[14].mxu1  ;;  %v15242_v14 = vld [vmem:[#allocation10 + $0x104] ss:$16 sps:$4 sm:$0xff]   ;;  %v15245_v19 = vld [vmem:[#allocation10 + $0x10c] ss:$16 sps:$4 sm:$0xff]  }
 0xb45   : > { %v5889_v31 = vmax.f32 %v14007_v24, 0.0  ;;  %v5891_v32 = vmax.f32 %v14009_v26, 0.0  ;;  %v5801_v33 = vpop.f32.mrb[23].mxu0  ;;  %v5883_v34 = vpop.f32.mrb[15].mxu1  ;;  %v15240_v22 = vld [vmem:[#allocation10 + $0x100] ss:$16 sps:$4 sm:$0xff]  }
 0xb46   : > { %v5890_v35 = vmax.f32 %v14008_v28, 0.0  ;;  %v5892_v36 = vmax.f32 %v14010_v29, 0.0  ;;  %v15243_v23 = vld [vmem:[#allocation10 + $0x108] ss:$16 sps:$4 sm:$0xff]   ;;  %v15248_v24 = vld [vmem:[#allocation10 + $0x124] ss:$16 sps:$4 sm:$0xff]  }
 0xb47   : > { %v5893_v37 = vpack.c.bf16 %v5889_v31, %v5889_v31  ;;  %v5895_v38 = vpack.c.bf16 %v5891_v32, %v5891_v32  ;;  %v15251_v26 = vld [vmem:[#allocation10 + $0x12c] ss:$16 sps:$4 sm:$0xff]   ;;  %v15246_v57 = vld [vmem:[#allocation10 + $0x120] ss:$16 sps:$4 sm:$0xff]   ;;  %v15249_v27 = vld [vmem:[#allocation10 + $0x128] ss:$16 sps:$4 sm:$0xff]  }
 0xb48   : > { %v17356_v39 = vpack.c.bf16 %v5890_v35, %v5890_v35  ;;  %v17358_v40 = vpack.c.bf16 %v5892_v36, %v5892_v36  ;;  %v15254_v28 = vld [vmem:[#allocation10 + $0x144] ss:$16 sps:$4 sm:$0xff]   ;;  %v15257_v29 = vld [vmem:[#allocation10 + $0x14c] ss:$16 sps:$4 sm:$0xff]   ;;  %v15252_v63 = vld [vmem:[#allocation10 + $0x140] ss:$16 sps:$4 sm:$0xff]  }
 0xb49   : > { %v17361_v46 = vsel %vm5903_vm5, %v5893_v37, 0  ;;  %v17364_v47 = vsel %vm5903_vm5, %v5895_v38, 0  ;;  %v15255_v30 = vld [vmem:[#allocation10 + $0x148] ss:$16 sps:$4 sm:$0xff]   ;;  %v15260_v31 = vld [vmem:[#allocation10 + $0x164] ss:$16 sps:$4 sm:$0xff]  }
 0xb4a   : > { %13009 = vmatprep.subr.msk.bf16.mxu0 %vm5903_vm5, %v17356_v39  ;;  %13011 = vmatprep.subr.msk.bf16.mxu1 %vm5903_vm5, %v17358_v40  ;;  %v15263_v32 = vld [vmem:[#allocation10 + $0x16c] ss:$16 sps:$4 sm:$0xff]   ;;  %v15258_v33 = vld [vmem:[#allocation10 + $0x160] ss:$16 sps:$4 sm:$0xff]   ;;  %v15261_v34 = vld [vmem:[#allocation10 + $0x168] ss:$16 sps:$4 sm:$0xff]  }
 0xb4b   : > { %5917 = vmatpush1.bf16.msra.mxu0 %v17361_v46  ;;  %5958 = vmatpush1.bf16.msra.mxu1 %v17364_v47  ;;  %v15266_v35 = vld [vmem:[#allocation10 + $0x184] ss:$16 sps:$4 sm:$0xff]   ;;  %v15269_v36 = vld [vmem:[#allocation10 + $0x18c] ss:$16 sps:$4 sm:$0xff]   ;;  %v15264_v37 = vld [vmem:[#allocation10 + $0x180] ss:$16 sps:$4 sm:$0xff]  }
 0xb4c   : > { %6770 = vmatprep.subr.bf16.mxu0 %v15194_v41  ;;  %6852 = vmatprep.subr.bf16.mxu1 %v15197_v43  ;;  %v15267_v38 = vld [vmem:[#allocation10 + $0x188] ss:$16 sps:$4 sm:$0xff]   ;;  %v15272_v41 = vld [vmem:[#allocation10 + $0x1a4] ss:$16 sps:$4 sm:$0xff]   ;;  %v15275_v43 = vld [vmem:[#allocation10 + $0x1ac] ss:$16 sps:$4 sm:$0xff]  }
 0xb4e   : > { %13010 = vmatmul.mubr.msk.bf16.vlgmr.msra.gmra.mrb[36].mxu0 %vm5899_vm6, %v5898_v50  ;;  %13012 = vmatmul.mubr.msk.bf16.vlgmr.msra.gmra.mrb[28].mxu1 %vm5899_vm6, %v5898_v50  ;;  %v15270_v50 = vld [vmem:[#allocation10 + $0x1a0] ss:$16 sps:$4 sm:$0xff]  }
 0xb4f   : > { %6771 = vmatpush1.bf16.msra.mxu0 %v15192_v51  ;;  %6853 = vmatpush1.bf16.msra.mxu1 %v15195_v52  ;;  %v15273_v51 = vld [vmem:[#allocation10 + $0x1a8] ss:$16 sps:$4 sm:$0xff]   ;;  %v15278_v52 = vld [vmem:[#allocation10 + $0x1c4] ss:$16 sps:$4 sm:$0xff]  }
 0xb50   : > { %6772 = vmatprep.subr.bf16.mxu0 %v15200_v44  ;;  %6854 = vmatprep.subr.bf16.mxu1 %v15203_v45  ;;  %v15281_v44 = vld [vmem:[#allocation10 + $0x1cc] ss:$16 sps:$4 sm:$0xff]   ;;  %v15276_v45 = vld [vmem:[#allocation10 + $0x1c0] ss:$16 sps:$4 sm:$0xff]  }
 0xb53   : > { %6773 = vmatpush1.bf16.msra.mxu0 %v15198_v25  ;;  %6855 = vmatpush1.bf16.msra.mxu1 %v15201_v53  ;;  %v15279_v25 = vld [vmem:[#allocation10 + $0x1c8] ss:$16 sps:$4 sm:$0xff]   ;;  %v15284_v53 = vld [vmem:[#allocation10 + $0x1e4] ss:$16 sps:$4 sm:$0xff]  }
 0xb54   : > { %6774 = vmatprep.subr.bf16.mxu0 %v15206_v54  ;;  %6856 = vmatprep.subr.bf16.mxu1 %v15209_v48  ;;  %v15287_v54 = vld [vmem:[#allocation10 + $0x1ec] ss:$16 sps:$4 sm:$0xff]   ;;  %v15282_v48 = vld [vmem:[#allocation10 + $0x1e0] ss:$16 sps:$4 sm:$0xff]  }
 0xb57   : > { %6775 = vmatpush1.bf16.msra.mxu0 %v15204_v55  ;;  %6857 = vmatpush1.bf16.msra.mxu1 %v15207_v49  ;;  %v15285_v55 = vld [vmem:[#allocation10 + $0x1e8] ss:$16 sps:$4 sm:$0xff]   ;;  %v15290_v49 = vld [vmem:[#allocation10 + $0x204] ss:$16 sps:$4 sm:$0xff]  }
 0xb58   : > { %6776 = vmatprep.subr.bf16.mxu0 %v15212_v56  ;;  %6858 = vmatprep.subr.bf16.mxu1 %v15215_v58  ;;  %v15293_v56 = vld [vmem:[#allocation10 + $0x20c] ss:$16 sps:$4 sm:$0xff]  }
 0xb5b   : > { %6777 = vmatpush1.bf16.msra.mxu0 %v15210_v59  ;;  %6859 = vmatpush1.bf16.msra.mxu1 %v15213_v60 }
 0xb5c   : > { %6778 = vmatprep.subr.bf16.mxu0 %v15218_v61  ;;  %6860 = vmatprep.subr.bf16.mxu1 %v15221_v62 }
 0xb5f   : > { %6779 = vmatpush1.bf16.msra.mxu0 %v15216_v1  ;;  %6861 = vmatpush1.bf16.msra.mxu1 %v15219_v2  ;;  %v15288_v2 = vld [vmem:[#allocation10 + $0x200] ss:$16 sps:$4 sm:$0xff]  }
 0xb60   : > { %6780 = vmatprep.subr.bf16.mxu0 %v15224_v3  ;;  %6862 = vmatprep.subr.bf16.mxu1 %v15227_v4  ;;  %v15291_v3 = vld [vmem:[#allocation10 + $0x208] ss:$16 sps:$4 sm:$0xff]  }
 0xb63   : > { %6781 = vmatpush1.bf16.msra.mxu0 %v15222_v5  ;;  %6863 = vmatpush1.bf16.msra.mxu1 %v15225_v6 }
 0xb64   : > { %6782 = vmatprep.subr.bf16.mxu0 %v15230_v42  ;;  %6864 = vmatprep.subr.bf16.mxu1 %v15233_v7  ;;  %v15296_v42 = vld [vmem:[#allocation10 + $0x224] ss:$16 sps:$4 sm:$0xff]   ;;  %v15299_v7 = vld [vmem:[#allocation10 + $0x22c] ss:$16 sps:$4 sm:$0xff]  }
 0xb67   : > { %6783 = vmatpush1.bf16.msra.mxu0 %v15228_v8  ;;  %6865 = vmatpush1.bf16.msra.mxu1 %v15231_v9 }
 0xb68   : > { %6784 = vmatprep.subr.bf16.mxu0 %v15236_v10  ;;  %6866 = vmatprep.subr.bf16.mxu1 %v15239_v11  ;;  %v15294_v10 = vld [vmem:[#allocation10 + $0x220] ss:$16 sps:$4 sm:$0xff]   ;;  %v15297_v11 = vld [vmem:[#allocation10 + $0x228] ss:$16 sps:$4 sm:$0xff]  }
 0xb6b   : > { %6785 = vmatpush1.bf16.msra.mxu0 %v15234_v12  ;;  %6867 = vmatpush1.bf16.msra.mxu1 %v15237_v13  ;;  %v15302_v12 = vld [vmem:[#allocation10 + $0x244] ss:$16 sps:$4 sm:$0xff]   ;;  %v15305_v13 = vld [vmem:[#allocation10 + $0x24c] ss:$16 sps:$4 sm:$0xff]  }
 0xb6c   : > { %6786 = vmatprep.subr.bf16.mxu0 %v15242_v14  ;;  %6868 = vmatprep.subr.bf16.mxu1 %v15245_v19  ;;  %v15300_v14 = vld [vmem:[#allocation10 + $0x240] ss:$16 sps:$4 sm:$0xff]   ;;  %v15303_v19 = vld [vmem:[#allocation10 + $0x248] ss:$16 sps:$4 sm:$0xff]  }
 0xb6f   : > { %6787 = vmatpush1.bf16.msra.mxu0 %v15240_v22  ;;  %6869 = vmatpush1.bf16.msra.mxu1 %v15243_v23  ;;  %v15308_v22 = vld [vmem:[#allocation10 + $0x264] ss:$16 sps:$4 sm:$0xff]   ;;  %v15311_v23 = vld [vmem:[#allocation10 + $0x26c] ss:$16 sps:$4 sm:$0xff]  }
 0xb70   : > { %6788 = vmatprep.subr.bf16.mxu0 %v15248_v24  ;;  %6870 = vmatprep.subr.bf16.mxu1 %v15251_v26  ;;  %v15306_v24 = vld [vmem:[#allocation10 + $0x260] ss:$16 sps:$4 sm:$0xff]   ;;  %v15309_v26 = vld [vmem:[#allocation10 + $0x268] ss:$16 sps:$4 sm:$0xff]  }
 0xb73   : > { %6789 = vmatpush1.bf16.msra.mxu0 %v15246_v57  ;;  %6871 = vmatpush1.bf16.msra.mxu1 %v15249_v27  ;;  %v15314_v57 = vld [vmem:[#allocation10 + $0x284] ss:$16 sps:$4 sm:$0xff]   ;;  %v15317_v27 = vld [vmem:[#allocation10 + $0x28c] ss:$16 sps:$4 sm:$0xff]  }
 0xb74   : > { %6790 = vmatprep.subr.bf16.mxu0 %v15254_v28  ;;  %6872 = vmatprep.subr.bf16.mxu1 %v15257_v29  ;;  %v15312_v28 = vld [vmem:[#allocation10 + $0x280] ss:$16 sps:$4 sm:$0xff]   ;;  %v15315_v29 = vld [vmem:[#allocation10 + $0x288] ss:$16 sps:$4 sm:$0xff]  }
 0xb77   : > { %6791 = vmatpush1.bf16.msra.mxu0 %v15252_v63  ;;  %6873 = vmatpush1.bf16.msra.mxu1 %v15255_v30  ;;  %v15320_v63 = vld [vmem:[#allocation10 + $0x2a4] ss:$16 sps:$4 sm:$0xff]   ;;  %v15323_v30 = vld [vmem:[#allocation10 + $0x2ac] ss:$16 sps:$4 sm:$0xff]  }
 0xb78   : > { %6792 = vmatprep.subr.bf16.mxu0 %v15260_v31  ;;  %6874 = vmatprep.subr.bf16.mxu1 %v15263_v32  ;;  %v15318_v31 = vld [vmem:[#allocation10 + $0x2a0] ss:$16 sps:$4 sm:$0xff]   ;;  %v15321_v32 = vld [vmem:[#allocation10 + $0x2a8] ss:$16 sps:$4 sm:$0xff]  }
 0xb7b   : > { %6793 = vmatpush1.bf16.msra.mxu0 %v15258_v33  ;;  %6875 = vmatpush1.bf16.msra.mxu1 %v15261_v34  ;;  %v15326_v33 = vld [vmem:[#allocation10 + $0x2c4] ss:$16 sps:$4 sm:$0xff]   ;;  %v15329_v34 = vld [vmem:[#allocation10 + $0x2cc] ss:$16 sps:$4 sm:$0xff]  }
 0xb7c   : > { %6794 = vmatprep.subr.bf16.mxu0 %v15266_v35  ;;  %6876 = vmatprep.subr.bf16.mxu1 %v15269_v36  ;;  %v15324_v35 = vld [vmem:[#allocation10 + $0x2c0] ss:$16 sps:$4 sm:$0xff]   ;;  %v15327_v36 = vld [vmem:[#allocation10 + $0x2c8] ss:$16 sps:$4 sm:$0xff]  }
 0xb7f   : > { %6795 = vmatpush1.bf16.msra.mxu0 %v15264_v37  ;;  %6877 = vmatpush1.bf16.msra.mxu1 %v15267_v38  ;;  %v15332_v37 = vld [vmem:[#allocation10 + $0x2e4] ss:$16 sps:$4 sm:$0xff]   ;;  %v15335_v38 = vld [vmem:[#allocation10 + $0x2ec] ss:$16 sps:$4 sm:$0xff]  }
 0xb80   : > { %6796 = vmatprep.subr.bf16.mxu0 %v15272_v41  ;;  %6878 = vmatprep.subr.bf16.mxu1 %v15275_v43  ;;  %v15330_v41 = vld [vmem:[#allocation10 + $0x2e0] ss:$16 sps:$4 sm:$0xff]   ;;  %v15333_v43 = vld [vmem:[#allocation10 + $0x2e8] ss:$16 sps:$4 sm:$0xff]  }
 0xb83   : > { %6797 = vmatpush1.bf16.msra.mxu0 %v15270_v50  ;;  %6879 = vmatpush1.bf16.msra.mxu1 %v15273_v51  ;;  %v15338_v50 = vld [vmem:[#allocation10 + $0x304] ss:$16 sps:$4 sm:$0xff]   ;;  %v15341_v51 = vld [vmem:[#allocation10 + $0x30c] ss:$16 sps:$4 sm:$0xff]  }
 0xb84   : > { %6798 = vmatprep.subr.bf16.mxu0 %v15278_v52  ;;  %6880 = vmatprep.subr.bf16.mxu1 %v15281_v44  ;;  %v15336_v52 = vld [vmem:[#allocation10 + $0x300] ss:$16 sps:$4 sm:$0xff]   ;;  %v15339_v44 = vld [vmem:[#allocation10 + $0x308] ss:$16 sps:$4 sm:$0xff]  }
 0xb87   : > { %6799 = vmatpush1.bf16.msra.mxu0 %v15276_v45  ;;  %6881 = vmatpush1.bf16.msra.mxu1 %v15279_v25  ;;  %v15344_v45 = vld [vmem:[#allocation10 + $0x324] ss:$16 sps:$4 sm:$0xff]   ;;  %v15347_v25 = vld [vmem:[#allocation10 + $0x32c] ss:$16 sps:$4 sm:$0xff]  }
 0xb88   : > { %6800 = vmatprep.subr.bf16.mxu0 %v15284_v53  ;;  %6882 = vmatprep.subr.bf16.mxu1 %v15287_v54  ;;  %v15342_v53 = vld [vmem:[#allocation10 + $0x320] ss:$16 sps:$4 sm:$0xff]   ;;  %v15345_v54 = vld [vmem:[#allocation10 + $0x328] ss:$16 sps:$4 sm:$0xff]  }
 0xb8b   : > { %6801 = vmatpush1.bf16.msra.mxu0 %v15282_v48  ;;  %6883 = vmatpush1.bf16.msra.mxu1 %v15285_v55  ;;  %v15350_v48 = vld [vmem:[#allocation10 + $0x344] ss:$16 sps:$4 sm:$0xff]   ;;  %v15353_v55 = vld [vmem:[#allocation10 + $0x34c] ss:$16 sps:$4 sm:$0xff]  }
 0xb8c   : > { %6811 = vmatprep.subr.bf16.mxu0 %v15290_v49  ;;  %6893 = vmatprep.subr.bf16.mxu1 %v15293_v56  ;;  %v15348_v49 = vld [vmem:[#allocation10 + $0x340] ss:$16 sps:$4 sm:$0xff]   ;;  %v15351_v56 = vld [vmem:[#allocation10 + $0x348] ss:$16 sps:$4 sm:$0xff]  }
 0xc21   : > { %v5950_v58 = vpop.f32.mrb[36].mxu0  ;;  %v17377_v59 = vpop.f32.mrb[28].mxu1 }
 0xc22   : > { %v5952_v60 = vpop.f32.mrb[37].mxu0  ;;  %v5993_v61 = vpop.f32.mrb[29].mxu1  ;;  %v5998_v5 = vpack.c.bf16 %v5950_v58, %v5950_v58  ;;  %v15356_v58 = vld [vmem:[#allocation10 + $0x364] ss:$16 sps:$4 sm:$0xff]  }
 0xc23   : > { %v5999_v62 = vpack.c.bf16 %v5952_v60, %v5952_v60  ;;  %v5954_v1 = vpop.f32.mrb[38].mxu0  ;;  %v5995_v4 = vpop.f32.mrb[30].mxu1  ;;  %v6001_v9 = vpack.c.bf16 %v5993_v61, %v5993_v61  ;;  %v15359_v60 = vld [vmem:[#allocation10 + $0x36c] ss:$16 sps:$4 sm:$0xff]   ;;  %v15354_v61 = vld [vmem:[#allocation10 + $0x360] ss:$16 sps:$4 sm:$0xff]  }
 0xc24   : > { %v5955_v6 = vpop.f32.mrb[39].mxu0  ;;  %v5996_v8 = vpop.f32.mrb[31].mxu1  ;;  %v15362_v1 = vld [vmem:[#allocation10 + $0x384] ss:$16 sps:$4 sm:$0xff]   ;;  %v15363_v4 = vld [vmem:[#allocation10 + $0x388] ss:$16 sps:$4 sm:$0xff]  }
 0xc25   : > { %6802 = vmatprep.mubr.bf16.mxu0 %v5999_v62  ;;  %6884 = vmatprep.mubr.bf16.mxu1 %v5999_v62  ;;  %v15357_v62 = vld [vmem:[#allocation10 + $0x368] ss:$16 sps:$4 sm:$0xff]   ;;  %v15371_v6 = vld [vmem:[#allocation10 + $0x3ac] ss:$16 sps:$4 sm:$0xff]   ;;  %v15374_v8 = vld [vmem:[#allocation10 + $0x3c4] ss:$16 sps:$4 sm:$0xff]  }
 0xc26   : > { %6803 = vmatmul.mubr.bf16.vlgmr.msra.gmra.mrb[40].mxu0 %v5998_v5  ;;  %6885 = vmatmul.mubr.bf16.vlgmr.msra.gmra.mrb[32].mxu1 %v5998_v5  ;;  %v15368_v5 = vld [vmem:[#allocation10 + $0x3a4] ss:$16 sps:$4 sm:$0xff]  }
 0xc27   : > { %6812 = vmatpush1.bf16.msra.mxu0 %v15288_v2  ;;  %6894 = vmatpush1.bf16.msra.mxu1 %v15291_v3  ;;  %v15365_v2 = vld [vmem:[#allocation10 + $0x38c] ss:$16 sps:$4 sm:$0xff]   ;;  %v15360_v3 = vld [vmem:[#allocation10 + $0x380] ss:$16 sps:$4 sm:$0xff]  }
 0xc28   : > { %6813 = vmatprep.subr.bf16.mxu0 %v15296_v42  ;;  %6895 = vmatprep.subr.bf16.mxu1 %v15299_v7  ;;  %v15366_v42 = vld [vmem:[#allocation10 + $0x3a0] ss:$16 sps:$4 sm:$0xff]   ;;  %v15369_v7 = vld [vmem:[#allocation10 + $0x3a8] ss:$16 sps:$4 sm:$0xff]  }
 0xc29   : > { %6843 = vmatprep.mubr.bf16.mxu0 %v6001_v9  ;;  %6925 = vmatprep.mubr.bf16.mxu1 %v6001_v9  ;;  %v15377_v9 = vld [vmem:[#allocation10 + $0x3cc] ss:$16 sps:$4 sm:$0xff]  }
 0xc2b   : > { %6814 = vmatpush1.bf16.msra.mxu0 %v15294_v10  ;;  %6896 = vmatpush1.bf16.msra.mxu1 %v15297_v11  ;;  %v15372_v10 = vld [vmem:[#allocation10 + $0x3c0] ss:$16 sps:$4 sm:$0xff]   ;;  %v15375_v11 = vld [vmem:[#allocation10 + $0x3c8] ss:$16 sps:$4 sm:$0xff]  }
 0xc2c   : > { %6815 = vmatprep.subr.bf16.mxu0 %v15302_v12  ;;  %6897 = vmatprep.subr.bf16.mxu1 %v15305_v13  ;;  %v15380_v12 = vld [vmem:[#allocation10 + $0x3e4] ss:$16 sps:$4 sm:$0xff]   ;;  %v15383_v13 = vld [vmem:[#allocation10 + $0x3ec] ss:$16 sps:$4 sm:$0xff]  }
 0xc2f   : > { %6816 = vmatpush1.bf16.msra.mxu0 %v15300_v14  ;;  %6898 = vmatpush1.bf16.msra.mxu1 %v15303_v19  ;;  %v15378_v14 = vld [vmem:[#allocation10 + $0x3e0] ss:$16 sps:$4 sm:$0xff]   ;;  %v15381_v19 = vld [vmem:[#allocation10 + $0x3e8] ss:$16 sps:$4 sm:$0xff]  }
 0xc30   : > { %6817 = vmatprep.subr.bf16.mxu0 %v15308_v22  ;;  %6899 = vmatprep.subr.bf16.mxu1 %v15311_v23  ;;  %v6000_v22 = vpack.c.bf16 %v17377_v59, %v17377_v59  ;;  %v15387_v23 = vld [vmem:[#allocation10 + $0x404] ss:$16 sps:$4 sm:$0xff]  }
 0xc33   : > { %6818 = vmatpush1.bf16.msra.mxu0 %v15306_v24  ;;  %6900 = vmatpush1.bf16.msra.mxu1 %v15309_v26  ;;  %v15390_v24 = vld [vmem:[#allocation10 + $0x40c] ss:$16 sps:$4 sm:$0xff]   ;;  %v15384_v26 = vld [vmem:[%s17683_s7] ss:$0 sps:$4 sm:$0x22]  }
 0xc34   : > { %6819 = vmatprep.subr.bf16.mxu0 %v15314_v57  ;;  %6901 = vmatprep.subr.bf16.mxu1 %v15317_v27  ;;  %v6963_v59 = vrot.slane %v15384_v26, 1  ;;  %v15385_v57 = vld [vmem:[#allocation10 + $0x400] ss:$16 sps:$4 sm:$0xff]   ;;  %v15388_v27 = vld [vmem:[#allocation10 + $0x408] ss:$16 sps:$4 sm:$0xff]  }
 0xc35   : > { %v15468_v26 = vld [vmem:[#allocation10 + $0x5ac] ss:$16 sps:$4 sm:$0xff]  }
 0xc37   : > { %6820 = vmatpush1.bf16.msra.mxu0 %v15312_v28  ;;  %6902 = vmatpush1.bf16.msra.mxu1 %v15315_v29  ;;  %v15393_v28 = vld [vmem:[#allocation10 + $0x424] ss:$16 sps:$4 sm:$0xff]   ;;  %v15396_v29 = vld [vmem:[#allocation10 + $0x42c] ss:$16 sps:$4 sm:$0xff]  }
 0xc38   : > { %6821 = vmatprep.subr.bf16.mxu0 %v15320_v63  ;;  %6903 = vmatprep.subr.bf16.mxu1 %v15323_v30  ;;  %v15391_v63 = vld [vmem:[#allocation10 + $0x420] ss:$16 sps:$4 sm:$0xff]   ;;  %v15394_v30 = vld [vmem:[#allocation10 + $0x428] ss:$16 sps:$4 sm:$0xff]  }
 0xc3b   : > { %6822 = vmatpush1.bf16.msra.mxu0 %v15318_v31  ;;  %6904 = vmatpush1.bf16.msra.mxu1 %v15321_v32  ;;  %v15399_v31 = vld [vmem:[#allocation10 + $0x444] ss:$16 sps:$4 sm:$0xff]   ;;  %v15402_v32 = vld [vmem:[#allocation10 + $0x44c] ss:$16 sps:$4 sm:$0xff]  }
 0xc3c   : > { %6823 = vmatprep.subr.bf16.mxu0 %v15326_v33  ;;  %6905 = vmatprep.subr.bf16.mxu1 %v15329_v34  ;;  %v15397_v33 = vld [vmem:[#allocation10 + $0x440] ss:$16 sps:$4 sm:$0xff]   ;;  %v15400_v34 = vld [vmem:[#allocation10 + $0x448] ss:$16 sps:$4 sm:$0xff]  }
 0xc3f   : > { %6824 = vmatpush1.bf16.msra.mxu0 %v15324_v35  ;;  %6906 = vmatpush1.bf16.msra.mxu1 %v15327_v36  ;;  %v15405_v35 = vld [vmem:[#allocation10 + $0x464] ss:$16 sps:$4 sm:$0xff]   ;;  %v15408_v36 = vld [vmem:[#allocation10 + $0x46c] ss:$16 sps:$4 sm:$0xff]  }
 0xc40   : > { %6825 = vmatprep.subr.bf16.mxu0 %v15332_v37  ;;  %6907 = vmatprep.subr.bf16.mxu1 %v15335_v38  ;;  %v15403_v37 = vld [vmem:[#allocation10 + $0x460] ss:$16 sps:$4 sm:$0xff]   ;;  %v15406_v38 = vld [vmem:[#allocation10 + $0x468] ss:$16 sps:$4 sm:$0xff]  }
 0xc43   : > { %6826 = vmatpush1.bf16.msra.mxu0 %v15330_v41  ;;  %6908 = vmatpush1.bf16.msra.mxu1 %v15333_v43  ;;  %v15411_v41 = vld [vmem:[#allocation10 + $0x484] ss:$16 sps:$4 sm:$0xff]   ;;  %v15414_v43 = vld [vmem:[#allocation10 + $0x48c] ss:$16 sps:$4 sm:$0xff]  }
 0xc44   : > { %6827 = vmatprep.subr.bf16.mxu0 %v15338_v50  ;;  %6909 = vmatprep.subr.bf16.mxu1 %v15341_v51  ;;  %v15409_v50 = vld [vmem:[#allocation10 + $0x480] ss:$16 sps:$4 sm:$0xff]   ;;  %v15412_v51 = vld [vmem:[#allocation10 + $0x488] ss:$16 sps:$4 sm:$0xff]  }
 0xc47   : > { %6828 = vmatpush1.bf16.msra.mxu0 %v15336_v52  ;;  %6910 = vmatpush1.bf16.msra.mxu1 %v15339_v44  ;;  %v15417_v52 = vld [vmem:[#allocation10 + $0x4a4] ss:$16 sps:$4 sm:$0xff]   ;;  %v15420_v44 = vld [vmem:[#allocation10 + $0x4ac] ss:$16 sps:$4 sm:$0xff]  }
 0xc48   : > { %6829 = vmatprep.subr.bf16.mxu0 %v15344_v45  ;;  %6911 = vmatprep.subr.bf16.mxu1 %v15347_v25  ;;  %v15415_v45 = vld [vmem:[#allocation10 + $0x4a0] ss:$16 sps:$4 sm:$0xff]   ;;  %v15418_v25 = vld [vmem:[#allocation10 + $0x4a8] ss:$16 sps:$4 sm:$0xff]  }
 0xc4b   : > { %6830 = vmatpush1.bf16.msra.mxu0 %v15342_v53  ;;  %6912 = vmatpush1.bf16.msra.mxu1 %v15345_v54  ;;  %v15423_v53 = vld [vmem:[#allocation10 + $0x4c4] ss:$16 sps:$4 sm:$0xff]   ;;  %v15426_v54 = vld [vmem:[#allocation10 + $0x4cc] ss:$16 sps:$4 sm:$0xff]  }
 0xc4c   : > { %6831 = vmatprep.subr.bf16.mxu0 %v15350_v48  ;;  %6913 = vmatprep.subr.bf16.mxu1 %v15353_v55  ;;  %v15421_v48 = vld [vmem:[#allocation10 + $0x4c0] ss:$16 sps:$4 sm:$0xff]   ;;  %v15424_v55 = vld [vmem:[#allocation10 + $0x4c8] ss:$16 sps:$4 sm:$0xff]  }
 0xc4f   : > { %6832 = vmatpush1.bf16.msra.mxu0 %v15348_v49  ;;  %6914 = vmatpush1.bf16.msra.mxu1 %v15351_v56  ;;  %v15429_v49 = vld [vmem:[#allocation10 + $0x4e4] ss:$16 sps:$4 sm:$0xff]   ;;  %v15432_v56 = vld [vmem:[#allocation10 + $0x4ec] ss:$16 sps:$4 sm:$0xff]  }
 0xc50   : > { %6833 = vmatprep.subr.bf16.mxu0 %v15356_v58  ;;  %6915 = vmatprep.subr.bf16.mxu1 %v15359_v60  ;;  %v15427_v58 = vld [vmem:[#allocation10 + $0x4e0] ss:$16 sps:$4 sm:$0xff]   ;;  %v15430_v60 = vld [vmem:[#allocation10 + $0x4e8] ss:$16 sps:$4 sm:$0xff]  }
 0xc53   : > { %6834 = vmatpush1.bf16.msra.mxu0 %v15354_v61  ;;  %6916 = vmatpush1.bf16.msra.mxu1 %v15357_v62  ;;  %v15435_v61 = vld [vmem:[#allocation10 + $0x504] ss:$16 sps:$4 sm:$0xff]   ;;  %v15438_v62 = vld [vmem:[#allocation10 + $0x50c] ss:$16 sps:$4 sm:$0xff]  }
 0xc54   : > { %6835 = vmatprep.subr.bf16.mxu0 %v15362_v1  ;;  %6917 = vmatprep.subr.bf16.mxu1 %v15365_v2  ;;  %v15433_v1 = vld [vmem:[#allocation10 + $0x500] ss:$16 sps:$4 sm:$0xff]   ;;  %v15436_v2 = vld [vmem:[#allocation10 + $0x508] ss:$16 sps:$4 sm:$0xff]  }
 0xc57   : > { %6836 = vmatpush1.bf16.msra.mxu0 %v15360_v3  ;;  %6918 = vmatpush1.bf16.msra.mxu1 %v15363_v4  ;;  %v15441_v3 = vld [vmem:[#allocation10 + $0x524] ss:$16 sps:$4 sm:$0xff]   ;;  %v15444_v4 = vld [vmem:[#allocation10 + $0x52c] ss:$16 sps:$4 sm:$0xff]  }
 0xc58   : > { %6837 = vmatprep.subr.bf16.mxu0 %v15368_v5  ;;  %6919 = vmatprep.subr.bf16.mxu1 %v15371_v6  ;;  %v15439_v5 = vld [vmem:[#allocation10 + $0x520] ss:$16 sps:$4 sm:$0xff]   ;;  %v15442_v6 = vld [vmem:[#allocation10 + $0x528] ss:$16 sps:$4 sm:$0xff]  }
 0xc5b   : > { %6838 = vmatpush1.bf16.msra.mxu0 %v15366_v42  ;;  %6920 = vmatpush1.bf16.msra.mxu1 %v15369_v7  ;;  %v15447_v42 = vld [vmem:[#allocation10 + $0x544] ss:$16 sps:$4 sm:$0xff]   ;;  %v15450_v7 = vld [vmem:[#allocation10 + $0x54c] ss:$16 sps:$4 sm:$0xff]  }
 0xc5c   : > { %6839 = vmatprep.subr.bf16.mxu0 %v15374_v8  ;;  %6921 = vmatprep.subr.bf16.mxu1 %v15377_v9  ;;  %v15445_v8 = vld [vmem:[#allocation10 + $0x540] ss:$16 sps:$4 sm:$0xff]   ;;  %v15448_v9 = vld [vmem:[#allocation10 + $0x548] ss:$16 sps:$4 sm:$0xff]  }
 0xc5f   : > { %6840 = vmatpush1.bf16.msra.mxu0 %v15372_v10  ;;  %6922 = vmatpush1.bf16.msra.mxu1 %v15375_v11  ;;  %v15453_v10 = vld [vmem:[#allocation10 + $0x564] ss:$16 sps:$4 sm:$0xff]   ;;  %v15456_v11 = vld [vmem:[#allocation10 + $0x56c] ss:$16 sps:$4 sm:$0xff]  }
 0xc60   : > { %6841 = vmatprep.subr.bf16.mxu0 %v15380_v12  ;;  %6923 = vmatprep.subr.bf16.mxu1 %v15383_v13  ;;  %v15451_v12 = vld [vmem:[#allocation10 + $0x560] ss:$16 sps:$4 sm:$0xff]   ;;  %v15454_v13 = vld [vmem:[#allocation10 + $0x568] ss:$16 sps:$4 sm:$0xff]  }
 0xc63   : > { %6842 = vmatpush1.bf16.msra.mxu0 %v15378_v14  ;;  %6924 = vmatpush1.bf16.msra.mxu1 %v15381_v19  ;;  %v15459_v14 = vld [vmem:[#allocation10 + $0x584] ss:$16 sps:$4 sm:$0xff]   ;;  %v15462_v19 = vld [vmem:[#allocation10 + $0x58c] ss:$16 sps:$4 sm:$0xff]  }
 0xc64   : > { %13142 = vmatprep.subr.msk.bf16.mxu0 %vm5903_vm5, %v17356_v39  ;;  %13144 = vmatprep.subr.msk.bf16.mxu1 %vm5903_vm5, %v17358_v40 }
 0xc66   : > { %6844 = vmatmul.mubr.bf16.vlgmr.msra.gmra.mrb[40].mxu0 %v6000_v22  ;;  %6926 = vmatmul.mubr.bf16.vlgmr.msra.gmra.mrb[32].mxu1 %v6000_v22  ;;  %v15457_v22 = vld [vmem:[#allocation10 + $0x580] ss:$16 sps:$4 sm:$0xff]  }
 0xc67   : > { %6968 = vmatpush1.bf16.msra.mxu0 %v17361_v46  ;;  %7009 = vmatpush1.bf16.msra.mxu1 %v17364_v47 }
 0xc68   : > { %6999 = vmatprep.mubr.bf16.mxu0 %v16650_v15  ;;  %7040 = vmatprep.mubr.bf16.mxu1 %v16650_v15 }
 0xc69   : > { %7822 = vmatprep.subr.bf16.mxu0 %v15387_v23  ;;  %7904 = vmatprep.subr.bf16.mxu1 %v15390_v24  ;;  %v15460_v23 = vld [vmem:[#allocation10 + $0x588] ss:$16 sps:$4 sm:$0xff]   ;;  %v15465_v24 = vld [vmem:[#allocation10 + $0x5a4] ss:$16 sps:$4 sm:$0xff]  }
 0xc6e   : > { %13143 = vmatmul.mubr.msk.bf16.vlgmr.msra.gmra.mrb[44].mxu0 %vm5899_vm6, %v6963_v59  ;;  %13145 = vmatmul.mubr.msk.bf16.vlgmr.msra.gmra.mrb[36].mxu1 %vm5899_vm6, %v6963_v59  ;;  %v15463_v59 = vld [vmem:[#allocation10 + $0x5a0] ss:$16 sps:$4 sm:$0xff]  }
 0xc6f   : > { %7823 = vmatpush1.bf16.msra.mxu0 %v15385_v57  ;;  %7905 = vmatpush1.bf16.msra.mxu1 %v15388_v27  ;;  %v15466_v57 = vld [vmem:[#allocation10 + $0x5a8] ss:$16 sps:$4 sm:$0xff]   ;;  %v15471_v27 = vld [vmem:[#allocation10 + $0x5c4] ss:$16 sps:$4 sm:$0xff]  }
 0xc70   : > { %7824 = vmatprep.subr.bf16.mxu0 %v15393_v28  ;;  %7906 = vmatprep.subr.bf16.mxu1 %v15396_v29  ;;  %v15474_v28 = vld [vmem:[#allocation10 + $0x5cc] ss:$16 sps:$4 sm:$0xff]   ;;  %v15469_v29 = vld [vmem:[#allocation10 + $0x5c0] ss:$16 sps:$4 sm:$0xff]  }
 0xc73   : > { %7825 = vmatpush1.bf16.msra.mxu0 %v15391_v63  ;;  %7907 = vmatpush1.bf16.msra.mxu1 %v15394_v30  ;;  %v15472_v63 = vld [vmem:[#allocation10 + $0x5c8] ss:$16 sps:$4 sm:$0xff]   ;;  %v15477_v30 = vld [vmem:[#allocation10 + $0x5e4] ss:$16 sps:$4 sm:$0xff]  }
 0xc74   : > { %7826 = vmatprep.subr.bf16.mxu0 %v15399_v31  ;;  %7908 = vmatprep.subr.bf16.mxu1 %v15402_v32  ;;  %v15480_v31 = vld [vmem:[#allocation10 + $0x5ec] ss:$16 sps:$4 sm:$0xff]   ;;  %v15475_v32 = vld [vmem:[#allocation10 + $0x5e0] ss:$16 sps:$4 sm:$0xff]  }
 0xc77   : > { %7827 = vmatpush1.bf16.msra.mxu0 %v15397_v33  ;;  %7909 = vmatpush1.bf16.msra.mxu1 %v15400_v34  ;;  %v15478_v33 = vld [vmem:[#allocation10 + $0x5e8] ss:$16 sps:$4 sm:$0xff]   ;;  %v15483_v34 = vld [vmem:[#allocation10 + $0x604] ss:$16 sps:$4 sm:$0xff]  }
 0xc78   : > { %7828 = vmatprep.subr.bf16.mxu0 %v15405_v35  ;;  %7910 = vmatprep.subr.bf16.mxu1 %v15408_v36  ;;  %v15486_v35 = vld [vmem:[#allocation10 + $0x60c] ss:$16 sps:$4 sm:$0xff]  }
 0xc7b   : > { %7829 = vmatpush1.bf16.msra.mxu0 %v15403_v37  ;;  %7911 = vmatpush1.bf16.msra.mxu1 %v15406_v38 }
 0xc7c   : > { %7830 = vmatprep.subr.bf16.mxu0 %v15411_v41  ;;  %7912 = vmatprep.subr.bf16.mxu1 %v15414_v43 }
 0xc7f   : > { %7831 = vmatpush1.bf16.msra.mxu0 %v15409_v50  ;;  %7913 = vmatpush1.bf16.msra.mxu1 %v15412_v51  ;;  %v15481_v51 = vld [vmem:[#allocation10 + $0x600] ss:$16 sps:$4 sm:$0xff]  }
 0xc80   : > { %7832 = vmatprep.subr.bf16.mxu0 %v15417_v52  ;;  %7914 = vmatprep.subr.bf16.mxu1 %v15420_v44  ;;  %v15484_v52 = vld [vmem:[#allocation10 + $0x608] ss:$16 sps:$4 sm:$0xff]  }
 0xc83   : > { %7833 = vmatpush1.bf16.msra.mxu0 %v15415_v45  ;;  %7915 = vmatpush1.bf16.msra.mxu1 %v15418_v25 }
 0xc84   : > { %7834 = vmatprep.subr.bf16.mxu0 %v15423_v53  ;;  %7916 = vmatprep.subr.bf16.mxu1 %v15426_v54  ;;  %v15489_v53 = vld [vmem:[#allocation10 + $0x624] ss:$16 sps:$4 sm:$0xff]   ;;  %v15492_v54 = vld [vmem:[#allocation10 + $0x62c] ss:$16 sps:$4 sm:$0xff]  }
 0xc87   : > { %7835 = vmatpush1.bf16.msra.mxu0 %v15421_v48  ;;  %7917 = vmatpush1.bf16.msra.mxu1 %v15424_v55 }
 0xc88   : > { %7836 = vmatprep.subr.bf16.mxu0 %v15429_v49  ;;  %7918 = vmatprep.subr.bf16.mxu1 %v15432_v56  ;;  %v15487_v49 = vld [vmem:[#allocation10 + $0x620] ss:$16 sps:$4 sm:$0xff]   ;;  %v15490_v56 = vld [vmem:[#allocation10 + $0x628] ss:$16 sps:$4 sm:$0xff]  }
 0xc8b   : > { %7837 = vmatpush1.bf16.msra.mxu0 %v15427_v58  ;;  %7919 = vmatpush1.bf16.msra.mxu1 %v15430_v60  ;;  %v15495_v58 = vld [vmem:[#allocation10 + $0x644] ss:$16 sps:$4 sm:$0xff]   ;;  %v15498_v60 = vld [vmem:[#allocation10 + $0x64c] ss:$16 sps:$4 sm:$0xff]  }
 0xc8c   : > { %7838 = vmatprep.subr.bf16.mxu0 %v15435_v61  ;;  %7920 = vmatprep.subr.bf16.mxu1 %v15438_v62  ;;  %v15493_v61 = vld [vmem:[#allocation10 + $0x640] ss:$16 sps:$4 sm:$0xff]   ;;  %v15496_v62 = vld [vmem:[#allocation10 + $0x648] ss:$16 sps:$4 sm:$0xff]  }
 0xc8f   : > { %7839 = vmatpush1.bf16.msra.mxu0 %v15433_v1  ;;  %7921 = vmatpush1.bf16.msra.mxu1 %v15436_v2  ;;  %v15501_v1 = vld [vmem:[#allocation10 + $0x664] ss:$16 sps:$4 sm:$0xff]   ;;  %v15504_v2 = vld [vmem:[#allocation10 + $0x66c] ss:$16 sps:$4 sm:$0xff]  }
 0xc90   : > { %7840 = vmatprep.subr.bf16.mxu0 %v15441_v3  ;;  %7922 = vmatprep.subr.bf16.mxu1 %v15444_v4  ;;  %v15499_v3 = vld [vmem:[#allocation10 + $0x660] ss:$16 sps:$4 sm:$0xff]   ;;  %v15502_v4 = vld [vmem:[#allocation10 + $0x668] ss:$16 sps:$4 sm:$0xff]  }
 0xc93   : > { %7841 = vmatpush1.bf16.msra.mxu0 %v15439_v5  ;;  %7923 = vmatpush1.bf16.msra.mxu1 %v15442_v6  ;;  %v15507_v5 = vld [vmem:[#allocation10 + $0x684] ss:$16 sps:$4 sm:$0xff]   ;;  %v15510_v6 = vld [vmem:[#allocation10 + $0x68c] ss:$16 sps:$4 sm:$0xff]  }
 0xc94   : > { %7842 = vmatprep.subr.bf16.mxu0 %v15447_v42  ;;  %7924 = vmatprep.subr.bf16.mxu1 %v15450_v7  ;;  %v15505_v42 = vld [vmem:[#allocation10 + $0x680] ss:$16 sps:$4 sm:$0xff]   ;;  %v15508_v7 = vld [vmem:[#allocation10 + $0x688] ss:$16 sps:$4 sm:$0xff]  }
 0xc97   : > { %7843 = vmatpush1.bf16.msra.mxu0 %v15445_v8  ;;  %7925 = vmatpush1.bf16.msra.mxu1 %v15448_v9  ;;  %v15513_v8 = vld [vmem:[#allocation10 + $0x6a4] ss:$16 sps:$4 sm:$0xff]   ;;  %v15516_v9 = vld [vmem:[#allocation10 + $0x6ac] ss:$16 sps:$4 sm:$0xff]  }
 0xc98   : > { %7844 = vmatprep.subr.bf16.mxu0 %v15453_v10  ;;  %7926 = vmatprep.subr.bf16.mxu1 %v15456_v11  ;;  %v15511_v10 = vld [vmem:[#allocation10 + $0x6a0] ss:$16 sps:$4 sm:$0xff]   ;;  %v15514_v11 = vld [vmem:[#allocation10 + $0x6a8] ss:$16 sps:$4 sm:$0xff]  }
 0xc9b   : > { %7845 = vmatpush1.bf16.msra.mxu0 %v15451_v12  ;;  %7927 = vmatpush1.bf16.msra.mxu1 %v15454_v13  ;;  %v15519_v12 = vld [vmem:[#allocation10 + $0x6c4] ss:$16 sps:$4 sm:$0xff]   ;;  %v15522_v13 = vld [vmem:[#allocation10 + $0x6cc] ss:$16 sps:$4 sm:$0xff]  }
 0xc9c   : > { %7846 = vmatprep.subr.bf16.mxu0 %v15459_v14  ;;  %7928 = vmatprep.subr.bf16.mxu1 %v15462_v19  ;;  %v15517_v14 = vld [vmem:[#allocation10 + $0x6c0] ss:$16 sps:$4 sm:$0xff]   ;;  %v15520_v19 = vld [vmem:[#allocation10 + $0x6c8] ss:$16 sps:$4 sm:$0xff]  }
 0xc9f   : > { %7847 = vmatpush1.bf16.msra.mxu0 %v15457_v22  ;;  %7929 = vmatpush1.bf16.msra.mxu1 %v15460_v23  ;;  %v15525_v22 = vld [vmem:[#allocation10 + $0x6e4] ss:$16 sps:$4 sm:$0xff]   ;;  %v15528_v23 = vld [vmem:[#allocation10 + $0x6ec] ss:$16 sps:$4 sm:$0xff]  }
 0xca0   : > { %7848 = vmatprep.subr.bf16.mxu0 %v15465_v24  ;;  %7930 = vmatprep.subr.bf16.mxu1 %v15468_v26  ;;  %v15523_v24 = vld [vmem:[#allocation10 + $0x6e0] ss:$16 sps:$4 sm:$0xff]   ;;  %v15526_v26 = vld [vmem:[#allocation10 + $0x6e8] ss:$16 sps:$4 sm:$0xff]  }
 0xca3   : > { %7849 = vmatpush1.bf16.msra.mxu0 %v15463_v59  ;;  %7931 = vmatpush1.bf16.msra.mxu1 %v15466_v57  ;;  %v15531_v59 = vld [vmem:[#allocation10 + $0x704] ss:$16 sps:$4 sm:$0xff]   ;;  %v15534_v57 = vld [vmem:[#allocation10 + $0x70c] ss:$16 sps:$4 sm:$0xff]  }
 0xca4   : > { %7850 = vmatprep.subr.bf16.mxu0 %v15471_v27  ;;  %7932 = vmatprep.subr.bf16.mxu1 %v15474_v28  ;;  %v15529_v27 = vld [vmem:[#allocation10 + $0x700] ss:$16 sps:$4 sm:$0xff]   ;;  %v15532_v28 = vld [vmem:[#allocation10 + $0x708] ss:$16 sps:$4 sm:$0xff]  }
 0xca7   : > { %7851 = vmatpush1.bf16.msra.mxu0 %v15469_v29  ;;  %7933 = vmatpush1.bf16.msra.mxu1 %v15472_v63  ;;  %v15537_v29 = vld [vmem:[#allocation10 + $0x724] ss:$16 sps:$4 sm:$0xff]   ;;  %v15540_v63 = vld [vmem:[#allocation10 + $0x72c] ss:$16 sps:$4 sm:$0xff]  }
 0xca8   : > { %7852 = vmatprep.subr.bf16.mxu0 %v15477_v30  ;;  %7934 = vmatprep.subr.bf16.mxu1 %v15480_v31  ;;  %v15535_v30 = vld [vmem:[#allocation10 + $0x720] ss:$16 sps:$4 sm:$0xff]   ;;  %v15538_v31 = vld [vmem:[#allocation10 + $0x728] ss:$16 sps:$4 sm:$0xff]  }
 0xcab   : > { %7853 = vmatpush1.bf16.msra.mxu0 %v15475_v32  ;;  %7935 = vmatpush1.bf16.msra.mxu1 %v15478_v33  ;;  %v15543_v32 = vld [vmem:[#allocation10 + $0x744] ss:$16 sps:$4 sm:$0xff]   ;;  %v15546_v33 = vld [vmem:[#allocation10 + $0x74c] ss:$16 sps:$4 sm:$0xff]  }
 0xcac   : > { %7863 = vmatprep.subr.bf16.mxu0 %v15483_v34  ;;  %7945 = vmatprep.subr.bf16.mxu1 %v15486_v35  ;;  %v15541_v34 = vld [vmem:[#allocation10 + $0x740] ss:$16 sps:$4 sm:$0xff]   ;;  %v15544_v35 = vld [vmem:[#allocation10 + $0x748] ss:$16 sps:$4 sm:$0xff]  }
 0xd41   : > { %v7001_v36 = vpop.f32.mrb[44].mxu0  ;;  %v17394_v37 = vpop.f32.mrb[36].mxu1 }
 0xd42   : > { %v7003_v38 = vpop.f32.mrb[45].mxu0  ;;  %v7044_v41 = vpop.f32.mrb[37].mxu1  ;;  %v7049_v45 = vpack.c.bf16 %v7001_v36, %v7001_v36  ;;  %v15549_v36 = vld [vmem:[#allocation10 + $0x764] ss:$16 sps:$4 sm:$0xff]  }
 0xd43   : > { %v7050_v43 = vpack.c.bf16 %v7003_v38, %v7003_v38  ;;  %v7005_v50 = vpop.f32.mrb[46].mxu0  ;;  %v7046_v44 = vpop.f32.mrb[38].mxu1  ;;  %v7052_v55 = vpack.c.bf16 %v7044_v41, %v7044_v41  ;;  %v15552_v38 = vld [vmem:[#allocation10 + $0x76c] ss:$16 sps:$4 sm:$0xff]   ;;  %v15547_v41 = vld [vmem:[#allocation10 + $0x760] ss:$16 sps:$4 sm:$0xff]  }
 0xd44   : > { %v7006_v25 = vpop.f32.mrb[47].mxu0  ;;  %v7047_v48 = vpop.f32.mrb[39].mxu1  ;;  %v15555_v50 = vld [vmem:[#allocation10 + $0x784] ss:$16 sps:$4 sm:$0xff]   ;;  %v15556_v44 = vld [vmem:[#allocation10 + $0x788] ss:$16 sps:$4 sm:$0xff]  }
 0xd45   : > { %7854 = vmatprep.mubr.bf16.mxu0 %v7050_v43  ;;  %7936 = vmatprep.mubr.bf16.mxu1 %v7050_v43  ;;  %v15550_v43 = vld [vmem:[#allocation10 + $0x768] ss:$16 sps:$4 sm:$0xff]   ;;  %v15564_v25 = vld [vmem:[#allocation10 + $0x7ac] ss:$16 sps:$4 sm:$0xff]   ;;  %v15567_v48 = vld [vmem:[#allocation10 + $0x7c4] ss:$16 sps:$4 sm:$0xff]  }
 0xd46   : > { %7855 = vmatmul.mubr.bf16.vlgmr.msra.gmra.mrb[40].mxu0 %v7049_v45  ;;  %7937 = vmatmul.mubr.bf16.vlgmr.msra.gmra.mrb[32].mxu1 %v7049_v45  ;;  %v15561_v45 = vld [vmem:[#allocation10 + $0x7a4] ss:$16 sps:$4 sm:$0xff]  }
 0xd47   : > { %7864 = vmatpush1.bf16.msra.mxu0 %v15481_v51  ;;  %7946 = vmatpush1.bf16.msra.mxu1 %v15484_v52  ;;  %v15558_v51 = vld [vmem:[#allocation10 + $0x78c] ss:$16 sps:$4 sm:$0xff]   ;;  %v15553_v52 = vld [vmem:[#allocation10 + $0x780] ss:$16 sps:$4 sm:$0xff]  }
 0xd48   : > { %7865 = vmatprep.subr.bf16.mxu0 %v15489_v53  ;;  %7947 = vmatprep.subr.bf16.mxu1 %v15492_v54  ;;  %v15559_v53 = vld [vmem:[#allocation10 + $0x7a0] ss:$16 sps:$4 sm:$0xff]   ;;  %v15562_v54 = vld [vmem:[#allocation10 + $0x7a8] ss:$16 sps:$4 sm:$0xff]  }
 0xd49   : > { %7895 = vmatprep.mubr.bf16.mxu0 %v7052_v55  ;;  %7977 = vmatprep.mubr.bf16.mxu1 %v7052_v55  ;;  %v15570_v55 = vld [vmem:[#allocation10 + $0x7cc] ss:$16 sps:$4 sm:$0xff]  }
 0xd4b   : > { %7866 = vmatpush1.bf16.msra.mxu0 %v15487_v49  ;;  %7948 = vmatpush1.bf16.msra.mxu1 %v15490_v56  ;;  %v15565_v49 = vld [vmem:[#allocation10 + $0x7c0] ss:$16 sps:$4 sm:$0xff]   ;;  %v15568_v56 = vld [vmem:[#allocation10 + $0x7c8] ss:$16 sps:$4 sm:$0xff]  }
 0xd4c   : > { %7867 = vmatprep.subr.bf16.mxu0 %v15495_v58  ;;  %7949 = vmatprep.subr.bf16.mxu1 %v15498_v60  ;;  %v15573_v58 = vld [vmem:[#allocation10 + $0x7e4] ss:$16 sps:$4 sm:$0xff]   ;;  %v15576_v60 = vld [vmem:[#allocation10 + $0x7ec] ss:$16 sps:$4 sm:$0xff]  }
 0xd4f   : > { %7868 = vmatpush1.bf16.msra.mxu0 %v15493_v61  ;;  %7950 = vmatpush1.bf16.msra.mxu1 %v15496_v62  ;;  %v15571_v61 = vld [vmem:[#allocation10 + $0x7e0] ss:$16 sps:$4 sm:$0xff]   ;;  %v15574_v62 = vld [vmem:[#allocation10 + $0x7e8] ss:$16 sps:$4 sm:$0xff]  }
 0xd50   : > { %7869 = vmatprep.subr.bf16.mxu0 %v15501_v1  ;;  %7951 = vmatprep.subr.bf16.mxu1 %v15504_v2  ;;  %v7051_v1 = vpack.c.bf16 %v17394_v37, %v17394_v37  ;;  %v15580_v2 = vld [vmem:[#allocation10 + $0x804] ss:$16 sps:$4 sm:$0xff]  }
 0xd53   : > { %7870 = vmatpush1.bf16.msra.mxu0 %v15499_v3  ;;  %7952 = vmatpush1.bf16.msra.mxu1 %v15502_v4  ;;  %v15583_v3 = vld [vmem:[#allocation10 + $0x80c] ss:$16 sps:$4 sm:$0xff]   ;;  %v15577_v4 = vld [vmem:[%s17683_s7] ss:$0 sps:$4 sm:$0x44]  }
 0xd54   : > { %7871 = vmatprep.subr.bf16.mxu0 %v15507_v5  ;;  %7953 = vmatprep.subr.bf16.mxu1 %v15510_v6  ;;  %v7994_v37 = vrot.slane %v15577_v4, 2  ;;  %v15578_v5 = vld [vmem:[#allocation10 + $0x800] ss:$16 sps:$4 sm:$0xff]   ;;  %v15581_v6 = vld [vmem:[#allocation10 + $0x808] ss:$16 sps:$4 sm:$0xff]  }
 0xd55   : > { %v15661_v4 = vld [vmem:[#allocation10 + $0x9ac] ss:$16 sps:$4 sm:$0xff]  }
 0xd57   : > { %7872 = vmatpush1.bf16.msra.mxu0 %v15505_v42  ;;  %7954 = vmatpush1.bf16.msra.mxu1 %v15508_v7  ;;  %v15586_v42 = vld [vmem:[#allocation10 + $0x824] ss:$16 sps:$4 sm:$0xff]   ;;  %v15589_v7 = vld [vmem:[#allocation10 + $0x82c] ss:$16 sps:$4 sm:$0xff]  }
 0xd58   : > { %7873 = vmatprep.subr.bf16.mxu0 %v15513_v8  ;;  %7955 = vmatprep.subr.bf16.mxu1 %v15516_v9  ;;  %v15584_v8 = vld [vmem:[#allocation10 + $0x820] ss:$16 sps:$4 sm:$0xff]   ;;  %v15587_v9 = vld [vmem:[#allocation10 + $0x828] ss:$16 sps:$4 sm:$0xff]  }
 0xd5b   : > { %7874 = vmatpush1.bf16.msra.mxu0 %v15511_v10  ;;  %7956 = vmatpush1.bf16.msra.mxu1 %v15514_v11  ;;  %v15592_v10 = vld [vmem:[#allocation10 + $0x844] ss:$16 sps:$4 sm:$0xff]   ;;  %v15595_v11 = vld [vmem:[#allocation10 + $0x84c] ss:$16 sps:$4 sm:$0xff]  }
 0xd5c   : > { %7875 = vmatprep.subr.bf16.mxu0 %v15519_v12  ;;  %7957 = vmatprep.subr.bf16.mxu1 %v15522_v13  ;;  %v15590_v12 = vld [vmem:[#allocation10 + $0x840] ss:$16 sps:$4 sm:$0xff]   ;;  %v15593_v13 = vld [vmem:[#allocation10 + $0x848] ss:$16 sps:$4 sm:$0xff]  }
 0xd5f   : > { %7876 = vmatpush1.bf16.msra.mxu0 %v15517_v14  ;;  %7958 = vmatpush1.bf16.msra.mxu1 %v15520_v19  ;;  %v15598_v14 = vld [vmem:[#allocation10 + $0x864] ss:$16 sps:$4 sm:$0xff]   ;;  %v15601_v19 = vld [vmem:[#allocation10 + $0x86c] ss:$16 sps:$4 sm:$0xff]  }
 0xd60   : > { %7877 = vmatprep.subr.bf16.mxu0 %v15525_v22  ;;  %7959 = vmatprep.subr.bf16.mxu1 %v15528_v23  ;;  %v15596_v22 = vld [vmem:[#allocation10 + $0x860] ss:$16 sps:$4 sm:$0xff]   ;;  %v15599_v23 = vld [vmem:[#allocation10 + $0x868] ss:$16 sps:$4 sm:$0xff]  }
 0xd63   : > { %7878 = vmatpush1.bf16.msra.mxu0 %v15523_v24  ;;  %7960 = vmatpush1.bf16.msra.mxu1 %v15526_v26  ;;  %v15604_v24 = vld [vmem:[#allocation10 + $0x884] ss:$16 sps:$4 sm:$0xff]   ;;  %v15607_v26 = vld [vmem:[#allocation10 + $0x88c] ss:$16 sps:$4 sm:$0xff]  }
 0xd64   : > { %7879 = vmatprep.subr.bf16.mxu0 %v15531_v59  ;;  %7961 = vmatprep.subr.bf16.mxu1 %v15534_v57  ;;  %v15602_v59 = vld [vmem:[#allocation10 + $0x880] ss:$16 sps:$4 sm:$0xff]   ;;  %v15605_v57 = vld [vmem:[#allocation10 + $0x888] ss:$16 sps:$4 sm:$0xff]  }
 0xd67   : > { %7880 = vmatpush1.bf16.msra.mxu0 %v15529_v27  ;;  %7962 = vmatpush1.bf16.msra.mxu1 %v15532_v28  ;;  %v15610_v27 = vld [vmem:[#allocation10 + $0x8a4] ss:$16 sps:$4 sm:$0xff]   ;;  %v15613_v28 = vld [vmem:[#allocation10 + $0x8ac] ss:$16 sps:$4 sm:$0xff]  }
 0xd68   : > { %7881 = vmatprep.subr.bf16.mxu0 %v15537_v29  ;;  %7963 = vmatprep.subr.bf16.mxu1 %v15540_v63  ;;  %v15608_v29 = vld [vmem:[#allocation10 + $0x8a0] ss:$16 sps:$4 sm:$0xff]   ;;  %v15611_v63 = vld [vmem:[#allocation10 + $0x8a8] ss:$16 sps:$4 sm:$0xff]  }
 0xd6b   : > { %7882 = vmatpush1.bf16.msra.mxu0 %v15535_v30  ;;  %7964 = vmatpush1.bf16.msra.mxu1 %v15538_v31  ;;  %v15616_v30 = vld [vmem:[#allocation10 + $0x8c4] ss:$16 sps:$4 sm:$0xff]   ;;  %v15619_v31 = vld [vmem:[#allocation10 + $0x8cc] ss:$16 sps:$4 sm:$0xff]  }
 0xd6c   : > { %7883 = vmatprep.subr.bf16.mxu0 %v15543_v32  ;;  %7965 = vmatprep.subr.bf16.mxu1 %v15546_v33  ;;  %v15614_v32 = vld [vmem:[#allocation10 + $0x8c0] ss:$16 sps:$4 sm:$0xff]   ;;  %v15617_v33 = vld [vmem:[#allocation10 + $0x8c8] ss:$16 sps:$4 sm:$0xff]  }
 0xd6f   : > { %7884 = vmatpush1.bf16.msra.mxu0 %v15541_v34  ;;  %7966 = vmatpush1.bf16.msra.mxu1 %v15544_v35  ;;  %v15622_v34 = vld [vmem:[#allocation10 + $0x8e4] ss:$16 sps:$4 sm:$0xff]   ;;  %v15625_v35 = vld [vmem:[#allocation10 + $0x8ec] ss:$16 sps:$4 sm:$0xff]  }
 0xd70   : > { %7885 = vmatprep.subr.bf16.mxu0 %v15549_v36  ;;  %7967 = vmatprep.subr.bf16.mxu1 %v15552_v38  ;;  %v15620_v36 = vld [vmem:[#allocation10 + $0x8e0] ss:$16 sps:$4 sm:$0xff]   ;;  %v15623_v38 = vld [vmem:[#allocation10 + $0x8e8] ss:$16 sps:$4 sm:$0xff]  }
 0xd73   : > { %7886 = vmatpush1.bf16.msra.mxu0 %v15547_v41  ;;  %7968 = vmatpush1.bf16.msra.mxu1 %v15550_v43  ;;  %v15628_v41 = vld [vmem:[#allocation10 + $0x904] ss:$16 sps:$4 sm:$0xff]   ;;  %v15631_v43 = vld [vmem:[#allocation10 + $0x90c] ss:$16 sps:$4 sm:$0xff]  }
 0xd74   : > { %7887 = vmatprep.subr.bf16.mxu0 %v15555_v50  ;;  %7969 = vmatprep.subr.bf16.mxu1 %v15558_v51  ;;  %v15626_v50 = vld [vmem:[#allocation10 + $0x900] ss:$16 sps:$4 sm:$0xff]   ;;  %v15629_v51 = vld [vmem:[#allocation10 + $0x908] ss:$16 sps:$4 sm:$0xff]  }
 0xd77   : > { %7888 = vmatpush1.bf16.msra.mxu0 %v15553_v52  ;;  %7970 = vmatpush1.bf16.msra.mxu1 %v15556_v44  ;;  %v15634_v52 = vld [vmem:[#allocation10 + $0x924] ss:$16 sps:$4 sm:$0xff]   ;;  %v15637_v44 = vld [vmem:[#allocation10 + $0x92c] ss:$16 sps:$4 sm:$0xff]  }
 0xd78   : > { %7889 = vmatprep.subr.bf16.mxu0 %v15561_v45  ;;  %7971 = vmatprep.subr.bf16.mxu1 %v15564_v25  ;;  %v15632_v45 = vld [vmem:[#allocation10 + $0x920] ss:$16 sps:$4 sm:$0xff]   ;;  %v15635_v25 = vld [vmem:[#allocation10 + $0x928] ss:$16 sps:$4 sm:$0xff]  }
 0xd7b   : > { %7890 = vmatpush1.bf16.msra.mxu0 %v15559_v53  ;;  %7972 = vmatpush1.bf16.msra.mxu1 %v15562_v54  ;;  %v15640_v53 = vld [vmem:[#allocation10 + $0x944] ss:$16 sps:$4 sm:$0xff]   ;;  %v15643_v54 = vld [vmem:[#allocation10 + $0x94c] ss:$16 sps:$4 sm:$0xff]  }
 0xd7c   : > { %7891 = vmatprep.subr.bf16.mxu0 %v15567_v48  ;;  %7973 = vmatprep.subr.bf16.mxu1 %v15570_v55  ;;  %v15638_v48 = vld [vmem:[#allocation10 + $0x940] ss:$16 sps:$4 sm:$0xff]   ;;  %v15641_v55 = vld [vmem:[#allocation10 + $0x948] ss:$16 sps:$4 sm:$0xff]  }
 0xd7f   : > { %7892 = vmatpush1.bf16.msra.mxu0 %v15565_v49  ;;  %7974 = vmatpush1.bf16.msra.mxu1 %v15568_v56  ;;  %v15646_v49 = vld [vmem:[#allocation10 + $0x964] ss:$16 sps:$4 sm:$0xff]   ;;  %v15649_v56 = vld [vmem:[#allocation10 + $0x96c] ss:$16 sps:$4 sm:$0xff]  }
 0xd80   : > { %7893 = vmatprep.subr.bf16.mxu0 %v15573_v58  ;;  %7975 = vmatprep.subr.bf16.mxu1 %v15576_v60  ;;  %v15644_v58 = vld [vmem:[#allocation10 + $0x960] ss:$16 sps:$4 sm:$0xff]   ;;  %v15647_v60 = vld [vmem:[#allocation10 + $0x968] ss:$16 sps:$4 sm:$0xff]  }
 0xd83   : > { %7894 = vmatpush1.bf16.msra.mxu0 %v15571_v61  ;;  %7976 = vmatpush1.bf16.msra.mxu1 %v15574_v62  ;;  %v15652_v61 = vld [vmem:[#allocation10 + $0x984] ss:$16 sps:$4 sm:$0xff]   ;;  %v15655_v62 = vld [vmem:[#allocation10 + $0x98c] ss:$16 sps:$4 sm:$0xff]  }
 0xd84   : > { %13275 = vmatprep.subr.msk.bf16.mxu0 %vm5903_vm5, %v17356_v39  ;;  %13277 = vmatprep.subr.msk.bf16.mxu1 %vm5903_vm5, %v17358_v40 }
 0xd86   : > { %7896 = vmatmul.mubr.bf16.vlgmr.msra.gmra.mrb[40].mxu0 %v7051_v1  ;;  %7978 = vmatmul.mubr.bf16.vlgmr.msra.gmra.mrb[32].mxu1 %v7051_v1  ;;  %v15650_v1 = vld [vmem:[#allocation10 + $0x980] ss:$16 sps:$4 sm:$0xff]  }
 0xd87   : > { %7999 = vmatpush1.bf16.msra.mxu0 %v17361_v46  ;;  %8040 = vmatpush1.bf16.msra.mxu1 %v17364_v47 }
 0xd88   : > { %8030 = vmatprep.mubr.bf16.mxu0 %v16650_v15  ;;  %8071 = vmatprep.mubr.bf16.mxu1 %v16650_v15 }
 0xd89   : > { %8853 = vmatprep.subr.bf16.mxu0 %v15580_v2  ;;  %8935 = vmatprep.subr.bf16.mxu1 %v15583_v3  ;;  %v15653_v2 = vld [vmem:[#allocation10 + $0x988] ss:$16 sps:$4 sm:$0xff]   ;;  %v15658_v3 = vld [vmem:[#allocation10 + $0x9a4] ss:$16 sps:$4 sm:$0xff]  }
 0xd8e   : > { %13276 = vmatmul.mubr.msk.bf16.vlgmr.msra.gmra.mrb[48].mxu0 %vm5899_vm6, %v7994_v37  ;;  %13278 = vmatmul.mubr.msk.bf16.vlgmr.msra.gmra.mrb[40].mxu1 %vm5899_vm6, %v7994_v37  ;;  %v15656_v37 = vld [vmem:[#allocation10 + $0x9a0] ss:$16 sps:$4 sm:$0xff]  }
 0xd8f   : > { %8854 = vmatpush1.bf16.msra.mxu0 %v15578_v5  ;;  %8936 = vmatpush1.bf16.msra.mxu1 %v15581_v6  ;;  %v15659_v5 = vld [vmem:[#allocation10 + $0x9a8] ss:$16 sps:$4 sm:$0xff]   ;;  %v15664_v6 = vld [vmem:[#allocation10 + $0x9c4] ss:$16 sps:$4 sm:$0xff]  }
 0xd90   : > { %8855 = vmatprep.subr.bf16.mxu0 %v15586_v42  ;;  %8937 = vmatprep.subr.bf16.mxu1 %v15589_v7  ;;  %v15667_v42 = vld [vmem:[#allocation10 + $0x9cc] ss:$16 sps:$4 sm:$0xff]   ;;  %v15662_v7 = vld [vmem:[#allocation10 + $0x9c0] ss:$16 sps:$4 sm:$0xff]  }
 0xd93   : > { %8856 = vmatpush1.bf16.msra.mxu0 %v15584_v8  ;;  %8938 = vmatpush1.bf16.msra.mxu1 %v15587_v9  ;;  %v15665_v8 = vld [vmem:[#allocation10 + $0x9c8] ss:$16 sps:$4 sm:$0xff]   ;;  %v15670_v9 = vld [vmem:[#allocation10 + $0x9e4] ss:$16 sps:$4 sm:$0xff]  }
 0xd94   : > { %8857 = vmatprep.subr.bf16.mxu0 %v15592_v10  ;;  %8939 = vmatprep.subr.bf16.mxu1 %v15595_v11  ;;  %v15673_v10 = vld [vmem:[#allocation10 + $0x9ec] ss:$16 sps:$4 sm:$0xff]   ;;  %v15668_v11 = vld [vmem:[#allocation10 + $0x9e0] ss:$16 sps:$4 sm:$0xff]  }
 0xd97   : > { %8858 = vmatpush1.bf16.msra.mxu0 %v15590_v12  ;;  %8940 = vmatpush1.bf16.msra.mxu1 %v15593_v13  ;;  %v15671_v12 = vld [vmem:[#allocation10 + $0x9e8] ss:$16 sps:$4 sm:$0xff]   ;;  %v15676_v13 = vld [vmem:[#allocation10 + $0xa04] ss:$16 sps:$4 sm:$0xff]  }
 0xd98   : > { %8859 = vmatprep.subr.bf16.mxu0 %v15598_v14  ;;  %8941 = vmatprep.subr.bf16.mxu1 %v15601_v19  ;;  %v15679_v14 = vld [vmem:[#allocation10 + $0xa0c] ss:$16 sps:$4 sm:$0xff]  }
 0xd9b   : > { %8860 = vmatpush1.bf16.msra.mxu0 %v15596_v22  ;;  %8942 = vmatpush1.bf16.msra.mxu1 %v15599_v23 }
 0xd9c   : > { %8861 = vmatprep.subr.bf16.mxu0 %v15604_v24  ;;  %8943 = vmatprep.subr.bf16.mxu1 %v15607_v26 }
 0xd9f   : > { %8862 = vmatpush1.bf16.msra.mxu0 %v15602_v59  ;;  %8944 = vmatpush1.bf16.msra.mxu1 %v15605_v57  ;;  %v15674_v57 = vld [vmem:[#allocation10 + $0xa00] ss:$16 sps:$4 sm:$0xff]  }
 0xda0   : > { %8863 = vmatprep.subr.bf16.mxu0 %v15610_v27  ;;  %8945 = vmatprep.subr.bf16.mxu1 %v15613_v28  ;;  %v15677_v27 = vld [vmem:[#allocation10 + $0xa08] ss:$16 sps:$4 sm:$0xff]  }
 0xda3   : > { %8864 = vmatpush1.bf16.msra.mxu0 %v15608_v29  ;;  %8946 = vmatpush1.bf16.msra.mxu1 %v15611_v63 }
 0xda4   : > { %8865 = vmatprep.subr.bf16.mxu0 %v15616_v30  ;;  %8947 = vmatprep.subr.bf16.mxu1 %v15619_v31  ;;  %v15682_v30 = vld [vmem:[#allocation10 + $0xa24] ss:$16 sps:$4 sm:$0xff]   ;;  %v15685_v31 = vld [vmem:[#allocation10 + $0xa2c] ss:$16 sps:$4 sm:$0xff]  }
 0xda7   : > { %8866 = vmatpush1.bf16.msra.mxu0 %v15614_v32  ;;  %8948 = vmatpush1.bf16.msra.mxu1 %v15617_v33 }
 0xda8   : > { %8867 = vmatprep.subr.bf16.mxu0 %v15622_v34  ;;  %8949 = vmatprep.subr.bf16.mxu1 %v15625_v35  ;;  %v15680_v34 = vld [vmem:[#allocation10 + $0xa20] ss:$16 sps:$4 sm:$0xff]   ;;  %v15683_v35 = vld [vmem:[#allocation10 + $0xa28] ss:$16 sps:$4 sm:$0xff]  }
 0xdab   : > { %8868 = vmatpush1.bf16.msra.mxu0 %v15620_v36  ;;  %8950 = vmatpush1.bf16.msra.mxu1 %v15623_v38  ;;  %v15688_v36 = vld [vmem:[#allocation10 + $0xa44] ss:$16 sps:$4 sm:$0xff]   ;;  %v15691_v38 = vld [vmem:[#allocation10 + $0xa4c] ss:$16 sps:$4 sm:$0xff]  }
 0xdac   : > { %8869 = vmatprep.subr.bf16.mxu0 %v15628_v41  ;;  %8951 = vmatprep.subr.bf16.mxu1 %v15631_v43  ;;  %v15686_v41 = vld [vmem:[#allocation10 + $0xa40] ss:$16 sps:$4 sm:$0xff]   ;;  %v15689_v43 = vld [vmem:[#allocation10 + $0xa48] ss:$16 sps:$4 sm:$0xff]  }
 0xdaf   : > { %8870 = vmatpush1.bf16.msra.mxu0 %v15626_v50  ;;  %8952 = vmatpush1.bf16.msra.mxu1 %v15629_v51  ;;  %v15694_v50 = vld [vmem:[#allocation10 + $0xa64] ss:$16 sps:$4 sm:$0xff]   ;;  %v15697_v51 = vld [vmem:[#allocation10 + $0xa6c] ss:$16 sps:$4 sm:$0xff]  }
 0xdb0   : > { %8871 = vmatprep.subr.bf16.mxu0 %v15634_v52  ;;  %8953 = vmatprep.subr.bf16.mxu1 %v15637_v44  ;;  %v15692_v52 = vld [vmem:[#allocation10 + $0xa60] ss:$16 sps:$4 sm:$0xff]   ;;  %v15695_v44 = vld [vmem:[#allocation10 + $0xa68] ss:$16 sps:$4 sm:$0xff]  }
 0xdb3   : > { %8872 = vmatpush1.bf16.msra.mxu0 %v15632_v45  ;;  %8954 = vmatpush1.bf16.msra.mxu1 %v15635_v25  ;;  %v15700_v45 = vld [vmem:[#allocation10 + $0xa84] ss:$16 sps:$4 sm:$0xff]   ;;  %v15703_v25 = vld [vmem:[#allocation10 + $0xa8c] ss:$16 sps:$4 sm:$0xff]  }
 0xdb4   : > { %8873 = vmatprep.subr.bf16.mxu0 %v15640_v53  ;;  %8955 = vmatprep.subr.bf16.mxu1 %v15643_v54  ;;  %v15698_v53 = vld [vmem:[#allocation10 + $0xa80] ss:$16 sps:$4 sm:$0xff]   ;;  %v15701_v54 = vld [vmem:[#allocation10 + $0xa88] ss:$16 sps:$4 sm:$0xff]  }
 0xdb7   : > { %8874 = vmatpush1.bf16.msra.mxu0 %v15638_v48  ;;  %8956 = vmatpush1.bf16.msra.mxu1 %v15641_v55  ;;  %v15706_v48 = vld [vmem:[#allocation10 + $0xaa4] ss:$16 sps:$4 sm:$0xff]   ;;  %v15709_v55 = vld [vmem:[#allocation10 + $0xaac] ss:$16 sps:$4 sm:$0xff]  }
 0xdb8   : > { %8875 = vmatprep.subr.bf16.mxu0 %v15646_v49  ;;  %8957 = vmatprep.subr.bf16.mxu1 %v15649_v56  ;;  %v15704_v49 = vld [vmem:[#allocation10 + $0xaa0] ss:$16 sps:$4 sm:$0xff]   ;;  %v15707_v56 = vld [vmem:[#allocation10 + $0xaa8] ss:$16 sps:$4 sm:$0xff]  }
 0xdbb   : > { %8876 = vmatpush1.bf16.msra.mxu0 %v15644_v58  ;;  %8958 = vmatpush1.bf16.msra.mxu1 %v15647_v60  ;;  %v15712_v58 = vld [vmem:[#allocation10 + $0xac4] ss:$16 sps:$4 sm:$0xff]   ;;  %v15715_v60 = vld [vmem:[#allocation10 + $0xacc] ss:$16 sps:$4 sm:$0xff]  }
 0xdbc   : > { %8877 = vmatprep.subr.bf16.mxu0 %v15652_v61  ;;  %8959 = vmatprep.subr.bf16.mxu1 %v15655_v62  ;;  %v15710_v61 = vld [vmem:[#allocation10 + $0xac0] ss:$16 sps:$4 sm:$0xff]   ;;  %v15713_v62 = vld [vmem:[#allocation10 + $0xac8] ss:$16 sps:$4 sm:$0xff]  }
 0xdbf   : > { %8878 = vmatpush1.bf16.msra.mxu0 %v15650_v1  ;;  %8960 = vmatpush1.bf16.msra.mxu1 %v15653_v2  ;;  %v15718_v1 = vld [vmem:[#allocation10 + $0xae4] ss:$16 sps:$4 sm:$0xff]   ;;  %v15721_v2 = vld [vmem:[#allocation10 + $0xaec] ss:$16 sps:$4 sm:$0xff]  }
 0xdc0   : > { %8879 = vmatprep.subr.bf16.mxu0 %v15658_v3  ;;  %8961 = vmatprep.subr.bf16.mxu1 %v15661_v4  ;;  %v15716_v3 = vld [vmem:[#allocation10 + $0xae0] ss:$16 sps:$4 sm:$0xff]   ;;  %v15719_v4 = vld [vmem:[#allocation10 + $0xae8] ss:$16 sps:$4 sm:$0xff]  }
 0xdc3   : > { %8880 = vmatpush1.bf16.msra.mxu0 %v15656_v37  ;;  %8962 = vmatpush1.bf16.msra.mxu1 %v15659_v5  ;;  %v15724_v37 = vld [vmem:[#allocation10 + $0xb04] ss:$16 sps:$4 sm:$0xff]   ;;  %v15727_v5 = vld [vmem:[#allocation10 + $0xb0c] ss:$16 sps:$4 sm:$0xff]  }
 0xdc4   : > { %8881 = vmatprep.subr.bf16.mxu0 %v15664_v6  ;;  %8963 = vmatprep.subr.bf16.mxu1 %v15667_v42  ;;  %v15722_v6 = vld [vmem:[#allocation10 + $0xb00] ss:$16 sps:$4 sm:$0xff]   ;;  %v15725_v42 = vld [vmem:[#allocation10 + $0xb08] ss:$16 sps:$4 sm:$0xff]  }
 0xdc7   : > { %8882 = vmatpush1.bf16.msra.mxu0 %v15662_v7  ;;  %8964 = vmatpush1.bf16.msra.mxu1 %v15665_v8  ;;  %v15730_v7 = vld [vmem:[#allocation10 + $0xb24] ss:$16 sps:$4 sm:$0xff]   ;;  %v15733_v8 = vld [vmem:[#allocation10 + $0xb2c] ss:$16 sps:$4 sm:$0xff]  }
 0xdc8   : > { %8883 = vmatprep.subr.bf16.mxu0 %v15670_v9  ;;  %8965 = vmatprep.subr.bf16.mxu1 %v15673_v10  ;;  %v15728_v9 = vld [vmem:[#allocation10 + $0xb20] ss:$16 sps:$4 sm:$0xff]   ;;  %v15731_v10 = vld [vmem:[#allocation10 + $0xb28] ss:$16 sps:$4 sm:$0xff]  }
 0xdcb   : > { %8884 = vmatpush1.bf16.msra.mxu0 %v15668_v11  ;;  %8966 = vmatpush1.bf16.msra.mxu1 %v15671_v12  ;;  %v15736_v11 = vld [vmem:[#allocation10 + $0xb44] ss:$16 sps:$4 sm:$0xff]   ;;  %v15739_v12 = vld [vmem:[#allocation10 + $0xb4c] ss:$16 sps:$4 sm:$0xff]  }
 0xdcc   : > { %8894 = vmatprep.subr.bf16.mxu0 %v15676_v13  ;;  %8976 = vmatprep.subr.bf16.mxu1 %v15679_v14  ;;  %v15734_v13 = vld [vmem:[#allocation10 + $0xb40] ss:$16 sps:$4 sm:$0xff]   ;;  %v15737_v14 = vld [vmem:[#allocation10 + $0xb48] ss:$16 sps:$4 sm:$0xff]  }
 0xe61   : > { %v8032_v19 = vpop.f32.mrb[48].mxu0  ;;  %v17411_v22 = vpop.f32.mrb[40].mxu1 }
 0xe62   : > { %v8034_v23 = vpop.f32.mrb[49].mxu0  ;;  %v8075_v24 = vpop.f32.mrb[41].mxu1  ;;  %v8080_v29 = vpack.c.bf16 %v8032_v19, %v8032_v19  ;;  %v15742_v19 = vld [vmem:[#allocation10 + $0xb64] ss:$16 sps:$4 sm:$0xff]  }
 0xe63   : > { %v8081_v26 = vpack.c.bf16 %v8034_v23, %v8034_v23  ;;  %v8036_v59 = vpop.f32.mrb[50].mxu0  ;;  %v8077_v28 = vpop.f32.mrb[42].mxu1  ;;  %v8083_v33 = vpack.c.bf16 %v8075_v24, %v8075_v24  ;;  %v15745_v23 = vld [vmem:[#allocation10 + $0xb6c] ss:$16 sps:$4 sm:$0xff]   ;;  %v15740_v24 = vld [vmem:[#allocation10 + $0xb60] ss:$16 sps:$4 sm:$0xff]  }
 0xe64   : > { %v8037_v63 = vpop.f32.mrb[51].mxu0  ;;  %v8078_v32 = vpop.f32.mrb[43].mxu1  ;;  %v15748_v59 = vld [vmem:[#allocation10 + $0xb84] ss:$16 sps:$4 sm:$0xff]   ;;  %v15749_v28 = vld [vmem:[#allocation10 + $0xb88] ss:$16 sps:$4 sm:$0xff]  }
 0xe65   : > { %8885 = vmatprep.mubr.bf16.mxu0 %v8081_v26  ;;  %8967 = vmatprep.mubr.bf16.mxu1 %v8081_v26  ;;  %v15743_v26 = vld [vmem:[#allocation10 + $0xb68] ss:$16 sps:$4 sm:$0xff]   ;;  %v15757_v63 = vld [vmem:[#allocation10 + $0xbac] ss:$16 sps:$4 sm:$0xff]   ;;  %v15760_v32 = vld [vmem:[#allocation10 + $0xbc4] ss:$16 sps:$4 sm:$0xff]  }
 0xe66   : > { %8886 = vmatmul.mubr.bf16.vlgmr.msra.gmra.mrb[40].mxu0 %v8080_v29  ;;  %8968 = vmatmul.mubr.bf16.vlgmr.msra.gmra.mrb[32].mxu1 %v8080_v29  ;;  %v15754_v29 = vld [vmem:[#allocation10 + $0xba4] ss:$16 sps:$4 sm:$0xff]  }
 0xe67   : > { %8895 = vmatpush1.bf16.msra.mxu0 %v15674_v57  ;;  %8977 = vmatpush1.bf16.msra.mxu1 %v15677_v27  ;;  %v15751_v57 = vld [vmem:[#allocation10 + $0xb8c] ss:$16 sps:$4 sm:$0xff]   ;;  %v15746_v27 = vld [vmem:[#allocation10 + $0xb80] ss:$16 sps:$4 sm:$0xff]  }
 0xe68   : > { %8896 = vmatprep.subr.bf16.mxu0 %v15682_v30  ;;  %8978 = vmatprep.subr.bf16.mxu1 %v15685_v31  ;;  %v15752_v30 = vld [vmem:[#allocation10 + $0xba0] ss:$16 sps:$4 sm:$0xff]   ;;  %v15755_v31 = vld [vmem:[#allocation10 + $0xba8] ss:$16 sps:$4 sm:$0xff]  }
 0xe69   : > { %8926 = vmatprep.mubr.bf16.mxu0 %v8083_v33  ;;  %9008 = vmatprep.mubr.bf16.mxu1 %v8083_v33  ;;  %v15763_v33 = vld [vmem:[#allocation10 + $0xbcc] ss:$16 sps:$4 sm:$0xff]  }
 0xe6b   : > { %8897 = vmatpush1.bf16.msra.mxu0 %v15680_v34  ;;  %8979 = vmatpush1.bf16.msra.mxu1 %v15683_v35  ;;  %v15758_v34 = vld [vmem:[#allocation10 + $0xbc0] ss:$16 sps:$4 sm:$0xff]   ;;  %v15761_v35 = vld [vmem:[#allocation10 + $0xbc8] ss:$16 sps:$4 sm:$0xff]  }
 0xe6c   : > { %8898 = vmatprep.subr.bf16.mxu0 %v15688_v36  ;;  %8980 = vmatprep.subr.bf16.mxu1 %v15691_v38  ;;  %v15766_v36 = vld [vmem:[#allocation10 + $0xbe4] ss:$16 sps:$4 sm:$0xff]   ;;  %v15769_v38 = vld [vmem:[#allocation10 + $0xbec] ss:$16 sps:$4 sm:$0xff]  }
 0xe6f   : > { %8899 = vmatpush1.bf16.msra.mxu0 %v15686_v41  ;;  %8981 = vmatpush1.bf16.msra.mxu1 %v15689_v43  ;;  %v15764_v41 = vld [vmem:[#allocation10 + $0xbe0] ss:$16 sps:$4 sm:$0xff]   ;;  %v15767_v43 = vld [vmem:[#allocation10 + $0xbe8] ss:$16 sps:$4 sm:$0xff]  }
 0xe70   : > { %8900 = vmatprep.subr.bf16.mxu0 %v15694_v50  ;;  %8982 = vmatprep.subr.bf16.mxu1 %v15697_v51  ;;  %v8082_v50 = vpack.c.bf16 %v17411_v22, %v17411_v22  ;;  %v15773_v51 = vld [vmem:[#allocation10 + $0xc04] ss:$16 sps:$4 sm:$0xff]   ;;  %v15774_v22 = vld [vmem:[#allocation10 + $0xc08] ss:$16 sps:$4 sm:$0xff]  }
 0xe73   : > { %8901 = vmatpush1.bf16.msra.mxu0 %v15692_v52  ;;  %8983 = vmatpush1.bf16.msra.mxu1 %v15695_v44  ;;  %v15776_v52 = vld [vmem:[#allocation10 + $0xc0c] ss:$16 sps:$4 sm:$0xff]   ;;  %v15770_v44 = vld [vmem:[%s17683_s7] ss:$0 sps:$4 sm:$0x88]  }
 0xe74   : > { %8902 = vmatprep.subr.bf16.mxu0 %v15700_v45  ;;  %8984 = vmatprep.subr.bf16.mxu1 %v15703_v25  ;;  %v15779_v45 = vld [vmem:[#allocation10 + $0xc24] ss:$16 sps:$4 sm:$0xff]   ;;  %v15782_v25 = vld [vmem:[#allocation10 + $0xc2c] ss:$16 sps:$4 sm:$0xff]  }
 0xe77   : > { %8903 = vmatpush1.bf16.msra.mxu0 %v15698_v53  ;;  %8985 = vmatpush1.bf16.msra.mxu1 %v15701_v54  ;;  %v15780_v53 = vld [vmem:[#allocation10 + $0xc28] ss:$16 sps:$4 sm:$0xff]   ;;  %v15788_v54 = vld [vmem:[#allocation10 + $0xc4c] ss:$16 sps:$4 sm:$0xff]  }
 0xe78   : > { %8904 = vmatprep.subr.bf16.mxu0 %v15706_v48  ;;  %8986 = vmatprep.subr.bf16.mxu1 %v15709_v55  ;;  %v15783_v48 = vld [vmem:[#allocation10 + $0xc40] ss:$16 sps:$4 sm:$0xff]   ;;  %v15786_v55 = vld [vmem:[#allocation10 + $0xc48] ss:$16 sps:$4 sm:$0xff]  }
 0xe7b   : > { %8905 = vmatpush1.bf16.msra.mxu0 %v15704_v49  ;;  %8987 = vmatpush1.bf16.msra.mxu1 %v15707_v56  ;;  %v15791_v49 = vld [vmem:[#allocation10 + $0xc64] ss:$16 sps:$4 sm:$0xff]   ;;  %v15794_v56 = vld [vmem:[#allocation10 + $0xc6c] ss:$16 sps:$4 sm:$0xff]  }
 0xe7c   : > { %8906 = vmatprep.subr.bf16.mxu0 %v15712_v58  ;;  %8988 = vmatprep.subr.bf16.mxu1 %v15715_v60  ;;  %v15789_v58 = vld [vmem:[#allocation10 + $0xc60] ss:$16 sps:$4 sm:$0xff]   ;;  %v15792_v60 = vld [vmem:[#allocation10 + $0xc68] ss:$16 sps:$4 sm:$0xff]  }
 0xe7f   : > { %8907 = vmatpush1.bf16.msra.mxu0 %v15710_v61  ;;  %8989 = vmatpush1.bf16.msra.mxu1 %v15713_v62  ;;  %v15797_v61 = vld [vmem:[#allocation10 + $0xc84] ss:$16 sps:$4 sm:$0xff]   ;;  %v15800_v62 = vld [vmem:[#allocation10 + $0xc8c] ss:$16 sps:$4 sm:$0xff]  }
 0xe80   : > { %8908 = vmatprep.subr.bf16.mxu0 %v15718_v1  ;;  %8990 = vmatprep.subr.bf16.mxu1 %v15721_v2  ;;  %v15795_v1 = vld [vmem:[#allocation10 + $0xc80] ss:$16 sps:$4 sm:$0xff]   ;;  %v15798_v2 = vld [vmem:[#allocation10 + $0xc88] ss:$16 sps:$4 sm:$0xff]  }
 0xe83   : > { %8909 = vmatpush1.bf16.msra.mxu0 %v15716_v3  ;;  %8991 = vmatpush1.bf16.msra.mxu1 %v15719_v4  ;;  %v15803_v3 = vld [vmem:[#allocation10 + $0xca4] ss:$16 sps:$4 sm:$0xff]   ;;  %v15806_v4 = vld [vmem:[#allocation10 + $0xcac] ss:$16 sps:$4 sm:$0xff]  }
 0xe84   : > { %8910 = vmatprep.subr.bf16.mxu0 %v15724_v37  ;;  %8992 = vmatprep.subr.bf16.mxu1 %v15727_v5  ;;  %v15801_v37 = vld [vmem:[#allocation10 + $0xca0] ss:$16 sps:$4 sm:$0xff]   ;;  %v15804_v5 = vld [vmem:[#allocation10 + $0xca8] ss:$16 sps:$4 sm:$0xff]  }
 0xe87   : > { %8911 = vmatpush1.bf16.msra.mxu0 %v15722_v6  ;;  %8993 = vmatpush1.bf16.msra.mxu1 %v15725_v42  ;;  %v15809_v6 = vld [vmem:[#allocation10 + $0xcc4] ss:$16 sps:$4 sm:$0xff]   ;;  %v15812_v42 = vld [vmem:[#allocation10 + $0xccc] ss:$16 sps:$4 sm:$0xff]  }
 0xe88   : > { %8912 = vmatprep.subr.bf16.mxu0 %v15730_v7  ;;  %8994 = vmatprep.subr.bf16.mxu1 %v15733_v8  ;;  %v15807_v7 = vld [vmem:[#allocation10 + $0xcc0] ss:$16 sps:$4 sm:$0xff]   ;;  %v15810_v8 = vld [vmem:[#allocation10 + $0xcc8] ss:$16 sps:$4 sm:$0xff]  }
 0xe8b   : > { %8913 = vmatpush1.bf16.msra.mxu0 %v15728_v9  ;;  %8995 = vmatpush1.bf16.msra.mxu1 %v15731_v10  ;;  %v15815_v9 = vld [vmem:[#allocation10 + $0xce4] ss:$16 sps:$4 sm:$0xff]   ;;  %v15818_v10 = vld [vmem:[#allocation10 + $0xcec] ss:$16 sps:$4 sm:$0xff]  }
 0xe8c   : > { %8914 = vmatprep.subr.bf16.mxu0 %v15736_v11  ;;  %8996 = vmatprep.subr.bf16.mxu1 %v15739_v12  ;;  %v15813_v11 = vld [vmem:[#allocation10 + $0xce0] ss:$16 sps:$4 sm:$0xff]   ;;  %v15816_v12 = vld [vmem:[#allocation10 + $0xce8] ss:$16 sps:$4 sm:$0xff]  }
 0xe8f   : > { %8915 = vmatpush1.bf16.msra.mxu0 %v15734_v13  ;;  %8997 = vmatpush1.bf16.msra.mxu1 %v15737_v14  ;;  %v15821_v13 = vld [vmem:[#allocation10 + $0xd04] ss:$16 sps:$4 sm:$0xff]   ;;  %v15824_v14 = vld [vmem:[#allocation10 + $0xd0c] ss:$16 sps:$4 sm:$0xff]  }
 0xe90   : > { %8916 = vmatprep.subr.bf16.mxu0 %v15742_v19  ;;  %8998 = vmatprep.subr.bf16.mxu1 %v15745_v23  ;;  %v15819_v19 = vld [vmem:[#allocation10 + $0xd00] ss:$16 sps:$4 sm:$0xff]   ;;  %v15822_v23 = vld [vmem:[#allocation10 + $0xd08] ss:$16 sps:$4 sm:$0xff]  }
 0xe93   : > { %8917 = vmatpush1.bf16.msra.mxu0 %v15740_v24  ;;  %8999 = vmatpush1.bf16.msra.mxu1 %v15743_v26  ;;  %v15827_v24 = vld [vmem:[#allocation10 + $0xd24] ss:$16 sps:$4 sm:$0xff]   ;;  %v15830_v26 = vld [vmem:[#allocation10 + $0xd2c] ss:$16 sps:$4 sm:$0xff]  }
 0xe94   : > { %8918 = vmatprep.subr.bf16.mxu0 %v15748_v59  ;;  %9000 = vmatprep.subr.bf16.mxu1 %v15751_v57  ;;  %v15825_v59 = vld [vmem:[#allocation10 + $0xd20] ss:$16 sps:$4 sm:$0xff]   ;;  %v15828_v57 = vld [vmem:[#allocation10 + $0xd28] ss:$16 sps:$4 sm:$0xff]  }
 0xe97   : > { %8919 = vmatpush1.bf16.msra.mxu0 %v15746_v27  ;;  %9001 = vmatpush1.bf16.msra.mxu1 %v15749_v28  ;;  %v15833_v27 = vld [vmem:[#allocation10 + $0xd44] ss:$16 sps:$4 sm:$0xff]   ;;  %v15836_v28 = vld [vmem:[#allocation10 + $0xd4c] ss:$16 sps:$4 sm:$0xff]  }
 0xe98   : > { %8920 = vmatprep.subr.bf16.mxu0 %v15754_v29  ;;  %9002 = vmatprep.subr.bf16.mxu1 %v15757_v63  ;;  %v15831_v29 = vld [vmem:[#allocation10 + $0xd40] ss:$16 sps:$4 sm:$0xff]   ;;  %v15834_v63 = vld [vmem:[#allocation10 + $0xd48] ss:$16 sps:$4 sm:$0xff]  }
 0xe9b   : > { %8921 = vmatpush1.bf16.msra.mxu0 %v15752_v30  ;;  %9003 = vmatpush1.bf16.msra.mxu1 %v15755_v31  ;;  %v15839_v30 = vld [vmem:[#allocation10 + $0xd64] ss:$16 sps:$4 sm:$0xff]   ;;  %v15842_v31 = vld [vmem:[#allocation10 + $0xd6c] ss:$16 sps:$4 sm:$0xff]  }
 0xe9c   : > { %8922 = vmatprep.subr.bf16.mxu0 %v15760_v32  ;;  %9004 = vmatprep.subr.bf16.mxu1 %v15763_v33  ;;  %v15837_v32 = vld [vmem:[#allocation10 + $0xd60] ss:$16 sps:$4 sm:$0xff]   ;;  %v15840_v33 = vld [vmem:[#allocation10 + $0xd68] ss:$16 sps:$4 sm:$0xff]  }
 0xe9f   : > { %8923 = vmatpush1.bf16.msra.mxu0 %v15758_v34  ;;  %9005 = vmatpush1.bf16.msra.mxu1 %v15761_v35  ;;  %v15845_v34 = vld [vmem:[#allocation10 + $0xd84] ss:$16 sps:$4 sm:$0xff]   ;;  %v15848_v35 = vld [vmem:[#allocation10 + $0xd8c] ss:$16 sps:$4 sm:$0xff]  }
 0xea0   : > { %8924 = vmatprep.subr.bf16.mxu0 %v15766_v36  ;;  %9006 = vmatprep.subr.bf16.mxu1 %v15769_v38  ;;  %v15843_v36 = vld [vmem:[#allocation10 + $0xd80] ss:$16 sps:$4 sm:$0xff]   ;;  %v15846_v38 = vld [vmem:[#allocation10 + $0xd88] ss:$16 sps:$4 sm:$0xff]  }
 0xea3   : > { %8925 = vmatpush1.bf16.msra.mxu0 %v15764_v41  ;;  %9007 = vmatpush1.bf16.msra.mxu1 %v15767_v43  ;;  %v15851_v41 = vld [vmem:[#allocation10 + $0xda4] ss:$16 sps:$4 sm:$0xff]   ;;  %v15854_v43 = vld [vmem:[#allocation10 + $0xdac] ss:$16 sps:$4 sm:$0xff]  }
 0xea4   : > { %13408 = vmatprep.subr.msk.bf16.mxu0 %vm5903_vm5, %v17356_v39  ;;  %13410 = vmatprep.subr.msk.bf16.mxu1 %vm5903_vm5, %v17358_v40  ;;  %v9025_v39 = vrot.slane %v15770_v44, 3  ;;  %v15771_v40 = vld [vmem:[#allocation10 + $0xc00] ss:$16 sps:$4 sm:$0xff]   ;;  %v15860_v44 = vld [vmem:[#allocation10 + $0xdcc] ss:$16 sps:$4 sm:$0xff]  }
 0xea6   : > { %8927 = vmatmul.mubr.bf16.vlgmr.msra.gmra.mrb[40].mxu0 %v8082_v50  ;;  %9009 = vmatmul.mubr.bf16.vlgmr.msra.gmra.mrb[32].mxu1 %v8082_v50  ;;  %v15849_v50 = vld [vmem:[#allocation10 + $0xda0] ss:$16 sps:$4 sm:$0xff]  }
 0xea7   : > { %9030 = vmatpush1.bf16.msra.mxu0 %v17361_v46  ;;  %9071 = vmatpush1.bf16.msra.mxu1 %v17364_v47  ;;  %v15777_v46 = vld [vmem:[#allocation10 + $0xc20] ss:$16 sps:$4 sm:$0xff]   ;;  %v15785_v47 = vld [vmem:[#allocation10 + $0xc44] ss:$16 sps:$4 sm:$0xff]  }
 0xea8   : > { %9061 = vmatprep.mubr.bf16.mxu0 %v16650_v15  ;;  %9102 = vmatprep.mubr.bf16.mxu1 %v16650_v15 }
 0xea9   : > { %9884 = vmatprep.subr.bf16.mxu0 %v15773_v51  ;;  %9966 = vmatprep.subr.bf16.mxu1 %v15776_v52  ;;  %v15852_v51 = vld [vmem:[#allocation10 + $0xda8] ss:$16 sps:$4 sm:$0xff]   ;;  %v15857_v52 = vld [vmem:[#allocation10 + $0xdc4] ss:$16 sps:$4 sm:$0xff]  }
 0xeae   : > { %13409 = vmatmul.mubr.msk.bf16.vlgmr.msra.gmra.mrb[52].mxu0 %vm5899_vm6, %v9025_v39  ;;  %13411 = vmatmul.mubr.msk.bf16.vlgmr.msra.gmra.mrb[44].mxu1 %vm5899_vm6, %v9025_v39  ;;  %v15855_v39 = vld [vmem:[#allocation10 + $0xdc0] ss:$16 sps:$4 sm:$0xff]  }
 0xeaf   : > { %9885 = vmatpush1.bf16.msra.mxu0 %v15771_v40  ;;  %9967 = vmatpush1.bf16.msra.mxu1 %v15774_v22  ;;  %v15858_v40 = vld [vmem:[#allocation10 + $0xdc8] ss:$16 sps:$4 sm:$0xff]   ;;  %v15863_v22 = vld [vmem:[#allocation10 + $0xde4] ss:$16 sps:$4 sm:$0xff]  }
 0xeb0   : > { %9886 = vmatprep.subr.bf16.mxu0 %v15779_v45  ;;  %9968 = vmatprep.subr.bf16.mxu1 %v15782_v25  ;;  %v15866_v45 = vld [vmem:[#allocation10 + $0xdec] ss:$16 sps:$4 sm:$0xff]   ;;  %v15861_v25 = vld [vmem:[#allocation10 + $0xde0] ss:$16 sps:$4 sm:$0xff]  }
 0xeb3   : > { %9887 = vmatpush1.bf16.msra.mxu0 %v15777_v46  ;;  %9969 = vmatpush1.bf16.msra.mxu1 %v15780_v53  ;;  %v15864_v46 = vld [vmem:[#allocation10 + $0xde8] ss:$16 sps:$4 sm:$0xff]   ;;  %v15869_v53 = vld [vmem:[#allocation10 + $0xe04] ss:$16 sps:$4 sm:$0xff]  }
 0xeb4   : > { %9888 = vmatprep.subr.bf16.mxu0 %v15785_v47  ;;  %9970 = vmatprep.subr.bf16.mxu1 %v15788_v54  ;;  %v15872_v47 = vld [vmem:[#allocation10 + $0xe0c] ss:$16 sps:$4 sm:$0xff]  }
 0xeb7   : > { %9889 = vmatpush1.bf16.msra.mxu0 %v15783_v48  ;;  %9971 = vmatpush1.bf16.msra.mxu1 %v15786_v55 }
 0xeb8   : > { %9890 = vmatprep.subr.bf16.mxu0 %v15791_v49  ;;  %9972 = vmatprep.subr.bf16.mxu1 %v15794_v56 }
 0xebb   : > { %9891 = vmatpush1.bf16.msra.mxu0 %v15789_v58  ;;  %9973 = vmatpush1.bf16.msra.mxu1 %v15792_v60  ;;  %v15867_v60 = vld [vmem:[#allocation10 + $0xe00] ss:$16 sps:$4 sm:$0xff]  }
 0xebc   : > { %9892 = vmatprep.subr.bf16.mxu0 %v15797_v61  ;;  %9974 = vmatprep.subr.bf16.mxu1 %v15800_v62  ;;  %v15870_v61 = vld [vmem:[#allocation10 + $0xe08] ss:$16 sps:$4 sm:$0xff]  }
 0xebf   : > { %9893 = vmatpush1.bf16.msra.mxu0 %v15795_v1  ;;  %9975 = vmatpush1.bf16.msra.mxu1 %v15798_v2 }
 0xec0   : > { %9894 = vmatprep.subr.bf16.mxu0 %v15803_v3  ;;  %9976 = vmatprep.subr.bf16.mxu1 %v15806_v4  ;;  %v15875_v3 = vld [vmem:[#allocation10 + $0xe24] ss:$16 sps:$4 sm:$0xff]   ;;  %v15878_v4 = vld [vmem:[#allocation10 + $0xe2c] ss:$16 sps:$4 sm:$0xff]  }
 0xec3   : > { %9895 = vmatpush1.bf16.msra.mxu0 %v15801_v37  ;;  %9977 = vmatpush1.bf16.msra.mxu1 %v15804_v5 }
 0xec4   : > { %9896 = vmatprep.subr.bf16.mxu0 %v15809_v6  ;;  %9978 = vmatprep.subr.bf16.mxu1 %v15812_v42  ;;  %v15873_v6 = vld [vmem:[#allocation10 + $0xe20] ss:$16 sps:$4 sm:$0xff]   ;;  %v15876_v42 = vld [vmem:[#allocation10 + $0xe28] ss:$16 sps:$4 sm:$0xff]  }
 0xec7   : > { %9897 = vmatpush1.bf16.msra.mxu0 %v15807_v7  ;;  %9979 = vmatpush1.bf16.msra.mxu1 %v15810_v8  ;;  %v15881_v7 = vld [vmem:[#allocation10 + $0xe44] ss:$16 sps:$4 sm:$0xff]   ;;  %v15884_v8 = vld [vmem:[#allocation10 + $0xe4c] ss:$16 sps:$4 sm:$0xff]  }
 0xec8   : > { %9898 = vmatprep.subr.bf16.mxu0 %v15815_v9  ;;  %9980 = vmatprep.subr.bf16.mxu1 %v15818_v10  ;;  %v15879_v9 = vld [vmem:[#allocation10 + $0xe40] ss:$16 sps:$4 sm:$0xff]   ;;  %v15882_v10 = vld [vmem:[#allocation10 + $0xe48] ss:$16 sps:$4 sm:$0xff]  }
 0xecb   : > { %9899 = vmatpush1.bf16.msra.mxu0 %v15813_v11  ;;  %9981 = vmatpush1.bf16.msra.mxu1 %v15816_v12  ;;  %v15887_v11 = vld [vmem:[#allocation10 + $0xe64] ss:$16 sps:$4 sm:$0xff]   ;;  %v15890_v12 = vld [vmem:[#allocation10 + $0xe6c] ss:$16 sps:$4 sm:$0xff]  }
 0xecc   : > { %9900 = vmatprep.subr.bf16.mxu0 %v15821_v13  ;;  %9982 = vmatprep.subr.bf16.mxu1 %v15824_v14  ;;  %v15885_v13 = vld [vmem:[#allocation10 + $0xe60] ss:$16 sps:$4 sm:$0xff]   ;;  %v15888_v14 = vld [vmem:[#allocation10 + $0xe68] ss:$16 sps:$4 sm:$0xff]  }
 0xecf   : > { %9901 = vmatpush1.bf16.msra.mxu0 %v15819_v19  ;;  %9983 = vmatpush1.bf16.msra.mxu1 %v15822_v23  ;;  %v15893_v19 = vld [vmem:[#allocation10 + $0xe84] ss:$16 sps:$4 sm:$0xff]   ;;  %v15896_v23 = vld [vmem:[#allocation10 + $0xe8c] ss:$16 sps:$4 sm:$0xff]  }
 0xed0   : > { %9902 = vmatprep.subr.bf16.mxu0 %v15827_v24  ;;  %9984 = vmatprep.subr.bf16.mxu1 %v15830_v26  ;;  %v15891_v24 = vld [vmem:[#allocation10 + $0xe80] ss:$16 sps:$4 sm:$0xff]   ;;  %v15894_v26 = vld [vmem:[#allocation10 + $0xe88] ss:$16 sps:$4 sm:$0xff]  }
 0xed3   : > { %9903 = vmatpush1.bf16.msra.mxu0 %v15825_v59  ;;  %9985 = vmatpush1.bf16.msra.mxu1 %v15828_v57  ;;  %v15899_v59 = vld [vmem:[#allocation10 + $0xea4] ss:$16 sps:$4 sm:$0xff]   ;;  %v15902_v57 = vld [vmem:[#allocation10 + $0xeac] ss:$16 sps:$4 sm:$0xff]  }
 0xed4   : > { %9904 = vmatprep.subr.bf16.mxu0 %v15833_v27  ;;  %9986 = vmatprep.subr.bf16.mxu1 %v15836_v28  ;;  %v15897_v27 = vld [vmem:[#allocation10 + $0xea0] ss:$16 sps:$4 sm:$0xff]   ;;  %v15900_v28 = vld [vmem:[#allocation10 + $0xea8] ss:$16 sps:$4 sm:$0xff]  }
 0xed7   : > { %9905 = vmatpush1.bf16.msra.mxu0 %v15831_v29  ;;  %9987 = vmatpush1.bf16.msra.mxu1 %v15834_v63  ;;  %v15905_v29 = vld [vmem:[#allocation10 + $0xec4] ss:$16 sps:$4 sm:$0xff]   ;;  %v15908_v63 = vld [vmem:[#allocation10 + $0xecc] ss:$16 sps:$4 sm:$0xff]  }
 0xed8   : > { %9906 = vmatprep.subr.bf16.mxu0 %v15839_v30  ;;  %9988 = vmatprep.subr.bf16.mxu1 %v15842_v31  ;;  %v15903_v30 = vld [vmem:[#allocation10 + $0xec0] ss:$16 sps:$4 sm:$0xff]   ;;  %v15906_v31 = vld [vmem:[#allocation10 + $0xec8] ss:$16 sps:$4 sm:$0xff]  }
 0xedb   : > { %9907 = vmatpush1.bf16.msra.mxu0 %v15837_v32  ;;  %9989 = vmatpush1.bf16.msra.mxu1 %v15840_v33  ;;  %v15911_v32 = vld [vmem:[#allocation10 + $0xee4] ss:$16 sps:$4 sm:$0xff]   ;;  %v15914_v33 = vld [vmem:[#allocation10 + $0xeec] ss:$16 sps:$4 sm:$0xff]  }
 0xedc   : > { %9908 = vmatprep.subr.bf16.mxu0 %v15845_v34  ;;  %9990 = vmatprep.subr.bf16.mxu1 %v15848_v35  ;;  %v15909_v34 = vld [vmem:[#allocation10 + $0xee0] ss:$16 sps:$4 sm:$0xff]   ;;  %v15912_v35 = vld [vmem:[#allocation10 + $0xee8] ss:$16 sps:$4 sm:$0xff]  }
 0xedf   : > { %9909 = vmatpush1.bf16.msra.mxu0 %v15843_v36  ;;  %9991 = vmatpush1.bf16.msra.mxu1 %v15846_v38  ;;  %v15917_v36 = vld [vmem:[#allocation10 + $0xf04] ss:$16 sps:$4 sm:$0xff]   ;;  %v15920_v38 = vld [vmem:[#allocation10 + $0xf0c] ss:$16 sps:$4 sm:$0xff]  }
 0xee0   : > { %9910 = vmatprep.subr.bf16.mxu0 %v15851_v41  ;;  %9992 = vmatprep.subr.bf16.mxu1 %v15854_v43  ;;  %v15915_v41 = vld [vmem:[#allocation10 + $0xf00] ss:$16 sps:$4 sm:$0xff]   ;;  %v15918_v43 = vld [vmem:[#allocation10 + $0xf08] ss:$16 sps:$4 sm:$0xff]  }
 0xee3   : > { %9911 = vmatpush1.bf16.msra.mxu0 %v15849_v50  ;;  %9993 = vmatpush1.bf16.msra.mxu1 %v15852_v51  ;;  %v15923_v50 = vld [vmem:[#allocation10 + $0xf24] ss:$16 sps:$4 sm:$0xff]   ;;  %v15926_v51 = vld [vmem:[#allocation10 + $0xf2c] ss:$16 sps:$4 sm:$0xff]  }
 0xee4   : > { %9912 = vmatprep.subr.bf16.mxu0 %v15857_v52  ;;  %9994 = vmatprep.subr.bf16.mxu1 %v15860_v44  ;;  %v15921_v52 = vld [vmem:[#allocation10 + $0xf20] ss:$16 sps:$4 sm:$0xff]   ;;  %v15924_v44 = vld [vmem:[#allocation10 + $0xf28] ss:$16 sps:$4 sm:$0xff]  }
 0xee7   : > { %9913 = vmatpush1.bf16.msra.mxu0 %v15855_v39  ;;  %9995 = vmatpush1.bf16.msra.mxu1 %v15858_v40  ;;  %v15929_v39 = vld [vmem:[#allocation10 + $0xf44] ss:$16 sps:$4 sm:$0xff]   ;;  %v15932_v40 = vld [vmem:[#allocation10 + $0xf4c] ss:$16 sps:$4 sm:$0xff]  }
 0xee8   : > { %9914 = vmatprep.subr.bf16.mxu0 %v15863_v22  ;;  %9996 = vmatprep.subr.bf16.mxu1 %v15866_v45  ;;  %v15927_v22 = vld [vmem:[#allocation10 + $0xf40] ss:$16 sps:$4 sm:$0xff]   ;;  %v15930_v45 = vld [vmem:[#allocation10 + $0xf48] ss:$16 sps:$4 sm:$0xff]  }
 0xeeb   : > { %9915 = vmatpush1.bf16.msra.mxu0 %v15861_v25  ;;  %9997 = vmatpush1.bf16.msra.mxu1 %v15864_v46  ;;  %v15935_v25 = vld [vmem:[#allocation10 + $0xf64] ss:$16 sps:$4 sm:$0xff]   ;;  %v15938_v46 = vld [vmem:[#allocation10 + $0xf6c] ss:$16 sps:$4 sm:$0xff]  }
 0xeec   : > { %9925 = vmatprep.subr.bf16.mxu0 %v15869_v53  ;;  %10007 = vmatprep.subr.bf16.mxu1 %v15872_v47  ;;  %v15933_v53 = vld [vmem:[#allocation10 + $0xf60] ss:$16 sps:$4 sm:$0xff]   ;;  %v15936_v47 = vld [vmem:[#allocation10 + $0xf68] ss:$16 sps:$4 sm:$0xff]  }
 0xf81   : > { %v9063_v54 = vpop.f32.mrb[52].mxu0  ;;  %v17428_v48 = vpop.f32.mrb[44].mxu1 }
 0xf82   : > { %v9065_v55 = vpop.f32.mrb[53].mxu0  ;;  %v9106_v49 = vpop.f32.mrb[45].mxu1  ;;  %v9111_v1 = vpack.c.bf16 %v9063_v54, %v9063_v54  ;;  %v15941_v54 = vld [vmem:[#allocation10 + $0xf84] ss:$16 sps:$4 sm:$0xff]  }
 0xf83   : > { %v9112_v56 = vpack.c.bf16 %v9065_v55, %v9065_v55  ;;  %v9067_v58 = vpop.f32.mrb[54].mxu0  ;;  %v9108_v62 = vpop.f32.mrb[46].mxu1  ;;  %v9114_v5 = vpack.c.bf16 %v9106_v49, %v9106_v49  ;;  %v15944_v55 = vld [vmem:[#allocation10 + $0xf8c] ss:$16 sps:$4 sm:$0xff]   ;;  %v15939_v49 = vld [vmem:[#allocation10 + $0xf80] ss:$16 sps:$4 sm:$0xff]  }
 0xf84   : > { %v9068_v2 = vpop.f32.mrb[55].mxu0  ;;  %v9109_v37 = vpop.f32.mrb[47].mxu1  ;;  %v15947_v58 = vld [vmem:[#allocation10 + $0xfa4] ss:$16 sps:$4 sm:$0xff]   ;;  %v15948_v62 = vld [vmem:[#allocation10 + $0xfa8] ss:$16 sps:$4 sm:$0xff]  }
 0xf85   : > { %9916 = vmatprep.mubr.bf16.mxu0 %v9112_v56  ;;  %9998 = vmatprep.mubr.bf16.mxu1 %v9112_v56  ;;  %v15942_v56 = vld [vmem:[#allocation10 + $0xf88] ss:$16 sps:$4 sm:$0xff]   ;;  %v15956_v2 = vld [vmem:[#allocation10 + $0xfcc] ss:$16 sps:$4 sm:$0xff]   ;;  %v15959_v37 = vld [vmem:[#allocation10 + $0xfe4] ss:$16 sps:$4 sm:$0xff]  }
 0xf86   : > { %9917 = vmatmul.mubr.bf16.vlgmr.msra.gmra.mrb[40].mxu0 %v9111_v1  ;;  %9999 = vmatmul.mubr.bf16.vlgmr.msra.gmra.mrb[32].mxu1 %v9111_v1  ;;  %v15953_v1 = vld [vmem:[#allocation10 + $0xfc4] ss:$16 sps:$4 sm:$0xff]  }
 0xf87   : > { %9926 = vmatpush1.bf16.msra.mxu0 %v15867_v60  ;;  %10008 = vmatpush1.bf16.msra.mxu1 %v15870_v61  ;;  %v15950_v60 = vld [vmem:[#allocation10 + $0xfac] ss:$16 sps:$4 sm:$0xff]   ;;  %v15945_v61 = vld [vmem:[#allocation10 + $0xfa0] ss:$16 sps:$4 sm:$0xff]  }
 0xf88   : > { %9927 = vmatprep.subr.bf16.mxu0 %v15875_v3  ;;  %10009 = vmatprep.subr.bf16.mxu1 %v15878_v4  ;;  %v15951_v3 = vld [vmem:[#allocation10 + $0xfc0] ss:$16 sps:$4 sm:$0xff]   ;;  %v15954_v4 = vld [vmem:[#allocation10 + $0xfc8] ss:$16 sps:$4 sm:$0xff]  }
 0xf89   : > { %9957 = vmatprep.mubr.bf16.mxu0 %v9114_v5  ;;  %10039 = vmatprep.mubr.bf16.mxu1 %v9114_v5  ;;  %v15962_v5 = vld [vmem:[#allocation10 + $0xfec] ss:$16 sps:$4 sm:$0xff]  }
 0xf8b   : > { %9928 = vmatpush1.bf16.msra.mxu0 %v15873_v6  ;;  %10010 = vmatpush1.bf16.msra.mxu1 %v15876_v42  ;;  %v15957_v6 = vld [vmem:[#allocation10 + $0xfe0] ss:$16 sps:$4 sm:$0xff]   ;;  %v15960_v42 = vld [vmem:[#allocation10 + $0xfe8] ss:$16 sps:$4 sm:$0xff]  }
 0xf8c   : > { %9929 = vmatprep.subr.bf16.mxu0 %v15881_v7  ;;  %10011 = vmatprep.subr.bf16.mxu1 %v15884_v8  ;;  %v9113_v7 = vpack.c.bf16 %v17428_v48, %v17428_v48  ;;  %v5897_v8 = vld [vmem:[#allocation11] sm:$0xf] }
 0xf8f   : > { %9930 = vmatpush1.bf16.msra.mxu0 %v15879_v9  ;;  %10012 = vmatpush1.bf16.msra.mxu1 %v15882_v10  ;;  %v6938_v9 = vrot.slane %v5897_v8, %v17259_v17  ;;  %v6946_v10 = vrot.slane %v5897_v8, %v17262_v18 }
 0xf90   : > { %9931 = vmatprep.subr.bf16.mxu0 %v15887_v11  ;;  %10013 = vmatprep.subr.bf16.mxu1 %v15890_v12  ;;  %v6942_v11 = vrot.slane %v5897_v8, %v17265_v20  ;;  %v6950_v12 = vrot.slane %v5897_v8, %v17268_v21 }
 0xf93   : > { %9932 = vmatpush1.bf16.msra.mxu0 %v15885_v13  ;;  %10014 = vmatpush1.bf16.msra.mxu1 %v15888_v14 }
 0xf94   : > { %9933 = vmatprep.subr.bf16.mxu0 %v15893_v19  ;;  %10015 = vmatprep.subr.bf16.mxu1 %v15896_v23 }
 0xf97   : > { %9934 = vmatpush1.bf16.msra.mxu0 %v15891_v24  ;;  %10016 = vmatpush1.bf16.msra.mxu1 %v15894_v26 }
 0xf98   : > { %9935 = vmatprep.subr.bf16.mxu0 %v15899_v59  ;;  %10017 = vmatprep.subr.bf16.mxu1 %v15902_v57 }
 0xf9b   : > { %9936 = vmatpush1.bf16.msra.mxu0 %v15897_v27  ;;  %10018 = vmatpush1.bf16.msra.mxu1 %v15900_v28 }
 0xf9c   : > { %9937 = vmatprep.subr.bf16.mxu0 %v15905_v29  ;;  %10019 = vmatprep.subr.bf16.mxu1 %v15908_v63 }
 0xf9f   : > { %9938 = vmatpush1.bf16.msra.mxu0 %v15903_v30  ;;  %10020 = vmatpush1.bf16.msra.mxu1 %v15906_v31 }
 0xfa0   : > { %9939 = vmatprep.subr.bf16.mxu0 %v15911_v32  ;;  %10021 = vmatprep.subr.bf16.mxu1 %v15914_v33  ;;  %v15963_v33 = vld [vmem:[#allocation13 + $0x40] sm:$0xff]  }
 0xfa3   : > { %9940 = vmatpush1.bf16.msra.mxu0 %v15909_v34  ;;  %10022 = vmatpush1.bf16.msra.mxu1 %v15912_v35  ;;  %v15964_v34 = vld [vmem:[#allocation13 + $0xc0] sm:$0xff]  }
 0xfa4   : > { %9941 = vmatprep.subr.bf16.mxu0 %v15917_v36  ;;  %10023 = vmatprep.subr.bf16.mxu1 %v15920_v38  ;;  %v17457_v38 = vld [vmem:[%s17684_s21] sm:$0x1] }
 0xfa7   : > { %9942 = vmatpush1.bf16.msra.mxu0 %v15915_v41  ;;  %10024 = vmatpush1.bf16.msra.mxu1 %v15918_v43  ;;  %v15965_v41 = vld [vmem:[#allocation13] sm:$0xff]  }
 0xfa8   : > { %9943 = vmatprep.subr.bf16.mxu0 %v15923_v50  ;;  %10025 = vmatprep.subr.bf16.mxu1 %v15926_v51  ;;  %v15966_v43 = vld [vmem:[#allocation13 + $0x80] sm:$0xff]   ;;  %v15967_v50 = vld [vmem:[#allocation13 + $0x48] sm:$0xff]  }
 0xfa9   : > { %v15968_v51 = vld [vmem:[#allocation13 + $0xc8] sm:$0xff]  }
 0xfab   : > { %9944 = vmatpush1.bf16.msra.mxu0 %v15921_v52  ;;  %10026 = vmatpush1.bf16.msra.mxu1 %v15924_v44  ;;  %v15969_v52 = vld [vmem:[#allocation13 + $0x8] sm:$0xff]  }
 0xfac   : > { %9945 = vmatprep.subr.bf16.mxu0 %v15929_v39  ;;  %10027 = vmatprep.subr.bf16.mxu1 %v15932_v40  ;;  %v15970_v44 = vld [vmem:[#allocation13 + $0x88] sm:$0xff]   ;;  %v15971_v39 = vld [vmem:[#allocation13 + $0x50] sm:$0xff]  }
 0xfad   : > { %v15972_v40 = vld [vmem:[#allocation13 + $0xd0] sm:$0xff]  }
 0xfaf   : > { %9946 = vmatpush1.bf16.msra.mxu0 %v15927_v22  ;;  %10028 = vmatpush1.bf16.msra.mxu1 %v15930_v45  ;;  %v15973_v22 = vld [vmem:[#allocation13 + $0x10] sm:$0xff]  }
 0xfb0   : > { %9947 = vmatprep.subr.bf16.mxu0 %v15935_v25  ;;  %10029 = vmatprep.subr.bf16.mxu1 %v15938_v46  ;;  %v15974_v45 = vld [vmem:[#allocation13 + $0x90] sm:$0xff]   ;;  %v15975_v25 = vld [vmem:[#allocation13 + $0x58] sm:$0xff]  }
 0xfb1   : > { %v15976_v46 = vld [vmem:[#allocation13 + $0xd8] sm:$0xff]  }
 0xfb3   : > { %9948 = vmatpush1.bf16.msra.mxu0 %v15933_v53  ;;  %10030 = vmatpush1.bf16.msra.mxu1 %v15936_v47  ;;  %v15977_v53 = vld [vmem:[#allocation13 + $0x18] sm:$0xff]  }
 0xfb4   : > { %9949 = vmatprep.subr.bf16.mxu0 %v15941_v54  ;;  %10031 = vmatprep.subr.bf16.mxu1 %v15944_v55  ;;  %v15978_v47 = vld [vmem:[#allocation13 + $0x98] sm:$0xff]   ;;  %v15979_v54 = vld [vmem:[#allocation13 + $0x60] sm:$0xff]  }
 0xfb5   : > { %v15980_v55 = vld [vmem:[#allocation13 + $0xe0] sm:$0xff]  }
 0xfb7   : > { %9950 = vmatpush1.bf16.msra.mxu0 %v15939_v49  ;;  %10032 = vmatpush1.bf16.msra.mxu1 %v15942_v56  ;;  %v15981_v49 = vld [vmem:[#allocation13 + $0x20] sm:$0xff]  }
 0xfb8   : > { %9951 = vmatprep.subr.bf16.mxu0 %v15947_v58  ;;  %10033 = vmatprep.subr.bf16.mxu1 %v15950_v60  ;;  %v15982_v56 = vld [vmem:[#allocation13 + $0xa0] sm:$0xff]   ;;  %v15983_v58 = vld [vmem:[#allocation13 + $0x68] sm:$0xff]  }
 0xfb9   : > { %v15984_v60 = vld [vmem:[#allocation13 + $0xe8] sm:$0xff]  }
 0xfbb   : > { %9952 = vmatpush1.bf16.msra.mxu0 %v15945_v61  ;;  %10034 = vmatpush1.bf16.msra.mxu1 %v15948_v62  ;;  %v15985_v61 = vld [vmem:[#allocation13 + $0x28] sm:$0xff]  }
 0xfbc   : > { %9953 = vmatprep.subr.bf16.mxu0 %v15953_v1  ;;  %10035 = vmatprep.subr.bf16.mxu1 %v15956_v2  ;;  %v15986_v62 = vld [vmem:[#allocation13 + $0xa8] sm:$0xff]   ;;  %v15987_v1 = vld [vmem:[#allocation13 + $0x70] sm:$0xff]  }
 0xfbd   : > { %v15988_v2 = vld [vmem:[#allocation13 + $0xf0] sm:$0xff]  }
 0xfbf   : > { %9954 = vmatpush1.bf16.msra.mxu0 %v15951_v3  ;;  %10036 = vmatpush1.bf16.msra.mxu1 %v15954_v4  ;;  %v15989_v3 = vld [vmem:[#allocation13 + $0x30] sm:$0xff]  }
 0xfc0   : > { %9955 = vmatprep.subr.bf16.mxu0 %v15959_v37  ;;  %10037 = vmatprep.subr.bf16.mxu1 %v15962_v5  ;;  %v15990_v4 = vld [vmem:[#allocation13 + $0xb0] sm:$0xff]   ;;  %v15991_v37 = vld [vmem:[#allocation13 + $0x78] sm:$0xff]  }
 0xfc1   : > { %v15992_v5 = vld [vmem:[#allocation13 + $0xf8] sm:$0xff]  }
 0xfc3   : > { %9956 = vmatpush1.bf16.msra.mxu0 %v15957_v6  ;;  %10038 = vmatpush1.bf16.msra.mxu1 %v15960_v42  ;;  %v15993_v6 = vld [vmem:[#allocation13 + $0x38] sm:$0xff]  }
 0xfc4   : > { %v15994_v42 = vld [vmem:[#allocation13 + $0xb8] sm:$0xff]  }
 0xfc6   : > { %9958 = vmatmul.mubr.bf16.vlgmr.msra.gmra.mrb[40].mxu0 %v9113_v7  ;;  %10040 = vmatmul.mubr.bf16.vlgmr.msra.gmra.mrb[32].mxu1 %v9113_v7  ;;  %v16651_v7 = vmov 1983009808  }
 0xfc7   : > { %10111 = vmatprep.mubr.bf16.mxu0 %v16650_v15  ;;  %10152 = vmatprep.mubr.bf16.mxu1 %v16650_v15  ;;  %v10504_v8 = vunpack.c.l.s4 %v16651_v7 }
0x1099   : > { %v9959_v13 = vpop.f32.mrb[40].mxu0  ;;  %v10041_v14 = vpop.f32.mrb[32].mxu1 }
0x109a   : > { %v14011_v19 = vadd.f32 %v9959_v13, %v6938_v9  ;;  %v14013_v23 = vadd.f32 %v10041_v14, %v6946_v10  ;;  %v9961_v48 = vpop.f32.mrb[41].mxu0  ;;  %v10043_v24 = vpop.f32.mrb[33].mxu1  ;;  %v10505_v9 = vunpack.c.0.s8 %v10504_v8 }
0x109b   : > { %v14012_v26 = vadd.f32 %v9961_v48, %v6942_v11  ;;  %v14014_v59 = vadd.f32 %v10043_v24, %v6950_v12  ;;  %v9963_v57 = vpop.f32.mrb[42].mxu0  ;;  %v10045_v27 = vpop.f32.mrb[34].mxu1 }
0x109c   : > { %v10052_v28 = vmax.f32 %v14011_v19, 0.0  ;;  %v10054_v29 = vmax.f32 %v14013_v23, 0.0  ;;  %v9964_v63 = vpop.f32.mrb[43].mxu0  ;;  %v10046_v17 = vpop.f32.mrb[35].mxu1  ;;  %v10508_v12 = vsub.s32 %v10505_v9, %v17256_v16 }
0x109d   : > { %v10053_v30 = vmax.f32 %v14012_v26, 0.0  ;;  %v10055_v18 = vmax.f32 %v14014_v59, 0.0  ;;  %v15997_v17 = vld [vmem:[#allocation13 + $0x100] sm:$0xff]  }
0x109e   : > { %v10056_v20 = vpack.c.bf16 %v10052_v28, %v10052_v28  ;;  %v10058_v31 = vpack.c.bf16 %v10054_v29, %v10054_v29  ;;  %v15995_v28 = vld [vmem:[#allocation13 + $0x140] sm:$0xff]   ;;  %v10509_v63 = vrot.slane %v17457_v38, %v10508_v12 }
0x109f   : > { %v17438_v21 = vpack.c.bf16 %v10053_v30, %v10053_v30  ;;  %v17440_v32 = vpack.c.bf16 %v10055_v18, %v10055_v18  ;;  %v15996_v29 = vld [vmem:[#allocation13 + $0x1c0] sm:$0xff]   ;;  %v15999_v18 = vld [vmem:[#allocation13 + $0x148] sm:$0xff]  }
0x10a0   : > { %v17443_v35 = vsel %vm10066_vm7, %v10056_v20, 0  ;;  %v17446_v36 = vsel %vm10066_vm7, %v10058_v31, 0  ;;  %v10511_v16 = vshrl.u32 %v10509_v63, 16  ;;  %v15998_v30 = vld [vmem:[#allocation13 + $0x180] sm:$0xff]   ;;  %v16000_v20 = vld [vmem:[#allocation13 + $0x1c8] sm:$0xff]  }
0x10a1   : > { %13540 = vmatprep.subr.msk.bf16.mxu0 %vm10066_vm7, %v17438_v21  ;;  %13542 = vmatprep.subr.msk.bf16.mxu1 %vm10066_vm7, %v17440_v32  ;;  %v16001_v31 = vld [vmem:[#allocation13 + $0x108] sm:$0xff]  }
0x10a2   : > { %10080 = vmatpush1.bf16.msra.mxu0 %v17443_v35  ;;  %10121 = vmatpush1.bf16.msra.mxu1 %v17446_v36 }
0x10a3   : > { %13720 = vmatprep.subr.bf16.mxu0 %v15963_v33  ;;  %13742 = vmatprep.subr.bf16.mxu1 %v15964_v34  ;;  %v16002_v33 = vld [vmem:[#allocation13 + $0x188] sm:$0xff]   ;;  %v16003_v34 = vld [vmem:[#allocation13 + $0x150] sm:$0xff]  }
0x10a5   : > { %13541 = vmatmul.mubr.msk.bf16.vlgmr.msra.gmra.mrb[56].mxu0 %vm10062_vm8, %v17457_v38  ;;  %13543 = vmatmul.mubr.msk.bf16.vlgmr.msra.gmra.mrb[48].mxu1 %vm10062_vm8, %v17457_v38  ;;  %v16004_v38 = vld [vmem:[#allocation13 + $0x1d0] sm:$0xff]  }
0x10a6   : > { %13721 = vmatpush3.bf16.msra.mxu0 %v15965_v41  ;;  %13743 = vmatpush3.bf16.msra.mxu1 %v15966_v43  ;;  %v16005_v41 = vld [vmem:[#allocation13 + $0x110] sm:$0xff]  }
0x10a7   : > { %13722 = vmatprep.subr.bf16.mxu0 %v15967_v50  ;;  %13744 = vmatprep.subr.bf16.mxu1 %v15968_v51  ;;  %v16006_v43 = vld [vmem:[#allocation13 + $0x190] sm:$0xff]   ;;  %v16007_v50 = vld [vmem:[#allocation13 + $0x158] sm:$0xff]  }
0x10a8   : > { %v16008_v51 = vld [vmem:[#allocation13 + $0x1d8] sm:$0xff]  }
0x10aa   : > { %13723 = vmatpush3.bf16.msra.mxu0 %v15969_v52  ;;  %13745 = vmatpush3.bf16.msra.mxu1 %v15970_v44  ;;  %v16009_v52 = vld [vmem:[#allocation13 + $0x118] sm:$0xff]  }
0x10ab   : > { %13724 = vmatprep.subr.bf16.mxu0 %v15971_v39  ;;  %13746 = vmatprep.subr.bf16.mxu1 %v15972_v40  ;;  %v16010_v44 = vld [vmem:[#allocation13 + $0x198] sm:$0xff]   ;;  %v16011_v39 = vld [vmem:[#allocation13 + $0x160] sm:$0xff]  }
0x10ac   : > { %v16012_v40 = vld [vmem:[#allocation13 + $0x1e0] sm:$0xff]  }
0x10ae   : > { %13725 = vmatpush3.bf16.msra.mxu0 %v15973_v22  ;;  %13747 = vmatpush3.bf16.msra.mxu1 %v15974_v45  ;;  %v16013_v22 = vld [vmem:[#allocation13 + $0x120] sm:$0xff]  }
0x10af   : > { %13726 = vmatprep.subr.bf16.mxu0 %v15975_v25  ;;  %13748 = vmatprep.subr.bf16.mxu1 %v15976_v46  ;;  %v16014_v45 = vld [vmem:[#allocation13 + $0x1a0] sm:$0xff]   ;;  %v16015_v25 = vld [vmem:[#allocation13 + $0x168] sm:$0xff]  }
0x10b0   : > { %v16016_v46 = vld [vmem:[#allocation13 + $0x1e8] sm:$0xff]  }
0x10b2   : > { %13727 = vmatpush3.bf16.msra.mxu0 %v15977_v53  ;;  %13749 = vmatpush3.bf16.msra.mxu1 %v15978_v47  ;;  %v16017_v53 = vld [vmem:[#allocation13 + $0x128] sm:$0xff]  }
0x10b3   : > { %13728 = vmatprep.subr.bf16.mxu0 %v15979_v54  ;;  %13750 = vmatprep.subr.bf16.mxu1 %v15980_v55  ;;  %v16018_v47 = vld [vmem:[#allocation13 + $0x1a8] sm:$0xff]   ;;  %v16019_v54 = vld [vmem:[#allocation13 + $0x170] sm:$0xff]  }
0x10b4   : > { %v16020_v55 = vld [vmem:[#allocation13 + $0x1f0] sm:$0xff]  }
0x10b6   : > { %13729 = vmatpush3.bf16.msra.mxu0 %v15981_v49  ;;  %13751 = vmatpush3.bf16.msra.mxu1 %v15982_v56  ;;  %v16021_v49 = vld [vmem:[#allocation13 + $0x130] sm:$0xff]  }
0x10b7   : > { %13730 = vmatprep.subr.bf16.mxu0 %v15983_v58  ;;  %13752 = vmatprep.subr.bf16.mxu1 %v15984_v60  ;;  %v16022_v56 = vld [vmem:[#allocation13 + $0x1b0] sm:$0xff]   ;;  %v16023_v58 = vld [vmem:[#allocation13 + $0x178] sm:$0xff]  }
0x10b8   : > { %v16024_v60 = vld [vmem:[#allocation13 + $0x1f8] sm:$0xff]  }
0x10ba   : > { %13731 = vmatpush3.bf16.msra.mxu0 %v15985_v61  ;;  %13753 = vmatpush3.bf16.msra.mxu1 %v15986_v62  ;;  %v16025_v61 = vld [vmem:[#allocation13 + $0x138] sm:$0xff]  }
0x10bb   : > { %13732 = vmatprep.subr.bf16.mxu0 %v15987_v1  ;;  %13754 = vmatprep.subr.bf16.mxu1 %v15988_v2  ;;  %v16026_v62 = vld [vmem:[#allocation13 + $0x1b8] sm:$0xff]  }
0x10be   : > { %13733 = vmatpush3.bf16.msra.mxu0 %v15989_v3  ;;  %13755 = vmatpush3.bf16.msra.mxu1 %v15990_v4 }
0x10bf   : > { %13734 = vmatprep.subr.bf16.mxu0 %v15991_v37  ;;  %13756 = vmatprep.subr.bf16.mxu1 %v15992_v5 }
0x10c2   : > { %13735 = vmatpush3.bf16.msra.mxu0 %v15993_v6  ;;  %13757 = vmatpush3.bf16.msra.mxu1 %v15994_v42 }
0x10c3   : > { %13576 = vmatprep.subr.msk.bf16.mxu0 %vm10066_vm7, %v17438_v21  ;;  %13578 = vmatprep.subr.msk.bf16.mxu1 %vm10066_vm7, %v17440_v32 }
0x1178   : > { %v10113_v10 = vpop.f32.mrb[56].mxu0  ;;  %v10154_v11 = vpop.f32.mrb[48].mxu1 }
0x1179   : > { %v10163_v13 = vpack.c.bf16 %v10154_v11, %v10154_v11  ;;  %v10115_v14 = vpop.f32.mrb[57].mxu0  ;;  %v10156_v19 = vpop.f32.mrb[49].mxu1  ;;  %v10161_v59 = vpack.c.bf16 %v10113_v10, %v10113_v10 }
0x117a   : > { %v10162_v23 = vpack.c.bf16 %v10115_v14, %v10115_v14  ;;  %v10164_v48 = vpack.c.bf16 %v10156_v19, %v10156_v19  ;;  %v10117_v24 = vpop.f32.mrb[58].mxu0  ;;  %v10158_v26 = vpop.f32.mrb[50].mxu1 }
0x117b   : > { %v10118_v57 = vpop.f32.mrb[59].mxu0  ;;  %v10159_v27 = vpop.f32.mrb[51].mxu1 }
0x117c   : > { %10453 = vmatprep.mubr.bf16.mxu0 %v10162_v23  ;;  %10493 = vmatprep.mubr.bf16.mxu1 %v10164_v48  ;;  %v16027_v27 = vld [vmem:[#allocation13 + $0x240] sm:$0xff]  }
0x117d   : > { %10454 = vmatmul.mubr.bf16.vlgmr.msra.gmra.mrb[60].mxu0 %v10161_v59  ;;  %10494 = vmatmul.mubr.bf16.vlgmr.msra.gmra.mrb[52].mxu1 %v10163_v13 }
0x117e   : > { %10517 = vmatpush1.bf16.msra.mxu0 %v17443_v35  ;;  %10558 = vmatpush1.bf16.msra.mxu1 %v17446_v36 }
0x117f   : > { %10548 = vmatprep.mubr.bf16.mxu0 %v16650_v15  ;;  %10589 = vmatprep.mubr.bf16.mxu1 %v16650_v15 }
0x1180   : > { %13764 = vmatprep.subr.bf16.mxu0 %v15995_v28  ;;  %13786 = vmatprep.subr.bf16.mxu1 %v15996_v29  ;;  %v16028_v28 = vld [vmem:[#allocation13 + $0x2c0] sm:$0xff]   ;;  %v17486_v29 = vld.sshfl [vmem:[%s17684_s21] sm:$0x2 pattern:$0x76325410] }
0x1181   : > { %v10949_v63 = vrot.slane %v17486_v29, 1 }
0x1185   : > { %13577 = vmatmul.mubr.msk.bf16.vlgmr.msra.gmra.mrb[64].mxu0 %vm10062_vm8, %v10511_v16  ;;  %13579 = vmatmul.mubr.msk.bf16.vlgmr.msra.gmra.mrb[56].mxu1 %vm10062_vm8, %v10511_v16  ;;  %v16029_v16 = vld [vmem:[#allocation13 + $0x200] sm:$0xff]  }
0x1186   : > { %13765 = vmatpush3.bf16.msra.mxu0 %v15997_v17  ;;  %13787 = vmatpush3.bf16.msra.mxu1 %v15998_v30  ;;  %v16030_v17 = vld [vmem:[#allocation13 + $0x280] sm:$0xff]   ;;  %v16031_v30 = vld [vmem:[#allocation13 + $0x248] sm:$0xff]  }
0x1187   : > { %13766 = vmatprep.subr.bf16.mxu0 %v15999_v18  ;;  %13788 = vmatprep.subr.bf16.mxu1 %v16000_v20  ;;  %v16032_v18 = vld [vmem:[#allocation13 + $0x2c8] sm:$0xff]  }
0x1188   : > { %v16033_v20 = vld [vmem:[#allocation13 + $0x208] sm:$0xff]  }
0x118a   : > { %13767 = vmatpush3.bf16.msra.mxu0 %v16001_v31  ;;  %13789 = vmatpush3.bf16.msra.mxu1 %v16002_v33  ;;  %v16034_v31 = vld [vmem:[#allocation13 + $0x288] sm:$0xff]   ;;  %v16035_v33 = vld [vmem:[#allocation13 + $0x250] sm:$0xff]  }
0x118b   : > { %13768 = vmatprep.subr.bf16.mxu0 %v16003_v34  ;;  %13790 = vmatprep.subr.bf16.mxu1 %v16004_v38  ;;  %v16036_v34 = vld [vmem:[#allocation13 + $0x2d0] sm:$0xff]  }
0x118c   : > { %v16037_v38 = vld [vmem:[#allocation13 + $0x210] sm:$0xff]  }
0x118e   : > { %13769 = vmatpush3.bf16.msra.mxu0 %v16005_v41  ;;  %13791 = vmatpush3.bf16.msra.mxu1 %v16006_v43  ;;  %v16038_v41 = vld [vmem:[#allocation13 + $0x290] sm:$0xff]   ;;  %v16039_v43 = vld [vmem:[#allocation13 + $0x258] sm:$0xff]  }
0x118f   : > { %13770 = vmatprep.subr.bf16.mxu0 %v16007_v50  ;;  %13792 = vmatprep.subr.bf16.mxu1 %v16008_v51  ;;  %v16040_v50 = vld [vmem:[#allocation13 + $0x2d8] sm:$0xff]  }
0x1190   : > { %v16041_v51 = vld [vmem:[#allocation13 + $0x218] sm:$0xff]  }
0x1192   : > { %13771 = vmatpush3.bf16.msra.mxu0 %v16009_v52  ;;  %13793 = vmatpush3.bf16.msra.mxu1 %v16010_v44  ;;  %v16042_v52 = vld [vmem:[#allocation13 + $0x298] sm:$0xff]   ;;  %v16043_v44 = vld [vmem:[#allocation13 + $0x260] sm:$0xff]  }
0x1193   : > { %13772 = vmatprep.subr.bf16.mxu0 %v16011_v39  ;;  %13794 = vmatprep.subr.bf16.mxu1 %v16012_v40  ;;  %v16044_v39 = vld [vmem:[#allocation13 + $0x2e0] sm:$0xff]  }
0x1194   : > { %v16045_v40 = vld [vmem:[#allocation13 + $0x220] sm:$0xff]  }
0x1196   : > { %13773 = vmatpush3.bf16.msra.mxu0 %v16013_v22  ;;  %13795 = vmatpush3.bf16.msra.mxu1 %v16014_v45  ;;  %v16046_v22 = vld [vmem:[#allocation13 + $0x2a0] sm:$0xff]   ;;  %v16047_v45 = vld [vmem:[#allocation13 + $0x268] sm:$0xff]  }
0x1197   : > { %13774 = vmatprep.subr.bf16.mxu0 %v16015_v25  ;;  %13796 = vmatprep.subr.bf16.mxu1 %v16016_v46  ;;  %v16048_v25 = vld [vmem:[#allocation13 + $0x2e8] sm:$0xff]  }
0x1198   : > { %v16049_v46 = vld [vmem:[#allocation13 + $0x228] sm:$0xff]  }
0x119a   : > { %13775 = vmatpush3.bf16.msra.mxu0 %v16017_v53  ;;  %13797 = vmatpush3.bf16.msra.mxu1 %v16018_v47  ;;  %v16050_v53 = vld [vmem:[#allocation13 + $0x2a8] sm:$0xff]   ;;  %v16051_v47 = vld [vmem:[#allocation13 + $0x270] sm:$0xff]  }
0x119b   : > { %13776 = vmatprep.subr.bf16.mxu0 %v16019_v54  ;;  %13798 = vmatprep.subr.bf16.mxu1 %v16020_v55  ;;  %v16052_v54 = vld [vmem:[#allocation13 + $0x2f0] sm:$0xff]  }
0x119c   : > { %v16053_v55 = vld [vmem:[#allocation13 + $0x230] sm:$0xff]  }
0x119e   : > { %13777 = vmatpush3.bf16.msra.mxu0 %v16021_v49  ;;  %13799 = vmatpush3.bf16.msra.mxu1 %v16022_v56  ;;  %v16054_v49 = vld [vmem:[#allocation13 + $0x2b0] sm:$0xff]   ;;  %v16055_v56 = vld [vmem:[#allocation13 + $0x278] sm:$0xff]  }
0x119f   : > { %13778 = vmatprep.subr.bf16.mxu0 %v16023_v58  ;;  %13800 = vmatprep.subr.bf16.mxu1 %v16024_v60  ;;  %v16056_v58 = vld [vmem:[#allocation13 + $0x2f8] sm:$0xff]  }
0x11a0   : > { %v16057_v60 = vld [vmem:[#allocation13 + $0x238] sm:$0xff]  }
0x11a2   : > { %13779 = vmatpush3.bf16.msra.mxu0 %v16025_v61  ;;  %13801 = vmatpush3.bf16.msra.mxu1 %v16026_v62  ;;  %v16058_v61 = vld [vmem:[#allocation13 + $0x2b8] sm:$0xff]  }
0x11a3   : > { %13613 = vmatprep.subr.msk.bf16.mxu0 %vm10066_vm7, %v17438_v21  ;;  %13615 = vmatprep.subr.msk.bf16.mxu1 %vm10066_vm7, %v17440_v32 }
0x1250   : > { %v13736_v1 = vpop.f32.mrb[60].mxu0  ;;  %v13758_v2 = vpop.f32.mrb[52].mxu1 }
0x1251   : > { %v13737_v3 = vpop.f32.mrb[61].mxu0  ;;  %v13759_v4 = vpop.f32.mrb[53].mxu1 }
0x1252   : > { %v13738_v37 = vadd.f32 %v13737_v3, %v13736_v1  ;;  %v13739_v5 = vpop.f32.mrb[62].mxu0  ;;  %v13760_v6 = vadd.f32 %v13759_v4, %v13758_v2  ;;  %v13761_v42 = vpop.f32.mrb[54].mxu1  ;;  %v10060_v2 = vld [vmem:[#allocation14] sm:$0x1] }
0x1253   : > { %v13740_v7 = vpop.f32.mrb[63].mxu0  ;;  %v13762_v8 = vpop.f32.mrb[55].mxu1 }
0x1254   : > { %v17479_v9 = vadd.f32 %v13760_v6, %v13738_v37 }
0x1258   : > { %v10550_v10 = vpop.f32.mrb[64].mxu0  ;;  %v10591_v11 = vpop.f32.mrb[56].mxu1 }
0x1259   : > { %v10600_v12 = vpack.c.bf16 %v10591_v11, %v10591_v11  ;;  %v10552_v13 = vpop.f32.mrb[65].mxu0  ;;  %v10593_v14 = vpop.f32.mrb[57].mxu1  ;;  %v10598_v26 = vpack.c.bf16 %v10550_v10, %v10550_v10  ;;  %v10501_v10 = vadd.f32 %v17479_v9, %v10060_v2  ;;  %v11387_v9 = vshrl.u32 %v17486_v29, 16  ;;  %v16066_v29 = vld [vmem:[#allocation13 + $0x388] sm:$0xff]  }
0x125a   : > { %v10599_v19 = vpack.c.bf16 %v10552_v13, %v10552_v13  ;;  %v10601_v23 = vpack.c.bf16 %v10593_v14, %v10593_v14  ;;  %v10554_v48 = vpop.f32.mrb[66].mxu0  ;;  %v10595_v24 = vpop.f32.mrb[58].mxu1 }
0x125b   : > { %v10555_v59 = vpop.f32.mrb[67].mxu0  ;;  %v10596_v57 = vpop.f32.mrb[59].mxu1 }
0x125c   : > { %10891 = vmatprep.mubr.bf16.mxu0 %v10599_v19  ;;  %10931 = vmatprep.mubr.bf16.mxu1 %v10601_v23 }
0x125d   : > { %10892 = vmatmul.mubr.bf16.vlgmr.msra.gmra.mrb[68].mxu0 %v10598_v26  ;;  %10932 = vmatmul.mubr.bf16.vlgmr.msra.gmra.mrb[60].mxu1 %v10600_v12 }
0x125e   : > { %10954 = vmatpush1.bf16.msra.mxu0 %v17443_v35  ;;  %10995 = vmatpush1.bf16.msra.mxu1 %v17446_v36 }
0x125f   : > { %10985 = vmatprep.mubr.bf16.mxu0 %v16650_v15  ;;  %11026 = vmatprep.mubr.bf16.mxu1 %v16650_v15 }
0x1260   : > { %13808 = vmatprep.subr.bf16.mxu0 %v16027_v27  ;;  %13830 = vmatprep.subr.bf16.mxu1 %v16028_v28  ;;  %v16059_v28 = vld [vmem:[#allocation13 + $0x340] sm:$0xff]  }
0x1265   : > { %13614 = vmatmul.mubr.msk.bf16.vlgmr.msra.gmra.mrb[72].mxu0 %vm10062_vm8, %v10949_v63  ;;  %13616 = vmatmul.mubr.msk.bf16.vlgmr.msra.gmra.mrb[64].mxu1 %vm10062_vm8, %v10949_v63  ;;  %v16060_v63 = vld [vmem:[#allocation13 + $0x3c0] sm:$0xff]  }
0x1266   : > { %13809 = vmatpush3.bf16.msra.mxu0 %v16029_v16  ;;  %13831 = vmatpush3.bf16.msra.mxu1 %v16030_v17  ;;  %v11389_v16 = vrot.slane %v11387_v9, 1  ;;  %v16061_v17 = vld [vmem:[#allocation13 + $0x300] sm:$0xff]   ;;  %v16103_v9 = vld [vmem:[#allocation23] sm:$0xff]  }
0x1267   : > { %13810 = vmatprep.subr.bf16.mxu0 %v16031_v30  ;;  %13832 = vmatprep.subr.bf16.mxu1 %v16032_v18  ;;  %v16062_v30 = vld [vmem:[#allocation13 + $0x380] sm:$0xff]   ;;  %v16063_v18 = vld [vmem:[#allocation13 + $0x348] sm:$0xff]  }
0x126a   : > { %13811 = vmatpush3.bf16.msra.mxu0 %v16033_v20  ;;  %13833 = vmatpush3.bf16.msra.mxu1 %v16034_v31  ;;  %v16064_v20 = vld [vmem:[#allocation13 + $0x3c8] sm:$0xff]   ;;  %v16068_v31 = vld [vmem:[#allocation13 + $0x3d0] sm:$0xff]  }
0x126b   : > { %13812 = vmatprep.subr.bf16.mxu0 %v16035_v33  ;;  %13834 = vmatprep.subr.bf16.mxu1 %v16036_v34  ;;  %v16070_v33 = vld [vmem:[#allocation13 + $0x390] sm:$0xff]   ;;  %v16071_v34 = vld [vmem:[#allocation13 + $0x358] sm:$0xff]  }
0x126e   : > { %13813 = vmatpush3.bf16.msra.mxu0 %v16037_v38  ;;  %13835 = vmatpush3.bf16.msra.mxu1 %v16038_v41  ;;  %v16072_v38 = vld [vmem:[#allocation13 + $0x3d8] sm:$0xff]  }
0x126f   : > { %13814 = vmatprep.subr.bf16.mxu0 %v16039_v43  ;;  %13836 = vmatprep.subr.bf16.mxu1 %v16040_v50  ;;  %v16073_v41 = vld [vmem:[#allocation13 + $0x318] sm:$0xff]   ;;  %v16075_v50 = vld [vmem:[#allocation13 + $0x360] sm:$0xff]  }
0x1270   : > { %v16074_v43 = vld [vmem:[#allocation13 + $0x398] sm:$0xff]  }
0x1272   : > { %13815 = vmatpush3.bf16.msra.mxu0 %v16041_v51  ;;  %13837 = vmatpush3.bf16.msra.mxu1 %v16042_v52  ;;  %v16076_v51 = vld [vmem:[#allocation13 + $0x3e0] sm:$0xff]  }
0x1273   : > { %13816 = vmatprep.subr.bf16.mxu0 %v16043_v44  ;;  %13838 = vmatprep.subr.bf16.mxu1 %v16044_v39  ;;  %v16077_v52 = vld [vmem:[#allocation13 + $0x320] sm:$0xff]   ;;  %v16079_v39 = vld [vmem:[#allocation13 + $0x368] sm:$0xff]  }
0x1274   : > { %v16078_v44 = vld [vmem:[#allocation13 + $0x3a0] sm:$0xff]  }
0x1276   : > { %13817 = vmatpush3.bf16.msra.mxu0 %v16045_v40  ;;  %13839 = vmatpush3.bf16.msra.mxu1 %v16046_v22  ;;  %v16080_v40 = vld [vmem:[#allocation13 + $0x3e8] sm:$0xff]  }
0x1277   : > { %13818 = vmatprep.subr.bf16.mxu0 %v16047_v45  ;;  %13840 = vmatprep.subr.bf16.mxu1 %v16048_v25  ;;  %v16081_v22 = vld [vmem:[#allocation13 + $0x328] sm:$0xff]   ;;  %v16083_v25 = vld [vmem:[#allocation13 + $0x370] sm:$0xff]  }
0x1278   : > { %v16082_v45 = vld [vmem:[#allocation13 + $0x3a8] sm:$0xff]  }
0x127a   : > { %13819 = vmatpush3.bf16.msra.mxu0 %v16049_v46  ;;  %13841 = vmatpush3.bf16.msra.mxu1 %v16050_v53  ;;  %v16084_v46 = vld [vmem:[#allocation13 + $0x3f0] sm:$0xff]  }
0x127b   : > { %13820 = vmatprep.subr.bf16.mxu0 %v16051_v47  ;;  %13842 = vmatprep.subr.bf16.mxu1 %v16052_v54  ;;  %v16085_v53 = vld [vmem:[#allocation13 + $0x330] sm:$0xff]   ;;  %v16087_v54 = vld [vmem:[#allocation13 + $0x378] sm:$0xff]  }
0x127c   : > { %v16086_v47 = vld [vmem:[#allocation13 + $0x3b0] sm:$0xff]  }
0x127e   : > { %13821 = vmatpush3.bf16.msra.mxu0 %v16053_v55  ;;  %13843 = vmatpush3.bf16.msra.mxu1 %v16054_v49  ;;  %v16088_v55 = vld [vmem:[#allocation13 + $0x3f8] sm:$0xff]  }
0x127f   : > { %13822 = vmatprep.subr.bf16.mxu0 %v16055_v56  ;;  %13844 = vmatprep.subr.bf16.mxu1 %v16056_v58  ;;  %v16089_v49 = vld [vmem:[#allocation13 + $0x338] sm:$0xff]  }
0x1280   : > { %v16090_v56 = vld [vmem:[#allocation13 + $0x3b8] sm:$0xff]  }
0x1282   : > { %13823 = vmatpush3.bf16.msra.mxu0 %v16057_v60  ;;  %13845 = vmatpush3.bf16.msra.mxu1 %v16058_v61 }
0x1283   : > { %13650 = vmatprep.subr.msk.bf16.mxu0 %vm10066_vm7, %v17438_v21  ;;  %13652 = vmatprep.subr.msk.bf16.mxu1 %vm10066_vm7, %v17440_v32 }
0x1330   : > { %v13780_v62 = vpop.f32.mrb[68].mxu0  ;;  %v13802_v1 = vpop.f32.mrb[60].mxu1 }
0x1331   : > { %v13781_v3 = vpop.f32.mrb[69].mxu0  ;;  %v13803_v4 = vpop.f32.mrb[61].mxu1 }
0x1332   : > { %v13782_v37 = vadd.f32 %v13781_v3, %v13780_v62  ;;  %v13804_v5 = vadd.f32 %v13803_v4, %v13802_v1  ;;  %v13783_v6 = vpop.f32.mrb[70].mxu0  ;;  %v13805_v42 = vpop.f32.mrb[62].mxu1 }
0x1333   : > { %v13784_v7 = vpop.f32.mrb[71].mxu0  ;;  %v13806_v8 = vpop.f32.mrb[63].mxu1 }
0x1334   : > { %v10934_v11 = vadd.f32 %v13804_v5, %v13782_v37 }
0x1336   : > { %v17498_v12 = vadd.f32 %v10934_v11, %v10501_v10  ;;  %v11820_v10 = vld [vmem:[#allocation16] sm:$0x3] }
0x1338   : > { %v10987_v21 = vpop.f32.mrb[72].mxu0  ;;  %v11028_v13 = vpop.f32.mrb[64].mxu1 }
0x1339   : > { %v11037_v14 = vpack.c.bf16 %v11028_v13, %v11028_v13  ;;  %v10989_v32 = vpop.f32.mrb[73].mxu0  ;;  %v11030_v19 = vpop.f32.mrb[65].mxu1  ;;  %v11035_v59 = vpack.c.bf16 %v10987_v21, %v10987_v21 }
0x133a   : > { %v11036_v23 = vpack.c.bf16 %v10989_v32, %v10989_v32  ;;  %v11038_v48 = vpack.c.bf16 %v11030_v19, %v11030_v19  ;;  %v10991_v24 = vpop.f32.mrb[74].mxu0  ;;  %v11032_v26 = vpop.f32.mrb[66].mxu1 }
0x133b   : > { %v10992_v57 = vpop.f32.mrb[75].mxu0  ;;  %v11033_v27 = vpop.f32.mrb[67].mxu1  ;;  %v11826_v26 = vsel %vm5903_vm5, %v11820_v10, 0 }
0x133c   : > { %11328 = vmatprep.mubr.bf16.mxu0 %v11036_v23  ;;  %11368 = vmatprep.mubr.bf16.mxu1 %v11038_v48  ;;  %v16091_v57 = vld [vmem:[#allocation19] sm:$0xff]   ;;  %v16092_v27 = vld [vmem:[#allocation19 + $0x8] sm:$0xff]  }
0x133d   : > { %11329 = vmatmul.mubr.bf16.vlgmr.msra.gmra.mrb[76].mxu0 %v11035_v59  ;;  %11369 = vmatmul.mubr.bf16.vlgmr.msra.gmra.mrb[68].mxu1 %v11037_v14 }
0x133e   : > { %11394 = vmatpush1.bf16.msra.mxu0 %v17443_v35  ;;  %11435 = vmatpush1.bf16.msra.mxu1 %v17446_v36  ;;  %v16065_v35 = vld [vmem:[#allocation13 + $0x308] sm:$0xff]   ;;  %v16067_v36 = vld [vmem:[#allocation13 + $0x350] sm:$0xff]  }
0x133f   : > { %11425 = vmatprep.mubr.bf16.mxu0 %v16650_v15  ;;  %11466 = vmatprep.mubr.bf16.mxu1 %v16650_v15  ;;  %v16069_v15 = vld [vmem:[#allocation13 + $0x310] sm:$0xff]  }
0x1340   : > { %13852 = vmatprep.subr.bf16.mxu0 %v16059_v28  ;;  %13874 = vmatprep.subr.bf16.mxu1 %v16060_v63  ;;  %v16093_v28 = vld [vmem:[#allocation19 + $0x10] sm:$0xff]   ;;  %v16094_v63 = vld [vmem:[#allocation19 + $0x18] sm:$0xff]  }
0x1345   : > { %13651 = vmatmul.mubr.msk.bf16.vlgmr.msra.gmra.mrb[80].mxu0 %vm10062_vm8, %v11389_v16  ;;  %13653 = vmatmul.mubr.msk.bf16.vlgmr.msra.gmra.mrb[72].mxu1 %vm10062_vm8, %v11389_v16  ;;  %v16104_v16 = vld [vmem:[#allocation23 + $0x8] sm:$0xff]  }
0x1346   : > { %13853 = vmatpush3.bf16.msra.mxu0 %v16061_v17  ;;  %13875 = vmatpush3.bf16.msra.mxu1 %v16062_v30  ;;  %v16105_v17 = vld [vmem:[#allocation23 + $0x10] sm:$0xff]   ;;  %v16106_v30 = vld [vmem:[#allocation23 + $0x18] sm:$0xff]  }
0x1347   : > { %13854 = vmatprep.subr.bf16.mxu0 %v16063_v18  ;;  %13876 = vmatprep.subr.bf16.mxu1 %v16064_v20  ;;  %v16107_v18 = vld [vmem:[#allocation23 + $0x20] sm:$0xff]   ;;  %v16108_v20 = vld [vmem:[#allocation23 + $0x28] sm:$0xff]  }
0x134a   : > { %13855 = vmatpush3.bf16.msra.mxu0 %v16065_v35  ;;  %13877 = vmatpush3.bf16.msra.mxu1 %v16066_v29 }
0x134b   : > { %13856 = vmatprep.subr.bf16.mxu0 %v16067_v36  ;;  %13878 = vmatprep.subr.bf16.mxu1 %v16068_v31 }
0x134e   : > { %13857 = vmatpush3.bf16.msra.mxu0 %v16069_v15  ;;  %13879 = vmatpush3.bf16.msra.mxu1 %v16070_v33 }
0x134f   : > { %13858 = vmatprep.subr.bf16.mxu0 %v16071_v34  ;;  %13880 = vmatprep.subr.bf16.mxu1 %v16072_v38 }
0x1352   : > { %13859 = vmatpush3.bf16.msra.mxu0 %v16073_v41  ;;  %13881 = vmatpush3.bf16.msra.mxu1 %v16074_v43 }
0x1353   : > { %13860 = vmatprep.subr.bf16.mxu0 %v16075_v50  ;;  %13882 = vmatprep.subr.bf16.mxu1 %v16076_v51 }
0x1356   : > { %13861 = vmatpush3.bf16.msra.mxu0 %v16077_v52  ;;  %13883 = vmatpush3.bf16.msra.mxu1 %v16078_v44  ;;  %v11821_v52 = vld [vmem:[#allocation17] sm:$0x1] }
0x1357   : > { %13862 = vmatprep.subr.bf16.mxu0 %v16079_v39  ;;  %13884 = vmatprep.subr.bf16.mxu1 %v16080_v40 }
0x135a   : > { %13863 = vmatpush3.bf16.msra.mxu0 %v16081_v22  ;;  %13885 = vmatpush3.bf16.msra.mxu1 %v16082_v45 }
0x135b   : > { %13864 = vmatprep.subr.bf16.mxu0 %v16083_v25  ;;  %13886 = vmatprep.subr.bf16.mxu1 %v16084_v46  ;;  %v16095_v46 = vld [vmem:[#allocation22] sm:$0xff]  }
0x135e   : > { %13865 = vmatpush3.bf16.msra.mxu0 %v16085_v53  ;;  %13887 = vmatpush3.bf16.msra.mxu1 %v16086_v47  ;;  %v16096_v47 = vld [vmem:[#allocation22 + $0x8] sm:$0xff]  }
0x135f   : > { %13866 = vmatprep.subr.bf16.mxu0 %v16087_v54  ;;  %13888 = vmatprep.subr.bf16.mxu1 %v16088_v55  ;;  %v16097_v54 = vld [vmem:[#allocation22 + $0x10] sm:$0xff]   ;;  %v16098_v55 = vld [vmem:[#allocation22 + $0x18] sm:$0xff]  }
0x1362   : > { %13867 = vmatpush3.bf16.msra.mxu0 %v16089_v49  ;;  %13889 = vmatpush3.bf16.msra.mxu1 %v16090_v56  ;;  %v16099_v49 = vld [vmem:[#allocation22 + $0x20] sm:$0xff]   ;;  %v16100_v56 = vld [vmem:[#allocation22 + $0x28] sm:$0xff]  }
0x1363   : > { %13945 = vmatprep.subr.bf16.mxu0 %v16648_v0  ;;  %13951 = vmatprep.subr.bf16.mxu1 %v16648_v0 }
0x1410   : > { %v13824_v58 = vpop.f32.mrb[76].mxu0  ;;  %v13846_v60 = vpop.f32.mrb[68].mxu1 }
0x1411   : > { %v13825_v61 = vpop.f32.mrb[77].mxu0  ;;  %v13847_v62 = vpop.f32.mrb[69].mxu1 }
0x1412   : > { %v13826_v1 = vadd.f32 %v13825_v61, %v13824_v58  ;;  %v13848_v2 = vadd.f32 %v13847_v62, %v13846_v60  ;;  %v13827_v3 = vpop.f32.mrb[78].mxu0  ;;  %v13849_v4 = vpop.f32.mrb[70].mxu1  ;;  %v16101_v58 = vld [vmem:[#allocation22 + $0x30] sm:$0xff]   ;;  %v16102_v60 = vld [vmem:[#allocation22 + $0x38] sm:$0xff]  }
0x1413   : > { %v13828_v37 = vpop.f32.mrb[79].mxu0  ;;  %v13850_v5 = vpop.f32.mrb[71].mxu1  ;;  %v11878_v3 = vld [vmem:[#allocation20] sm:$0x1] }
0x1414   : > { %v11371_v6 = vadd.f32 %v13848_v2, %v13826_v1  ;;  %v16109_v1 = vld [vmem:[#allocation23 + $0x30] sm:$0xff]   ;;  %v16110_v2 = vld [vmem:[#allocation23 + $0x38] sm:$0xff]  }
0x1416   : > { %v17510_v42 = vadd.f32 %v11371_v6, %v17498_v12  ;;  %v11819_v12 = vld [vmem:[%s869_s9] sm:$0x1]  ;;  %s16652_s9 = smov [#allocation26]  }
0x1417   : > { %s16537_s23 = sshll.u32 %s16652_s9, 4  ;;  %s16538_s23 = int_to_ptr.vmem [resolvable:$false] %s16537_s23 }
0x1418   : > { %v11427_v7 = vpop.f32.mrb[80].mxu0  ;;  %v11468_v8 = vpop.f32.mrb[72].mxu1  ;;  %s16539_s1 = scalar_lea.vmem %s16538_s23, 32  ;;  %p16540_p2 = scmp.lt.s32.totalorder %s17553_s22, %s16538_s23 }
0x1419   : > { %v11477_v11 = vpack.c.bf16 %v11468_v8, %v11468_v8  ;;  %v11429_v21 = vpop.f32.mrb[81].mxu0  ;;  %v11470_v13 = vpop.f32.mrb[73].mxu1  ;;  %v11475_v48 = vpack.c.bf16 %v11427_v7, %v11427_v7  ;;  %p16541_p3 = scmp.lt.s32.totalorder %s16539_s1, %s16533_s3 }
0x141a   : > { %v11476_v14 = vpack.c.bf16 %v11429_v21, %v11429_v21  ;;  %v11478_v32 = vpack.c.bf16 %v11470_v13, %v11470_v13  ;;  %v11431_v19 = vpop.f32.mrb[82].mxu0  ;;  %v11472_v23 = vpop.f32.mrb[74].mxu1 }
0x141b   : > { %v11432_v24 = vpop.f32.mrb[83].mxu0  ;;  %v11473_v59 = vpop.f32.mrb[75].mxu1  ;;  %p16542_p4 = por %p16541_p3, %p16540_p2 }
0x141c   : > { %11768 = vmatprep.mubr.bf16.mxu0 %v11476_v14  ;;  %11808 = vmatprep.mubr.bf16.mxu1 %v11478_v32 }
0x141d   : > { %11769 = vmatmul.mubr.bf16.vlgmr.msra.gmra.mrb[84].mxu0 %v11475_v48  ;;  %11809 = vmatmul.mubr.bf16.vlgmr.msra.gmra.mrb[76].mxu1 %v11477_v11  ;;  %p16543_p7 = pnand %p16542_p4, %p16536_p10 }
0x141e   : > { %13946 = vmatpush3.bf16.msra.mxu0 %v11826_v26  ;;  %13947 = vmatprep.mubr.msk.bf16.mxu0 %vm16649_vm0, %v16648_v0 }
0x141f   : > { %13952 = vmatpush3.bf16.msra.mxu1 %v16091_v57  ;;  %13959 = vmatprep.mubr.msk.bf16.mxu1 %vm16649_vm0, %v16648_v0 }
0x1420   : > { %13953 = vmatprep.subr.bf16.mxu1 %v16648_v0  ;;  %13963 = vmatprep.subr.bf16.mxu0 %v16648_v0 }
0x1423   : > { %13954 = vmatpush3.bf16.msra.mxu1 %v16092_v27 }
0x1424   : > { %13955 = vmatprep.subr.bf16.mxu1 %v16648_v0 }
0x1425   : > { %13948 = vmatmul.mubr.msk.bf16.vlgmr.msra.gmra.mrb[88].mxu0 %vm5899_vm6, %v11819_v12 }
0x1426   : > { %13979 = vmatprep.mubr.msk.bf16.mxu0 %vm16649_vm0, %v16648_v0  ;;  %13964 = vmatpush3.bf16.msra.mxu0 %v16103_v9 }
0x1427   : > { %13956 = vmatpush3.bf16.msra.mxu1 %v16093_v28  ;;  %13965 = vmatprep.subr.bf16.mxu0 %v16648_v0 }
0x1428   : > { %13957 = vmatprep.subr.bf16.mxu1 %v16648_v0 }
0x142a   : > { %13966 = vmatpush3.bf16.msra.mxu0 %v16104_v16 }
0x142b   : > { %13958 = vmatpush3.bf16.msra.mxu1 %v16094_v63  ;;  %13967 = vmatprep.subr.bf16.mxu0 %v16648_v0 }
0x142c   : > { %13983 = vmatprep.subr.bf16.mxu1 %v16648_v0 }
0x142e   : > { %13968 = vmatpush3.bf16.msra.mxu0 %v16105_v17 }
0x142f   : > { %13969 = vmatprep.subr.bf16.mxu0 %v16648_v0 }
0x1432   : > { %13970 = vmatpush3.bf16.msra.mxu0 %v16106_v30 }
0x1433   : > { %13971 = vmatprep.subr.bf16.mxu0 %v16648_v0 }
0x1436   : > { %13972 = vmatpush3.bf16.msra.mxu0 %v16107_v18 }
0x1437   : > { %13973 = vmatprep.subr.bf16.mxu0 %v16648_v0 }
0x143a   : > { %13974 = vmatpush3.bf16.msra.mxu0 %v16108_v20 }
0x143b   : > { %13975 = vmatprep.subr.bf16.mxu0 %v16648_v0 }
0x143e   : > { %13976 = vmatpush3.bf16.msra.mxu0 %v16109_v1 }
0x143f   : > { %13977 = vmatprep.subr.bf16.mxu0 %v16648_v0 }
0x1442   : > { %13978 = vmatpush3.bf16.msra.mxu0 %v16110_v2 }
0x14f0   : > { %v13868_v35 = vpop.f32.mrb[84].mxu0  ;;  %v13890_v29 = vpop.f32.mrb[76].mxu1 }
0x14f1   : > { %v13869_v36 = vpop.f32.mrb[85].mxu0  ;;  %v13891_v31 = vpop.f32.mrb[77].mxu1 }
0x14f2   : > { %v13870_v15 = vadd.f32 %v13869_v36, %v13868_v35  ;;  %v13892_v33 = vadd.f32 %v13891_v31, %v13890_v29  ;;  %v13871_v34 = vpop.f32.mrb[86].mxu0  ;;  %v13893_v38 = vpop.f32.mrb[78].mxu1 }
0x14f3   : > { %v13872_v41 = vpop.f32.mrb[87].mxu0  ;;  %v13894_v43 = vpop.f32.mrb[79].mxu1 }
0x14f4   : > { %v11811_v50 = vadd.f32 %v13892_v33, %v13870_v15 }
0x14f6   : > { %v11816_v51 = vadd.f32 %v11811_v50, %v17510_v42 }
0x14f8   : > { %v11862_v44 = vpop.f32.mrb[88].mxu0  ;;  %v11817_v61 = vmax.f32 %v11816_v51, 0.0 }
0x14f9   : > { %v11863_v39 = vadd.f32 %v11862_v44, %v11821_v52  ;;  %v13949_v40 = vpop.f32.mrb[89].mxu0 }
0x14fa   : > { %v11865_v22 = vpop.f32.mrb[90].mxu0  ;;  %v11818_v62 = vpack.c.bf16 %v11817_v61, %v11817_v61 }
0x14fb   : > { %v11868_v45 = vmax.f32 %v11863_v39, 0.0  ;;  %v13950_v25 = vpop.f32.mrb[91].mxu0 }
0x14fd   : > { %v11869_v53 = vpack.c.bf16 %v11868_v45, %v11868_v45 }
0x14ff   : > { %13960 = vmatmul.mubr.msk.bf16.vlgmr.msra.gmra.mrb[80].mxu1 %vm11903_vm9, %v11869_v53 }
0x1500   : > { %13984 = vmatpush3.bf16.msra.mxu1 %v16095_v46  ;;  %13999 = vmatprep.mubr.msk.bf16.mxu1 %vm16649_vm0, %v16648_v0 }
0x1501   : > { %13985 = vmatprep.subr.bf16.mxu1 %v16648_v0 }
0x1504   : > { %13986 = vmatpush3.bf16.msra.mxu1 %v16096_v47 }
0x1505   : > { %13987 = vmatprep.subr.bf16.mxu1 %v16648_v0 }
0x1508   : > { %13988 = vmatpush3.bf16.msra.mxu1 %v16097_v54 }
0x1509   : > { %13989 = vmatprep.subr.bf16.mxu1 %v16648_v0 }
0x150c   : > { %13990 = vmatpush3.bf16.msra.mxu1 %v16098_v55 }
0x150d   : > { %13991 = vmatprep.subr.bf16.mxu1 %v16648_v0 }
0x1510   : > { %13992 = vmatpush3.bf16.msra.mxu1 %v16099_v49 }
0x1511   : > { %13993 = vmatprep.subr.bf16.mxu1 %v16648_v0 }
0x1514   : > { %13994 = vmatpush3.bf16.msra.mxu1 %v16100_v56 }
0x1515   : > { %13995 = vmatprep.subr.bf16.mxu1 %v16648_v0 }
0x1518   : > { %13996 = vmatpush3.bf16.msra.mxu1 %v16101_v58 }
0x1519   : > { %13997 = vmatprep.subr.bf16.mxu1 %v16648_v0  ;;  %v12157_v0 = vld [vmem:[#allocation25] sm:$0x1] }
0x151c   : > { %13998 = vmatpush3.bf16.msra.mxu1 %v16102_v60 }
0x151f   : > { %14000 = vmatmul.mubr.bf16.vlgmr.msra.gmra.mrb[84].mxu1 %v11818_v62 }
0x15d2   : > { %v11941_v4 = vpop.f32.mrb[80].mxu1 }
0x15d3   : > { %v11942_v37 = vadd.f32 %v11941_v4, %v11878_v3  ;;  %v13961_v5 = vpop.f32.mrb[81].mxu1 }
0x15d4   : > { %v11944_v6 = vpop.f32.mrb[82].mxu1 }
0x15d5   : > { %v11947_v42 = vmax.f32 %v11942_v37, 0.0  ;;  %v13962_v7 = vpop.f32.mrb[83].mxu1 }
0x15d7   : > { %v11964_v8 = vpack.c.bf16 %v11947_v42, %v11947_v42 }
0x15d9   : > { %13980 = vmatmul.mubr.bf16.vlgmr.msra.gmra.mrb[92].mxu0 %v11964_v8 }
0x15f2   : > { %v12151_v10 = vpop.f32.mrb[84].mxu1 }
0x15f3   : > { %v14001_v11 = vpop.f32.mrb[85].mxu1 }
0x15f4   : > { %v12154_v21 = vpop.f32.mrb[86].mxu1 }
0x15f5   : > { %v14002_v13 = vpop.f32.mrb[87].mxu1 }
0x16ac   : > { %v12063_v14 = vpop.f32.mrb[92].mxu0 }
0x16ad   : > { %v12152_v32 = vadd.f32 %v12151_v10, %v12063_v14  ;;  %v13981_v19 = vpop.f32.mrb[93].mxu0 }
0x16ae   : > { %v12066_v23 = vpop.f32.mrb[94].mxu0 }
0x16af   : > { %v12158_v48 = vadd.f32 %v12157_v0, %v12152_v32  ;;  %v13982_v24 = vpop.f32.mrb[95].mxu0 }
0x16b1   : > { %12159 = vst [vmem:[%s861_s26] sm:$0x1] %v12158_v48 }
0x16b2   : > { %16546 = shalt.err (!%p16543_p7)
}
0x16b3   : > { %s16547_s0 = scalar_lea.hbm %s17551_s2, 16  ;;  %s16551_s30 = scalar_lea.hbm %s17689_s29, 32 }
0x16b4   : > { %p16548_p8 = scmp.ne.s32.totalorder %s17551_s2, %s16547_s0  ;;  %p16552_p1 = scmp.lt.u32.totalorder %s17551_s2, %s17689_s29 }
0x16b5   : > { %p16553_p0 = scmp.lt.u32.totalorder %s16551_s30, %s16547_s0  ;;  %p16555_p5 = scmp.lt.u32.totalorder %s16547_s0, %s17551_s2 }
0x16b6   : > { %p16549_p11 = pnand %p16548_p8, %p17690_p9 }
0x16b7   : > { %p16554_p6 = por %p16553_p0, %p16552_p1 }
0x16b8   : > { %p16550_p13 = pneg %p16549_p11 }
0x16b9   : > { %p16556_p12 = por %p16555_p5, %p16554_p6 }
0x16bb   : > { %p16557_p10 = pnand %p16556_p12, %p16550_p13 }
0x16bd   : > { %16560 = shalt.err (!%p16557_p10)
}
0x16be   : > { %14211 = dma.vmem_to_hbm [thread:$0]  (%p17690_p9), %s17553_s22, 16, %s17551_s2, %s12161_s25  }
0x16bf PF: > { %s17691_s1 = sld [smem:[#allocation39_spill]]  ;;  %s17692_s3 = sld [smem:[#allocation36_spill]] }
0x16c0   : > { %s17693_s9 = sld [smem:[#allocation43_spill]] }
0x16c5   : > { %p14293_p2 = scmp.ge.s32.totalorder %s17691_s1, 2  ;;  %s12185_s23 = sand.u32 1, %s17692_s3  }
0x16c6   : > { %p17694_p3 = scmp.ne.s32.totalorder %s17693_s9, 0  ;;  %s12186_s28 = scalar_lea.sflag [#allocation4], %s12185_s23 }
0x16c8   : > { %p14260_p4 = pnand %p14293_p2, %p17694_p3 }
0x16ca   : > { %16610 = dma.done.wait (!%p14260_p4), %s12186_s28, 16  }
0x16cb   : > { %16612 = vsyncadd (!%p14260_p4), %s12186_s28, 4294967280  ;;  %s17695_s27 = sld [smem:[#allocation40_spill]]  ;;  %s17696_s2 = sld [smem:[#allocation37_spill]] }
0x16cc   : > { %s17697_s25 = sld [smem:[#allocation38_spill]]  ;;  %s17698_s26 = sld [smem:[#allocation41_spill]] }
0x16d1   : > { %p39_p7 = scmp.ge.s32.totalorder %s17695_s27, 4  }
0x16d3   :  { %41 = sbr.rel (!%p39_p7) target bundleno = 21 (0x15), region = 215 }
0x16da   :  { %12190 = vsyncpa [#allocation3], 1 }
0x16db   :  { %12192 = vsyncpa [#allocation3 + $0x1], 1 }
0x16dc   :  { %12193 = vsyncpa [#allocation6], 1 }
0x16dd   :  { %12194 = vsyncpa [#allocation9], 1 }
0x16de   :  { %12195 = vsyncpa [#allocation12], 1 }
0x16df   :  { %12196 = vsyncpa [#allocation15], 1 }
0x16e0   :  { %12197 = vsyncpa [#allocation18], 1 }
0x16e1   :  { %12198 = vsyncpa [#allocation21], 1 }
0x16e2   :  { %12199 = vsyncpa [#allocation24], 1 }
0x16e3   :  { %12200 = vsyncpa [#allocation4], 1 }
0x16e4   :  { %12202 = vsyncpa [#allocation4 + $0x1], 1 }

</bundles_post_ra>
